<compile_context>
chip_gen: v7x
topology: tpu7x:2x2x1
jax: 0.10.0
libtpu: 0.0.40
codegen_flags: <defaults>
</compile_context>

<pallas_src>
import functools

import jax
import jax.numpy as jnp
from jax import lax
from jax.experimental import pallas as pl
from jax.experimental.pallas import tpu as pltpu


def _resunit_kernel(x_ref, w1_ref, b1_ref, alpha_ref, w2_ref, b2_ref,
                    o_ref, pad_ref, col_ref, *, TB, H, W, C, K, LP):
    P = K // 2
    Hp = H + 2 * P
    Wpx = pad_ref.shape[2]          # padded width incl. alignment columns
    HW = H * W
    f32 = jnp.float32
    bf16 = jnp.bfloat16

    # ---- zero only the halo borders (interior is fully overwritten for each
    #      conv below; alignment-only columns are never read, so left as-is).
    #      Done every grid step: scratch is not zero-initialized and an SMEM
    #      init flag cannot be trusted, and this is minor work. ----
    pad_ref[:, 0:P, :, :] = jnp.zeros((TB, P, Wpx, C), bf16)
    pad_ref[:, P + H:Hp, :, :] = jnp.zeros((TB, P, Wpx, C), bf16)
    pad_ref[:, P:P + H, LP - P:LP, :] = jnp.zeros((TB, H, P, C), bf16)
    pad_ref[:, P:P + H, LP + W:LP + W + P, :] = jnp.zeros((TB, H, P, C), bf16)

    def fill_interior(act_flat_f32):
        # (TB*HW, C) f32 -> bf16 interior of the padded scratch.  The interior
        # starts at lane offset LP*C (a multiple of 128): dense, aligned stores.
        pad_ref[:, P:P + H, LP:LP + W, :] = (
            act_flat_f32.reshape(TB, H, W, C).astype(bf16))

    def tap(t):
        # Read tap (kh, kw) directly as a ref slice (no full padded-image
        # value); leading-dim reshape to (TB*HW, C) is layout preserving.
        kh, kw = divmod(t, K)
        c0 = kw + LP - P
        return pad_ref[:, kh:kh + H, c0:c0 + W, :].reshape(TB * HW, C)

    def im2col():
        # Pair adjacent taps into 128-lane slabs: full-width, 128-aligned col
        # stores (halves the store-instruction count vs. 64-lane masked
        # stores; the concat lane-shift work lands on the XLU/VPU slack).
        t = 0
        while t + 1 < K * K:
            col_ref[:, t * C:(t + 2) * C] = jnp.concatenate(
                [tap(t), tap(t + 1)], axis=-1)
            t += 2
        if t < K * K:                               # odd leftover tap
            col_ref[:, t * C:(t + 1) * C] = tap(t)

    # ---- conv1: deep MXU matmul, bf16 operands, f32 accumulation ----
    fill_interior(x_ref[...].reshape(TB * HW, C))   # value dies right here
    im2col()
    act = jnp.dot(col_ref[...], w1_ref[...], preferred_element_type=f32)
    act = act + b1_ref[...]
    act = jnp.where(act > 0, act, alpha_ref[...] * act)     # PReLU (shared a)

    # ---- conv2: re-pad the intermediate (borders still zero) ----
    fill_interior(act)                               # act dies here
    im2col()
    out = jnp.dot(col_ref[...], w2_ref[...], preferred_element_type=f32)
    # bias + residual: x is re-read *here* so it is not live across the convs.
    out = out + b2_ref[...] + x_ref[...].reshape(TB * HW, C)

    o_ref[...] = out.reshape(TB, HW, C).astype(o_ref.dtype)


def _pick_block_n(N, requested=None):
    """Batch images per grid step: keep grid length >= min(4, N) so dual-TC
    parts can shard it and the pipeline has steps to overlap; within that,
    take the largest divisor of N (bigger M per matmul)."""
    if requested is not None and N % requested == 0:
        return requested
    target = min(4, N)
    for tb in range(N, 0, -1):
        if N % tb == 0 and N // tb >= target:
            return tb
    return 1


def resunit_forward(x_nchw, w1, b1, alpha, w2, b2, ksize=3, block_n=None):
    """x_nchw: (N, C, H, W); conv weights in PyTorch OIHW layout; returns NCHW."""
    N, C, H, W = x_nchw.shape
    K = ksize
    assert K % 2 == 1, "ResUnit uses 'same' padding with an odd kernel size"
    P = K // 2
    HW = H * W

    # Left alignment pad: interior column offset LP*C must be a multiple of 128.
    LP = P
    while (LP * C) % 128:
        LP += 1
    # Padded width: at least W + LP + P readable columns, rounded so a full
    # padded row is a whole number of 128-lane vregs.
    Wpx = W + LP + P
    while (Wpx * C) % 128:
        Wpx += 1
    Hp = H + 2 * P

    TB = _pick_block_n(N, block_n)

    # Activations NHWC with flattened pixels (C on the lane dim).
    # TODO(synk): if this ResUnit sits inside a larger NHWC pipeline, keep the
    # activations NHWC end-to-end and drop these two transposes.
    x = jnp.transpose(x_nchw, (0, 2, 3, 1)).reshape(N, HW, C).astype(jnp.float32)
    # OIHW -> (kh, kw, Cin, Cout) -> (K*K*Cin, Cout) im2col weights, bf16 operands.
    w1m = jnp.transpose(w1, (2, 3, 1, 0)).reshape(K * K * C, C).astype(jnp.bfloat16)
    w2m = jnp.transpose(w2, (2, 3, 1, 0)).reshape(K * K * C, C).astype(jnp.bfloat16)
    b1k = b1.reshape(1, C).astype(jnp.float32)
    b2k = b2.reshape(1, C).astype(jnp.float32)
    alphak = jnp.full((1, C), alpha, jnp.float32)   # PReLU(num_parameters=1)

    kernel = functools.partial(_resunit_kernel, TB=TB, H=H, W=W, C=C, K=K, LP=LP)

    out = pl.pallas_call(
        kernel,
        out_shape=jax.ShapeDtypeStruct((N, HW, C), jnp.float32),
        grid_spec=pltpu.PrefetchScalarGridSpec(
            num_scalar_prefetch=0,
            grid=(N // TB,),
            in_specs=[
                pl.BlockSpec((TB, HW, C), lambda i: (i, 0, 0)),      # x (+ residual)
                pl.BlockSpec((K * K * C, C), lambda i: (0, 0)),      # w1 (im2col, bf16)
                pl.BlockSpec((1, C), lambda i: (0, 0)),              # b1
                pl.BlockSpec((1, C), lambda i: (0, 0)),              # alpha
                pl.BlockSpec((K * K * C, C), lambda i: (0, 0)),      # w2 (im2col, bf16)
                pl.BlockSpec((1, C), lambda i: (0, 0)),              # b2
            ],
            out_specs=pl.BlockSpec((TB, HW, C), lambda i: (i, 0, 0)),
            scratch_shapes=[
                pltpu.VMEM((TB, Hp, Wpx, C), jnp.bfloat16),          # padded act (halo)
                pltpu.VMEM((TB * HW, K * K * C), jnp.bfloat16),      # im2col buffer
            ],
        ),
        compiler_params=pltpu.CompilerParams(
            dimension_semantics=("parallel",)),
    )(x, w1m, b1k, alphak, w2m, b2k)

    return jnp.transpose(out.reshape(N, H, W, C), (0, 3, 1, 2))     # back to NCHW


if __name__ == "__main__":
    N, C, H, W, K = 2, 64, 16, 16, 3          # wkdim=64 (module default), small spatial
    key = jax.random.PRNGKey(0)
    k1, k2, k3, k4, k5 = jax.random.split(key, 5)
    x = jax.random.normal(k1, (N, C, H, W), jnp.float32)
    w1 = jax.random.normal(k2, (C, C, K, K), jnp.float32) * 0.05
    b1 = jax.random.normal(k3, (C,), jnp.float32) * 0.05
    w2 = jax.random.normal(k4, (C, C, K, K), jnp.float32) * 0.05
    b2 = jax.random.normal(k5, (C,), jnp.float32) * 0.05
    alpha = jnp.float32(0.25)                 # PyTorch PReLU default init

    y = jax.block_until_ready(resunit_forward(x, w1, b1, alpha, w2, b2, ksize=K))

    # ---- references ----
    P = K // 2
    dn = ("NCHW", "OIHW", "NCHW")

    def ref(xin, cast_bf16):
        def cast(a):
            return a.astype(jnp.bfloat16) if cast_bf16 else a
        c1 = lax.conv_general_dilated(
            cast(xin), cast(w1), (1, 1), [(P, P), (P, P)], dimension_numbers=dn,
            preferred_element_type=jnp.float32,
            precision=lax.Precision.HIGHEST) + b1.reshape(1, C, 1, 1)
        a = jnp.where(c1 > 0, c1, alpha * c1)
        c2 = lax.conv_general_dilated(
            cast(a), cast(w2), (1, 1), [(P, P), (P, P)], dimension_numbers=dn,
            preferred_element_type=jnp.float32,
            precision=lax.Precision.HIGHEST) + b2.reshape(1, C, 1, 1)
        return xin + c2

    # Structural check: reference with the same bf16-operand / f32-accumulation
    # numerics as the kernel (catches any indexing / padding / layout bug).
    y_bf = ref(x, cast_bf16=True)
    err_bf = float(jnp.max(jnp.abs(y - y_bf)))
    assert jnp.allclose(y, y_bf, atol=1e-2, rtol=1e-2), err_bf

    # Semantic sanity vs. the pure-f32 module: tolerance relaxed because the
    # matmul operands are bf16 (per the performance review).
    y_f32 = ref(x, cast_bf16=False)
    err = float(jnp.max(jnp.abs(y - y_f32)))
    assert jnp.allclose(y, y_f32, atol=1e-1, rtol=1e-1), err

    print("KERNEL_OK")
</pallas_src>

<mosaic_0001>
module attributes {stable_mosaic.version = 11 : i64} {
  func.func @_resunit_kernel(%arg0: i32, %arg1: memref<1x256x64xf32, #tpu.memory_space<vmem>>, %arg2: memref<576x64xbf16, #tpu.memory_space<vmem>>, %arg3: memref<1x64xf32, #tpu.memory_space<vmem>>, %arg4: memref<1x64xf32, #tpu.memory_space<vmem>>, %arg5: memref<576x64xbf16, #tpu.memory_space<vmem>>, %arg6: memref<1x64xf32, #tpu.memory_space<vmem>>, %arg7: memref<1x256x64xf32, #tpu.memory_space<vmem>>, %arg8: memref<1x18x20x64xbf16, #tpu.memory_space<vmem>>, %arg9: memref<256x576xbf16, #tpu.memory_space<vmem>>) attributes {dimension_semantics = [#tpu.dimension_semantics<parallel>], iteration_bounds = array<i64: 2>, scalar_prefetch = 0 : i64, scratch_operands = 2 : i64, tpu.core_type = #tpu.core_type<tc>, window_params = [{transform_indices = @transform_0, window_bounds = array<i64: 1, 256, 64>}, {pipeline_mode = #tpu.pipeline_mode<synchronous>, transform_indices = @transform_1, window_bounds = array<i64: 576, 64>}, {pipeline_mode = #tpu.pipeline_mode<synchronous>, transform_indices = @transform_2, window_bounds = array<i64: 1, 64>}, {pipeline_mode = #tpu.pipeline_mode<synchronous>, transform_indices = @transform_3, window_bounds = array<i64: 1, 64>}, {pipeline_mode = #tpu.pipeline_mode<synchronous>, transform_indices = @transform_4, window_bounds = array<i64: 576, 64>}, {pipeline_mode = #tpu.pipeline_mode<synchronous>, transform_indices = @transform_5, window_bounds = array<i64: 1, 64>}, {transform_indices = @transform_6, window_bounds = array<i64: 1, 256, 64>}]} {
    %cst = arith.constant 0.000000e+00 : bf16
    %0 = vector.broadcast %cst : bf16 to vector<1x1x20x64xbf16>
    %c0 = arith.constant 0 : index
    %c0_0 = arith.constant 0 : index
    %c0_1 = arith.constant 0 : index
    %c0_2 = arith.constant 0 : index
    %1 = vector.load %arg8[%c0, %c0_0, %c0_1, %c0_2] : memref<1x18x20x64xbf16, #tpu.memory_space<vmem>>, vector<1x1x20x64xbf16>
    tpu.vector_store %arg8[%c0, %c0_0, %c0_1, %c0_2], %0 {strides = array<i32>} : memref<1x18x20x64xbf16, #tpu.memory_space<vmem>>, vector<1x1x20x64xbf16>,
    %cst_3 = arith.constant 0.000000e+00 : bf16
    %2 = vector.broadcast %cst_3 : bf16 to vector<1x1x20x64xbf16>
    %c0_4 = arith.constant 0 : index
    %c17 = arith.constant 17 : index
    %c0_5 = arith.constant 0 : index
    %c0_6 = arith.constant 0 : index
    %3 = vector.load %arg8[%c0_4, %c17, %c0_5, %c0_6] : memref<1x18x20x64xbf16, #tpu.memory_space<vmem>>, vector<1x1x20x64xbf16>
    tpu.vector_store %arg8[%c0_4, %c17, %c0_5, %c0_6], %2 {strides = array<i32>} : memref<1x18x20x64xbf16, #tpu.memory_space<vmem>>, vector<1x1x20x64xbf16>,
    %cst_7 = arith.constant 0.000000e+00 : bf16
    %4 = vector.broadcast %cst_7 : bf16 to vector<1x16x1x64xbf16>
    %c0_8 = arith.constant 0 : index
    %c1 = arith.constant 1 : index
    %c1_9 = arith.constant 1 : index
    %c0_10 = arith.constant 0 : index
    %5 = vector.load %arg8[%c0_8, %c1, %c1_9, %c0_10] : memref<1x18x20x64xbf16, #tpu.memory_space<vmem>>, vector<1x16x1x64xbf16>
    tpu.vector_store %arg8[%c0_8, %c1, %c1_9, %c0_10], %4 {strides = array<i32>} : memref<1x18x20x64xbf16, #tpu.memory_space<vmem>>, vector<1x16x1x64xbf16>,
    %cst_11 = arith.constant 0.000000e+00 : bf16
    %6 = vector.broadcast %cst_11 : bf16 to vector<1x16x1x64xbf16>
    %c0_12 = arith.constant 0 : index
    %c1_13 = arith.constant 1 : index
    %c18 = arith.constant 18 : index
    %c0_14 = arith.constant 0 : index
    %7 = vector.load %arg8[%c0_12, %c1_13, %c18, %c0_14] : memref<1x18x20x64xbf16, #tpu.memory_space<vmem>>, vector<1x16x1x64xbf16>
    tpu.vector_store %arg8[%c0_12, %c1_13, %c18, %c0_14], %6 {strides = array<i32>} : memref<1x18x20x64xbf16, #tpu.memory_space<vmem>>, vector<1x16x1x64xbf16>,
    %c0_15 = arith.constant 0 : index
    %c0_16 = arith.constant 0 : index
    %c0_17 = arith.constant 0 : index
    %8 = vector.load %arg1[%c0_15, %c0_16, %c0_17] : memref<1x256x64xf32, #tpu.memory_space<vmem>>, vector<1x256x64xf32>
    %9 = vector.shape_cast %8 : vector<1x256x64xf32> to vector<256x64xf32>
    %10 = vector.shape_cast %9 : vector<256x64xf32> to vector<1x16x16x64xf32>
    %11 = arith.truncf %10 : vector<1x16x16x64xf32> to vector<1x16x16x64xbf16>
    %c0_18 = arith.constant 0 : index
    %c1_19 = arith.constant 1 : index
    %c2 = arith.constant 2 : index
    %c0_20 = arith.constant 0 : index
    %12 = vector.load %arg8[%c0_18, %c1_19, %c2, %c0_20] : memref<1x18x20x64xbf16, #tpu.memory_space<vmem>>, vector<1x16x16x64xbf16>
    tpu.vector_store %arg8[%c0_18, %c1_19, %c2, %c0_20], %11 {strides = array<i32>} : memref<1x18x20x64xbf16, #tpu.memory_space<vmem>>, vector<1x16x16x64xbf16>,
    %c0_21 = arith.constant 0 : index
    %c0_22 = arith.constant 0 : index
    %c1_23 = arith.constant 1 : index
    %c0_24 = arith.constant 0 : index
    %13 = vector.load %arg8[%c0_21, %c0_22, %c1_23, %c0_24] : memref<1x18x20x64xbf16, #tpu.memory_space<vmem>>, vector<1x16x16x64xbf16>
    %14 = vector.shape_cast %13 : vector<1x16x16x64xbf16> to vector<256x64xbf16>
    %c0_25 = arith.constant 0 : index
    %c0_26 = arith.constant 0 : index
    %c2_27 = arith.constant 2 : index
    %c0_28 = arith.constant 0 : index
    %15 = vector.load %arg8[%c0_25, %c0_26, %c2_27, %c0_28] : memref<1x18x20x64xbf16, #tpu.memory_space<vmem>>, vector<1x16x16x64xbf16>
    %16 = vector.shape_cast %15 : vector<1x16x16x64xbf16> to vector<256x64xbf16>
    %17 = tpu.concatenate %14, %16 in 1 : vector<256x64xbf16>, vector<256x64xbf16> -> vector<256x128xbf16>
    %c0_29 = arith.constant 0 : index
    %c0_30 = arith.constant 0 : index
    %18 = vector.load %arg9[%c0_29, %c0_30] : memref<256x576xbf16, #tpu.memory_space<vmem>>, vector<256x128xbf16>
    tpu.vector_store %arg9[%c0_29, %c0_30], %17 {strides = array<i32>} : memref<256x576xbf16, #tpu.memory_space<vmem>>, vector<256x128xbf16>,
    %c0_31 = arith.constant 0 : index
    %c0_32 = arith.constant 0 : index
    %c3 = arith.constant 3 : index
    %c0_33 = arith.constant 0 : index
    %19 = vector.load %arg8[%c0_31, %c0_32, %c3, %c0_33] : memref<1x18x20x64xbf16, #tpu.memory_space<vmem>>, vector<1x16x16x64xbf16>
    %20 = vector.shape_cast %19 : vector<1x16x16x64xbf16> to vector<256x64xbf16>
    %c0_34 = arith.constant 0 : index
    %c1_35 = arith.constant 1 : index
    %c1_36 = arith.constant 1 : index
    %c0_37 = arith.constant 0 : index
    %21 = vector.load %arg8[%c0_34, %c1_35, %c1_36, %c0_37] : memref<1x18x20x64xbf16, #tpu.memory_space<vmem>>, vector<1x16x16x64xbf16>
    %22 = vector.shape_cast %21 : vector<1x16x16x64xbf16> to vector<256x64xbf16>
    %23 = tpu.concatenate %20, %22 in 1 : vector<256x64xbf16>, vector<256x64xbf16> -> vector<256x128xbf16>
    %c0_38 = arith.constant 0 : index
    %c128 = arith.constant 128 : index
    %24 = vector.load %arg9[%c0_38, %c128] : memref<256x576xbf16, #tpu.memory_space<vmem>>, vector<256x128xbf16>
    tpu.vector_store %arg9[%c0_38, %c128], %23 {strides = array<i32>} : memref<256x576xbf16, #tpu.memory_space<vmem>>, vector<256x128xbf16>,
    %c0_39 = arith.constant 0 : index
    %c1_40 = arith.constant 1 : index
    %c2_41 = arith.constant 2 : index
    %c0_42 = arith.constant 0 : index
    %25 = vector.load %arg8[%c0_39, %c1_40, %c2_41, %c0_42] : memref<1x18x20x64xbf16, #tpu.memory_space<vmem>>, vector<1x16x16x64xbf16>
    %26 = vector.shape_cast %25 : vector<1x16x16x64xbf16> to vector<256x64xbf16>
    %c0_43 = arith.constant 0 : index
    %c1_44 = arith.constant 1 : index
    %c3_45 = arith.constant 3 : index
    %c0_46 = arith.constant 0 : index
    %27 = vector.load %arg8[%c0_43, %c1_44, %c3_45, %c0_46] : memref<1x18x20x64xbf16, #tpu.memory_space<vmem>>, vector<1x16x16x64xbf16>
    %28 = vector.shape_cast %27 : vector<1x16x16x64xbf16> to vector<256x64xbf16>
    %29 = tpu.concatenate %26, %28 in 1 : vector<256x64xbf16>, vector<256x64xbf16> -> vector<256x128xbf16>
    %c0_47 = arith.constant 0 : index
    %c256 = arith.constant 256 : index
    %30 = vector.load %arg9[%c0_47, %c256] : memref<256x576xbf16, #tpu.memory_space<vmem>>, vector<256x128xbf16>
    tpu.vector_store %arg9[%c0_47, %c256], %29 {strides = array<i32>} : memref<256x576xbf16, #tpu.memory_space<vmem>>, vector<256x128xbf16>,
    %c0_48 = arith.constant 0 : index
    %c2_49 = arith.constant 2 : index
    %c1_50 = arith.constant 1 : index
    %c0_51 = arith.constant 0 : index
    %31 = vector.load %arg8[%c0_48, %c2_49, %c1_50, %c0_51] : memref<1x18x20x64xbf16, #tpu.memory_space<vmem>>, vector<1x16x16x64xbf16>
    %32 = vector.shape_cast %31 : vector<1x16x16x64xbf16> to vector<256x64xbf16>
    %c0_52 = arith.constant 0 : index
    %c2_53 = arith.constant 2 : index
    %c2_54 = arith.constant 2 : index
    %c0_55 = arith.constant 0 : index
    %33 = vector.load %arg8[%c0_52, %c2_53, %c2_54, %c0_55] : memref<1x18x20x64xbf16, #tpu.memory_space<vmem>>, vector<1x16x16x64xbf16>
    %34 = vector.shape_cast %33 : vector<1x16x16x64xbf16> to vector<256x64xbf16>
    %35 = tpu.concatenate %32, %34 in 1 : vector<256x64xbf16>, vector<256x64xbf16> -> vector<256x128xbf16>
    %c0_56 = arith.constant 0 : index
    %c384 = arith.constant 384 : index
    %36 = vector.load %arg9[%c0_56, %c384] : memref<256x576xbf16, #tpu.memory_space<vmem>>, vector<256x128xbf16>
    tpu.vector_store %arg9[%c0_56, %c384], %35 {strides = array<i32>} : memref<256x576xbf16, #tpu.memory_space<vmem>>, vector<256x128xbf16>,
    %c0_57 = arith.constant 0 : index
    %c2_58 = arith.constant 2 : index
    %c3_59 = arith.constant 3 : index
    %c0_60 = arith.constant 0 : index
    %37 = vector.load %arg8[%c0_57, %c2_58, %c3_59, %c0_60] : memref<1x18x20x64xbf16, #tpu.memory_space<vmem>>, vector<1x16x16x64xbf16>
    %38 = vector.shape_cast %37 : vector<1x16x16x64xbf16> to vector<256x64xbf16>
    %c0_61 = arith.constant 0 : index
    %c512 = arith.constant 512 : index
    %39 = vector.load %arg9[%c0_61, %c512] : memref<256x576xbf16, #tpu.memory_space<vmem>>, vector<256x64xbf16>
    tpu.vector_store %arg9[%c0_61, %c512], %38 {strides = array<i32>} : memref<256x576xbf16, #tpu.memory_space<vmem>>, vector<256x64xbf16>,
    %c0_62 = arith.constant 0 : index
    %c0_63 = arith.constant 0 : index
    %40 = vector.load %arg9[%c0_62, %c0_63] : memref<256x576xbf16, #tpu.memory_space<vmem>>, vector<256x576xbf16>
    %c0_64 = arith.constant 0 : index
    %c0_65 = arith.constant 0 : index
    %41 = vector.load %arg2[%c0_64, %c0_65] : memref<576x64xbf16, #tpu.memory_space<vmem>>, vector<576x64xbf16>
    %cst_66 = arith.constant dense<0.000000e+00> : vector<256x64xf32>
    %42 = tpu.matmul %40, %41, %cst_66 {dimension_numbers = #tpu.dot_dimension_numbers<[1], [0], [0], [1], [0, 0, 1, 1], [], []>} : vector<256x576xbf16>, vector<576x64xbf16>, vector<256x64xf32> -> vector<256x64xf32>
    %c0_67 = arith.constant 0 : index
    %c0_68 = arith.constant 0 : index
    %43 = vector.load %arg3[%c0_67, %c0_68] : memref<1x64xf32, #tpu.memory_space<vmem>>, vector<1x64xf32>
    %44 = vector.broadcast %43 : vector<1x64xf32> to vector<256x64xf32>
    %45 = arith.addf %42, %44 : vector<256x64xf32>
    %cst_69 = arith.constant 0.000000e+00 : f32
    %46 = vector.broadcast %cst_69 : f32 to vector<256x64xf32>
    %47 = arith.cmpf ogt, %45, %46 : vector<256x64xf32>
    %c0_70 = arith.constant 0 : index
    %c0_71 = arith.constant 0 : index
    %48 = vector.load %arg4[%c0_70, %c0_71] : memref<1x64xf32, #tpu.memory_space<vmem>>, vector<1x64xf32>
    %49 = vector.broadcast %48 : vector<1x64xf32> to vector<256x64xf32>
    %50 = arith.mulf %49, %45 : vector<256x64xf32>
    %51 = arith.select %47, %45, %50 : vector<256x64xi1>, vector<256x64xf32>
    %52 = vector.shape_cast %51 : vector<256x64xf32> to vector<1x16x16x64xf32>
    %53 = arith.truncf %52 : vector<1x16x16x64xf32> to vector<1x16x16x64xbf16>
    %c0_72 = arith.constant 0 : index
    %c1_73 = arith.constant 1 : index
    %c2_74 = arith.constant 2 : index
    %c0_75 = arith.constant 0 : index
    %54 = vector.load %arg8[%c0_72, %c1_73, %c2_74, %c0_75] : memref<1x18x20x64xbf16, #tpu.memory_space<vmem>>, vector<1x16x16x64xbf16>
    tpu.vector_store %arg8[%c0_72, %c1_73, %c2_74, %c0_75], %53 {strides = array<i32>} : memref<1x18x20x64xbf16, #tpu.memory_space<vmem>>, vector<1x16x16x64xbf16>,
    %c0_76 = arith.constant 0 : index
    %c0_77 = arith.constant 0 : index
    %c1_78 = arith.constant 1 : index
    %c0_79 = arith.constant 0 : index
    %55 = vector.load %arg8[%c0_76, %c0_77, %c1_78, %c0_79] : memref<1x18x20x64xbf16, #tpu.memory_space<vmem>>, vector<1x16x16x64xbf16>
    %56 = vector.shape_cast %55 : vector<1x16x16x64xbf16> to vector<256x64xbf16>
    %c0_80 = arith.constant 0 : index
    %c0_81 = arith.constant 0 : index
    %c2_82 = arith.constant 2 : index
    %c0_83 = arith.constant 0 : index
    %57 = vector.load %arg8[%c0_80, %c0_81, %c2_82, %c0_83] : memref<1x18x20x64xbf16, #tpu.memory_space<vmem>>, vector<1x16x16x64xbf16>
    %58 = vector.shape_cast %57 : vector<1x16x16x64xbf16> to vector<256x64xbf16>
    %59 = tpu.concatenate %56, %58 in 1 : vector<256x64xbf16>, vector<256x64xbf16> -> vector<256x128xbf16>
    %c0_84 = arith.constant 0 : index
    %c0_85 = arith.constant 0 : index
    %60 = vector.load %arg9[%c0_84, %c0_85] : memref<256x576xbf16, #tpu.memory_space<vmem>>, vector<256x128xbf16>
    tpu.vector_store %arg9[%c0_84, %c0_85], %59 {strides = array<i32>} : memref<256x576xbf16, #tpu.memory_space<vmem>>, vector<256x128xbf16>,
    %c0_86 = arith.constant 0 : index
    %c0_87 = arith.constant 0 : index
    %c3_88 = arith.constant 3 : index
    %c0_89 = arith.constant 0 : index
    %61 = vector.load %arg8[%c0_86, %c0_87, %c3_88, %c0_89] : memref<1x18x20x64xbf16, #tpu.memory_space<vmem>>, vector<1x16x16x64xbf16>
    %62 = vector.shape_cast %61 : vector<1x16x16x64xbf16> to vector<256x64xbf16>
    %c0_90 = arith.constant 0 : index
    %c1_91 = arith.constant 1 : index
    %c1_92 = arith.constant 1 : index
    %c0_93 = arith.constant 0 : index
    %63 = vector.load %arg8[%c0_90, %c1_91, %c1_92, %c0_93] : memref<1x18x20x64xbf16, #tpu.memory_space<vmem>>, vector<1x16x16x64xbf16>
    %64 = vector.shape_cast %63 : vector<1x16x16x64xbf16> to vector<256x64xbf16>
    %65 = tpu.concatenate %62, %64 in 1 : vector<256x64xbf16>, vector<256x64xbf16> -> vector<256x128xbf16>
    %c0_94 = arith.constant 0 : index
    %c128_95 = arith.constant 128 : index
    %66 = vector.load %arg9[%c0_94, %c128_95] : memref<256x576xbf16, #tpu.memory_space<vmem>>, vector<256x128xbf16>
    tpu.vector_store %arg9[%c0_94, %c128_95], %65 {strides = array<i32>} : memref<256x576xbf16, #tpu.memory_space<vmem>>, vector<256x128xbf16>,
    %c0_96 = arith.constant 0 : index
    %c1_97 = arith.constant 1 : index
    %c2_98 = arith.constant 2 : index
    %c0_99 = arith.constant 0 : index
    %67 = vector.load %arg8[%c0_96, %c1_97, %c2_98, %c0_99] : memref<1x18x20x64xbf16, #tpu.memory_space<vmem>>, vector<1x16x16x64xbf16>
    %68 = vector.shape_cast %67 : vector<1x16x16x64xbf16> to vector<256x64xbf16>
    %c0_100 = arith.constant 0 : index
    %c1_101 = arith.constant 1 : index
    %c3_102 = arith.constant 3 : index
    %c0_103 = arith.constant 0 : index
    %69 = vector.load %arg8[%c0_100, %c1_101, %c3_102, %c0_103] : memref<1x18x20x64xbf16, #tpu.memory_space<vmem>>, vector<1x16x16x64xbf16>
    %70 = vector.shape_cast %69 : vector<1x16x16x64xbf16> to vector<256x64xbf16>
    %71 = tpu.concatenate %68, %70 in 1 : vector<256x64xbf16>, vector<256x64xbf16> -> vector<256x128xbf16>
    %c0_104 = arith.constant 0 : index
    %c256_105 = arith.constant 256 : index
    %72 = vector.load %arg9[%c0_104, %c256_105] : memref<256x576xbf16, #tpu.memory_space<vmem>>, vector<256x128xbf16>
    tpu.vector_store %arg9[%c0_104, %c256_105], %71 {strides = array<i32>} : memref<256x576xbf16, #tpu.memory_space<vmem>>, vector<256x128xbf16>,
    %c0_106 = arith.constant 0 : index
    %c2_107 = arith.constant 2 : index
    %c1_108 = arith.constant 1 : index
    %c0_109 = arith.constant 0 : index
    %73 = vector.load %arg8[%c0_106, %c2_107, %c1_108, %c0_109] : memref<1x18x20x64xbf16, #tpu.memory_space<vmem>>, vector<1x16x16x64xbf16>
    %74 = vector.shape_cast %73 : vector<1x16x16x64xbf16> to vector<256x64xbf16>
    %c0_110 = arith.constant 0 : index
    %c2_111 = arith.constant 2 : index
    %c2_112 = arith.constant 2 : index
    %c0_113 = arith.constant 0 : index
    %75 = vector.load %arg8[%c0_110, %c2_111, %c2_112, %c0_113] : memref<1x18x20x64xbf16, #tpu.memory_space<vmem>>, vector<1x16x16x64xbf16>
    %76 = vector.shape_cast %75 : vector<1x16x16x64xbf16> to vector<256x64xbf16>
    %77 = tpu.concatenate %74, %76 in 1 : vector<256x64xbf16>, vector<256x64xbf16> -> vector<256x128xbf16>
    %c0_114 = arith.constant 0 : index
    %c384_115 = arith.constant 384 : index
    %78 = vector.load %arg9[%c0_114, %c384_115] : memref<256x576xbf16, #tpu.memory_space<vmem>>, vector<256x128xbf16>
    tpu.vector_store %arg9[%c0_114, %c384_115], %77 {strides = array<i32>} : memref<256x576xbf16, #tpu.memory_space<vmem>>, vector<256x128xbf16>,
    %c0_116 = arith.constant 0 : index
    %c2_117 = arith.constant 2 : index
    %c3_118 = arith.constant 3 : index
    %c0_119 = arith.constant 0 : index
    %79 = vector.load %arg8[%c0_116, %c2_117, %c3_118, %c0_119] : memref<1x18x20x64xbf16, #tpu.memory_space<vmem>>, vector<1x16x16x64xbf16>
    %80 = vector.shape_cast %79 : vector<1x16x16x64xbf16> to vector<256x64xbf16>
    %c0_120 = arith.constant 0 : index
    %c512_121 = arith.constant 512 : index
    %81 = vector.load %arg9[%c0_120, %c512_121] : memref<256x576xbf16, #tpu.memory_space<vmem>>, vector<256x64xbf16>
    tpu.vector_store %arg9[%c0_120, %c512_121], %80 {strides = array<i32>} : memref<256x576xbf16, #tpu.memory_space<vmem>>, vector<256x64xbf16>,
    %c0_122 = arith.constant 0 : index
    %c0_123 = arith.constant 0 : index
    %82 = vector.load %arg9[%c0_122, %c0_123] : memref<256x576xbf16, #tpu.memory_space<vmem>>, vector<256x576xbf16>
    %c0_124 = arith.constant 0 : index
    %c0_125 = arith.constant 0 : index
    %83 = vector.load %arg5[%c0_124, %c0_125] : memref<576x64xbf16, #tpu.memory_space<vmem>>, vector<576x64xbf16>
    %cst_126 = arith.constant dense<0.000000e+00> : vector<256x64xf32>
    %84 = tpu.matmul %82, %83, %cst_126 {dimension_numbers = #tpu.dot_dimension_numbers<[1], [0], [0], [1], [0, 0, 1, 1], [], []>} : vector<256x576xbf16>, vector<576x64xbf16>, vector<256x64xf32> -> vector<256x64xf32>
    %c0_127 = arith.constant 0 : index
    %c0_128 = arith.constant 0 : index
    %85 = vector.load %arg6[%c0_127, %c0_128] : memref<1x64xf32, #tpu.memory_space<vmem>>, vector<1x64xf32>
    %86 = vector.broadcast %85 : vector<1x64xf32> to vector<256x64xf32>
    %87 = arith.addf %84, %86 : vector<256x64xf32>
    %c0_129 = arith.constant 0 : index
    %c0_130 = arith.constant 0 : index
    %c0_131 = arith.constant 0 : index
    %88 = vector.load %arg1[%c0_129, %c0_130, %c0_131] : memref<1x256x64xf32, #tpu.memory_space<vmem>>, vector<1x256x64xf32>
    %89 = vector.shape_cast %88 : vector<1x256x64xf32> to vector<256x64xf32>
    %90 = arith.addf %87, %89 : vector<256x64xf32>
    %91 = vector.shape_cast %90 : vector<256x64xf32> to vector<1x256x64xf32>
    %c0_132 = arith.constant 0 : index
    %c0_133 = arith.constant 0 : index
    %c0_134 = arith.constant 0 : index
    %92 = vector.load %arg7[%c0_132, %c0_133, %c0_134] : memref<1x256x64xf32, #tpu.memory_space<vmem>>, vector<1x256x64xf32>
    tpu.vector_store %arg7[%c0_132, %c0_133, %c0_134], %91 {strides = array<i32>} : memref<1x256x64xf32, #tpu.memory_space<vmem>>, vector<1x256x64xf32>,
    return
  }
  func.func @transform_0(%arg0: i32) -> (i32, i32, i32) {
    %c0_i32 = arith.constant 0 : i32
    %c0_i32_0 = arith.constant 0 : i32
    %c0_i32_1 = arith.constant 0 : i32
    return %arg0, %c0_i32, %c0_i32_0 : i32, i32, i32
  }
  func.func @transform_1(%arg0: i32) -> (i32, i32) {
    %c0_i32 = arith.constant 0 : i32
    %c0_i32_0 = arith.constant 0 : i32
    %c0_i32_1 = arith.constant 0 : i32
    return %c0_i32, %c0_i32_0 : i32, i32
  }
  func.func @transform_2(%arg0: i32) -> (i32, i32) {
    %c0_i32 = arith.constant 0 : i32
    %c0_i32_0 = arith.constant 0 : i32
    %c0_i32_1 = arith.constant 0 : i32
    return %c0_i32, %c0_i32_0 : i32, i32
  }
  func.func @transform_3(%arg0: i32) -> (i32, i32) {
    %c0_i32 = arith.constant 0 : i32
    %c0_i32_0 = arith.constant 0 : i32
    %c0_i32_1 = arith.constant 0 : i32
    return %c0_i32, %c0_i32_0 : i32, i32
  }
  func.func @transform_4(%arg0: i32) -> (i32, i32) {
    %c0_i32 = arith.constant 0 : i32
    %c0_i32_0 = arith.constant 0 : i32
    %c0_i32_1 = arith.constant 0 : i32
    return %c0_i32, %c0_i32_0 : i32, i32
  }
  func.func @transform_5(%arg0: i32) -> (i32, i32) {
    %c0_i32 = arith.constant 0 : i32
    %c0_i32_0 = arith.constant 0 : i32
    %c0_i32_1 = arith.constant 0 : i32
    return %c0_i32, %c0_i32_0 : i32, i32
  }
  func.func @transform_6(%arg0: i32) -> (i32, i32, i32) {
    %c0_i32 = arith.constant 0 : i32
    %c0_i32_0 = arith.constant 0 : i32
    %c0_i32_1 = arith.constant 0 : i32
    return %arg0, %c0_i32, %c0_i32_0 : i32, i32, i32
  }
}

</mosaic_0001>

<bundles_post_ra>
// kernel: tpu_custom_call.1
= control target key start
LH: loop header
LB: loop body
LE: loop exit
PB: predicated region body
PF: predicated region fallthrough
CT: control target
= control target key end

     0   :  { %s12975_s21 = smov 0   ;;  %s16370_s0 = inlined_call_operand.vmem [shape: f32[2,256,64], index: 0, kind: input, shape index: {}]   ;;  %s16371_s1 = inlined_call_operand.vmem [shape: bf16[576,64], index: 1, kind: input, shape index: {}]   ;;  %s16372_s2 = inlined_call_operand.vmem [shape: f32[1,64], index: 2, kind: input, shape index: {}]   ;;  %s16373_s3 = inlined_call_operand.vmem [shape: f32[1,64], index: 3, kind: input, shape index: {}]   ;;  %s16374_s4 = inlined_call_operand.vmem [shape: bf16[576,64], index: 4, kind: input, shape index: {}]   ;;  %s16375_s5 = inlined_call_operand.vmem [shape: f32[1,64], index: 5, kind: input, shape index: {}]   ;;  %s16376_s6 = inlined_call_operand.vmem [shape: f32[2,256,64], index: 6, kind: output, shape index: {}]  }
   0x1 LB: > { %s11471_s22 = sadd.s32 4294967295, %s12936_s21   ;;  %p11475_p0 = scmp.ge.s32.totalorder %s12936_s21, 1  ;;  %s12936_s21 = sphi %s12975_s21, %s16_s21  }
   0x2   : > { %p212_p1 = scmp.lt.s32.totalorder %s12936_s21, 3 }
   0x4   : > { %p213_p2 = pnand %p11475_p0, %p212_p1 }
   0x6   : > { %216 = sbr.rel (%p213_p2) target bundleno = 1584 (0x630), region = 44 }
   0xd   : > { %p242_p3 = scmp.lt.s32.totalorder %s11471_s22, 1  ;;  %vm263_vm0 = vcmask 516096   ;;  %vm264_vm1 = vsmask.f32 7938  ;;  %v266_v1 = vld [vmem:[#allocation2 + $0xc] sm:$0x1] }
   0xe   : > { %vm12984_vm2 = vmand %vm263_vm0, %vm264_vm1  ;;  %v269_v3 = vld [vmem:[#allocation2 + $0x18] sm:$0x1]  ;;  %vm253_vm3 = vcmask 519168   ;;  %vm256_vm4 = vcmask 517120   ;;  %vm493_vm5 = vcmask 1040384   ;;  %v12938_v5 = vmov 0  }
   0xf   : > { %s16494_s22 = smov (!%p242_p3, %s11471_s22), 1  ;;  %v267_v2 = vsel %vm12984_vm2, 0, %v266_v1  ;;  %v270_v4 = vsel %vm12984_vm2, 0, %v269_v3  ;;  %254 = vst.msk [vmem:[#allocation2] sm:$0xf] %vm253_vm3, %v12938_v5  ;;  %vm494_vm6 = vcmask 1044484  }
  0x10   : > { %268 = vst [vmem:[#allocation2 + $0xc] sm:$0x1] %v267_v2  ;;  %s12037_s23 = sshll.u32 %s16494_s22, 8  ;;  %271 = vst [vmem:[#allocation2 + $0x18] sm:$0x1] %v270_v4  ;;  %vm624_vm7 = vcmask 519169  }
  0x11   : > { %255 = vst.msk [vmem:[#allocation2 + $0x4] sm:$0xf] %vm253_vm3, %v12938_v5  ;;  %259 = vst.msk [vmem:[#allocation2 + $0xcc] sm:$0xf] %vm253_vm3, %v12938_v5  ;;  %v272_v6 = vld [vmem:[#allocation2 + $0x24] sm:$0x1]  ;;  %s13004_s26 = scalar_lea.vmem %s16370_s0, %s12037_s23  ;;  %s16232_s9 = scalar_lea.vmem %s16376_s6, %s12037_s23 }
  0x12   : > { %257 = vst.msk [vmem:[#allocation2 + $0x8] sm:$0x3] %vm256_vm4, %v12938_v5  ;;  %261 = vst.msk [vmem:[#allocation2 + $0xd4] sm:$0x3] %vm256_vm4, %v12938_v5  ;;  %v275_v7 = vld [vmem:[#allocation2 + $0x30] sm:$0x1] }
  0x13   : > { %260 = vst.msk [vmem:[#allocation2 + $0xd0] sm:$0xf] %vm253_vm3, %v12938_v5  ;;  %v273_v8 = vsel %vm12984_vm2, 0, %v272_v6  ;;  %v276_v9 = vsel %vm12984_vm2, 0, %v275_v7  ;;  %v278_v10 = vld [vmem:[#allocation2 + $0x3c] sm:$0x1]  ;;  %vm13026_vm9 = vmor %vm493_vm5, %vm494_vm6 }
  0x14   : > { %v281_v11 = vld [vmem:[#allocation2 + $0x48] sm:$0x1]  ;;  %v365_v12 = vld [vmem:[%s13004_s26] sm:$0xff]  ;;  %v367_v14 = vld [vmem:[%s13004_s26 + $0x10] sm:$0xff]  ;;  %274 = vst [vmem:[#allocation2 + $0x24] sm:$0x1] %v273_v8 }
  0x15   : > { %v366_v13 = vld [vmem:[%s13004_s26 + $0x8] sm:$0xff]  ;;  %277 = vst [vmem:[#allocation2 + $0x30] sm:$0x1] %v276_v9  ;;  %v279_v15 = vsel %vm12984_vm2, 0, %v278_v10  ;;  %v282_v16 = vsel %vm12984_vm2, 0, %v281_v11  ;;  %v12039_v17 = vpack.c.bf16 %v365_v12, %v365_v12  ;;  %v368_v19 = vld [vmem:[%s13004_s26 + $0x18] sm:$0xff]  ;;  %v12041_v20 = vpack.c.bf16 %v367_v14, %v367_v14 }
  0x16   : > { %v12040_v18 = vpack.c.bf16 %v366_v13, %v366_v13  ;;  %v369_v21 = vld [vmem:[%s13004_s26 + $0x20] sm:$0xff]  ;;  %v370_v22 = vld [vmem:[%s13004_s26 + $0x28] sm:$0xff]  ;;  %280 = vst [vmem:[#allocation2 + $0x3c] sm:$0x1] %v279_v15  ;;  %283 = vst [vmem:[#allocation2 + $0x48] sm:$0x1] %v282_v16  ;;  %v12042_v23 = vpack.c.bf16 %v368_v19, %v368_v19 }
  0x17   : > { %vm1173_vm8 = vcmask 1042432   ;;  %v12043_v24 = vpack.c.bf16 %v369_v21, %v369_v21  ;;  %v12044_v25 = vpack.c.bf16 %v370_v22, %v370_v22  ;;  %v371_v26 = vld [vmem:[%s13004_s26 + $0x30] sm:$0xff]  ;;  %v372_v27 = vld [vmem:[%s13004_s26 + $0x38] sm:$0xff]  ;;  %v496_v28 = vrot.slane %v12039_v17, 7  ;;  %v373_v32 = vld [vmem:[%s13004_s26 + $0x40] sm:$0xff]  ;;  %s12939_s27 = smov 64  }
  0x18   : > { %v498_v29 = vrot.slane %v12040_v18, 7  ;;  %v501_v30 = vrot.slane %v12041_v20, 7  ;;  %v12045_v31 = vpack.c.bf16 %v371_v26, %v371_v26  ;;  %v374_v33 = vld [vmem:[%s13004_s26 + $0x48] sm:$0xff]  ;;  %v16389_v34 = vmov 0  ;;  %v675_v41 = vld [vmem:[#allocation2 + $0x4] sm:$0xf] }
  0x19   : > { %v16390_v34 = vsel %vm13026_vm9, 4294967295, %v16389_v34  ;;  %v503_v35 = vrot.slane %v12042_v23, 7  ;;  %vm1174_vm10 = vcmask 1046532   ;;  %v506_v36 = vrot.slane %v12043_v24, 7  ;;  %625 = vst.msk [vmem:[#allocation2 + $0xc] sm:$0xe] %vm624_vm7, %v496_v28 }
  0x1a   : > { %16391 = vst [vmem:[#allocation4_spill] sm:$0xff] %v16390_v34  ;;  %v12046_v37 = vpack.c.bf16 %v372_v27, %v372_v27  ;;  %v497_v38 = vrot.slane %v496_v28, 4  ;;  %v500_v39 = vrot.slane %v498_v29, 4  ;;  %v502_v40 = vrot.slane %v501_v30, 4  ;;  %629 = vst.msk [vmem:[#allocation2 + $0x18] sm:$0xe] %vm624_vm7, %v501_v30 }
  0x1b   : > { %v511_v42 = vrot.slane %v12045_v31, 7  ;;  %v505_v43 = vrot.slane %v503_v35, 4  ;;  %v676_v44 = vld [vmem:[#allocation2 + $0x8] sm:$0x1]  ;;  %v1109_v45 = vld [vmem:[#allocation2] sm:$0xe]  ;;  %v12047_v47 = vpack.c.bf16 %v373_v32, %v373_v32  ;;  %v12048_v48 = vpack.c.bf16 %v374_v33, %v374_v33  ;;  %vm13040_vm13 = vmor %vm1173_vm8, %vm1174_vm10 }
  0x1c   : > { %v508_v46 = vrot.slane %v12044_v25, 7  ;;  %632 = vst.msk [vmem:[#allocation2 + $0x24] sm:$0xe] %vm624_vm7, %v506_v36  ;;  %v499_v49 = vsel %vm13026_vm9, %v497_v38, %v498_v29  ;;  %vm722_vm11 = vsmask.f32 3328  ;;  %v504_v50 = vsel %vm13026_vm9, %v502_v40, %v503_v35  ;;  %v13046_v53 = vld [vmem:[%s13004_s26 + $0x50] sm:$0xff] }
  0x1d   : > { %628 = vst.msk [vmem:[#allocation2 + $0x14] sm:$0x1] %vm263_vm0, %v500_v39  ;;  %vm723_vm12 = vsmask.f32 7440  ;;  %v16392_v51 = vmov 0  ;;  %v11512_v52 = vrot.slane %v1109_v45, 9  ;;  %v12049_v5 = vpack.c.bf16 %v13046_v53, %v13046_v53 }
  0x1e   : > { %v16393_v51 = vsel %vm13040_vm13, 4294967295, %v16392_v51  ;;  %635 = vst.msk [vmem:[#allocation2 + $0x30] sm:$0xe] %vm624_vm7, %v511_v42  ;;  %v1178_v54 = vrot.slane %v675_v41, 5  ;;  %v1181_v55 = vrot.slane %v676_v44, 5  ;;  %v507_v56 = vrot.slane %v506_v36, 4  ;;  %vm13103_vm14 = vmor %vm722_vm11, %vm723_vm12 }
  0x1f   : > { %16394 = vst [vmem:[#allocation5_spill] sm:$0xff] %v16393_v51  ;;  %626 = vst.msk [vmem:[#allocation2 + $0x10] sm:$0xf] %vm253_vm3, %v499_v49  ;;  %v510_v57 = vrot.slane %v508_v46, 4  ;;  %v13052_v58 = vld [vmem:[%s13004_s26 + $0x58] sm:$0xff]  ;;  %v512_v59 = vrot.slane %v511_v42, 4 }
  0x20   : > { %630 = vst.msk [vmem:[#allocation2 + $0x1c] sm:$0xf] %vm253_vm3, %v504_v50  ;;  %v513_v60 = vrot.slane %v12046_v37, 7  ;;  %v516_v61 = vrot.slane %v12047_v47, 7  ;;  %v518_v62 = vrot.slane %v12048_v48, 7  ;;  %v13055_v63 = vld [vmem:[%s13004_s26 + $0x60] sm:$0xff]  ;;  %v13062_v2 = vsel %vm13040_vm13, %v11512_v52, %v1178_v54 }
  0x21   : > { %631 = vst.msk [vmem:[#allocation2 + $0x20] sm:$0x1] %vm263_vm0, %v505_v43  ;;  %v13058_v1 = vld [vmem:[%s13004_s26 + $0x68] sm:$0xff]  ;;  %v1180_v3 = vrot.slane %v1178_v54, 4  ;;  %v509_v4 = vsel %vm13026_vm9, %v507_v56, %v508_v46  ;;  %634 = vst.msk [vmem:[#allocation2 + $0x2c] sm:$0x1] %vm263_vm0, %v510_v57  ;;  %v12050_v16 = vpack.c.bf16 %v13052_v58, %v13052_v58  ;;  %v12051_v17 = vpack.c.bf16 %v13055_v63, %v13055_v63 }
  0x22   : > { %633 = vst.msk [vmem:[#allocation2 + $0x28] sm:$0xf] %vm253_vm3, %v509_v4  ;;  %v514_v6 = vsel %vm13026_vm9, %v512_v59, %v513_v60  ;;  %v515_v7 = vrot.slane %v513_v60, 4  ;;  %v517_v8 = vrot.slane %v516_v61, 4  ;;  %v520_v9 = vrot.slane %v518_v62, 4  ;;  %v13074_v10 = vld [vmem:[%s13004_s26 + $0x70] sm:$0xff] }
  0x23   : > { %638 = vst.msk [vmem:[#allocation2 + $0x3c] sm:$0xe] %vm624_vm7, %v516_v61  ;;  %v13077_v11 = vld [vmem:[%s13004_s26 + $0x78] sm:$0xff]  ;;  %v1996_v12 = vld [vmem:[#allocation2 + $0xc] sm:$0xf]  ;;  %v13081_v14 = vsel %vm13040_vm13, %v1180_v3, %v1181_v55  ;;  %v12052_v18 = vpack.c.bf16 %v13058_v1, %v13058_v1  ;;  %v12053_v40 = vpack.c.bf16 %v13074_v10, %v13074_v10  ;;  %v16395_v47 = vmov 0 }
  0x24   : > { %v1999_v13 = vld [vmem:[#allocation2 + $0x18] sm:$0xf]  ;;  %v1110_v15 = vld [vmem:[#allocation2 + $0xc] sm:$0xe]  ;;  %636 = vst.msk [vmem:[#allocation2 + $0x34] sm:$0xf] %vm253_vm3, %v514_v6  ;;  %v11544_v25 = vcombine.low %v13062_v2, %v13081_v14  ;;  %v519_v28 = vsel %vm13026_vm9, %v517_v8, %v518_v62  ;;  %v12054_v41 = vpack.c.bf16 %v13077_v11, %v13077_v11 }
  0x25   : > { %v2045_v19 = vshrl.u32 %v1996_v12, 16  ;;  %v2048_v20 = vshll.u32 %v1996_v12, 16  ;;  %v2069_v21 = vshrl.u32 %v1999_v13, 16  ;;  %v2072_v22 = vshll.u32 %v1999_v13, 16  ;;  %v2002_v23 = vld [vmem:[#allocation2 + $0x24] sm:$0xf] }
  0x26   : > { %637 = vst.msk [vmem:[#allocation2 + $0x38] sm:$0x1] %vm263_vm0, %v515_v7  ;;  %640 = vst.msk [vmem:[#allocation2 + $0x44] sm:$0x1] %vm263_vm0, %v520_v9  ;;  %v1998_v24 = vld [vmem:[#allocation2 + $0x14] sm:$0x1] }
  0x27   : > { %v11513_v26 = vrot.slane %v1110_v15, 9  ;;  %v2093_v27 = vshrl.u32 %v2002_v23, 16  ;;  %v1997_v29 = vld [vmem:[#allocation2 + $0x10] sm:$0xf]  ;;  %v2047_v30 = vrot.slane %v2045_v19, 4  ;;  %v2050_v31 = vrot.slane %v2048_v20, 5 }
  0x28   : > { %v2064_v32 = vshll.u32 %v1998_v24, 16  ;;  %v2071_v33 = vrot.slane %v2069_v21, 4  ;;  %v679_v35 = vld [vmem:[#allocation2 + $0x14] sm:$0x1]  ;;  %639 = vst.msk [vmem:[#allocation2 + $0x40] sm:$0xf] %vm253_vm3, %v519_v28 }
  0x29   : > { %v2054_v36 = vshll.u32 %v1997_v29, 16  ;;  %v2058_v37 = vshrl.u32 %v1997_v29, 16  ;;  %v2000_v38 = vld [vmem:[#allocation2 + $0x1c] sm:$0xf]  ;;  %v2001_v39 = vld [vmem:[#allocation2 + $0x20] sm:$0x1]  ;;  %v2051_v42 = vor.u32 %v2050_v31, %v2047_v30 }
  0x2a   : > { %v2066_v43 = vrot.slane %v2064_v32, 5  ;;  %v2074_v44 = vrot.slane %v2072_v22, 5  ;;  %v2078_v45 = vshll.u32 %v2000_v38, 16  ;;  %v678_v46 = vld [vmem:[#allocation2 + $0x10] sm:$0xf]  ;;  %v16396_v47 = vsel %vm13103_vm14, 4294967295, %v16395_v47 }
  0x2b   : > { %16397 = vst [vmem:[#allocation6_spill] sm:$0xff] %v16396_v47  ;;  %v2056_v48 = vrot.slane %v2054_v36, 5  ;;  %v2060_v49 = vrot.slane %v2058_v37, 4  ;;  %v2082_v50 = vshrl.u32 %v2000_v38, 16  ;;  %v2088_v52 = vshll.u32 %v2001_v39, 16  ;;  %v12682_v53 = vld [vmem:[%s16371_s1] sm:$0xff]  }
  0x2c   : > { %v2052_v54 = vrot.slane %v2051_v42, 4  ;;  %v2075_v55 = vor.u32 %v2074_v44, %v2071_v33  ;;  %v2080_v56 = vrot.slane %v2078_v45, 5  ;;  %v1185_v57 = vrot.slane %v678_v46, 5  ;;  %v2003_v3 = vld [vmem:[#allocation2 + $0x28] sm:$0xf]  ;;  %v13199_v10 = vld [vmem:[%s13004_s26 + $0x98] sm:$0xff] }
  0x2d   : > { %v2061_v59 = vor.u32 %v2060_v49, %v2056_v48  ;;  %v2084_v60 = vrot.slane %v2082_v50, 4  ;;  %v2090_v61 = vrot.slane %v2088_v52, 5  ;;  %v1188_v62 = vrot.slane %v679_v35, 5  ;;  %v2004_v13 = vld [vmem:[#allocation2 + $0x2c] sm:$0x1] }
  0x2e   : > { %v2057_v4 = vsel %vm13103_vm14, %v2052_v54, %v2056_v48  ;;  %v2076_v6 = vrot.slane %v2075_v55, 4  ;;  %v1186_v7 = vsel %vm13040_vm13, %v11513_v26, %v1185_v57  ;;  %v1187_v8 = vrot.slane %v1185_v57, 4  ;;  %v681_v28 = vld [vmem:[#allocation2 + $0x1c] sm:$0xf]  ;;  %v1111_v29 = vld [vmem:[#allocation2 + $0x18] sm:$0xe] }
  0x2f   : > { %v2062_v9 = vrot.slane %v2061_v59, 4  ;;  %v2085_v12 = vor.u32 %v2084_v60, %v2080_v56  ;;  %v2095_v15 = vrot.slane %v2093_v27, 4  ;;  %v2096_v19 = vshll.u32 %v2002_v23, 16  ;;  %v682_v33 = vld [vmem:[#allocation2 + $0x20] sm:$0x1]  ;;  %v12683_v11 = vld [vmem:[%s16371_s1 + $0x48] sm:$0xff]  }
  0x30   : > { %v2081_v20 = vsel %vm13103_vm14, %v2076_v6, %v2080_v56  ;;  %v1189_v21 = vsel %vm13040_vm13, %v1187_v8, %v1188_v62  ;;  %v2102_v22 = vshll.u32 %v2003_v3, 16  ;;  %v2106_v24 = vshrl.u32 %v2003_v3, 16  ;;  %v2005_v37 = vld [vmem:[#allocation2 + $0x30] sm:$0xf]  ;;  %v2006_v45 = vld [vmem:[#allocation2 + $0x34] sm:$0xf] }
  0x31   : > { %v2067_v30 = vsel %vm13103_vm14, %v2062_v9, %v2066_v43  ;;  %v2086_v26 = vrot.slane %v2085_v12, 4  ;;  %v11545_v31 = vcombine.low %v1186_v7, %v1189_v21  ;;  %v2098_v32 = vrot.slane %v2096_v19, 5  ;;  %v2007_v50 = vld [vmem:[#allocation2 + $0x38] sm:$0x1]  ;;  %v684_v57 = vld [vmem:[#allocation2 + $0x28] sm:$0xf] }
  0x32   : > { %v11576_v35 = vcombine.low %v2057_v4, %v2067_v30  ;;  %v2104_v27 = vrot.slane %v2102_v22, 5  ;;  %v2108_v23 = vrot.slane %v2106_v24, 4  ;;  %v2112_v36 = vshll.u32 %v2004_v13, 16  ;;  %v1112_v3 = vld [vmem:[#allocation2 + $0x24] sm:$0xe] }
  0x33   : > { %v2091_v38 = vsel %vm13103_vm14, %v2086_v26, %v2090_v61  ;;  %v2099_v39 = vor.u32 %v2098_v32, %v2095_v15  ;;  %v11514_v42 = vrot.slane %v1111_v29, 9  ;;  %v1192_v44 = vrot.slane %v681_v28, 5  ;;  %v685_v9 = vld [vmem:[#allocation2 + $0x2c] sm:$0x1]  ;;  %v2008_v12 = vld [vmem:[#allocation2 + $0x3c] sm:$0xf] }
  0x34   : > { %2524 = vrot.lane.b32.xlu0 %v11576_v35, %s12939_s27  ;;  %v11577_v43 = vcombine.low %v2081_v20, %v2091_v38  ;;  %v2109_v46 = vor.u32 %v2108_v23, %v2104_v27  ;;  %v2114_v48 = vrot.slane %v2112_v36, 5  ;;  %v1195_v49 = vrot.slane %v682_v33, 5  ;;  %v2009_v21 = vld [vmem:[#allocation2 + $0x40] sm:$0xf]  ;;  %v2010_v33 = vld [vmem:[#allocation2 + $0x44] sm:$0x1] }
  0x35   : > { %v2100_v52 = vrot.slane %v2099_v39, 4  ;;  %v1193_v54 = vsel %vm13040_vm13, %v11514_v42, %v1192_v44  ;;  %v1194_v55 = vrot.slane %v1192_v44, 4  ;;  %v2117_v56 = vshrl.u32 %v2005_v37, 16  ;;  %v1113_v23 = vld [vmem:[#allocation2 + $0x30] sm:$0xe] }
  0x36   : > { %2526 = vrot.lane.b32.xlu1 %v11577_v43, %s12939_s27  ;;  %v2110_v59 = vrot.slane %v2109_v46, 4  ;;  %v2120_v60 = vshll.u32 %v2005_v37, 16  ;;  %v2126_v61 = vshll.u32 %v2006_v45, 16  ;;  %v2130_v62 = vshrl.u32 %v2006_v45, 16  ;;  %v687_v42 = vld [vmem:[#allocation2 + $0x34] sm:$0xf] }
  0x37   : > { %v2105_v4 = vsel %vm13103_vm14, %v2100_v52, %v2104_v27  ;;  %v1196_v6 = vsel %vm13040_vm13, %v1194_v55, %v1195_v49  ;;  %v2119_v7 = vrot.slane %v2117_v56, 4  ;;  %v2136_v8 = vshll.u32 %v2007_v50, 16  ;;  %v688_v46 = vld [vmem:[#allocation2 + $0x38] sm:$0x1] }
  0x38   : > { %1384 = vrot.lane.b32.xlu0 %v11544_v25, %s12939_s27  ;;  %v2115_v13 = vsel %vm13103_vm14, %v2110_v59, %v2114_v48  ;;  %v11546_v15 = vcombine.low %v1193_v54, %v1196_v6  ;;  %v2122_v19 = vrot.slane %v2120_v60, 5  ;;  %v2128_v20 = vrot.slane %v2126_v61, 5  ;;  %v690_v59 = vld [vmem:[#allocation2 + $0x40] sm:$0xf]  ;;  %v1114_v60 = vld [vmem:[#allocation2 + $0x3c] sm:$0xe] }
  0x39   : > { %v11578_v22 = vcombine.low %v2105_v4, %v2115_v13  ;;  %v2132_v24 = vrot.slane %v2130_v62, 4  ;;  %v2138_v28 = vrot.slane %v2136_v8, 5  ;;  %v11515_v29 = vrot.slane %v1112_v3, 9  ;;  %v12681_v6 = vld [vmem:[%s16371_s1 + $0x40] sm:$0xff]   ;;  %v284_v13 = vld [vmem:[#allocation2 + $0x54] sm:$0x1] }
  0x3a   : > { %1386 = vrot.lane.b32.xlu1 %v11545_v31, %s12939_s27  ;;  %v2123_v30 = vor.u32 %v2122_v19, %v2119_v7  ;;  %v1199_v26 = vrot.slane %v684_v57, 5  ;;  %v1202_v32 = vrot.slane %v685_v9, 5  ;;  %v2141_v35 = vshrl.u32 %v2008_v12, 16  ;;  %12103 = vmatprep.subr.bf16.mxu0 %v12681_v6 }
  0x3b   : > { %v2133_v2 = vor.u32 %v2132_v24, %v2128_v20  ;;  %v2144_v14 = vshll.u32 %v2008_v12, 16  ;;  %v2150_v25 = vshll.u32 %v2009_v21, 16  ;;  %v2154_v27 = vshrl.u32 %v2009_v21, 16  ;;  %12104 = vmatpush3.bf16.msra.mxu0 %v12682_v53 }
  0x3c   : > { %2528 = vrot.lane.b32.xlu0 %v11578_v22, %s12939_s27  ;;  %v2124_v36 = vrot.slane %v2123_v30, 4  ;;  %v1200_v37 = vsel %vm13040_vm13, %v11515_v29, %v1199_v26  ;;  %v1201_v38 = vrot.slane %v1199_v26, 4  ;;  %v2143_v39 = vrot.slane %v2141_v35, 4  ;;  %v381_v35 = vld [vmem:[%s13004_s26 + $0x80] sm:$0xff]  ;;  %12105 = vmatprep.subr.bf16.mxu0 %v12683_v11 }
  0x3d   : > { %v2134_v31 = vrot.slane %v2133_v2, 4  ;;  %v2146_v44 = vrot.slane %v2144_v14, 5  ;;  %v2152_v45 = vrot.slane %v2150_v25, 5  ;;  %v2156_v43 = vrot.slane %v2154_v27, 4 }
  0x3e   : > { %1388 = vrot.lane.b32.xlu1 %v11546_v15, %s12939_s27  ;;  %v2129_v48 = vsel %vm13103_vm14, %v2124_v36, %v2128_v20  ;;  %v1203_v49 = vsel %vm13040_vm13, %v1201_v38, %v1202_v32  ;;  %v2160_v50 = vshll.u32 %v2010_v33, 16  ;;  %v11516_v52 = vrot.slane %v1113_v23, 9  ;;  %v691_v20 = vld [vmem:[#allocation2 + $0x44] sm:$0x1]  ;;  %v290_v33 = vld [vmem:[#allocation2 + $0x6c] sm:$0x1] }
  0x3f   : > { %v2139_v54 = vsel %vm13103_vm14, %v2134_v31, %v2138_v28  ;;  %v11547_v55 = vcombine.low %v1200_v37, %v1203_v49  ;;  %v2147_v56 = vor.u32 %v2146_v44, %v2143_v39  ;;  %v2157_v57 = vor.u32 %v2156_v43, %v2152_v45  ;;  %v287_v28 = vld [vmem:[#allocation2 + $0x60] sm:$0x1]  ;;  %v382_v23 = vld [vmem:[%s13004_s26 + $0x88] sm:$0xff] }
  0x40   : > { %v11579_v61 = vcombine.low %v2129_v48, %v2139_v54  ;;  %v2162_v62 = vrot.slane %v2160_v50, 5  ;;  %v1206_v3 = vrot.slane %v687_v42, 5  ;;  %v1209_v4 = vrot.slane %v688_v46, 5  ;;  %v293_v42 = vld [vmem:[#allocation2 + $0x78] sm:$0x1]  ;;  %v13209_v50 = vld [vmem:[%s13004_s26 + $0xa0] sm:$0xff] }
  0x41   : > { %v2148_v7 = vrot.slane %v2147_v56, 4  ;;  %v2158_v8 = vrot.slane %v2157_v57, 4  ;;  %v521_v9 = vrot.slane %v12049_v5, 7  ;;  %v523_v12 = vrot.slane %v12050_v16, 7  ;;  %v12684_v54 = vld [vmem:[%s16371_s1 + $0x8] sm:$0xff]  }
  0x42   : > { %2530 = vrot.lane.b32.xlu0 %v11579_v61, %s12939_s27  ;;  %1390 = vrot.lane.b32.xlu1 %v11547_v55, %s12939_s27  ;;  %v1207_v15 = vsel %vm13040_vm13, %v11516_v52, %v1206_v3  ;;  %v1208_v19 = vrot.slane %v1206_v3, 4  ;;  %v11517_v21 = vrot.slane %v1114_v60, 9  ;;  %v1213_v22 = vrot.slane %v690_v59, 5  ;;  %v13212_v52 = vld [vmem:[%s13004_s26 + $0xa8] sm:$0xff] }
  0x43   : > { %v2153_v58 = vsel %vm13103_vm14, %v2148_v7, %v2152_v45  ;;  %v2163_v5 = vsel %vm13103_vm14, %v2158_v8, %v2162_v62  ;;  %v522_v16 = vrot.slane %v521_v9, 4  ;;  %v525_v24 = vrot.slane %v523_v12, 4  ;;  %641 = vst.msk [vmem:[#allocation2 + $0x48] sm:$0xe] %vm624_vm7, %v521_v9  ;;  %v13230_v7 = vld [vmem:[%s13004_s26 + $0xb0] sm:$0xff]  ;;  %12106 = vmatpush3.bf16.msra.mxu0 %v12684_v54 }
  0x44   : > { %v11580_v29 = vcombine.low %v2153_v58, %v2163_v5  ;;  %v1210_v30 = vsel %vm13040_vm13, %v1208_v19, %v1209_v4  ;;  %v1214_v26 = vsel %vm13040_vm13, %v11517_v21, %v1213_v22  ;;  %v1215_v32 = vrot.slane %v1213_v22, 4 }
  0x45   : > { %v11548_v2 = vcombine.low %v1207_v15, %v1210_v30  ;;  %v524_v14 = vsel %vm13026_vm9, %v522_v16, %v523_v12  ;;  %643 = vst.msk [vmem:[#allocation2 + $0x50] sm:$0x1] %vm263_vm0, %v525_v24  ;;  %v1216_v25 = vrot.slane %v691_v20, 5  ;;  %v285_v27 = vsel %vm12984_vm2, 0, %v284_v13  ;;  %v12685_v30 = vld [vmem:[%s16371_s1 + $0x50] sm:$0xff]  }
  0x46   : > { %2532 = vrot.lane.b32.xlu0 %v11580_v29, %s12939_s27  ;;  %642 = vst.msk [vmem:[#allocation2 + $0x4c] sm:$0xf] %vm253_vm3, %v524_v14  ;;  %286 = vst [vmem:[#allocation2 + $0x54] sm:$0x1] %v285_v27  ;;  %v526_v36 = vrot.slane %v12051_v17, 7  ;;  %v528_v37 = vrot.slane %v12052_v18, 7  ;;  %v12055_v17 = vpack.c.bf16 %v381_v35, %v381_v35  ;;  %v12056_v46 = vpack.c.bf16 %v382_v23, %v382_v23 }
  0x47   : > { %v288_v38 = vsel %vm12984_vm2, 0, %v287_v28  ;;  %v531_v39 = vrot.slane %v12053_v40, 7  ;;  %1392 = vrot.lane.b32.xlu1 %v11548_v2, %s12939_s27  ;;  %v1217_v31 = vsel %vm13040_vm13, %v1215_v32, %v1216_v25  ;;  %v533_v63 = vrot.slane %v12054_v41, 7  ;;  %v383_v18 = vld [vmem:[%s13004_s26 + $0x90] sm:$0xff]  ;;  %12107 = vmatprep.subr.bf16.mxu0 %v12685_v30 }
  0x48   : > { %289 = vst [vmem:[#allocation2 + $0x60] sm:$0x1] %v288_v38  ;;  %v291_v1 = vsel %vm12984_vm2, 0, %v290_v33  ;;  %v11549_v40 = vcombine.low %v1214_v26, %v1217_v31  ;;  %v527_v44 = vrot.slane %v526_v36, 4  ;;  %v530_v45 = vrot.slane %v528_v37, 4 }
  0x49   : > { %644 = vst.msk [vmem:[#allocation2 + $0x54] sm:$0xe] %vm624_vm7, %v526_v36  ;;  %v532_v43 = vrot.slane %v531_v39, 4  ;;  %647 = vst.msk [vmem:[#allocation2 + $0x60] sm:$0xe] %vm624_vm7, %v531_v39  ;;  %v535_v41 = vrot.slane %v533_v63, 4  ;;  %v12057_v60 = vpack.c.bf16 %v383_v18, %v383_v18  ;;  %v12058_v61 = vpack.c.bf16 %v13199_v10, %v13199_v10 }
  0x4a   : > { %292 = vst [vmem:[#allocation2 + $0x6c] sm:$0x1] %v291_v1  ;;  %v536_v48 = vrot.slane %v12055_v17, 7  ;;  %v294_v49 = vsel %vm12984_vm2, 0, %v293_v42  ;;  %v2011_v55 = vld [vmem:[#allocation2 + $0x48] sm:$0xf]  ;;  %v529_v56 = vsel %vm13026_vm9, %v527_v44, %v528_v37  ;;  %v12059_v15 = vpack.c.bf16 %v13209_v50, %v13209_v50 }
  0x4b   : > { %646 = vst.msk [vmem:[#allocation2 + $0x5c] sm:$0x1] %vm263_vm0, %v530_v45  ;;  %v1115_v57 = vld [vmem:[#allocation2 + $0x48] sm:$0xe]  ;;  %v534_v59 = vsel %vm13026_vm9, %v532_v43, %v533_v63  ;;  %295 = vst [vmem:[#allocation2 + $0x78] sm:$0x1] %v294_v49  ;;  %1394 = vrot.lane.b32.xlu1 %v11549_v40, %s12939_s27  ;;  %v12060_v19 = vpack.c.bf16 %v13212_v52, %v13212_v52  ;;  %v12061_v14 = vpack.c.bf16 %v13230_v7, %v13230_v7 }
  0x4c   : > { %v2165_v62 = vshrl.u32 %v2011_v55, 16  ;;  %v2168_v3 = vshll.u32 %v2011_v55, 16  ;;  %645 = vst.msk [vmem:[#allocation2 + $0x58] sm:$0xf] %vm253_vm3, %v529_v56  ;;  %v11518_v4 = vrot.slane %v1115_v57, 9  ;;  %v537_v6 = vrot.slane %v536_v48, 4 }
  0x4d   : > { %648 = vst.msk [vmem:[#allocation2 + $0x64] sm:$0xf] %vm253_vm3, %v534_v59  ;;  %v2013_v8 = vld [vmem:[#allocation2 + $0x50] sm:$0x1]  ;;  %v538_v12 = vrot.slane %v12056_v46, 7  ;;  %v13232_v13 = vrot.slane %v12057_v60, 7 }
  0x4e   : > { %649 = vst.msk [vmem:[#allocation2 + $0x68] sm:$0x1] %vm263_vm0, %v535_v41  ;;  %v694_v9 = vld [vmem:[#allocation2 + $0x50] sm:$0x1]  ;;  %v2012_v20 = vld [vmem:[#allocation2 + $0x4c] sm:$0xf] }
  0x4f   : > { %650 = vst.msk [vmem:[#allocation2 + $0x6c] sm:$0xe] %vm624_vm7, %v536_v48  ;;  %v2167_v21 = vrot.slane %v2165_v62, 4  ;;  %v2170_v22 = vrot.slane %v2168_v3, 5  ;;  %v2184_v53 = vshll.u32 %v2013_v8, 16  ;;  %v1223_v58 = vrot.slane %v694_v9, 5 }
  0x50   : > { %v2174_v5 = vshll.u32 %v2012_v20, 16  ;;  %v2178_v16 = vshrl.u32 %v2012_v20, 16  ;;  %v693_v24 = vld [vmem:[#allocation2 + $0x4c] sm:$0xf]  ;;  %v539_v28 = vsel %vm13026_vm9, %v537_v6, %v538_v12  ;;  %v540_v29 = vrot.slane %v538_v12, 4  ;;  %v12686_v63 = vld [vmem:[%s16371_s1 + $0x10] sm:$0xff]  }
  0x51   : > { %653 = vst.msk [vmem:[#allocation2 + $0x78] sm:$0xe] %vm624_vm7, %v13232_v13  ;;  %v2171_v26 = vor.u32 %v2170_v22, %v2167_v21  ;;  %v2186_v32 = vrot.slane %v2184_v53, 5  ;;  %v2014_v33 = vld [vmem:[#allocation2 + $0x54] sm:$0xf]  ;;  %v1220_v35 = vrot.slane %v693_v24, 5  ;;  %12108 = vmatpush3.bf16.msra.mxu0 %v12686_v63 }
  0x52   : > { %v2017_v2 = vld [vmem:[#allocation2 + $0x60] sm:$0xf]  ;;  %651 = vst.msk [vmem:[#allocation2 + $0x70] sm:$0xf] %vm253_vm3, %v539_v28  ;;  %v2176_v25 = vrot.slane %v2174_v5, 5  ;;  %v2180_v27 = vrot.slane %v2178_v16, 4 }
  0x53   : > { %v2189_v23 = vshrl.u32 %v2014_v33, 16  ;;  %v2192_v36 = vshll.u32 %v2014_v33, 16  ;;  %652 = vst.msk [vmem:[#allocation2 + $0x74] sm:$0x1] %vm263_vm0, %v540_v29  ;;  %v2172_v37 = vrot.slane %v2171_v26, 4  ;;  %v1221_v39 = vsel %vm13040_vm13, %v11518_v4, %v1220_v35  ;;  %v12687_v45 = vld [vmem:[%s16371_s1 + $0x58] sm:$0xff]  }
  0x54   : > { %v2016_v38 = vld [vmem:[#allocation2 + $0x5c] sm:$0x1]  ;;  %v1222_v42 = vrot.slane %v1220_v35, 4  ;;  %v2213_v31 = vshrl.u32 %v2017_v2, 16  ;;  %v2181_v1 = vor.u32 %v2180_v27, %v2176_v25  ;;  %v2015_v17 = vld [vmem:[#allocation2 + $0x58] sm:$0xf]  ;;  %12109 = vmatprep.subr.bf16.mxu0 %v12687_v45 }
  0x55   : > { %v2191_v18 = vrot.slane %v2189_v23, 4  ;;  %v2194_v40 = vrot.slane %v2192_v36, 5  ;;  %v2208_v44 = vshll.u32 %v2016_v38, 16  ;;  %v2177_v43 = vsel %vm13103_vm14, %v2172_v37, %v2176_v25  ;;  %v2018_v48 = vld [vmem:[#allocation2 + $0x64] sm:$0xf]  ;;  %v12688_v21 = vld [vmem:[%s16371_s1 + $0x18] sm:$0xff]  }
  0x56   : > { %v2198_v11 = vshll.u32 %v2015_v17, 16  ;;  %v2202_v41 = vshrl.u32 %v2015_v17, 16  ;;  %v1224_v46 = vsel %vm13040_vm13, %v1222_v42, %v1223_v58  ;;  %v2182_v49 = vrot.slane %v2181_v1, 4  ;;  %v2019_v57 = vld [vmem:[#allocation2 + $0x68] sm:$0x1]  ;;  %12110 = vmatpush3.bf16.msra.mxu0 %v12688_v21  ;;  %v12690_v27 = vld [vmem:[%s16371_s1 + $0x20] sm:$0xff]  }
  0x57   : > { %v2195_v54 = vor.u32 %v2194_v40, %v2191_v18  ;;  %v2210_v55 = vrot.slane %v2208_v44, 5  ;;  %v11550_v56 = vcombine.low %v1221_v39, %v1224_v46  ;;  %v2215_v62 = vrot.slane %v2213_v31, 4  ;;  %v1116_v4 = vld [vmem:[#allocation2 + $0x54] sm:$0xe]  ;;  %v696_v20 = vld [vmem:[#allocation2 + $0x58] sm:$0xf] }
  0x58   : > { %v2200_v59 = vrot.slane %v2198_v11, 5  ;;  %v2204_v60 = vrot.slane %v2202_v41, 4  ;;  %v2216_v3 = vshll.u32 %v2017_v2, 16  ;;  %v2187_v6 = vsel %vm13103_vm14, %v2182_v49, %v2186_v32  ;;  %v697_v16 = vld [vmem:[#allocation2 + $0x5c] sm:$0x1]  ;;  %v12689_v32 = vld [vmem:[%s16371_s1 + $0x60] sm:$0xff]  }
  0x59   : > { %v2196_v8 = vrot.slane %v2195_v54, 4  ;;  %1396 = vrot.lane.b32.xlu1 %v11550_v56, %s12939_s27  ;;  %v2222_v9 = vshll.u32 %v2018_v48, 16  ;;  %v2226_v12 = vshrl.u32 %v2018_v48, 16  ;;  %v11581_v22 = vcombine.low %v2177_v43, %v2187_v6  ;;  %v2020_v24 = vld [vmem:[#allocation2 + $0x6c] sm:$0xf]  ;;  %12111 = vmatprep.subr.bf16.mxu0 %v12689_v32 }
  0x5a   : > { %v2205_v53 = vor.u32 %v2204_v60, %v2200_v59  ;;  %v2218_v58 = vrot.slane %v2216_v3, 5  ;;  %v2232_v5 = vshll.u32 %v2019_v57, 16  ;;  %v11519_v26 = vrot.slane %v1116_v4, 9  ;;  %v2021_v37 = vld [vmem:[#allocation2 + $0x70] sm:$0xf]  ;;  %v12691_v42 = vld [vmem:[%s16371_s1 + $0x68] sm:$0xff]   ;;  %12112 = vmatpush3.bf16.msra.mxu0 %v12690_v27 }
  0x5b   : > { %v2201_v28 = vsel %vm13103_vm14, %v2196_v8, %v2200_v59  ;;  %v2224_v29 = vrot.slane %v2222_v9, 5  ;;  %v2228_v30 = vrot.slane %v2226_v12, 4  ;;  %2534 = vrot.lane.b32.xlu0 %v11581_v22, %s12939_s27  ;;  %v1227_v25 = vrot.slane %v696_v20, 5  ;;  %v2022_v18 = vld [vmem:[#allocation2 + $0x74] sm:$0x1]  ;;  %v12692_v41 = vld [vmem:[%s16371_s1 + $0x28] sm:$0xff]   ;;  %12113 = vmatprep.subr.bf16.mxu0 %v12691_v42 }
  0x5c   : > { %v2206_v33 = vrot.slane %v2205_v53, 4  ;;  %v2219_v35 = vor.u32 %v2218_v58, %v2215_v62  ;;  %v2234_v2 = vrot.slane %v2232_v5, 5  ;;  %v1230_v36 = vrot.slane %v697_v16, 5  ;;  %v1117_v11 = vld [vmem:[#allocation2 + $0x60] sm:$0xe]  ;;  %v12693_v4 = vld [vmem:[%s16371_s1 + $0x70] sm:$0xff]  }
  0x5d   : > { %v2229_v23 = vor.u32 %v2228_v30, %v2224_v29  ;;  %v2237_v38 = vshrl.u32 %v2020_v24, 16  ;;  %v2240_v39 = vshll.u32 %v2020_v24, 16  ;;  %v1228_v1 = vsel %vm13040_vm13, %v11519_v26, %v1227_v25  ;;  %v700_v56 = vld [vmem:[#allocation2 + $0x68] sm:$0x1]  ;;  %v2023_v3 = vld [vmem:[#allocation2 + $0x78] sm:$0xf] }
  0x5e   : > { %v2211_v31 = vsel %vm13103_vm14, %v2206_v33, %v2210_v55  ;;  %v2220_v63 = vrot.slane %v2219_v35, 4  ;;  %v1229_v17 = vrot.slane %v1227_v25, 4  ;;  %v2246_v49 = vshll.u32 %v2021_v37, 16  ;;  %v699_v55 = vld [vmem:[#allocation2 + $0x64] sm:$0xf]  ;;  %v12694_v22 = vld [vmem:[%s16371_s1 + $0x30] sm:$0xff]   ;;  %12114 = vmatpush3.bf16.msra.mxu0 %v12692_v41 }
  0x5f   : > { %v11582_v40 = vcombine.low %v2201_v28, %v2211_v31  ;;  %v2230_v44 = vrot.slane %v2229_v23, 4  ;;  %v2239_v45 = vrot.slane %v2237_v38, 4  ;;  %v2242_v43 = vrot.slane %v2240_v39, 5  ;;  %v702_v20 = vld [vmem:[#allocation2 + $0x70] sm:$0xf]  ;;  %12115 = vmatprep.subr.bf16.mxu0 %v12693_v4  ;;  %v388_v31 = vld [vmem:[%s13004_s26 + $0xb8] sm:$0xff] }
  0x60   : > { %v2225_v46 = vsel %vm13103_vm14, %v2220_v63, %v2224_v29  ;;  %v1231_v48 = vsel %vm13040_vm13, %v1229_v17, %v1230_v36  ;;  %v2250_v54 = vshrl.u32 %v2021_v37, 16  ;;  %v2256_v62 = vshll.u32 %v2022_v18, 16  ;;  %v1118_v21 = vld [vmem:[#allocation2 + $0x6c] sm:$0xe]  ;;  %v296_v24 = vld [vmem:[#allocation2 + $0x84] sm:$0x1] }
  0x61   : > { %2536 = vrot.lane.b32.xlu0 %v11582_v40, %s12939_s27  ;;  %v2235_v57 = vsel %vm13103_vm14, %v2230_v44, %v2234_v2  ;;  %v11551_v59 = vcombine.low %v1228_v1, %v1231_v48  ;;  %v2243_v60 = vor.u32 %v2242_v43, %v2239_v45  ;;  %v2248_v8 = vrot.slane %v2246_v49, 5  ;;  %v703_v25 = vld [vmem:[#allocation2 + $0x74] sm:$0x1]  ;;  %v299_v23 = vld [vmem:[#allocation2 + $0x90] sm:$0x1]  ;;  %v389_v44 = vld [vmem:[%s13004_s26 + $0xc0] sm:$0xff] }
  0x62   : > { %v11583_v6 = vcombine.low %v2225_v46, %v2235_v57  ;;  %v2252_v9 = vrot.slane %v2250_v54, 4  ;;  %v11520_v12 = vrot.slane %v1117_v11, 9  ;;  %v2258_v58 = vrot.slane %v2256_v62, 5  ;;  %v13314_v42 = vld [vmem:[#allocation2 + $0x78] sm:$0xe]  ;;  %12116 = vmatpush3.bf16.msra.mxu0 %v12694_v22  ;;  %v390_v45 = vld [vmem:[%s13004_s26 + $0xc8] sm:$0xff] }
  0x63   : > { %1398 = vrot.lane.b32.xlu1 %v11551_v59, %s12939_s27  ;;  %v2244_v53 = vrot.slane %v2243_v60, 4  ;;  %v1234_v5 = vrot.slane %v699_v55, 5  ;;  %v1237_v16 = vrot.slane %v700_v56, 5  ;;  %v542_v29 = vrot.slane %v13232_v13, 4  ;;  %v302_v40 = vld [vmem:[#allocation2 + $0x9c] sm:$0x1] }
  0x64   : > { %v2253_v28 = vor.u32 %v2252_v9, %v2248_v8  ;;  %v543_v30 = vrot.slane %v12058_v61, 7  ;;  %v2261_v26 = vshrl.u32 %v2023_v3, 16  ;;  %v2264_v2 = vshll.u32 %v2023_v3, 16  ;;  %v305_v48 = vld [vmem:[#allocation2 + $0xa8] sm:$0x1]  ;;  %v391_v49 = vld [vmem:[%s13004_s26 + $0xd0] sm:$0xff] }
  0x65   : > { %2538 = vrot.lane.b32.xlu0 %v11583_v6, %s12939_s27  ;;  %v2249_v32 = vsel %vm13103_vm14, %v2244_v53, %v2248_v8  ;;  %v1235_v33 = vsel %vm13040_vm13, %v11520_v12, %v1234_v5  ;;  %v1236_v35 = vrot.slane %v1234_v5, 4  ;;  %v11521_v38 = vrot.slane %v1118_v21, 9  ;;  %v13328_v54 = vld [vmem:[%s13004_s26 + $0xd8] sm:$0xff]  ;;  %v13341_v60 = vld [vmem:[%s13004_s26 + $0xe0] sm:$0xff] }
  0x66   : > { %v2254_v27 = vrot.slane %v2253_v28, 4  ;;  %v544_v13 = vsel %vm13026_vm9, %v542_v29, %v543_v30  ;;  %v545_v10 = vrot.slane %v543_v30, 4  ;;  %v2263_v61 = vrot.slane %v2261_v26, 4  ;;  %v12695_v8 = vld [vmem:[%s16371_s1 + $0x78] sm:$0xff]  }
  0x67   : > { %v1238_v36 = vsel %vm13040_vm13, %v1236_v35, %v1237_v16  ;;  %654 = vst.msk [vmem:[#allocation2 + $0x7c] sm:$0xf] %vm253_vm3, %v544_v13  ;;  %v2266_v37 = vrot.slane %v2264_v2, 5  ;;  %v1241_v39 = vrot.slane %v702_v20, 5  ;;  %v1244_v17 = vrot.slane %v703_v25, 5  ;;  %12117 = vmatprep.subr.bf16.mxu0 %v12695_v8  ;;  %v12696_v16 = vld [vmem:[%s16371_s1 + $0x38] sm:$0xff]  }
  0x68   : > { %v2259_v63 = vsel %vm13103_vm14, %v2254_v27, %v2258_v58  ;;  %v11552_v1 = vcombine.low %v1235_v33, %v1238_v36  ;;  %655 = vst.msk [vmem:[#allocation2 + $0x80] sm:$0x1] %vm263_vm0, %v545_v10  ;;  %v297_v18 = vsel %vm12984_vm2, 0, %v296_v24  ;;  %v546_v55 = vrot.slane %v12059_v15, 7  ;;  %12118 = vmatpush3.bf16.msra.mxu0 %v12696_v16 }
  0x69   : > { %v11584_v43 = vcombine.low %v2249_v32, %v2259_v63  ;;  %v2267_v11 = vor.u32 %v2266_v37, %v2263_v61  ;;  %v1242_v41 = vsel %vm13040_vm13, %v11521_v38, %v1241_v39  ;;  %v1243_v46 = vrot.slane %v1241_v39, 4  ;;  %298 = vst [vmem:[#allocation2 + $0x84] sm:$0x1] %v297_v18 }
  0x6a   : > { %1400 = vrot.lane.b32.xlu1 %v11552_v1, %s12939_s27  ;;  %v548_v56 = vrot.slane %v12060_v19, 7  ;;  %v11522_v57 = vrot.slane %v13314_v42, 9  ;;  %v300_v59 = vsel %vm12984_vm2, 0, %v299_v23  ;;  %v12062_v50 = vpack.c.bf16 %v388_v31, %v388_v31  ;;  %656 = vst.msk [vmem:[#allocation2 + $0x84] sm:$0xe] %vm624_vm7, %v546_v55 }
  0x6b   : > { %2540 = vrot.lane.b32.xlu0 %v11584_v43, %s12939_s27  ;;  %v13344_v62 = vrot.slane %v2267_v11, 4  ;;  %v1245_v3 = vsel %vm13040_vm13, %v1243_v46, %v1244_v17  ;;  %301 = vst [vmem:[#allocation2 + $0x90] sm:$0x1] %v300_v59  ;;  %v551_v52 = vrot.slane %v12061_v14, 7  ;;  %v547_v19 = vrot.slane %v546_v55, 4 }
  0x6c   : > { %v11553_v15 = vcombine.low %v1242_v41, %v1245_v3  ;;  %v550_v4 = vrot.slane %v548_v56, 4  ;;  %v303_v6 = vsel %vm12984_vm2, 0, %v302_v40  ;;  %v553_v12 = vrot.slane %v12062_v50, 7 }
  0x6d   : > { %v552_v9 = vrot.slane %v551_v52, 4  ;;  %659 = vst.msk [vmem:[#allocation2 + $0x90] sm:$0xe] %vm624_vm7, %v551_v52  ;;  %304 = vst [vmem:[#allocation2 + $0x9c] sm:$0x1] %v303_v6  ;;  %v12063_v20 = vpack.c.bf16 %v389_v44, %v389_v44  ;;  %v12064_v7 = vpack.c.bf16 %v390_v45, %v390_v45  ;;  %v549_v21 = vsel %vm13026_vm9, %v547_v19, %v548_v56 }
  0x6e   : > { %v2024_v14 = vld [vmem:[#allocation2 + $0x7c] sm:$0xf]  ;;  %1402 = vrot.lane.b32.xlu1 %v11553_v15, %s12939_s27  ;;  %658 = vst.msk [vmem:[#allocation2 + $0x8c] sm:$0x1] %vm263_vm0, %v550_v4  ;;  %v306_v53 = vsel %vm12984_vm2, 0, %v305_v48  ;;  %v12065_v58 = vpack.c.bf16 %v391_v49, %v391_v49  ;;  %v12066_v5 = vpack.c.bf16 %v13328_v54, %v13328_v54  ;;  %v12067_v32 = vpack.c.bf16 %v13341_v60, %v13341_v60 }
  0x6f   : > { %v705_v22 = vld [vmem:[#allocation2 + $0x7c] sm:$0xf]  ;;  %v2025_v24 = vld [vmem:[#allocation2 + $0x80] sm:$0x1]  ;;  %v2270_v28 = vshll.u32 %v2024_v14, 16  ;;  %v2274_v29 = vshrl.u32 %v2024_v14, 16  ;;  %v554_v26 = vsel %vm13026_vm9, %v552_v9, %v553_v12 }
  0x70   : > { %657 = vst.msk [vmem:[#allocation2 + $0x88] sm:$0xf] %vm253_vm3, %v549_v21  ;;  %v706_v30 = vld [vmem:[#allocation2 + $0x80] sm:$0x1]  ;;  %307 = vst [vmem:[#allocation2 + $0xa8] sm:$0x1] %v306_v53 }
  0x71   : > { %v2280_v33 = vshll.u32 %v2025_v24, 16  ;;  %v1248_v35 = vrot.slane %v705_v22, 5  ;;  %v1251_v2 = vrot.slane %v706_v30, 5  ;;  %v555_v25 = vrot.slane %v553_v12, 4  ;;  %660 = vst.msk [vmem:[#allocation2 + $0x94] sm:$0xf] %vm253_vm3, %v554_v26 }
  0x72   : > { %v2272_v27 = vrot.slane %v2270_v28, 5  ;;  %v2276_v13 = vrot.slane %v2274_v29, 4  ;;  %v556_v10 = vrot.slane %v12063_v20, 7  ;;  %v558_v61 = vrot.slane %v12064_v7, 7  ;;  %v2026_v31 = vld [vmem:[#allocation2 + $0x84] sm:$0xf] }
  0x73   : > { %v2282_v23 = vrot.slane %v2280_v33, 5  ;;  %v1249_v36 = vsel %vm13040_vm13, %v11522_v57, %v1248_v35  ;;  %v1250_v37 = vrot.slane %v1248_v35, 4  ;;  %661 = vst.msk [vmem:[#allocation2 + $0x98] sm:$0x1] %vm263_vm0, %v555_v25  ;;  %v13378_v38 = vrot.slane %v12065_v58, 7 }
  0x74   : > { %v2273_v39 = vsel %vm13103_vm14, %v13344_v62, %v2272_v27  ;;  %v2277_v42 = vor.u32 %v2276_v13, %v2272_v27  ;;  %v1120_v63 = vld [vmem:[#allocation2 + $0x84] sm:$0xe]  ;;  %v557_v1 = vrot.slane %v556_v10, 4  ;;  %v560_v17 = vrot.slane %v558_v61, 4  ;;  %662 = vst.msk [vmem:[#allocation2 + $0x9c] sm:$0xe] %vm624_vm7, %v556_v10 }
  0x75   : > { %v2285_v18 = vshrl.u32 %v2026_v31, 16  ;;  %v2288_v40 = vshll.u32 %v2026_v31, 16  ;;  %v1252_v44 = vsel %vm13040_vm13, %v1250_v37, %v1251_v2  ;;  %v2029_v45 = vld [vmem:[#allocation2 + $0x90] sm:$0xf]  ;;  %v11523_v43 = vrot.slane %v1120_v63, 9 }
  0x76   : > { %665 = vst.msk [vmem:[#allocation2 + $0xa8] sm:$0xe] %vm624_vm7, %v13378_v38  ;;  %v2278_v11 = vrot.slane %v2277_v42, 4  ;;  %v2028_v41 = vld [vmem:[#allocation2 + $0x8c] sm:$0x1]  ;;  %v11554_v46 = vcombine.low %v1249_v36, %v1252_v44  ;;  %v2309_v48 = vshrl.u32 %v2029_v45, 16  ;;  %v559_v62 = vsel %vm13026_vm9, %v557_v1, %v558_v61 }
  0x77   : > { %v2312_v49 = vshll.u32 %v2029_v45, 16  ;;  %664 = vst.msk [vmem:[#allocation2 + $0xa4] sm:$0x1] %vm263_vm0, %v560_v17  ;;  %v2027_v55 = vld [vmem:[#allocation2 + $0x88] sm:$0xf]  ;;  %v2287_v56 = vrot.slane %v2285_v18, 4 }
  0x78   : > { %v2290_v57 = vrot.slane %v2288_v40, 5  ;;  %v2304_v59 = vshll.u32 %v2028_v41, 16  ;;  %v2283_v3 = vsel %vm13103_vm14, %v2278_v11, %v2282_v23  ;;  %v2294_v50 = vshll.u32 %v2027_v55, 16  ;;  %1404 = vrot.lane.b32.xlu1 %v11554_v46, %s12939_s27  ;;  %v2030_v15 = vld [vmem:[#allocation2 + $0x94] sm:$0xf]  ;;  %v12697_v40 = vld [vmem:[%s16371_s1 + $0x100] sm:$0xff]  }
  0x79   : > { %v2298_v52 = vshrl.u32 %v2027_v55, 16  ;;  %v2311_v19 = vrot.slane %v2309_v48, 4  ;;  %663 = vst.msk [vmem:[#allocation2 + $0xa0] sm:$0xf] %vm253_vm3, %v559_v62  ;;  %v11585_v4 = vcombine.low %v2273_v39, %v2283_v3  ;;  %v2314_v9 = vrot.slane %v2312_v49, 5  ;;  %12591 = vmatprep.subr.bf16.mxu0 %v12697_v40 }
  0x7a   : > { %v2291_v6 = vor.u32 %v2290_v57, %v2287_v56  ;;  %v2306_v8 = vrot.slane %v2304_v59, 5  ;;  %v708_v12 = vld [vmem:[#allocation2 + $0x88] sm:$0xf]  ;;  %v709_v20 = vld [vmem:[#allocation2 + $0x8c] sm:$0x1]  ;;  %v2296_v7 = vrot.slane %v2294_v50, 5 }
  0x7b   : > { %v2300_v14 = vrot.slane %v2298_v52, 4  ;;  %v2031_v21 = vld [vmem:[#allocation2 + $0x98] sm:$0x1]  ;;  %v2318_v22 = vshll.u32 %v2030_v15, 16  ;;  %v2322_v53 = vshrl.u32 %v2030_v15, 16  ;;  %2542 = vrot.lane.b32.xlu0 %v11585_v4, %s12939_s27  ;;  %v2315_v16 = vor.u32 %v2314_v9, %v2311_v19 }
  0x7c   : > { %v2292_v58 = vrot.slane %v2291_v6, 4  ;;  %v2328_v24 = vshll.u32 %v2031_v21, 16  ;;  %v1255_v28 = vrot.slane %v708_v12, 5  ;;  %v2032_v29 = vld [vmem:[#allocation2 + $0x9c] sm:$0xf]  ;;  %v1258_v35 = vrot.slane %v709_v20, 5 }
  0x7d   : > { %v2301_v30 = vor.u32 %v2300_v14, %v2296_v7  ;;  %v2320_v26 = vrot.slane %v2318_v22, 5  ;;  %v2324_v33 = vrot.slane %v2322_v53, 4  ;;  %v2316_v25 = vrot.slane %v2315_v16, 4  ;;  %v711_v61 = vld [vmem:[#allocation2 + $0x94] sm:$0xf]  ;;  %v394_v14 = vld [vmem:[%s13004_s26 + $0xe8] sm:$0xff] }
  0x7e   : > { %v2297_v2 = vsel %vm13103_vm14, %v2292_v58, %v2296_v7  ;;  %v2330_v27 = vrot.slane %v2328_v24, 5  ;;  %v1256_v13 = vsel %vm13040_vm13, %v11523_v43, %v1255_v28  ;;  %v2034_v10 = vld [vmem:[#allocation2 + $0xa4] sm:$0x1]  ;;  %v1257_v37 = vrot.slane %v1255_v28, 4  ;;  %v1121_v42 = vld [vmem:[#allocation2 + $0x90] sm:$0xe] }
  0x7f   : > { %v2302_v23 = vrot.slane %v2301_v30, 4  ;;  %v2325_v36 = vor.u32 %v2324_v33, %v2320_v26  ;;  %v2333_v39 = vshrl.u32 %v2032_v29, 16  ;;  %v2321_v31 = vsel %vm13103_vm14, %v2316_v25, %v2320_v26  ;;  %v712_v41 = vld [vmem:[#allocation2 + $0x98] sm:$0x1]  ;;  %v2035_v3 = vld [vmem:[#allocation2 + $0xa8] sm:$0xf] }
  0x80   : > { %v2033_v63 = vld [vmem:[#allocation2 + $0xa0] sm:$0xf]  ;;  %v2336_v1 = vshll.u32 %v2032_v29, 16  ;;  %v2352_v17 = vshll.u32 %v2034_v10, 16  ;;  %v11524_v18 = vrot.slane %v1121_v42, 9  ;;  %v1259_v43 = vsel %vm13040_vm13, %v1257_v37, %v1258_v35  ;;  %v395_v37 = vld [vmem:[%s13004_s26 + $0xf0] sm:$0xff] }
  0x81   : > { %v2307_v44 = vsel %vm13103_vm14, %v2302_v23, %v2306_v8  ;;  %v2326_v45 = vrot.slane %v2325_v36, 4  ;;  %v2335_v11 = vrot.slane %v2333_v39, 4  ;;  %vm314_vm15 = vcmask 517121   ;;  %v714_v4 = vld [vmem:[#allocation2 + $0xa0] sm:$0xf] }
  0x82   : > { %vm315_vm1 = vsmask.f32 1280  ;;  %v11586_v46 = vcombine.low %v2297_v2, %v2307_v44  ;;  %v11555_v48 = vcombine.low %v1256_v13, %v1259_v43  ;;  %v2338_v49 = vrot.slane %v2336_v1, 5  ;;  %v1122_v6 = vld [vmem:[#allocation2 + $0x9c] sm:$0xe] }
  0x83   : > { %v2342_v55 = vshll.u32 %v2033_v63, 16  ;;  %v2331_v56 = vsel %vm13103_vm14, %v2326_v45, %v2330_v27  ;;  %v2346_v57 = vshrl.u32 %v2033_v63, 16  ;;  %v2354_v59 = vrot.slane %v2352_v17, 5  ;;  %v308_v7 = vld [vmem:[#allocation2 + $0xb4] sm:$0x1]  ;;  %v396_v63 = vld [vmem:[%s13004_s26 + $0xf8] sm:$0xff]  ;;  %vm13447_vm4 = vmand %vm314_vm15, %vm315_vm1 }
  0x84   : > { %v1262_v62 = vrot.slane %v711_v61, 5  ;;  %2544 = vrot.lane.b32.xlu0 %v11586_v46, %s12939_s27  ;;  %v11587_v50 = vcombine.low %v2321_v31, %v2331_v56  ;;  %1406 = vrot.lane.b32.xlu1 %v11555_v48, %s12939_s27  ;;  %v2339_v52 = vor.u32 %v2338_v49, %v2335_v11  ;;  %v1265_v19 = vrot.slane %v712_v41, 5  ;;  %v715_v16 = vld [vmem:[#allocation2 + $0xa4] sm:$0x1]  ;;  %v311_v26 = vld [vmem:[#allocation2 + $0xc0] sm:$0x1] }
  0x85   : > { %v2344_v15 = vrot.slane %v2342_v55, 5  ;;  %v2348_v8 = vrot.slane %v2346_v57, 4  ;;  %v562_v20 = vrot.slane %v13378_v38, 4  ;;  %v563_v22 = vrot.slane %v12066_v5, 7  ;;  %v1123_v13 = vld [vmem:[#allocation2 + $0xa8] sm:$0xe] }
  0x86   : > { %v1263_v9 = vsel %vm13040_vm13, %v11524_v18, %v1262_v62  ;;  %v1264_v12 = vrot.slane %v1262_v62, 4  ;;  %v2340_v21 = vrot.slane %v2339_v52, 4  ;;  %v2357_v53 = vshrl.u32 %v2035_v3, 16  ;;  %v3949_v44 = vld [vmem:[#allocation2 + $0x18] sm:$0xe] }
  0x87   : > { %v2360_v58 = vshll.u32 %v2035_v3, 16  ;;  %v2349_v24 = vor.u32 %v2348_v8, %v2344_v15  ;;  %v11525_v29 = vrot.slane %v1122_v6, 9  ;;  %v1269_v30 = vrot.slane %v714_v4, 5  ;;  %v317_v43 = vld [vmem:[#allocation2 + $0x14] sm:$0x2] }
  0x88   : > { %v1266_v28 = vsel %vm13040_vm13, %v1264_v12, %v1265_v19  ;;  %2546 = vrot.lane.b32.xlu0 %v11587_v50, %s12939_s27  ;;  %v2345_v38 = vsel %vm13103_vm14, %v2340_v21, %v2344_v15  ;;  %v564_v54 = vsel %vm13026_vm9, %v562_v20, %v563_v22  ;;  %v565_v5 = vrot.slane %v563_v22, 4  ;;  %v3518_v41 = vld [vmem:[#allocation2 + $0x1c] sm:$0xf]  ;;  %v3519_v57 = vld [vmem:[#allocation2 + $0x20] sm:$0x1] }
  0x89   : > { %v11556_v33 = vcombine.low %v1263_v9, %v1266_v28  ;;  %v2350_v35 = vrot.slane %v2349_v24, 4  ;;  %666 = vst.msk [vmem:[#allocation2 + $0xac] sm:$0xf] %vm253_vm3, %v564_v54  ;;  %v2359_v2 = vrot.slane %v2357_v53, 4  ;;  %v2362_v25 = vrot.slane %v2360_v58, 5 }
  0x8a   : > { %v1270_v27 = vsel %vm13040_vm13, %v11525_v29, %v1269_v30  ;;  %667 = vst.msk [vmem:[#allocation2 + $0xb0] sm:$0x1] %vm263_vm0, %v565_v5  ;;  %v1271_v10 = vrot.slane %v1269_v30, 4  ;;  %v1272_v61 = vrot.slane %v715_v16, 5  ;;  %v309_v23 = vsel %vm12984_vm2, 0, %v308_v7 }
  0x8b   : > { %1408 = vrot.lane.b32.xlu1 %v11556_v33, %s12939_s27  ;;  %v12068_v36 = vpack.c.bf16 %v394_v14, %v394_v14  ;;  %v2355_v39 = vsel %vm13103_vm14, %v2350_v35, %v2354_v59  ;;  %v2363_v42 = vor.u32 %v2362_v25, %v2359_v2  ;;  %310 = vst [vmem:[#allocation2 + $0xb4] sm:$0x1] %v309_v23  ;;  %v566_v31 = vrot.slane %v12067_v32, 7  ;;  %v13469_v5 = vld [vmem:[#allocation2 + $0x4] sm:$0xf] }
  0x8c   : > { %v11588_v1 = vcombine.low %v2345_v38, %v2355_v39  ;;  %v1273_v17 = vsel %vm13040_vm13, %v1271_v10, %v1272_v61  ;;  %v312_v40 = vsel %vm12984_vm2, 0, %v311_v26  ;;  %v12069_v32 = vpack.c.bf16 %v395_v37, %v395_v37 }
  0x8d   : > { %v568_v18 = vrot.slane %v12068_v36, 7  ;;  %v11557_v11 = vcombine.low %v1270_v27, %v1273_v17  ;;  %v567_v60 = vrot.slane %v566_v31, 4  ;;  %668 = vst.msk [vmem:[#allocation2 + $0xb4] sm:$0xe] %vm624_vm7, %v566_v31  ;;  %313 = vst [vmem:[#allocation2 + $0xc0] sm:$0x1] %v312_v40  ;;  %v12070_v49 = vpack.c.bf16 %v396_v63, %v396_v63 }
  0x8e   : > { %2548 = vrot.lane.b32.xlu0 %v11588_v1, %s12939_s27  ;;  %v13453_v46 = vrot.slane %v2363_v42, 4  ;;  %v11526_v48 = vrot.slane %v1123_v13, 9  ;;  %v571_v56 = vrot.slane %v12069_v32, 7  ;;  %v11640_v59 = vrot.slane %v3949_v44, 9 }
  0x8f   : > { %v570_v0 = vrot.slane %v568_v18, 4  ;;  %1410 = vrot.lane.b32.xlu1 %v11557_v11, %s12939_s27  ;;  %v569_v55 = vsel %vm13026_vm9, %v567_v60, %v568_v18  ;;  %v318_v62 = vsel %vm13447_vm4, 0, %v317_v43  ;;  %v573_v52 = vrot.slane %v12070_v49, 7 }
  0x90   : > { %v2036_v3 = vld [vmem:[#allocation2 + $0xac] sm:$0xf]  ;;  %669 = vst.msk [vmem:[#allocation2 + $0xb8] sm:$0xf] %vm253_vm3, %v569_v55  ;;  %v4015_v15 = vrot.slane %v3518_v41, 5  ;;  %v572_v7 = vrot.slane %v571_v56, 4 }
  0x91   : > { %670 = vst.msk [vmem:[#allocation2 + $0xbc] sm:$0x1] %vm263_vm0, %v570_v0  ;;  %v717_v50 = vld [vmem:[#allocation2 + $0xac] sm:$0xf]  ;;  %319 = vst [vmem:[#allocation2 + $0x14] sm:$0x2] %v318_v62 }
  0x92   : > { %v2037_v19 = vld [vmem:[#allocation2 + $0xb0] sm:$0x1]  ;;  %v2366_v4 = vshll.u32 %v2036_v3, 16  ;;  %v2370_v6 = vshrl.u32 %v2036_v3, 16  ;;  %671 = vst.msk [vmem:[#allocation2 + $0xc0] sm:$0xe] %vm624_vm7, %v571_v56  ;;  %v574_v28 = vsel %vm13026_vm9, %v572_v7, %v573_v52  ;;  %v13476_v27 = vsel %vm13040_vm13, %v11640_v59, %v4015_v15 }
  0x93   : > { %v718_v8 = vld [vmem:[#allocation2 + $0xb0] sm:$0x1]  ;;  %v2376_v9 = vshll.u32 %v2037_v19, 16  ;;  %v1276_v12 = vrot.slane %v717_v50, 5  ;;  %v575_v22 = vrot.slane %v573_v52, 4  ;;  %v4018_v53 = vrot.slane %v3519_v57, 5 }
  0x94   : > { %v1279_v20 = vrot.slane %v718_v8, 5  ;;  %v2368_v14 = vrot.slane %v2366_v4, 5  ;;  %v2372_v21 = vrot.slane %v2370_v6, 4  ;;  %v2038_v58 = vld [vmem:[#allocation2 + $0xb4] sm:$0xf]  ;;  %v4017_v30 = vrot.slane %v4015_v15, 4 }
  0x95   : > { %v1277_v16 = vsel %vm13040_vm13, %v11526_v48, %v1276_v12  ;;  %v1278_v24 = vrot.slane %v1276_v12, 4  ;;  %v1124_v29 = vld [vmem:[#allocation2 + $0xb4] sm:$0xe]  ;;  %v2378_v38 = vrot.slane %v2376_v9, 5  ;;  %v2381_v33 = vshrl.u32 %v2038_v58, 16 }
  0x96   : > { %v2373_v26 = vor.u32 %v2372_v21, %v2368_v14  ;;  %v2384_v54 = vshll.u32 %v2038_v58, 16  ;;  %672 = vst.msk [vmem:[#allocation2 + $0xc4] sm:$0xf] %vm253_vm3, %v574_v28  ;;  %v739_v35 = vshrl.u32 %v13469_v5, 16  ;;  %v11527_v25 = vrot.slane %v1124_v29, 9 }
  0x97   : > { %673 = vst.msk [vmem:[#allocation2 + $0xc8] sm:$0x1] %vm263_vm0, %v575_v22  ;;  %v1280_v2 = vsel %vm13040_vm13, %v1278_v24, %v1279_v20  ;;  %v2369_v13 = vsel %vm13103_vm14, %v13453_v46, %v2368_v14  ;;  %v2039_v61 = vld [vmem:[#allocation2 + $0xb8] sm:$0xf]  ;;  %v2383_v36 = vrot.slane %v2381_v33, 4  ;;  %v13486_v11 = vsel %vm13040_vm13, %v4017_v30, %v4018_v53 }
  0x98   : > { %v2374_v10 = vrot.slane %v2373_v26, 4  ;;  %v2040_v23 = vld [vmem:[#allocation2 + $0xbc] sm:$0x1]  ;;  %v11558_v37 = vcombine.low %v1277_v16, %v1280_v2  ;;  %v2386_v39 = vrot.slane %v2384_v54, 5  ;;  %v2390_v42 = vshll.u32 %v2039_v61, 16 }
  0x99   : > { %v2394_v31 = vshrl.u32 %v2039_v61, 16  ;;  %v2400_v63 = vshll.u32 %v2040_v23, 16  ;;  %v2041_v1 = vld [vmem:[#allocation2 + $0xc0] sm:$0xf]  ;;  %v720_v44 = vld [vmem:[#allocation2 + $0xb8] sm:$0xf]  ;;  %v11672_v52 = vcombine.low %v13476_v27, %v13486_v11 }
  0x9a   : > { %v2379_v17 = vsel %vm13103_vm14, %v2374_v10, %v2378_v38  ;;  %1412 = vrot.lane.b32.xlu1 %v11558_v37, %s12939_s27  ;;  %v2405_v18 = vshrl.u32 %v2041_v1, 16  ;;  %v2408_v40 = vshll.u32 %v2041_v1, 16  ;;  %v721_v43 = vld [vmem:[#allocation2 + $0xbc] sm:$0x1]  ;;  %v2387_v32 = vor.u32 %v2386_v39, %v2383_v36  ;;  %v2636_v56 = vld [vmem:[#allocation2 + $0xc] sm:$0xe] }
  0x9b   : > { %v11589_v60 = vcombine.low %v2369_v13, %v2379_v17  ;;  %v2392_v41 = vrot.slane %v2390_v42, 5  ;;  %v2396_v46 = vrot.slane %v2394_v31, 4  ;;  %v2402_v0 = vrot.slane %v2400_v63, 5  ;;  %v2637_v8 = vld [vmem:[#allocation2 + $0x10] sm:$0xf] }
  0x9c   : > { %v2407_v48 = vrot.slane %v2405_v18, 4  ;;  %v2410_v49 = vrot.slane %v2408_v40, 5  ;;  %v1283_v55 = vrot.slane %v720_v44, 5  ;;  %v2388_v57 = vrot.slane %v2387_v32, 4  ;;  %v3950_v14 = vld [vmem:[#allocation2 + $0x24] sm:$0xe] }
  0x9d   : > { %2550 = vrot.lane.b32.xlu0 %v11589_v60, %s12939_s27  ;;  %v2397_v59 = vor.u32 %v2396_v46, %v2392_v41  ;;  %v2042_v62 = vld [vmem:[#allocation2 + $0xc4] sm:$0xf]  ;;  %v1286_v50 = vrot.slane %v721_v43, 5  ;;  %vm1545_vm2 = vsmask.f32 2304  ;;  %v2861_v29 = vshrl.u32 %v2636_v56, 16 }
  0x9e   : > { %v2043_v3 = vld [vmem:[#allocation2 + $0xc8] sm:$0x1]  ;;  %v2411_v15 = vor.u32 %v2410_v49, %v2407_v48  ;;  %v2414_v19 = vshll.u32 %v2042_v62, 16  ;;  %v2418_v4 = vshrl.u32 %v2042_v62, 16  ;;  %v2393_v9 = vsel %vm13103_vm14, %v2388_v57, %v2392_v41  ;;  %v2844_v16 = vld [vmem:[#allocation2 + $0x14] sm:$0x3] }
  0x9f   : > { %v2424_v6 = vshll.u32 %v2043_v3, 16  ;;  %v2398_v12 = vrot.slane %v2397_v59, 4  ;;  %v1284_v20 = vsel %vm13040_vm13, %v11527_v25, %v1283_v55  ;;  %v1285_v7 = vrot.slane %v1283_v55, 4  ;;  %v3521_v54 = vld [vmem:[#allocation2 + $0x28] sm:$0xf] }
  0xa0   : > { %v2412_v21 = vrot.slane %v2411_v15, 4  ;;  %v2416_v22 = vrot.slane %v2414_v19, 5  ;;  %v2420_v53 = vrot.slane %v2418_v4, 4  ;;  %vm1546_vm5 = vsmask.f32 6416 }
  0xa1   : > { %v2426_v58 = vrot.slane %v2424_v6, 5  ;;  %v2403_v24 = vsel %vm13103_vm14, %v2398_v12, %v2402_v0  ;;  %v1287_v28 = vsel %vm13040_vm13, %v1285_v7, %v1286_v50  ;;  %v3522_v2 = vld [vmem:[#allocation2 + $0x2c] sm:$0x1]  ;;  %v2863_v25 = vrot.slane %v2861_v29, 5  ;;  %v320_v23 = vld [vmem:[#allocation2 + $0x20] sm:$0x2]  ;;  %vm13509_vm6 = vmor %vm1545_vm2, %vm1546_vm5 }
  0xa2   : > { %v11590_v30 = vcombine.low %v2393_v9, %v2403_v24  ;;  %v2417_v26 = vsel %vm13103_vm14, %v2412_v21, %v2416_v22  ;;  %v2421_v38 = vor.u32 %v2420_v53, %v2416_v22  ;;  %v11559_v33 = vcombine.low %v1284_v20, %v1287_v28  ;;  %v2639_v18 = vld [vmem:[#allocation2 + $0x18] sm:$0xe]  ;;  %v2640_v32 = vld [vmem:[#allocation2 + $0x1c] sm:$0xf]  ;;  %v3524_v49 = vld [vmem:[#allocation2 + $0x34] sm:$0xf] }
  0xa3   : > { %v2864_v13 = vshll.u32 %v2636_v56, 16  ;;  %v2870_v10 = vshrl.u32 %v2637_v8, 16  ;;  %v2873_v61 = vshll.u32 %v2637_v8, 16  ;;  %v2880_v37 = vshrl.u32 %v2844_v16, 16  ;;  %v3951_v55 = vld [vmem:[#allocation2 + $0x30] sm:$0xe] }
  0xa4   : > { %2552 = vrot.lane.b32.xlu0 %v11590_v30, %s12939_s27  ;;  %v2422_v36 = vrot.slane %v2421_v38, 4  ;;  %1414 = vrot.lane.b32.xlu1 %v11559_v33, %s12939_s27  ;;  %v2883_v39 = vshll.u32 %v2844_v16, 16  ;;  %v11641_v42 = vrot.slane %v3950_v14, 9  ;;  %v4022_v17 = vrot.slane %v3521_v54, 5  ;;  %v3525_v50 = vld [vmem:[#allocation2 + $0x38] sm:$0x1] }
  0xa5   : > { %v2866_v31 = vrot.slane %v2864_v13, 6  ;;  %v2872_v63 = vrot.slane %v2870_v10, 5  ;;  %v2875_v1 = vrot.slane %v2873_v61, 6  ;;  %v2882_v44 = vrot.slane %v2880_v37, 5  ;;  %v323_v15 = vld [vmem:[#allocation2 + $0x2c] sm:$0x2] }
  0xa6   : > { %v2427_v40 = vsel %vm13103_vm14, %v2422_v36, %v2426_v58  ;;  %v2885_v43 = vrot.slane %v2883_v39, 6  ;;  %v4025_v60 = vrot.slane %v3522_v2, 5  ;;  %v4023_v48 = vsel %vm13040_vm13, %v11641_v42, %v4022_v17  ;;  %v2642_v9 = vld [vmem:[#allocation2 + $0x24] sm:$0xe]  ;;  %v2643_v21 = vld [vmem:[#allocation2 + $0x28] sm:$0xf] }
  0xa7   : > { %v11591_v41 = vcombine.low %v2417_v26, %v2427_v40  ;;  %v2867_v46 = vor.u32 %v2866_v31, %v2863_v25  ;;  %v2876_v0 = vor.u32 %v2875_v1, %v2872_v63  ;;  %v4024_v59 = vrot.slane %v4022_v17, 4  ;;  %v3952_v26 = vld [vmem:[#allocation2 + $0x3c] sm:$0xe]  ;;  %v3527_v25 = vld [vmem:[#allocation2 + $0x40] sm:$0xf] }
  0xa8   : > { %v2886_v57 = vor.u32 %v2885_v43, %v2882_v44  ;;  %v321_v62 = vsel %vm13447_vm4, 0, %v320_v23  ;;  %v2889_v3 = vshrl.u32 %v2639_v18, 16  ;;  %v2892_v6 = vshll.u32 %v2639_v18, 16  ;;  %v3528_v36 = vld [vmem:[#allocation2 + $0x44] sm:$0x1] }
  0xa9   : > { %2554 = vrot.lane.b32.xlu0 %v11591_v41, %s12939_s27  ;;  %v2868_v19 = vrot.slane %v2867_v46, 4  ;;  %v2878_v4 = vrot.slane %v2876_v0, 4  ;;  %322 = vst [vmem:[#allocation2 + $0x20] sm:$0x2] %v321_v62  ;;  %v2898_v8 = vshrl.u32 %v2640_v32, 16  ;;  %v4026_v12 = vsel %vm13040_vm13, %v4024_v59, %v4025_v60 }
  0xaa   : > { %v2891_v20 = vrot.slane %v2889_v3, 5  ;;  %v2901_v7 = vshll.u32 %v2640_v32, 16  ;;  %v11642_v14 = vrot.slane %v3951_v55, 9  ;;  %v11673_v58 = vcombine.low %v4023_v48, %v4026_v12  ;;  %v326_v39 = vld [vmem:[#allocation2 + $0x38] sm:$0x2] }
  0xab   : > { %v2877_v22 = vsel %vm13509_vm6, %v2868_v19, %v2876_v0  ;;  %v2887_v53 = vsel %vm13509_vm6, %v2878_v4, %v2886_v57  ;;  %v2894_v16 = vrot.slane %v2892_v6, 6  ;;  %v2900_v28 = vrot.slane %v2898_v8, 5  ;;  %v2645_v18 = vld [vmem:[#allocation2 + $0x30] sm:$0xe]  ;;  %v2646_v32 = vld [vmem:[#allocation2 + $0x34] sm:$0xf] }
  0xac   : > { %v11624_v24 = vcombine.low %v2877_v22, %v2887_v53  ;;  %v2903_v29 = vrot.slane %v2901_v7, 6  ;;  %v4029_v30 = vrot.slane %v3524_v49, 5  ;;  %v4032_v33 = vrot.slane %v3525_v50, 5  ;;  %v3530_v12 = vld [vmem:[#allocation2 + $0x4c] sm:$0xf] }
  0xad   : > { %4221 = vrot.lane.b32.xlu0 %v11672_v52, %s12939_s27  ;;  %v2895_v38 = vor.u32 %v2894_v16, %v2891_v20  ;;  %v324_v54 = vsel %vm13447_vm4, 0, %v323_v15  ;;  %v2917_v2 = vshrl.u32 %v2642_v9, 16  ;;  %v2920_v23 = vshll.u32 %v2642_v9, 16  ;;  %v3953_v22 = vld [vmem:[#allocation2 + $0x48] sm:$0xe] }
  0xae   : > { %3404 = vrot.lane.b32.xlu1 %v11624_v24, %s12939_s27  ;;  %v2904_v13 = vor.u32 %v2903_v29, %v2900_v28  ;;  %v4030_v10 = vsel %vm13040_vm13, %v11642_v14, %v4029_v30  ;;  %v4031_v61 = vrot.slane %v4029_v30, 4  ;;  %325 = vst [vmem:[#allocation2 + $0x2c] sm:$0x2] %v324_v54  ;;  %v2926_v11 = vshrl.u32 %v2643_v21, 16  ;;  %v3531_v28 = vld [vmem:[#allocation2 + $0x50] sm:$0x1] }
  0xaf   : > { %v2896_v37 = vrot.slane %v2895_v38, 4  ;;  %v2919_v27 = vrot.slane %v2917_v2, 5  ;;  %v2929_v52 = vshll.u32 %v2643_v21, 16  ;;  %v2922_v1 = vrot.slane %v2920_v23, 6  ;;  %v329_v29 = vld [vmem:[#allocation2 + $0x44] sm:$0x2] }
  0xb0   : > { %v2845_v42 = vld [vmem:[#allocation2 + $0x20] sm:$0x3]  ;;  %v2906_v31 = vrot.slane %v2904_v13, 4  ;;  %v4033_v63 = vsel %vm13040_vm13, %v4031_v61, %v4032_v33  ;;  %v11643_v17 = vrot.slane %v3952_v26, 9  ;;  %v2928_v46 = vrot.slane %v2926_v11, 5 }
  0xb1   : > { %4223 = vrot.lane.b32.xlu0 %v11673_v58, %s12939_s27  ;;  %v2905_v40 = vsel %vm13509_vm6, %v2896_v37, %v2904_v13  ;;  %v2908_v44 = vshrl.u32 %v2845_v42, 16  ;;  %v2911_v43 = vshll.u32 %v2845_v42, 16  ;;  %v11674_v60 = vcombine.low %v4030_v10, %v4033_v63  ;;  %v2648_v54 = vld [vmem:[#allocation2 + $0x3c] sm:$0xe] }
  0xb2   : > { %v2923_v41 = vor.u32 %v2922_v1, %v2919_v27  ;;  %v2931_v0 = vrot.slane %v2929_v52, 6  ;;  %v4036_v48 = vrot.slane %v3527_v25, 5  ;;  %v4039_v57 = vrot.slane %v3528_v36, 5  ;;  %v2649_v27 = vld [vmem:[#allocation2 + $0x40] sm:$0xf] }
  0xb3   : > { %v2910_v49 = vrot.slane %v2908_v44, 5  ;;  %v2913_v55 = vrot.slane %v2911_v43, 6  ;;  %v327_v59 = vsel %vm13447_vm4, 0, %v326_v39  ;;  %v2945_v6 = vshrl.u32 %v2645_v18, 16 }
  0xb4   : > { %v2924_v62 = vrot.slane %v2923_v41, 4  ;;  %v2932_v3 = vor.u32 %v2931_v0, %v2928_v46  ;;  %v4037_v50 = vsel %vm13040_vm13, %v11643_v17, %v4036_v48  ;;  %v4038_v15 = vrot.slane %v4036_v48, 4  ;;  %328 = vst [vmem:[#allocation2 + $0x38] sm:$0x2] %v327_v59  ;;  %v3534_v41 = vld [vmem:[#allocation2 + $0x5c] sm:$0x1] }
  0xb5   : > { %v2914_v19 = vor.u32 %v2913_v55, %v2910_v49  ;;  %4225 = vrot.lane.b32.xlu0 %v11674_v60, %s12939_s27  ;;  %v2846_v4 = vld [vmem:[#allocation2 + $0x2c] sm:$0x3]  ;;  %v2948_v8 = vshll.u32 %v2645_v18, 16  ;;  %v2954_v9 = vshrl.u32 %v2646_v32, 16  ;;  %v2947_v16 = vrot.slane %v2945_v6, 5 }
  0xb6   : > { %v2933_v20 = vsel %vm13509_vm6, %v2924_v62, %v2932_v3  ;;  %v2934_v7 = vrot.slane %v2932_v3, 4  ;;  %v2936_v14 = vshrl.u32 %v2846_v4, 16  ;;  %v2939_v21 = vshll.u32 %v2846_v4, 16  ;;  %v3954_v55 = vld [vmem:[#allocation2 + $0x54] sm:$0xe] }
  0xb7   : > { %v2915_v53 = vsel %vm13509_vm6, %v2906_v31, %v2914_v19  ;;  %v4040_v58 = vsel %vm13040_vm13, %v4038_v15, %v4039_v57  ;;  %v2950_v24 = vrot.slane %v2948_v8, 6  ;;  %v2956_v25 = vrot.slane %v2954_v9, 5  ;;  %v2651_v15 = vld [vmem:[#allocation2 + $0x48] sm:$0xe] }
  0xb8   : > { %v11625_v30 = vcombine.low %v2905_v40, %v2915_v53  ;;  %v2938_v26 = vrot.slane %v2936_v14, 5  ;;  %v2941_v38 = vrot.slane %v2939_v21, 6  ;;  %v11675_v33 = vcombine.low %v4037_v50, %v4040_v58  ;;  %v332_v50 = vld [vmem:[#allocation2 + $0x50] sm:$0x2] }
  0xb9   : > { %v2951_v2 = vor.u32 %v2950_v24, %v2947_v16  ;;  %v2957_v13 = vshll.u32 %v2646_v32, 16  ;;  %v11644_v10 = vrot.slane %v3953_v22, 9  ;;  %v4043_v23 = vrot.slane %v3530_v12, 5  ;;  %v3533_v32 = vld [vmem:[#allocation2 + $0x58] sm:$0xf] }
  0xba   : > { %3406 = vrot.lane.b32.xlu1 %v11625_v30, %s12939_s27  ;;  %v2942_v61 = vor.u32 %v2941_v38, %v2938_v26  ;;  %4227 = vrot.lane.b32.xlu0 %v11675_v33, %s12939_s27  ;;  %v4046_v36 = vrot.slane %v3531_v28, 5  ;;  %v330_v37 = vsel %vm13447_vm4, 0, %v329_v29  ;;  %v2973_v42 = vshrl.u32 %v2648_v54, 16  ;;  %v2652_v30 = vld [vmem:[#allocation2 + $0x4c] sm:$0xf] }
  0xbb   : > { %v2847_v11 = vld [vmem:[#allocation2 + $0x38] sm:$0x3]  ;;  %v2952_v52 = vrot.slane %v2951_v2, 4  ;;  %v2959_v39 = vrot.slane %v2957_v13, 6  ;;  %331 = vst [vmem:[#allocation2 + $0x44] sm:$0x2] %v330_v37  ;;  %v4044_v18 = vsel %vm13040_vm13, %v11644_v10, %v4043_v23 }
  0xbc   : > { %v2976_v31 = vshll.u32 %v2648_v54, 16  ;;  %v2943_v63 = vsel %vm13509_vm6, %v2934_v7, %v2942_v61  ;;  %v2964_v1 = vshrl.u32 %v2847_v11, 16  ;;  %v2967_v17 = vshll.u32 %v2847_v11, 16  ;;  %v3536_v26 = vld [vmem:[#allocation2 + $0x64] sm:$0xf] }
  0xbd   : > { %v11626_v40 = vcombine.low %v2933_v20, %v2943_v63  ;;  %v2960_v44 = vor.u32 %v2959_v39, %v2956_v25  ;;  %v4045_v43 = vrot.slane %v4043_v23, 4  ;;  %v2975_v60 = vrot.slane %v2973_v42, 5  ;;  %v3955_v25 = vld [vmem:[#allocation2 + $0x60] sm:$0xe]  ;;  %v335_v39 = vld [vmem:[#allocation2 + $0x5c] sm:$0x2] }
  0xbe   : > { %v2966_v46 = vrot.slane %v2964_v1, 5  ;;  %v2969_v0 = vrot.slane %v2967_v17, 6  ;;  %v2978_v48 = vrot.slane %v2976_v31, 6  ;;  %v2982_v49 = vshrl.u32 %v2649_v27, 16  ;;  %v2654_v17 = vld [vmem:[#allocation2 + $0x54] sm:$0xe] }
  0xbf   : > { %3408 = vrot.lane.b32.xlu1 %v11626_v40, %s12939_s27  ;;  %v2961_v57 = vsel %vm13509_vm6, %v2952_v52, %v2960_v44  ;;  %v2962_v59 = vrot.slane %v2960_v44, 4  ;;  %v4047_v62 = vsel %vm13040_vm13, %v4045_v43, %v4046_v36  ;;  %v2985_v3 = vshll.u32 %v2649_v27, 16  ;;  %v3537_v36 = vld [vmem:[#allocation2 + $0x68] sm:$0x1] }
  0xc0   : > { %v2970_v19 = vor.u32 %v2969_v0, %v2966_v46  ;;  %v11676_v4 = vcombine.low %v4044_v18, %v4047_v62  ;;  %v2979_v6 = vor.u32 %v2978_v48, %v2975_v60  ;;  %v2984_v8 = vrot.slane %v2982_v49, 5 }
  0xc1   : > { %v2987_v9 = vrot.slane %v2985_v3, 6  ;;  %v11645_v12 = vrot.slane %v3954_v55, 9  ;;  %v4050_v20 = vrot.slane %v3533_v32, 5  ;;  %v4053_v7 = vrot.slane %v3534_v41, 5 }
  0xc2   : > { %v2971_v14 = vsel %vm13509_vm6, %v2962_v59, %v2970_v19  ;;  %4229 = vrot.lane.b32.xlu0 %v11676_v4, %s12939_s27  ;;  %v2848_v21 = vld [vmem:[#allocation2 + $0x44] sm:$0x3]  ;;  %v2980_v22 = vrot.slane %v2979_v6, 4  ;;  %v333_v53 = vsel %vm13447_vm4, 0, %v332_v50  ;;  %v3001_v58 = vshrl.u32 %v2651_v15, 16 }
  0xc3   : > { %v11627_v16 = vcombine.low %v2961_v57, %v2971_v14  ;;  %v2988_v24 = vor.u32 %v2987_v9, %v2984_v8  ;;  %v2992_v28 = vshrl.u32 %v2848_v21, 16  ;;  %v2995_v29 = vshll.u32 %v2848_v21, 16  ;;  %334 = vst [vmem:[#allocation2 + $0x50] sm:$0x2] %v333_v53  ;;  %v2655_v57 = vld [vmem:[#allocation2 + $0x58] sm:$0xf] }
  0xc4   : > { %v4051_v38 = vsel %vm13040_vm13, %v11645_v12, %v4050_v20  ;;  %v4052_v33 = vrot.slane %v4050_v20, 4  ;;  %v3003_v54 = vrot.slane %v3001_v58, 5  ;;  %v3004_v2 = vshll.u32 %v2651_v15, 16  ;;  %v1497_v19 = vld [vmem:[#allocation2] sm:$0xe] }
  0xc5   : > { %3410 = vrot.lane.b32.xlu1 %v11627_v16, %s12939_s27  ;;  %v2989_v13 = vsel %vm13509_vm6, %v2980_v22, %v2988_v24  ;;  %v2990_v10 = vrot.slane %v2988_v24, 4  ;;  %v2994_v61 = vrot.slane %v2992_v28, 5  ;;  %v2997_v23 = vrot.slane %v2995_v29, 6  ;;  %v13581_v4 = vld [vmem:[#allocation2 + $0x8] sm:$0x1] }
  0xc6   : > { %v4054_v37 = vsel %vm13040_vm13, %v4052_v33, %v4053_v7  ;;  %v3006_v27 = vrot.slane %v3004_v2, 6  ;;  %v3010_v11 = vshrl.u32 %v2652_v30, 16  ;;  %v3013_v52 = vshll.u32 %v2652_v30, 16  ;;  %v1498_v20 = vld [vmem:[#allocation2 + $0x4] sm:$0xf] }
  0xc7   : > { %v2998_v42 = vor.u32 %v2997_v23, %v2994_v61  ;;  %v11677_v31 = vcombine.low %v4051_v38, %v4054_v37  ;;  %v11646_v63 = vrot.slane %v3955_v25, 9  ;;  %v4057_v1 = vrot.slane %v3536_v26, 5  ;;  %v1499_v16 = vld [vmem:[#allocation2 + $0x8] sm:$0x3] }
  0xc8   : > { %v3007_v18 = vor.u32 %v3006_v27, %v3003_v54  ;;  %v3012_v40 = vrot.slane %v3010_v11, 5  ;;  %v3015_v44 = vrot.slane %v3013_v52, 6  ;;  %v4060_v43 = vrot.slane %v3537_v36, 5 }
  0xc9   : > { %v2999_v60 = vsel %vm13509_vm6, %v2990_v10, %v2998_v42  ;;  %4231 = vrot.lane.b32.xlu0 %v11677_v31, %s12939_s27  ;;  %v4058_v32 = vsel %vm13040_vm13, %v11646_v63, %v4057_v1  ;;  %v4059_v41 = vrot.slane %v4057_v1, 4  ;;  %v336_v46 = vsel %vm13447_vm4, 0, %v335_v39  ;;  %v1500_v39 = vld [vmem:[#allocation2 + $0xc] sm:$0xe] }
  0xca   : > { %v11628_v0 = vcombine.low %v2989_v13, %v2999_v60  ;;  %v2849_v48 = vld [vmem:[#allocation2 + $0x50] sm:$0x3]  ;;  %v3008_v49 = vrot.slane %v3007_v18, 4  ;;  %v3016_v55 = vor.u32 %v3015_v44, %v3012_v40  ;;  %337 = vst [vmem:[#allocation2 + $0x5c] sm:$0x2] %v336_v46  ;;  %v3029_v59 = vshrl.u32 %v2654_v17, 16 }
  0xcb   : > { %v3020_v62 = vshrl.u32 %v2849_v48, 16  ;;  %v3023_v3 = vshll.u32 %v2849_v48, 16  ;;  %v4061_v50 = vsel %vm13040_vm13, %v4059_v41, %v4060_v43  ;;  %v3032_v15 = vshll.u32 %v2654_v17, 16  ;;  %v1501_v17 = vld [vmem:[#allocation2 + $0x10] sm:$0xf] }
  0xcc   : > { %v745_v6 = vshll.u32 %v13581_v4, 16  ;;  %3412 = vrot.lane.b32.xlu1 %v11628_v0, %s12939_s27  ;;  %v3018_v8 = vrot.slane %v3016_v55, 4  ;;  %v11678_v9 = vcombine.low %v4058_v32, %v4061_v50  ;;  %v3031_v12 = vrot.slane %v3029_v59, 5  ;;  %v1502_v48 = vld [vmem:[#allocation2 + $0x14] sm:$0x3] }
  0xcd   : > { %v3022_v7 = vrot.slane %v3020_v62, 5  ;;  %v3025_v14 = vrot.slane %v3023_v3, 6  ;;  %v3034_v21 = vrot.slane %v3032_v15, 6  ;;  %v3038_v22 = vshrl.u32 %v2655_v57, 16  ;;  %v674_v15 = vld [vmem:[#allocation2] sm:$0xf] }
  0xce   : > { %v3017_v53 = vsel %vm13509_vm6, %v3008_v49, %v3016_v55  ;;  %4233 = vrot.lane.b32.xlu0 %v11678_v9, %s12939_s27  ;;  %v3041_v58 = vshll.u32 %v2655_v57, 16  ;;  %v1549_v24 = vshrl.u32 %v1497_v19, 16  ;;  %v1552_v28 = vshll.u32 %v1497_v19, 16 }
  0xcf   : > { %v3026_v29 = vor.u32 %v3025_v14, %v3022_v7  ;;  %v3035_v30 = vor.u32 %v3034_v21, %v3031_v12  ;;  %v3040_v26 = vrot.slane %v3038_v22, 5  ;;  %v1558_v38 = vshrl.u32 %v1498_v20, 16  ;;  %v2525_v14 = vpop.permute.xlu0 %2524 }
  0xd0   : > { %v3043_v33 = vrot.slane %v3041_v58, 6  ;;  %v1551_v54 = vrot.slane %v1549_v24, 5  ;;  %v1554_v2 = vrot.slane %v1552_v28, 6  ;;  %v1561_v25 = vshll.u32 %v1498_v20, 16 }
  0xd1   : > { %v3027_v13 = vsel %vm13509_vm6, %v3018_v8, %v3026_v29  ;;  %v2850_v10 = vld [vmem:[#allocation2 + $0x5c] sm:$0x3]  ;;  %v3036_v61 = vrot.slane %v3035_v30, 4  ;;  %vm1416_vm8 = vcmask 523264   ;;  %v1560_v23 = vrot.slane %v1558_v38, 5  ;;  %v12698_v29 = vld [vmem:[%s16371_s1 + $0xc0] sm:$0xff]  }
  0xd2   : > { %v1568_v36 = vshrl.u32 %v1499_v16, 16  ;;  %v11629_v37 = vcombine.low %v3017_v53, %v3027_v13  ;;  %v3044_v27 = vor.u32 %v3043_v33, %v3040_v26  ;;  %v3048_v11 = vshrl.u32 %v2850_v10, 16  ;;  %v677_v53 = vld [vmem:[#allocation2 + $0xc] sm:$0xf]  ;;  %12215 = vmatprep.subr.bf16.mxu1 %v12698_v29 }
  0xd3   : > { %v3051_v52 = vshll.u32 %v2850_v10, 16  ;;  %v1555_v42 = vor.u32 %v1554_v2, %v1551_v54  ;;  %v1563_v31 = vrot.slane %v1561_v25, 6  ;;  %v1571_v1 = vshll.u32 %v1499_v16, 16  ;;  %v12699_v54 = vld [vmem:[%s16371_s1 + $0x80] sm:$0xff]  }
  0xd4   : > { %v1570_v63 = vrot.slane %v1568_v36, 5  ;;  %3414 = vrot.lane.b32.xlu1 %v11629_v37, %s12939_s27  ;;  %v3045_v18 = vsel %vm13509_vm6, %v3036_v61, %v3044_v27  ;;  %v3046_v40 = vrot.slane %v3044_v27, 4  ;;  %v3050_v44 = vrot.slane %v3048_v11, 5  ;;  %12216 = vmatpush3.bf16.msra.mxu1 %v12699_v54 }
  0xd5   : > { %v3053_v43 = vrot.slane %v3051_v52, 6  ;;  %v1556_v60 = vrot.slane %v1555_v42, 4  ;;  %v1564_v32 = vor.u32 %v1563_v31, %v1560_v23  ;;  %v1573_v41 = vrot.slane %v1571_v1, 6  ;;  %v3539_v42 = vld [vmem:[#allocation2 + $0x70] sm:$0xf] }
  0xd6   : > { %v1577_v46 = vshrl.u32 %v1500_v39, 16  ;;  %v1580_v49 = vshll.u32 %v1500_v39, 16  ;;  %v1586_v55 = vshrl.u32 %v1501_v17, 16  ;;  %v1589_v57 = vshll.u32 %v1501_v17, 16  ;;  %v12755_v17 = vld [vmem:[#allocation2 + $0x14] sm:$0x1] }
  0xd7   : > { %v3054_v0 = vor.u32 %v3053_v43, %v3050_v44  ;;  %v1565_v59 = vsel %vm13509_vm6, %v1556_v60, %v1564_v32  ;;  %v1566_v62 = vrot.slane %v1564_v32, 4  ;;  %v1574_v3 = vor.u32 %v1573_v41, %v1570_v63  ;;  %v12756_v43 = vld [vmem:[#allocation2 + $0x10] sm:$0xf]  ;;  %v3540_v32 = vld [vmem:[#allocation2 + $0x74] sm:$0x1]  ;;  %v2527_v41 = vpop.permute.xlu1 %2526 }
  0xd8   : > { %v1579_v50 = vrot.slane %v1577_v46, 5  ;;  %v1582_v8 = vrot.slane %v1580_v49, 6  ;;  %v1588_v9 = vrot.slane %v1586_v55, 5  ;;  %v1591_v12 = vrot.slane %v1589_v57, 6 }
  0xd9   : > { %v3055_v19 = vsel %vm13509_vm6, %v3046_v40, %v3054_v0  ;;  %v1575_v7 = vsel %vm13509_vm6, %v1566_v62, %v1574_v3  ;;  %v1596_v21 = vshrl.u32 %v1502_v48, 16  ;;  %v1599_v22 = vshll.u32 %v1502_v48, 16  ;;  %v338_v48 = vld [vmem:[#allocation2 + $0x68] sm:$0x2]  ;;  %v2657_v62 = vld [vmem:[#allocation2 + $0x60] sm:$0xe] }
  0xda   : > { %v11630_v20 = vcombine.low %v3045_v18, %v3055_v19  ;;  %v11560_v58 = vcombine.low %v1565_v59, %v1575_v7  ;;  %v1583_v16 = vor.u32 %v1582_v8, %v1579_v50  ;;  %v1592_v24 = vor.u32 %v1591_v12, %v1588_v9  ;;  %v2658_v9 = vld [vmem:[#allocation2 + $0x64] sm:$0xf]  ;;  %v1503_v12 = vld [vmem:[#allocation2 + $0x18] sm:$0xe] }
  0xdb   : > { %v726_v28 = vshrl.u32 %v674_v15, 16  ;;  %v1598_v30 = vrot.slane %v1596_v21, 5  ;;  %v1601_v26 = vrot.slane %v1599_v22, 6  ;;  %v729_v38 = vshll.u32 %v674_v15, 16  ;;  %v1385_v15 = vpop.permute.xlu0 %1384  ;;  %v1504_v22 = vld [vmem:[#allocation2 + $0x1c] sm:$0xf] }
  0xdc   : > { %3416 = vrot.lane.b32.xlu1 %v11630_v20, %s12939_s27  ;;  %v735_v33 = vshll.u32 %v13469_v5, 16  ;;  %v2558_v2 = vsel %vm1416_vm8, %v11560_v58, %v2525_v14  ;;  %v1584_v25 = vrot.slane %v1583_v16, 4  ;;  %v1594_v13 = vrot.slane %v1592_v24, 4  ;;  %v3956_v5 = vld [vmem:[#allocation2 + $0x6c] sm:$0xe] }
  0xdd   : > { %v728_v10 = vrot.slane %v726_v28, 4  ;;  %v1602_v61 = vor.u32 %v1601_v26, %v1598_v30  ;;  %v731_v23 = vrot.slane %v729_v38, 5  ;;  %v741_v37 = vrot.slane %v739_v35, 4  ;;  %5364 = vmatprep.mubr.bf16.mxu0 %v2558_v2  ;;  %v12701_v38 = vld [vmem:[%s16371_s1 + $0xc8] sm:$0xff]  }
  0xde   : > { %v737_v36 = vrot.slane %v735_v33, 5  ;;  %v1593_v27 = vsel %vm13509_vm6, %v1584_v25, %v1592_v24  ;;  %v747_v11 = vrot.slane %v745_v6, 5  ;;  %v750_v52 = vshrl.u32 %v677_v53, 16  ;;  %12217 = vmatprep.subr.bf16.mxu1 %v12701_v38  ;;  %v12759_v38 = vld [vmem:[#allocation2 + $0x20] sm:$0x1] }
  0xdf   : > { %v753_v39 = vshll.u32 %v677_v53, 16  ;;  %v1603_v31 = vsel %vm13509_vm6, %v1594_v13, %v1602_v61  ;;  %v732_v63 = vor.u32 %v731_v23, %v728_v10  ;;  %v769_v18 = vshll.u32 %v12755_v17, 16  ;;  %v1505_v23 = vld [vmem:[#allocation2 + $0x20] sm:$0x3]  ;;  %v680_v17 = vld [vmem:[#allocation2 + $0x18] sm:$0xf] }
  0xe0   : > { %v742_v1 = vor.u32 %v741_v37, %v737_v36  ;;  %v11561_v35 = vcombine.low %v1593_v27, %v1603_v31  ;;  %v752_v40 = vrot.slane %v750_v52, 4  ;;  %v759_v60 = vshll.u32 %v12756_v43, 16  ;;  %v12757_v37 = vld [vmem:[%s16371_s1 + $0x100] sm:$0xff]  }
  0xe1   : > { %v755_v44 = vrot.slane %v753_v39, 5  ;;  %v733_v4 = vrot.slane %v732_v63, 4  ;;  %v771_v46 = vrot.slane %v769_v18, 5  ;;  %v763_v0 = vshrl.u32 %v12756_v43, 16  ;;  %v1387_v18 = vpop.permute.xlu1 %1386 }
  0xe2   : > { %v743_v6 = vrot.slane %v742_v1, 4  ;;  %v2562_v49 = vsel %vm1416_vm8, %v11561_v35, %v2527_v41  ;;  %v761_v57 = vrot.slane %v759_v60, 5  ;;  %v11647_v59 = vrot.slane %v3956_v5, 9 }
  0xe3   : > { %v756_v55 = vor.u32 %v755_v44, %v752_v40  ;;  %v738_v3 = vsel %vm13103_vm14, %v733_v4, %v737_v36  ;;  %v765_v19 = vrot.slane %v763_v0, 4  ;;  %v4064_v8 = vrot.slane %v3539_v42, 5 }
  0xe4   : > { %v748_v50 = vsel %vm13103_vm14, %v743_v6, %v747_v11  ;;  %v4067_v14 = vrot.slane %v3540_v32, 5  ;;  %v339_v21 = vsel %vm13447_vm4, 0, %v338_v48  ;;  %v3057_v24 = vshrl.u32 %v2657_v62, 16  ;;  %v12700_v6 = vld [vmem:[%s16371_s1 + $0x108] sm:$0xff]  }
  0xe5   : > { %v11528_v20 = vcombine.low %v738_v3, %v748_v50  ;;  %v757_v7 = vrot.slane %v756_v55, 4  ;;  %v766_v53 = vor.u32 %v765_v19, %v761_v57  ;;  %v4065_v58 = vsel %vm13040_vm13, %v11647_v59, %v4064_v8  ;;  %340 = vst [vmem:[#allocation2 + $0x68] sm:$0x2] %v339_v21  ;;  %v1507_v21 = vld [vmem:[#allocation2 + $0x28] sm:$0xf] }
  0xe6   : > { %v4066_v16 = vrot.slane %v4064_v8, 4  ;;  %v3060_v30 = vshll.u32 %v2657_v62, 16  ;;  %v3066_v26 = vshrl.u32 %v2658_v9, 16  ;;  %v3059_v2 = vrot.slane %v3057_v24, 5  ;;  %v1506_v8 = vld [vmem:[#allocation2 + $0x24] sm:$0xe] }
  0xe7   : > { %v1419_v28 = vsel %vm1416_vm8, %v11528_v20, %v1385_v15  ;;  %v762_v29 = vsel %vm13103_vm14, %v757_v7, %v761_v57  ;;  %v767_v33 = vrot.slane %v766_v53, 4  ;;  %v3069_v25 = vshll.u32 %v2658_v9, 16  ;;  %v12758_v7 = vld [vmem:[#allocation2 + $0x1c] sm:$0xf]  ;;  %v1508_v24 = vld [vmem:[#allocation2 + $0x2c] sm:$0x3] }
  0xe8   : > { %v4068_v54 = vsel %vm13040_vm13, %v4066_v16, %v4067_v14  ;;  %5365 = vmatmul.mubr.bf16.vlgmr.msra.gmra.mrb[0].mxu0 %v1419_v28  ;;  %v3062_v10 = vrot.slane %v3060_v30, 6  ;;  %v3068_v61 = vrot.slane %v3066_v26, 5  ;;  %v1605_v36 = vshrl.u32 %v1503_v12, 16  ;;  %v12702_v28 = vld [vmem:[%s16371_s1 + $0x88] sm:$0xff]  }
  0xe9   : > { %v11679_v13 = vcombine.low %v4065_v58, %v4068_v54  ;;  %12592 = vmatpush3.bf16.msra.mxu0 %v12757_v37  ;;  %5372 = vmatprep.mubr.bf16.mxu0 %v2562_v49  ;;  %v772_v27 = vsel %vm13103_vm14, %v767_v33, %v771_v46  ;;  %v3071_v11 = vrot.slane %v3069_v25, 6  ;;  %v1608_v52 = vshll.u32 %v1503_v12, 16  ;;  %v683_v54 = vld [vmem:[#allocation2 + $0x24] sm:$0xf] }
  0xea   : > { %v1614_v39 = vshrl.u32 %v1504_v22, 16  ;;  %v11529_v42 = vcombine.low %v762_v29, %v772_v27  ;;  %v3063_v31 = vor.u32 %v3062_v10, %v3059_v2  ;;  %v1607_v63 = vrot.slane %v1605_v36, 5  ;;  %12593 = vmatprep.subr.bf16.mxu0 %v12700_v6  ;;  %12218 = vmatpush3.bf16.msra.mxu1 %v12702_v28 }
  0xeb   : > { %4235 = vrot.lane.b32.xlu0 %v11679_v13, %s12939_s27  ;;  %v1617_v1 = vshll.u32 %v1504_v22, 16  ;;  %v3072_v5 = vor.u32 %v3071_v11, %v3068_v61  ;;  %v1610_v35 = vrot.slane %v1608_v52, 6  ;;  %v1624_v44 = vshrl.u32 %v1505_v23, 16  ;;  %v12703_v11 = vld [vmem:[%s16371_s1 + $0xd0] sm:$0xff]  }
  0xec   : > { %v1616_v40 = vrot.slane %v1614_v39, 5  ;;  %v1423_v43 = vsel %vm1416_vm8, %v11529_v42, %v1387_v18  ;;  %v2851_v60 = vld [vmem:[#allocation2 + $0x68] sm:$0x3]  ;;  %v3064_v32 = vrot.slane %v3063_v31, 4  ;;  %v1627_v4 = vshll.u32 %v1505_v23, 16  ;;  %v2529_v23 = vpop.permute.xlu0 %2528  ;;  %12219 = vmatprep.subr.bf16.mxu1 %v12703_v11 }
  0xed   : > { %v1619_v41 = vrot.slane %v1617_v1, 6  ;;  %v3074_v46 = vrot.slane %v3072_v5, 4  ;;  %v3076_v0 = vshrl.u32 %v2851_v60, 16  ;;  %v3079_v48 = vshll.u32 %v2851_v60, 16  ;;  %12594 = vmatpush3.bf16.msra.mxu0 %v12700_v6 }
  0xee   : > { %v1611_v49 = vor.u32 %v1610_v35, %v1607_v63  ;;  %v3073_v55 = vsel %vm13509_vm6, %v3064_v32, %v3072_v5  ;;  %v1626_v59 = vrot.slane %v1624_v44, 5  ;;  %v1629_v62 = vrot.slane %v1627_v4, 6  ;;  %v12704_v63 = vld [vmem:[%s16371_s1 + $0x90] sm:$0xff]  }
  0xef   : > { %v1620_v57 = vor.u32 %v1619_v41, %v1616_v40  ;;  %v3078_v3 = vrot.slane %v3076_v0, 5  ;;  %v3081_v50 = vrot.slane %v3079_v48, 6  ;;  %v774_v19 = vshrl.u32 %v680_v17, 16  ;;  %12220 = vmatpush3.bf16.msra.mxu1 %v12704_v63 }
  0xf0   : > { %v1612_v15 = vrot.slane %v1611_v49, 4  ;;  %5373 = vmatmul.mubr.bf16.gmra.mrb[4].mxu0 %v1423_v43  ;;  %v1630_v12 = vor.u32 %v1629_v62, %v1626_v59  ;;  %v777_v20 = vshll.u32 %v680_v17, 16  ;;  %v783_v14 = vshll.u32 %v12758_v7, 16  ;;  %v3542_v49 = vld [vmem:[#allocation2 + $0x7c] sm:$0xf] }
  0xf1   : > { %v1622_v9 = vrot.slane %v1620_v57, 4  ;;  %v3082_v22 = vor.u32 %v3081_v50, %v3078_v3  ;;  %v776_v58 = vrot.slane %v774_v19, 4  ;;  %v787_v16 = vshrl.u32 %v12758_v7, 16  ;;  %v12760_v62 = vld [vmem:[#allocation2 + $0x28] sm:$0xf]  ;;  %v1389_v19 = vpop.permute.xlu1 %1388 }
  0xf2   : > { %v1621_v53 = vsel %vm13509_vm6, %v1612_v15, %v1620_v57  ;;  %v779_v30 = vrot.slane %v777_v20, 5  ;;  %v785_v26 = vrot.slane %v783_v14, 5  ;;  %v793_v33 = vshll.u32 %v12759_v38, 16  ;;  %v3543_v50 = vld [vmem:[#allocation2 + $0x80] sm:$0x1] }
  0xf3   : > { %v1631_v29 = vsel %vm13509_vm6, %v1622_v9, %v1630_v12  ;;  %v3083_v2 = vsel %vm13509_vm6, %v3074_v46, %v3082_v22  ;;  %v789_v13 = vrot.slane %v787_v16, 4  ;;  %v1633_v10 = vshrl.u32 %v1506_v8, 16  ;;  %v3957_v15 = vld [vmem:[#allocation2 + $0x78] sm:$0xe]  ;;  %v12761_v20 = vld [vmem:[#allocation2 + $0x2c] sm:$0x1] }
  0xf4   : > { %v11562_v25 = vcombine.low %v1621_v53, %v1631_v29  ;;  %v11631_v61 = vcombine.low %v3073_v55, %v3083_v2  ;;  %v780_v36 = vor.u32 %v779_v30, %v776_v58  ;;  %v795_v37 = vrot.slane %v793_v33, 5  ;;  %v341_v14 = vld [vmem:[#allocation2 + $0x74] sm:$0x2]  ;;  %v2660_v16 = vld [vmem:[#allocation2 + $0x6c] sm:$0xe] }
  0xf5   : > { %v1636_v27 = vshll.u32 %v1506_v8, 16  ;;  %v790_v39 = vor.u32 %v789_v13, %v785_v26  ;;  %v1635_v42 = vrot.slane %v1633_v10, 5  ;;  %v1642_v31 = vshrl.u32 %v1507_v21, 16 }
  0xf6   : > { %v2566_v52 = vsel %vm1416_vm8, %v11562_v25, %v2529_v23  ;;  %3418 = vrot.lane.b32.xlu1 %v11631_v61, %s12939_s27  ;;  %v781_v1 = vrot.slane %v780_v36, 4  ;;  %v1645_v18 = vshll.u32 %v1507_v21, 16  ;;  %v1652_v5 = vshrl.u32 %v1508_v24, 16  ;;  %v1509_v25 = vld [vmem:[#allocation2 + $0x30] sm:$0xe]  ;;  %v2531_v36 = vpop.permute.xlu0 %2530 }
  0xf7   : > { %v1638_v17 = vrot.slane %v1636_v27, 6  ;;  %5380 = vmatprep.mubr.bf16.mxu0 %v2566_v52  ;;  %v791_v35 = vrot.slane %v790_v39, 4  ;;  %v1644_v40 = vrot.slane %v1642_v31, 5  ;;  %v1655_v44 = vshll.u32 %v1508_v24, 16  ;;  %v2661_v24 = vld [vmem:[#allocation2 + $0x70] sm:$0xf] }
  0xf8   : > { %v798_v43 = vshrl.u32 %v683_v54, 16  ;;  %v786_v60 = vsel %vm13103_vm14, %v781_v1, %v785_v26  ;;  %v1647_v41 = vrot.slane %v1645_v18, 6  ;;  %v1654_v4 = vrot.slane %v1652_v5, 5  ;;  %v12705_v39 = vld [vmem:[%s16371_s1 + $0xd8] sm:$0xff]  }
  0xf9   : > { %v1639_v32 = vor.u32 %v1638_v17, %v1635_v42  ;;  %v796_v6 = vsel %vm13103_vm14, %v791_v35, %v795_v37  ;;  %v1657_v46 = vrot.slane %v1655_v44, 6  ;;  %v801_v48 = vshll.u32 %v683_v54, 16  ;;  %v1510_v17 = vld [vmem:[#allocation2 + $0x34] sm:$0xf]  ;;  %v1511_v18 = vld [vmem:[#allocation2 + $0x38] sm:$0x3]  ;;  %12221 = vmatprep.subr.bf16.mxu1 %v12705_v39 }
  0xfa   : > { %v800_v0 = vrot.slane %v798_v43, 4  ;;  %v11530_v55 = vcombine.low %v786_v60, %v796_v6  ;;  %v1648_v59 = vor.u32 %v1647_v41, %v1644_v40  ;;  %v807_v3 = vshll.u32 %v12760_v62, 16 }
  0xfb   : > { %v1640_v57 = vrot.slane %v1639_v32, 4  ;;  %v1658_v8 = vor.u32 %v1657_v46, %v1654_v4  ;;  %v803_v9 = vrot.slane %v801_v48, 5  ;;  %v811_v12 = vshrl.u32 %v12760_v62, 16  ;;  %v1391_v48 = vpop.permute.xlu1 %1390 }
  0xfc   : > { %v817_v7 = vshll.u32 %v12761_v20, 16  ;;  %v1427_v21 = vsel %vm1416_vm8, %v11530_v55, %v1389_v19  ;;  %v1650_v53 = vrot.slane %v1648_v59, 4  ;;  %v809_v58 = vrot.slane %v807_v3, 5 }
  0xfd   : > { %v1649_v22 = vsel %vm13509_vm6, %v1640_v57, %v1648_v59  ;;  %v804_v28 = vor.u32 %v803_v9, %v800_v0  ;;  %v813_v29 = vrot.slane %v811_v12, 4  ;;  %v11648_v26 = vrot.slane %v3957_v15, 9  ;;  %5381 = vmatmul.mubr.bf16.gmra.mrb[8].mxu0 %v1427_v21 }
  0xfe   : > { %v819_v30 = vrot.slane %v817_v7, 5  ;;  %v1659_v38 = vsel %vm13509_vm6, %v1650_v53, %v1658_v8  ;;  %v4071_v33 = vrot.slane %v3542_v49, 5  ;;  %v4074_v54 = vrot.slane %v3543_v50, 5  ;;  %v686_v7 = vld [vmem:[#allocation2 + $0x30] sm:$0xf] }
  0xff   : > { %v342_v2 = vsel %vm13447_vm4, 0, %v341_v14  ;;  %v11563_v13 = vcombine.low %v1649_v22, %v1659_v38  ;;  %v805_v10 = vrot.slane %v804_v28, 4  ;;  %v814_v61 = vor.u32 %v813_v29, %v809_v58  ;;  %v12762_v38 = vld [vmem:[#allocation2 + $0x34] sm:$0xf] }
 0x100   : > { %343 = vst [vmem:[#allocation2 + $0x74] sm:$0x2] %v342_v2  ;;  %v3085_v23 = vshrl.u32 %v2660_v16, 16  ;;  %v4072_v37 = vsel %vm13040_vm13, %v11648_v26, %v4071_v33  ;;  %v4073_v27 = vrot.slane %v4071_v33, 4  ;;  %v3088_v11 = vshll.u32 %v2660_v16, 16 }
 0x101   : > { %v3094_v52 = vshrl.u32 %v2661_v24, 16  ;;  %v2570_v42 = vsel %vm1416_vm8, %v11563_v13, %v2531_v36  ;;  %v810_v31 = vsel %vm13103_vm14, %v805_v10, %v809_v58  ;;  %v815_v63 = vrot.slane %v814_v61, 4  ;;  %v1513_v61 = vld [vmem:[#allocation2 + $0x40] sm:$0xf] }
 0x102   : > { %v3087_v1 = vrot.slane %v3085_v23, 5  ;;  %v4075_v5 = vsel %vm13040_vm13, %v4073_v27, %v4074_v54  ;;  %v3090_v35 = vrot.slane %v3088_v11, 6  ;;  %v3097_v44 = vshll.u32 %v2661_v24, 16  ;;  %5388 = vmatprep.mubr.bf16.mxu0 %v2570_v42  ;;  %v1512_v54 = vld [vmem:[#allocation2 + $0x3c] sm:$0xe] }
 0x103   : > { %v3096_v40 = vrot.slane %v3094_v52, 5  ;;  %v820_v43 = vsel %vm13103_vm14, %v815_v63, %v819_v30  ;;  %v11680_v60 = vcombine.low %v4072_v37, %v4075_v5  ;;  %v1661_v32 = vshrl.u32 %v1509_v25, 16  ;;  %v1514_v11 = vld [vmem:[#allocation2 + $0x44] sm:$0x3]  ;;  %v12706_v52 = vld [vmem:[%s16371_s1 + $0x98] sm:$0xff]  }
 0x104   : > { %v1664_v41 = vshll.u32 %v1509_v25, 16  ;;  %v11531_v4 = vcombine.low %v810_v31, %v820_v43  ;;  %v3091_v6 = vor.u32 %v3090_v35, %v3087_v1  ;;  %v3099_v46 = vrot.slane %v3097_v44, 6  ;;  %v12763_v31 = vld [vmem:[#allocation2 + $0x38] sm:$0x1]  ;;  %12222 = vmatpush3.bf16.msra.mxu1 %v12706_v52 }
 0x105   : > { %v1670_v0 = vshrl.u32 %v1510_v17, 16  ;;  %4237 = vrot.lane.b32.xlu0 %v11680_v60, %s12939_s27  ;;  %v1663_v49 = vrot.slane %v1661_v32, 5  ;;  %v1673_v57 = vshll.u32 %v1510_v17, 16  ;;  %v1680_v59 = vshrl.u32 %v1511_v18, 16 }
 0x106   : > { %v1666_v55 = vrot.slane %v1664_v41, 6  ;;  %v1431_v62 = vsel %vm1416_vm8, %v11531_v4, %v1391_v48  ;;  %v3092_v50 = vrot.slane %v3091_v6, 4  ;;  %v3100_v15 = vor.u32 %v3099_v46, %v3096_v40  ;;  %v689_v40 = vld [vmem:[#allocation2 + $0x3c] sm:$0xf]  ;;  %v12707_v41 = vld [vmem:[%s16371_s1 + $0xe0] sm:$0xff]   ;;  %v2533_v4 = vpop.permute.xlu0 %2532 }
 0x107   : > { %v2852_v3 = vld [vmem:[#allocation2 + $0x74] sm:$0x3]  ;;  %v1672_v19 = vrot.slane %v1670_v0, 5  ;;  %v1675_v20 = vrot.slane %v1673_v57, 6  ;;  %5389 = vmatmul.mubr.bf16.gmra.mrb[12].mxu0 %v1431_v62  ;;  %v1682_v22 = vrot.slane %v1680_v59, 5  ;;  %v1683_v53 = vshll.u32 %v1511_v18, 16  ;;  %12223 = vmatprep.subr.bf16.mxu1 %v12707_v41 }
 0x108   : > { %v3104_v8 = vshrl.u32 %v2852_v3, 16  ;;  %v3107_v9 = vshll.u32 %v2852_v3, 16  ;;  %v1667_v12 = vor.u32 %v1666_v55, %v1663_v49  ;;  %v3101_v14 = vsel %vm13509_vm6, %v3092_v50, %v3100_v15  ;;  %v12708_v49 = vld [vmem:[%s16371_s1 + $0xa0] sm:$0xff]  }
 0x109   : > { %v3102_v21 = vrot.slane %v3100_v15, 4  ;;  %v1676_v28 = vor.u32 %v1675_v20, %v1672_v19  ;;  %v1685_v29 = vrot.slane %v1683_v53, 6  ;;  %v822_v30 = vshrl.u32 %v686_v7, 16  ;;  %12224 = vmatpush3.bf16.msra.mxu1 %v12708_v49 }
 0x10a   : > { %v3106_v58 = vrot.slane %v3104_v8, 5  ;;  %v3109_v16 = vrot.slane %v3107_v9, 6  ;;  %v1668_v24 = vrot.slane %v1667_v12, 4  ;;  %v825_v26 = vshll.u32 %v686_v7, 16  ;;  %v3958_v8 = vld [vmem:[#allocation2 + $0x84] sm:$0xe] }
 0x10b   : > { %v831_v33 = vshll.u32 %v12762_v38, 16  ;;  %v1678_v13 = vrot.slane %v1676_v28, 4  ;;  %v835_v10 = vshrl.u32 %v12762_v38, 16  ;;  %v1686_v23 = vor.u32 %v1685_v29, %v1682_v22 }
 0x10c   : > { %v3110_v2 = vor.u32 %v3109_v16, %v3106_v58  ;;  %v1677_v25 = vsel %vm13509_vm6, %v1668_v24, %v1676_v28  ;;  %v824_v36 = vrot.slane %v822_v30, 4  ;;  %v827_v37 = vrot.slane %v825_v26, 5  ;;  %v1393_v24 = vpop.permute.xlu1 %1392  ;;  %v12764_v30 = vld [vmem:[#allocation2 + $0x40] sm:$0xf] }
 0x10d   : > { %v833_v27 = vrot.slane %v831_v33, 5  ;;  %v837_v42 = vrot.slane %v835_v10, 4  ;;  %v841_v63 = vshll.u32 %v12763_v31, 16  ;;  %v1689_v1 = vshrl.u32 %v1512_v54, 16  ;;  %v344_v33 = vld [vmem:[#allocation2 + $0x80] sm:$0x2] }
 0x10e   : > { %v3111_v39 = vsel %vm13509_vm6, %v3102_v21, %v3110_v2  ;;  %v1687_v18 = vsel %vm13509_vm6, %v1678_v13, %v1686_v23  ;;  %v828_v5 = vor.u32 %v827_v37, %v824_v36  ;;  %v1692_v35 = vshll.u32 %v1512_v54, 16  ;;  %v3546_v21 = vld [vmem:[#allocation2 + $0x8c] sm:$0x1]  ;;  %v2663_v10 = vld [vmem:[#allocation2 + $0x78] sm:$0xe] }
 0x10f   : > { %v11632_v17 = vcombine.low %v3101_v14, %v3111_v39  ;;  %v11564_v44 = vcombine.low %v1677_v25, %v1687_v18  ;;  %v838_v43 = vor.u32 %v837_v42, %v833_v27  ;;  %v843_v60 = vrot.slane %v841_v63, 5  ;;  %v3545_v14 = vld [vmem:[#allocation2 + $0x88] sm:$0xf]  ;;  %v12765_v37 = vld [vmem:[#allocation2 + $0x44] sm:$0x1] }
 0x110   : > { %v1691_v32 = vrot.slane %v1689_v1, 5  ;;  %v829_v6 = vrot.slane %v828_v5, 4  ;;  %v1694_v46 = vrot.slane %v1692_v35, 6  ;;  %v1698_v0 = vshrl.u32 %v1513_v61, 16  ;;  %v2535_v5 = vpop.permute.xlu0 %2534 }
 0x111   : > { %3420 = vrot.lane.b32.xlu1 %v11632_v17, %s12939_s27  ;;  %v1701_v48 = vshll.u32 %v1513_v61, 16  ;;  %v2574_v55 = vsel %vm1416_vm8, %v11564_v44, %v2533_v4  ;;  %v839_v57 = vrot.slane %v838_v43, 4  ;;  %v1708_v59 = vshrl.u32 %v1514_v11, 16  ;;  %v2664_v61 = vld [vmem:[#allocation2 + $0x7c] sm:$0xf] }
 0x112   : > { %v1711_v62 = vshll.u32 %v1514_v11, 16  ;;  %v834_v3 = vsel %vm13103_vm14, %v829_v6, %v833_v27  ;;  %v1695_v50 = vor.u32 %v1694_v46, %v1691_v32  ;;  %v1700_v15 = vrot.slane %v1698_v0, 5  ;;  %5396 = vmatprep.mubr.bf16.mxu0 %v2574_v55  ;;  %v1515_v6 = vld [vmem:[#allocation2 + $0x48] sm:$0xe] }
 0x113   : > { %v1703_v19 = vrot.slane %v1701_v48, 6  ;;  %v844_v9 = vsel %vm13103_vm14, %v839_v57, %v843_v60  ;;  %v1710_v12 = vrot.slane %v1708_v59, 5  ;;  %v846_v7 = vshrl.u32 %v689_v40, 16  ;;  %v12709_v46 = vld [vmem:[%s16371_s1 + $0xe8] sm:$0xff]   ;;  %v1517_v59 = vld [vmem:[#allocation2 + $0x50] sm:$0x3] }
 0x114   : > { %v1713_v20 = vrot.slane %v1711_v62, 6  ;;  %v11532_v22 = vcombine.low %v834_v3, %v844_v9  ;;  %v1696_v53 = vrot.slane %v1695_v50, 4  ;;  %v849_v16 = vshll.u32 %v689_v40, 16  ;;  %v1516_v57 = vld [vmem:[#allocation2 + $0x4c] sm:$0xf]  ;;  %12225 = vmatprep.subr.bf16.mxu1 %v12709_v46 }
 0x115   : > { %v1704_v58 = vor.u32 %v1703_v19, %v1700_v15  ;;  %v848_v29 = vrot.slane %v846_v7, 4  ;;  %v855_v26 = vshll.u32 %v12764_v30, 16  ;;  %v859_v38 = vshrl.u32 %v12764_v30, 16 }
 0x116   : > { %v1714_v28 = vor.u32 %v1713_v20, %v1710_v12  ;;  %v1435_v54 = vsel %vm1416_vm8, %v11532_v22, %v1393_v24  ;;  %v851_v13 = vrot.slane %v849_v16, 5  ;;  %v865_v27 = vshll.u32 %v12765_v37, 16  ;;  %v1395_v20 = vpop.permute.xlu1 %1394  ;;  %v1518_v37 = vld [vmem:[#allocation2 + $0x54] sm:$0xe] }
 0x117   : > { %v1705_v2 = vsel %vm13509_vm6, %v1696_v53, %v1704_v58  ;;  %v1706_v25 = vrot.slane %v1704_v58, 4  ;;  %v857_v23 = vrot.slane %v855_v26, 5  ;;  %v861_v36 = vrot.slane %v859_v38, 4  ;;  %5397 = vmatmul.mubr.bf16.gmra.mrb[16].mxu0 %v1435_v54  ;;  %v692_v53 = vld [vmem:[#allocation2 + $0x48] sm:$0xf] }
 0x118   : > { %v11649_v11 = vrot.slane %v3958_v8, 9  ;;  %v852_v39 = vor.u32 %v851_v13, %v848_v29  ;;  %v4078_v42 = vrot.slane %v3545_v14, 5  ;;  %v4081_v31 = vrot.slane %v3546_v21, 5 }
 0x119   : > { %v1715_v52 = vsel %vm13509_vm6, %v1706_v25, %v1714_v28  ;;  %v862_v1 = vor.u32 %v861_v36, %v857_v23  ;;  %v867_v17 = vrot.slane %v865_v27, 5  ;;  %v345_v18 = vsel %vm13447_vm4, 0, %v344_v33 }
 0x11a   : > { %v11565_v63 = vcombine.low %v1705_v2, %v1715_v52  ;;  %v853_v35 = vrot.slane %v852_v39, 4  ;;  %v4079_v40 = vsel %vm13040_vm13, %v11649_v11, %v4078_v42  ;;  %v4080_v44 = vrot.slane %v4078_v42, 4  ;;  %346 = vst [vmem:[#allocation2 + $0x80] sm:$0x2] %v345_v18  ;;  %v12766_v18 = vld [vmem:[#allocation2 + $0x4c] sm:$0xf] }
 0x11b   : > { %v3113_v43 = vshrl.u32 %v2663_v10, 16  ;;  %v863_v32 = vrot.slane %v862_v1, 4  ;;  %v3116_v41 = vshll.u32 %v2663_v10, 16  ;;  %v3122_v4 = vshrl.u32 %v2664_v61, 16 }
 0x11c   : > { %v2578_v60 = vsel %vm1416_vm8, %v11565_v63, %v2535_v5  ;;  %v858_v0 = vsel %vm13103_vm14, %v853_v35, %v857_v23  ;;  %v4082_v48 = vsel %vm13040_vm13, %v4080_v44, %v4081_v31  ;;  %v3125_v55 = vshll.u32 %v2664_v61, 16  ;;  %v12710_v31 = vld [vmem:[%s16371_s1 + $0xa8] sm:$0xff]  }
 0x11d   : > { %2625 = vst [vmem:[#allocation3 + $0xd0] sm:$0xff] %v2578_v60  ;;  %v3115_v49 = vrot.slane %v3113_v43, 5  ;;  %v868_v62 = vsel %vm13103_vm14, %v863_v32, %v867_v17  ;;  %v11681_v3 = vcombine.low %v4079_v40, %v4082_v48  ;;  %v3118_v50 = vrot.slane %v3116_v41, 6  ;;  %v1519_v60 = vld [vmem:[#allocation2 + $0x58] sm:$0xf]  ;;  %12226 = vmatpush3.bf16.msra.mxu1 %v12710_v31  ;;  %v1397_v31 = vpop.permute.xlu1 %1396 }
 0x11e   : > { %v3124_v15 = vrot.slane %v3122_v4, 5  ;;  %v11533_v19 = vcombine.low %v858_v0, %v868_v62  ;;  %v3127_v8 = vrot.slane %v3125_v55, 6  ;;  %v1717_v9 = vshrl.u32 %v1515_v6, 16  ;;  %v1520_v32 = vld [vmem:[#allocation2 + $0x5c] sm:$0x3] }
 0x11f   : > { %v1720_v12 = vshll.u32 %v1515_v6, 16  ;;  %4239 = vrot.lane.b32.xlu0 %v11681_v3, %s12939_s27  ;;  %v3119_v7 = vor.u32 %v3118_v50, %v3115_v49  ;;  %v1726_v14 = vshrl.u32 %v1516_v57, 16  ;;  %v1729_v21 = vshll.u32 %v1516_v57, 16  ;;  %v12767_v6 = vld [vmem:[#allocation2 + $0x50] sm:$0x1] }
 0x120   : > { %v1736_v22 = vshrl.u32 %v1517_v59, 16  ;;  %v1439_v58 = vsel %vm1416_vm8, %v11533_v19, %v1395_v20  ;;  %v3128_v16 = vor.u32 %v3127_v8, %v3124_v15  ;;  %v1719_v24 = vrot.slane %v1717_v9, 5  ;;  %v695_v19 = vld [vmem:[#allocation2 + $0x54] sm:$0xf] }
 0x121   : > { %v1722_v28 = vrot.slane %v1720_v12, 6  ;;  %1486 = vst [vmem:[#allocation3 + $0xc8] sm:$0xff] %v1439_v58  ;;  %v2853_v29 = vld [vmem:[#allocation2 + $0x80] sm:$0x3]  ;;  %v3120_v30 = vrot.slane %v3119_v7, 4  ;;  %v1728_v26 = vrot.slane %v1726_v14, 5 }
 0x122   : > { %v1731_v38 = vrot.slane %v1729_v21, 6  ;;  %v1738_v33 = vrot.slane %v1736_v22, 5  ;;  %v3130_v54 = vrot.slane %v3128_v16, 4  ;;  %v3132_v2 = vshrl.u32 %v2853_v29, 16  ;;  %v12711_v8 = vld [vmem:[%s16371_s1 + $0xf0] sm:$0xff]   ;;  %v2537_v21 = vpop.permute.xlu0 %2536 }
 0x123   : > { %v3135_v25 = vshll.u32 %v2853_v29, 16  ;;  %v1723_v13 = vor.u32 %v1722_v28, %v1719_v24  ;;  %v3129_v10 = vsel %vm13509_vm6, %v3120_v30, %v3128_v16  ;;  %v1739_v23 = vshll.u32 %v1517_v59, 16  ;;  %v12712_v14 = vld [vmem:[%s16371_s1 + $0xb0] sm:$0xff]   ;;  %12227 = vmatprep.subr.bf16.mxu1 %v12711_v8 }
 0x124   : > { %v1732_v61 = vor.u32 %v1731_v38, %v1728_v26  ;;  %v870_v36 = vshrl.u32 %v692_v53, 16  ;;  %v4935_v27 = vld [vmem:[#allocation3 + $0xd0] sm:$0xff]  ;;  %v3134_v11 = vrot.slane %v3132_v2, 5  ;;  %v873_v42 = vshll.u32 %v692_v53, 16  ;;  %12228 = vmatpush3.bf16.msra.mxu1 %v12712_v14  ;;  %v12713_v2 = vld [vmem:[%s16371_s1 + $0xf8] sm:$0xff]  }
 0x125   : > { %v3137_v52 = vrot.slane %v3135_v25, 6  ;;  %v1724_v39 = vrot.slane %v1723_v13, 4  ;;  %5404 = vmatprep.mubr.bf16.mxu0 %v4935_v27  ;;  %v1741_v1 = vrot.slane %v1739_v23, 6  ;;  %v879_v5 = vshll.u32 %v12766_v18, 16  ;;  %v3548_v23 = vld [vmem:[#allocation2 + $0x94] sm:$0xf]  ;;  %12229 = vmatprep.subr.bf16.mxu1 %v12713_v2 }
 0x126   : > { %v1734_v63 = vrot.slane %v1732_v61, 4  ;;  %v872_v17 = vrot.slane %v870_v36, 4  ;;  %v875_v44 = vrot.slane %v873_v42, 5  ;;  %v883_v43 = vshrl.u32 %v12766_v18, 16  ;;  %v3549_v36 = vld [vmem:[#allocation2 + $0x98] sm:$0x1] }
 0x127   : > { %v3138_v35 = vor.u32 %v3137_v52, %v3134_v11  ;;  %v1733_v40 = vsel %vm13509_vm6, %v1724_v39, %v1732_v61  ;;  %v1742_v41 = vor.u32 %v1741_v1, %v1738_v33  ;;  %v881_v4 = vrot.slane %v879_v5, 5  ;;  %v12768_v39 = vld [vmem:[#allocation2 + $0x58] sm:$0xf]  ;;  %v12769_v18 = vld [vmem:[#allocation2 + $0x5c] sm:$0x1] }
 0x128   : > { %v889_v46 = vshll.u32 %v12767_v6, 16  ;;  %v1745_v0 = vshrl.u32 %v1518_v37, 16  ;;  %v876_v49 = vor.u32 %v875_v44, %v872_v17  ;;  %v885_v55 = vrot.slane %v883_v43, 4  ;;  %v4934_v59 = vld [vmem:[#allocation3 + $0xc8] sm:$0xff] }
 0x129   : > { %v3139_v48 = vsel %vm13509_vm6, %v3130_v54, %v3138_v35  ;;  %v1748_v57 = vshll.u32 %v1518_v37, 16  ;;  %v1743_v3 = vsel %vm13509_vm6, %v1734_v63, %v1742_v41  ;;  %5405 = vmatmul.mubr.bf16.gmra.mrb[20].mxu0 %v4934_v59  ;;  %v1754_v22 = vshrl.u32 %v1519_v60, 16  ;;  %v3959_v37 = vld [vmem:[#allocation2 + $0x90] sm:$0xe]  ;;  %v347_v35 = vld [vmem:[#allocation2 + $0x8c] sm:$0x2] }
 0x12a   : > { %v11633_v62 = vcombine.low %v3129_v10, %v3139_v48  ;;  %v891_v50 = vrot.slane %v889_v46, 5  ;;  %v1747_v15 = vrot.slane %v1745_v0, 5  ;;  %v11566_v9 = vcombine.low %v1733_v40, %v1743_v3  ;;  %v2667_v0 = vld [vmem:[#allocation2 + $0x88] sm:$0xf]  ;;  %v1521_v59 = vld [vmem:[#allocation2 + $0x60] sm:$0xe] }
 0x12b   : > { %v877_v12 = vrot.slane %v876_v49, 4  ;;  %v886_v20 = vor.u32 %v885_v55, %v881_v4  ;;  %v1750_v7 = vrot.slane %v1748_v57, 6  ;;  %v1757_v53 = vshll.u32 %v1519_v60, 16 }
 0x12c   : > { %3422 = vrot.lane.b32.xlu1 %v11633_v62, %s12939_s27  ;;  %v1764_v58 = vshrl.u32 %v1520_v32, 16  ;;  %v1767_v16 = vshll.u32 %v1520_v32, 16  ;;  %v2582_v24 = vsel %vm1416_vm8, %v11566_v9, %v2537_v21  ;;  %v1756_v26 = vrot.slane %v1754_v22, 5  ;;  %v2666_v32 = vld [vmem:[#allocation2 + $0x84] sm:$0xe]  ;;  %v2539_v9 = vpop.permute.xlu0 %2538  ;;  %v12714_v22 = vld [vmem:[%s16371_s1 + $0xb8] sm:$0xff]  }
 0x12d   : > { %v882_v28 = vsel %vm13103_vm14, %v877_v12, %v881_v4  ;;  %v887_v29 = vrot.slane %v886_v20, 4  ;;  %v1751_v30 = vor.u32 %v1750_v7, %v1747_v15  ;;  %2626 = vst [vmem:[#allocation3 + $0xf8] sm:$0xff] %v2582_v24  ;;  %v1759_v38 = vrot.slane %v1757_v53, 6  ;;  %v1523_v21 = vld [vmem:[#allocation2 + $0x68] sm:$0x3]  ;;  %12230 = vmatpush3.bf16.msra.mxu1 %v12714_v22 }
 0x12e   : > { %v1766_v33 = vrot.slane %v1764_v58, 5  ;;  %v1769_v54 = vrot.slane %v1767_v16, 6  ;;  %v894_v10 = vshrl.u32 %v695_v19, 16  ;;  %v897_v61 = vshll.u32 %v695_v19, 16  ;;  %v1522_v19 = vld [vmem:[#allocation2 + $0x64] sm:$0xf] }
 0x12f   : > { %v892_v25 = vsel %vm13103_vm14, %v887_v29, %v891_v50  ;;  %v1752_v13 = vrot.slane %v1751_v30, 4  ;;  %v1760_v11 = vor.u32 %v1759_v38, %v1756_v26  ;;  %v903_v42 = vshll.u32 %v12768_v39, 16 }
 0x130   : > { %v11534_v27 = vcombine.low %v882_v28, %v892_v25  ;;  %v1770_v52 = vor.u32 %v1769_v54, %v1766_v33  ;;  %v896_v63 = vrot.slane %v894_v10, 4  ;;  %v899_v1 = vrot.slane %v897_v61, 5 }
 0x131   : > { %v907_v17 = vshrl.u32 %v12768_v39, 16  ;;  %v913_v5 = vshll.u32 %v12769_v18, 16  ;;  %v1761_v44 = vsel %vm13509_vm6, %v1752_v13, %v1760_v11  ;;  %v1762_v43 = vrot.slane %v1760_v11, 4 }
 0x132   : > { %v1443_v40 = vsel %vm1416_vm8, %v11534_v27, %v1397_v31  ;;  %v905_v60 = vrot.slane %v903_v42, 5  ;;  %v900_v41 = vor.u32 %v899_v1, %v896_v63  ;;  %v11650_v46 = vrot.slane %v3959_v37, 9 }
 0x133   : > { %1487 = vst [vmem:[#allocation3 + $0xf0] sm:$0xff] %v1443_v40  ;;  %v909_v4 = vrot.slane %v907_v17, 4  ;;  %v915_v6 = vrot.slane %v913_v5, 5  ;;  %v1771_v48 = vsel %vm13509_vm6, %v1762_v43, %v1770_v52  ;;  %v4085_v49 = vrot.slane %v3548_v23, 5  ;;  %v698_v40 = vld [vmem:[#allocation2 + $0x60] sm:$0xf] }
 0x134   : > { %v4088_v55 = vrot.slane %v3549_v36, 5  ;;  %v348_v57 = vsel %vm13447_vm4, 0, %v347_v35  ;;  %v11567_v62 = vcombine.low %v1761_v44, %v1771_v48  ;;  %v901_v3 = vrot.slane %v900_v41, 4  ;;  %v4940_v8 = vld [vmem:[#allocation3 + $0xf8] sm:$0xff]  ;;  %v1399_v36 = vpop.permute.xlu1 %1398  ;;  %v1524_v41 = vld [vmem:[#allocation2 + $0x6c] sm:$0xe] }
 0x135   : > { %v910_v50 = vor.u32 %v909_v4, %v905_v60  ;;  %349 = vst [vmem:[#allocation2 + $0x8c] sm:$0x2] %v348_v57  ;;  %v3141_v15 = vshrl.u32 %v2666_v32, 16  ;;  %v4086_v12 = vsel %vm13040_vm13, %v11650_v46, %v4085_v49  ;;  %v4087_v20 = vrot.slane %v4085_v49, 4  ;;  %5412 = vmatprep.mubr.bf16.mxu0 %v4940_v8  ;;  %v12715_v49 = vld [vmem:[%s16371_s1 + $0x110] sm:$0xff]  }
 0x136   : > { %v3144_v7 = vshll.u32 %v2666_v32, 16  ;;  %v3150_v14 = vshrl.u32 %v2667_v0, 16  ;;  %v2586_v53 = vsel %vm1416_vm8, %v11567_v62, %v2539_v9  ;;  %v906_v58 = vsel %vm13103_vm14, %v901_v3, %v905_v60  ;;  %v12770_v62 = vld [vmem:[#allocation2 + $0x64] sm:$0xf]  ;;  %v1525_v9 = vld [vmem:[#allocation2 + $0x70] sm:$0xf]  ;;  %12595 = vmatprep.subr.bf16.mxu0 %v12715_v49 }
 0x137   : > { %v911_v16 = vrot.slane %v910_v50, 4  ;;  %v3143_v24 = vrot.slane %v3141_v15, 5  ;;  %2627 = vst [vmem:[#allocation3 + $0x120] sm:$0xff] %v2586_v53  ;;  %v4089_v28 = vsel %vm13040_vm13, %v4087_v20, %v4088_v55  ;;  %v3153_v26 = vshll.u32 %v2667_v0, 16  ;;  %12596 = vmatpush3.bf16.msra.mxu0 %v12715_v49  ;;  %v12771_v53 = vld [vmem:[#allocation2 + $0x68] sm:$0x1] }
 0x138   : > { %v3146_v29 = vrot.slane %v3144_v7, 6  ;;  %v3152_v30 = vrot.slane %v3150_v14, 5  ;;  %v11682_v33 = vcombine.low %v4086_v12, %v4089_v28  ;;  %v1773_v54 = vshrl.u32 %v1521_v59, 16  ;;  %v12772_v49 = vld [vmem:[#allocation2 + $0x70] sm:$0xf] }
 0x139   : > { %v916_v38 = vsel %vm13103_vm14, %v911_v16, %v915_v6  ;;  %v1776_v2 = vshll.u32 %v1521_v59, 16  ;;  %v3155_v10 = vrot.slane %v3153_v26, 6  ;;  %v1782_v61 = vshrl.u32 %v1522_v19, 16 }
 0x13a   : > { %v11535_v25 = vcombine.low %v906_v58, %v916_v38  ;;  %v3147_v13 = vor.u32 %v3146_v29, %v3143_v24  ;;  %v4939_v23 = vld [vmem:[#allocation3 + $0xf0] sm:$0xff]  ;;  %4241 = vrot.lane.b32.xlu0 %v11682_v33, %s12939_s27  ;;  %v1775_v37 = vrot.slane %v1773_v54, 5  ;;  %v1785_v11 = vshll.u32 %v1522_v19, 16 }
 0x13b   : > { %v1778_v27 = vrot.slane %v1776_v2, 6  ;;  %v1792_v52 = vshrl.u32 %v1523_v21, 16  ;;  %5413 = vmatmul.mubr.bf16.gmra.mrb[24].mxu0 %v4939_v23  ;;  %v3156_v63 = vor.u32 %v3155_v10, %v3152_v30  ;;  %v1784_v1 = vrot.slane %v1782_v61, 5  ;;  %v1526_v30 = vld [vmem:[#allocation2 + $0x74] sm:$0x3]  ;;  %v2541_v10 = vpop.permute.xlu0 %2540 }
 0x13c   : > { %v1447_v39 = vsel %vm1416_vm8, %v11535_v25, %v1399_v36  ;;  %v2854_v42 = vld [vmem:[#allocation2 + $0x8c] sm:$0x3]  ;;  %v3148_v31 = vrot.slane %v3147_v13, 4  ;;  %v1787_v35 = vrot.slane %v1785_v11, 6  ;;  %v1795_v32 = vshll.u32 %v1523_v21, 16 }
 0x13d   : > { %1488 = vst [vmem:[#allocation3 + $0x118] sm:$0xff] %v1447_v39  ;;  %v3160_v17 = vshrl.u32 %v2854_v42, 16  ;;  %v3163_v18 = vshll.u32 %v2854_v42, 16  ;;  %v1779_v5 = vor.u32 %v1778_v27, %v1775_v37  ;;  %v3158_v43 = vrot.slane %v3156_v63, 4  ;;  %v701_v13 = vld [vmem:[#allocation2 + $0x6c] sm:$0xf] }
 0x13e   : > { %v3157_v44 = vsel %vm13509_vm6, %v3148_v31, %v3156_v63  ;;  %v1794_v60 = vrot.slane %v1792_v52, 5  ;;  %v1788_v0 = vor.u32 %v1787_v35, %v1784_v1  ;;  %v4945_v48 = vld [vmem:[#allocation3 + $0x120] sm:$0xff]  ;;  %v1797_v55 = vrot.slane %v1795_v32, 6 }
 0x13f   : > { %v3162_v4 = vrot.slane %v3160_v17, 5  ;;  %v3165_v6 = vrot.slane %v3163_v18, 6  ;;  %v1780_v46 = vrot.slane %v1779_v5, 4  ;;  %v918_v57 = vshrl.u32 %v698_v40, 16  ;;  %5420 = vmatprep.mubr.bf16.mxu0 %v4945_v48  ;;  %v3960_v17 = vld [vmem:[#allocation2 + $0x9c] sm:$0xe] }
 0x140   : > { %v921_v59 = vshll.u32 %v698_v40, 16  ;;  %v927_v3 = vshll.u32 %v12770_v62, 16  ;;  %v1790_v19 = vrot.slane %v1788_v0, 4  ;;  %v931_v8 = vshrl.u32 %v12770_v62, 16 }
 0x141   : > { %v3166_v50 = vor.u32 %v3165_v6, %v3162_v4  ;;  %v1789_v15 = vsel %vm13509_vm6, %v1780_v46, %v1788_v0  ;;  %v1798_v12 = vor.u32 %v1797_v55, %v1794_v60  ;;  %v920_v20 = vrot.slane %v918_v57, 4  ;;  %v350_v6 = vld [vmem:[#allocation2 + $0x98] sm:$0x2]  ;;  %v1401_v46 = vpop.permute.xlu1 %1400 }
 0x142   : > { %v923_v7 = vrot.slane %v921_v59, 5  ;;  %v929_v14 = vrot.slane %v927_v3, 5  ;;  %v933_v22 = vrot.slane %v931_v8, 4  ;;  %v937_v58 = vshll.u32 %v12771_v53, 16 }
 0x143   : > { %v3167_v21 = vsel %vm13509_vm6, %v3158_v43, %v3166_v50  ;;  %v1801_v16 = vshrl.u32 %v1524_v41, 16  ;;  %v1799_v28 = vsel %vm13509_vm6, %v1790_v19, %v1798_v12  ;;  %v1804_v26 = vshll.u32 %v1524_v41, 16  ;;  %v3552_v43 = vld [vmem:[#allocation2 + $0xa4] sm:$0x1] }
 0x144   : > { %v11634_v24 = vcombine.low %v3157_v44, %v3167_v21  ;;  %v924_v29 = vor.u32 %v923_v7, %v920_v20  ;;  %v4944_v38 = vld [vmem:[#allocation3 + $0x118] sm:$0xff]  ;;  %v11568_v33 = vcombine.low %v1789_v15, %v1799_v28  ;;  %v934_v54 = vor.u32 %v933_v22, %v929_v14  ;;  %v3551_v44 = vld [vmem:[#allocation2 + $0xa0] sm:$0xf] }
 0x145   : > { %v939_v2 = vrot.slane %v937_v58, 5  ;;  %v1803_v25 = vrot.slane %v1801_v16, 5  ;;  %5421 = vmatmul.mubr.bf16.gmra.mrb[28].mxu0 %v4944_v38  ;;  %v1806_v23 = vrot.slane %v1804_v26, 6  ;;  %v1810_v36 = vshrl.u32 %v1525_v9, 16  ;;  %v2669_v15 = vld [vmem:[#allocation2 + $0x90] sm:$0xe]  ;;  %v2543_v26 = vpop.permute.xlu0 %2542 }
 0x146   : > { %3424 = vrot.lane.b32.xlu1 %v11634_v24, %s12939_s27  ;;  %v925_v61 = vrot.slane %v924_v29, 4  ;;  %v1813_v37 = vshll.u32 %v1525_v9, 16  ;;  %v2590_v27 = vsel %vm1416_vm8, %v11568_v33, %v2541_v10  ;;  %v935_v11 = vrot.slane %v934_v54, 4  ;;  %v12773_v9 = vld [vmem:[#allocation2 + $0x74] sm:$0x1] }
 0x147   : > { %v1820_v52 = vshrl.u32 %v1526_v30, 16  ;;  %v1823_v39 = vshll.u32 %v1526_v30, 16  ;;  %2628 = vst [vmem:[#allocation3 + $0x148] sm:$0xff] %v2590_v27  ;;  %v1807_v31 = vor.u32 %v1806_v23, %v1803_v25  ;;  %v1812_v63 = vrot.slane %v1810_v36, 5  ;;  %v2670_v7 = vld [vmem:[#allocation2 + $0x94] sm:$0xf] }
 0x148   : > { %v930_v42 = vsel %vm13103_vm14, %v925_v61, %v929_v14  ;;  %v1815_v1 = vrot.slane %v1813_v37, 6  ;;  %v940_v18 = vsel %vm13103_vm14, %v935_v11, %v939_v2  ;;  %v942_v40 = vshrl.u32 %v701_v13, 16  ;;  %v1527_v29 = vld [vmem:[#allocation2 + $0x78] sm:$0xe]  ;;  %v1528_v25 = vld [vmem:[#allocation2 + $0x7c] sm:$0xf] }
 0x149   : > { %v1822_v5 = vrot.slane %v1820_v52, 5  ;;  %v1825_v35 = vrot.slane %v1823_v39, 6  ;;  %v11536_v60 = vcombine.low %v930_v42, %v940_v18  ;;  %v1808_v32 = vrot.slane %v1807_v31, 4 }
 0x14a   : > { %v1816_v41 = vor.u32 %v1815_v1, %v1812_v63  ;;  %v945_v4 = vshll.u32 %v701_v13, 16  ;;  %v944_v48 = vrot.slane %v942_v40, 4  ;;  %v951_v55 = vshll.u32 %v12772_v49, 16  ;;  %v1529_v13 = vld [vmem:[#allocation2 + $0x80] sm:$0x3] }
 0x14b   : > { %v1826_v0 = vor.u32 %v1825_v35, %v1822_v5  ;;  %v955_v57 = vshrl.u32 %v12772_v49, 16  ;;  %v1451_v59 = vsel %vm1416_vm8, %v11536_v60, %v1401_v46  ;;  %v961_v12 = vshll.u32 %v12773_v9, 16  ;;  %v704_v35 = vld [vmem:[#allocation2 + $0x78] sm:$0xf] }
 0x14c   : > { %v1817_v62 = vsel %vm13509_vm6, %v1808_v32, %v1816_v41  ;;  %v1818_v3 = vrot.slane %v1816_v41, 4  ;;  %v947_v50 = vrot.slane %v945_v4, 5  ;;  %1489 = vst [vmem:[#allocation3 + $0x140] sm:$0xff] %v1451_v59  ;;  %v953_v19 = vrot.slane %v951_v55, 5 }
 0x14d   : > { %v957_v8 = vrot.slane %v955_v57, 4  ;;  %v11651_v20 = vrot.slane %v3960_v17, 9  ;;  %v4092_v22 = vrot.slane %v3551_v44, 5  ;;  %v4095_v53 = vrot.slane %v3552_v43, 5  ;;  %v1403_v44 = vpop.permute.xlu1 %1402 }
 0x14e   : > { %v1827_v14 = vsel %vm13509_vm6, %v1818_v3, %v1826_v0  ;;  %v948_v21 = vor.u32 %v947_v50, %v944_v48  ;;  %v963_v24 = vrot.slane %v961_v12, 5  ;;  %v351_v28 = vsel %vm13447_vm4, 0, %v350_v6  ;;  %v4950_v30 = vld [vmem:[#allocation3 + $0x148] sm:$0xff] }
 0x14f   : > { %v11569_v58 = vcombine.low %v1817_v62, %v1827_v14  ;;  %v958_v16 = vor.u32 %v957_v8, %v953_v19  ;;  %v4093_v33 = vsel %vm13040_vm13, %v11651_v20, %v4092_v22  ;;  %v4094_v54 = vrot.slane %v4092_v22, 4  ;;  %352 = vst [vmem:[#allocation2 + $0x98] sm:$0x2] %v351_v28  ;;  %5428 = vmatprep.mubr.bf16.mxu0 %v4950_v30  ;;  %v12774_v28 = vld [vmem:[#allocation2 + $0x7c] sm:$0xf] }
 0x150   : > { %v949_v38 = vrot.slane %v948_v21, 4  ;;  %v3169_v2 = vshrl.u32 %v2669_v15, 16  ;;  %v3172_v23 = vshll.u32 %v2669_v15, 16  ;;  %v3178_v36 = vshrl.u32 %v2670_v7, 16  ;;  %v12716_v30 = vld [vmem:[%s16371_s1 + $0x118] sm:$0xff]  }
 0x151   : > { %v2594_v10 = vsel %vm1416_vm8, %v11569_v58, %v2543_v26  ;;  %v959_v61 = vrot.slane %v958_v16, 4  ;;  %v4096_v27 = vsel %vm13040_vm13, %v4094_v54, %v4095_v53  ;;  %v3181_v52 = vshll.u32 %v2670_v7, 16  ;;  %v1530_v53 = vld [vmem:[#allocation2 + $0x84] sm:$0xe]  ;;  %12597 = vmatprep.subr.bf16.mxu0 %v12716_v30 }
 0x152   : > { %2629 = vst [vmem:[#allocation3 + $0x170] sm:$0xff] %v2594_v10  ;;  %v954_v37 = vsel %vm13103_vm14, %v949_v38, %v953_v19  ;;  %v3171_v11 = vrot.slane %v3169_v2, 5  ;;  %v11683_v42 = vcombine.low %v4093_v33, %v4096_v27  ;;  %v3174_v31 = vrot.slane %v3172_v23, 6  ;;  %v1531_v2 = vld [vmem:[#allocation2 + $0x88] sm:$0xf]  ;;  %12598 = vmatpush3.bf16.msra.mxu0 %v12716_v30 }
 0x153   : > { %v964_v39 = vsel %vm13103_vm14, %v959_v61, %v963_v24  ;;  %v3180_v63 = vrot.slane %v3178_v36, 5  ;;  %v3183_v17 = vrot.slane %v3181_v52, 6  ;;  %v1829_v18 = vshrl.u32 %v1527_v29, 16  ;;  %v4949_v40 = vld [vmem:[#allocation3 + $0x140] sm:$0xff]  ;;  %v12775_v61 = vld [vmem:[#allocation2 + $0x80] sm:$0x1] }
 0x154   : > { %v11537_v1 = vcombine.low %v954_v37, %v964_v39  ;;  %v1832_v5 = vshll.u32 %v1527_v29, 16  ;;  %4243 = vrot.lane.b32.xlu0 %v11683_v42, %s12939_s27  ;;  %v3175_v43 = vor.u32 %v3174_v31, %v3171_v11  ;;  %v1838_v60 = vshrl.u32 %v1528_v25, 16  ;;  %5429 = vmatmul.mubr.bf16.gmra.mrb[32].mxu0 %v4949_v40  ;;  %v2545_v40 = vpop.permute.xlu0 %2544 }
 0x155   : > { %v1841_v32 = vshll.u32 %v1528_v25, 16  ;;  %v1848_v41 = vshrl.u32 %v1529_v13, 16  ;;  %v3184_v6 = vor.u32 %v3183_v17, %v3180_v63  ;;  %v1831_v46 = vrot.slane %v1829_v18, 5  ;;  %v1532_v25 = vld [vmem:[#allocation2 + $0x8c] sm:$0x3] }
 0x156   : > { %v1455_v4 = vsel %vm1416_vm8, %v11537_v1, %v1403_v44  ;;  %v1834_v0 = vrot.slane %v1832_v5, 6  ;;  %v2855_v48 = vld [vmem:[#allocation2 + $0x98] sm:$0x3]  ;;  %v3176_v49 = vrot.slane %v3175_v43, 4  ;;  %v1840_v55 = vrot.slane %v1838_v60, 5 }
 0x157   : > { %1490 = vst [vmem:[#allocation3 + $0x168] sm:$0xff] %v1455_v4  ;;  %v1843_v57 = vrot.slane %v1841_v32, 6  ;;  %v1850_v59 = vrot.slane %v1848_v41, 5  ;;  %v3186_v62 = vrot.slane %v3184_v6, 4  ;;  %v3188_v3 = vshrl.u32 %v2855_v48, 16 }
 0x158   : > { %v3191_v50 = vshll.u32 %v2855_v48, 16  ;;  %v1835_v15 = vor.u32 %v1834_v0, %v1831_v46  ;;  %v3185_v19 = vsel %vm13509_vm6, %v3176_v49, %v3184_v6  ;;  %v1851_v9 = vshll.u32 %v1529_v13, 16  ;;  %v707_v41 = vld [vmem:[#allocation2 + $0x84] sm:$0xf] }
 0x159   : > { %v1844_v8 = vor.u32 %v1843_v57, %v1840_v55  ;;  %v966_v12 = vshrl.u32 %v704_v35, 16  ;;  %v4955_v20 = vld [vmem:[#allocation3 + $0x170] sm:$0xff]  ;;  %v3190_v7 = vrot.slane %v3188_v3, 5  ;;  %v969_v22 = vshll.u32 %v704_v35, 16 }
 0x15a   : > { %v3193_v14 = vrot.slane %v3191_v50, 6  ;;  %v1836_v21 = vrot.slane %v1835_v15, 4  ;;  %5436 = vmatprep.mubr.bf16.mxu0 %v4955_v20  ;;  %v1853_v16 = vrot.slane %v1851_v9, 6  ;;  %v975_v29 = vshll.u32 %v12774_v28, 16  ;;  %v3554_v15 = vld [vmem:[#allocation2 + $0xac] sm:$0xf] }
 0x15b   : > { %v1846_v58 = vrot.slane %v1844_v8, 4  ;;  %v968_v24 = vrot.slane %v966_v12, 4  ;;  %v971_v33 = vrot.slane %v969_v22, 5  ;;  %v979_v54 = vshrl.u32 %v12774_v28, 16  ;;  %v12776_v12 = vld [vmem:[#allocation2 + $0x88] sm:$0xf] }
 0x15c   : > { %v3194_v26 = vor.u32 %v3193_v14, %v3190_v7  ;;  %v1845_v38 = vsel %vm13509_vm6, %v1836_v21, %v1844_v8  ;;  %v1854_v13 = vor.u32 %v1853_v16, %v1850_v59  ;;  %v977_v10 = vrot.slane %v975_v29, 5  ;;  %v3555_v7 = vld [vmem:[#allocation2 + $0xb0] sm:$0x1]  ;;  %v3961_v14 = vld [vmem:[#allocation2 + $0xa8] sm:$0xe]  ;;  %v1405_v21 = vpop.permute.xlu1 %1404 }
 0x15d   : > { %v985_v23 = vshll.u32 %v12775_v61, 16  ;;  %v1857_v36 = vshrl.u32 %v1530_v53, 16  ;;  %v972_v27 = vor.u32 %v971_v33, %v968_v24  ;;  %v981_v11 = vrot.slane %v979_v54, 4  ;;  %v12777_v16 = vld [vmem:[#allocation2 + $0x8c] sm:$0x1] }
 0x15e   : > { %v3195_v37 = vsel %vm13509_vm6, %v3186_v62, %v3194_v26  ;;  %v1860_v52 = vshll.u32 %v1530_v53, 16  ;;  %v4954_v39 = vld [vmem:[#allocation3 + $0x168] sm:$0xff]  ;;  %v1855_v31 = vsel %vm13509_vm6, %v1846_v58, %v1854_v13  ;;  %v1866_v44 = vshrl.u32 %v1531_v2, 16  ;;  %v2672_v33 = vld [vmem:[#allocation2 + $0x9c] sm:$0xe] }
 0x15f   : > { %v11635_v42 = vcombine.low %v3185_v19, %v3195_v37  ;;  %v987_v63 = vrot.slane %v985_v23, 5  ;;  %v1859_v1 = vrot.slane %v1857_v36, 5  ;;  %5437 = vmatmul.mubr.bf16.gmra.mrb[36].mxu0 %v4954_v39  ;;  %v11570_v17 = vcombine.low %v1845_v38, %v1855_v31  ;;  %v353_v28 = vld [vmem:[#allocation2 + $0xa4] sm:$0x2]  ;;  %v2547_v31 = vpop.permute.xlu0 %2546 }
 0x160   : > { %v973_v18 = vrot.slane %v972_v27, 4  ;;  %v982_v5 = vor.u32 %v981_v11, %v977_v10  ;;  %v1862_v35 = vrot.slane %v1860_v52, 6  ;;  %v1869_v43 = vshll.u32 %v1531_v2, 16 }
 0x161   : > { %3426 = vrot.lane.b32.xlu1 %v11635_v42, %s12939_s27  ;;  %v1876_v60 = vshrl.u32 %v1532_v25, 16  ;;  %v1879_v32 = vshll.u32 %v1532_v25, 16  ;;  %v2598_v4 = vsel %vm1416_vm8, %v11570_v17, %v2545_v40  ;;  %v1868_v48 = vrot.slane %v1866_v44, 5 }
 0x162   : > { %v978_v6 = vsel %vm13103_vm14, %v973_v18, %v977_v10  ;;  %v983_v46 = vrot.slane %v982_v5, 4  ;;  %v1863_v0 = vor.u32 %v1862_v35, %v1859_v1  ;;  %2630 = vst [vmem:[#allocation3 + $0x198] sm:$0xff] %v2598_v4  ;;  %v1871_v49 = vrot.slane %v1869_v43, 6  ;;  %v2673_v10 = vld [vmem:[#allocation2 + $0xa0] sm:$0xf] }
 0x163   : > { %v1878_v55 = vrot.slane %v1876_v60, 5  ;;  %v1881_v57 = vrot.slane %v1879_v32, 6  ;;  %v990_v3 = vshrl.u32 %v707_v41, 16  ;;  %v993_v50 = vshll.u32 %v707_v41, 16  ;;  %v1533_v5 = vld [vmem:[#allocation2 + $0x90] sm:$0xe] }
 0x164   : > { %v988_v59 = vsel %vm13103_vm14, %v983_v46, %v987_v63  ;;  %v1864_v62 = vrot.slane %v1863_v0, 4  ;;  %v1872_v8 = vor.u32 %v1871_v49, %v1868_v48  ;;  %v999_v20 = vshll.u32 %v12776_v12, 16  ;;  %v1534_v60 = vld [vmem:[#allocation2 + $0x94] sm:$0xf]  ;;  %v1535_v46 = vld [vmem:[#allocation2 + $0x98] sm:$0x3] }
 0x165   : > { %v11538_v19 = vcombine.low %v978_v6, %v988_v59  ;;  %v1882_v9 = vor.u32 %v1881_v57, %v1878_v55  ;;  %v992_v22 = vrot.slane %v990_v3, 4  ;;  %v995_v53 = vrot.slane %v993_v50, 5 }
 0x166   : > { %v1003_v58 = vshrl.u32 %v12776_v12, 16  ;;  %v1009_v24 = vshll.u32 %v12777_v16, 16  ;;  %v1873_v30 = vsel %vm13509_vm6, %v1864_v62, %v1872_v8  ;;  %v1874_v26 = vrot.slane %v1872_v8, 4 }
 0x167   : > { %v1459_v29 = vsel %vm1416_vm8, %v11538_v19, %v1405_v21  ;;  %v1001_v38 = vrot.slane %v999_v20, 5  ;;  %v996_v54 = vor.u32 %v995_v53, %v992_v22  ;;  %v11652_v13 = vrot.slane %v3961_v14, 9 }
 0x168   : > { %1491 = vst [vmem:[#allocation3 + $0x190] sm:$0xff] %v1459_v29  ;;  %v1005_v2 = vrot.slane %v1003_v58, 4  ;;  %v1011_v25 = vrot.slane %v1009_v24, 5  ;;  %v1883_v61 = vsel %vm13509_vm6, %v1874_v26, %v1882_v9  ;;  %v4099_v23 = vrot.slane %v3554_v15, 5  ;;  %v1407_v15 = vpop.permute.xlu1 %1406 }
 0x169   : > { %v4102_v36 = vrot.slane %v3555_v7, 5  ;;  %v354_v37 = vsel %vm13447_vm4, 0, %v353_v28  ;;  %v11571_v27 = vcombine.low %v1873_v30, %v1883_v61  ;;  %v997_v11 = vrot.slane %v996_v54, 4  ;;  %v4960_v42 = vld [vmem:[#allocation3 + $0x198] sm:$0xff] }
 0x16a   : > { %v1006_v52 = vor.u32 %v1005_v2, %v1001_v38  ;;  %355 = vst [vmem:[#allocation2 + $0xa4] sm:$0x2] %v354_v37  ;;  %v3197_v39 = vshrl.u32 %v2672_v33, 16  ;;  %v4100_v63 = vsel %vm13040_vm13, %v11652_v13, %v4099_v23  ;;  %v4101_v1 = vrot.slane %v4099_v23, 4  ;;  %5444 = vmatprep.mubr.bf16.mxu0 %v4960_v42  ;;  %v710_v28 = vld [vmem:[#allocation2 + $0x90] sm:$0xf] }
 0x16b   : > { %v3200_v17 = vshll.u32 %v2672_v33, 16  ;;  %v3206_v18 = vshrl.u32 %v2673_v10, 16  ;;  %v2602_v35 = vsel %vm1416_vm8, %v11571_v27, %v2547_v31  ;;  %v1002_v40 = vsel %vm13103_vm14, %v997_v11, %v1001_v38  ;;  %v1536_v27 = vld [vmem:[#allocation2 + $0x9c] sm:$0xe] }
 0x16c   : > { %v1007_v44 = vrot.slane %v1006_v52, 4  ;;  %v3199_v43 = vrot.slane %v3197_v39, 5  ;;  %2631 = vst [vmem:[#allocation3 + $0x1c0] sm:$0xff] %v2602_v35  ;;  %v4103_v32 = vsel %vm13040_vm13, %v4101_v1, %v4102_v36  ;;  %v3209_v6 = vshll.u32 %v2673_v10, 16  ;;  %v12778_v36 = vld [vmem:[#allocation2 + $0x94] sm:$0xf] }
 0x16d   : > { %v3202_v41 = vrot.slane %v3200_v17, 6  ;;  %v3208_v4 = vrot.slane %v3206_v18, 5  ;;  %v11684_v48 = vcombine.low %v4100_v63, %v4103_v32  ;;  %v1885_v49 = vshrl.u32 %v1533_v5, 16  ;;  %v12779_v35 = vld [vmem:[#allocation2 + $0x98] sm:$0x1] }
 0x16e   : > { %v1012_v0 = vsel %vm13103_vm14, %v1007_v44, %v1011_v25  ;;  %v1888_v55 = vshll.u32 %v1533_v5, 16  ;;  %v3211_v62 = vrot.slane %v3209_v6, 6  ;;  %v1894_v3 = vshrl.u32 %v1534_v60, 16  ;;  %v1537_v44 = vld [vmem:[#allocation2 + $0xa0] sm:$0xf] }
 0x16f   : > { %v11539_v57 = vcombine.low %v1002_v40, %v1012_v0  ;;  %v3203_v59 = vor.u32 %v3202_v41, %v3199_v43  ;;  %v4959_v50 = vld [vmem:[#allocation3 + $0x190] sm:$0xff]  ;;  %4245 = vrot.lane.b32.xlu0 %v11684_v48, %s12939_s27  ;;  %v1887_v19 = vrot.slane %v1885_v49, 5  ;;  %v1897_v9 = vshll.u32 %v1534_v60, 16 }
 0x170   : > { %v1890_v8 = vrot.slane %v1888_v55, 6  ;;  %v1904_v12 = vshrl.u32 %v1535_v46, 16  ;;  %5445 = vmatmul.mubr.bf16.gmra.mrb[40].mxu0 %v4959_v50  ;;  %v3212_v21 = vor.u32 %v3211_v62, %v3208_v4  ;;  %v1896_v22 = vrot.slane %v1894_v3, 5 }
 0x171   : > { %v1463_v20 = vsel %vm1416_vm8, %v11539_v57, %v1407_v15  ;;  %v2856_v7 = vld [vmem:[#allocation2 + $0xa4] sm:$0x3]  ;;  %v3204_v14 = vrot.slane %v3203_v59, 4  ;;  %v1899_v24 = vrot.slane %v1897_v9, 6  ;;  %v1907_v38 = vshll.u32 %v1535_v46, 16  ;;  %v2549_v57 = vpop.permute.xlu0 %2548 }
 0x172   : > { %1492 = vst [vmem:[#allocation3 + $0x1b8] sm:$0xff] %v1463_v20  ;;  %v3216_v53 = vshrl.u32 %v2856_v7, 16  ;;  %v3219_v58 = vshll.u32 %v2856_v7, 16  ;;  %v1891_v16 = vor.u32 %v1890_v8, %v1887_v19  ;;  %v3214_v30 = vrot.slane %v3212_v21, 4  ;;  %v1538_v4 = vld [vmem:[#allocation2 + $0xa4] sm:$0x3] }
 0x173   : > { %v3213_v29 = vsel %vm13509_vm6, %v3204_v14, %v3212_v21  ;;  %v1906_v26 = vrot.slane %v1904_v12, 5  ;;  %v1900_v25 = vor.u32 %v1899_v24, %v1896_v22  ;;  %v4965_v13 = vld [vmem:[#allocation3 + $0x1c0] sm:$0xff]  ;;  %v1909_v10 = vrot.slane %v1907_v38, 6  ;;  %v3962_v38 = vld [vmem:[#allocation2 + $0xb4] sm:$0xe] }
 0x174   : > { %v3218_v33 = vrot.slane %v3216_v53, 5  ;;  %v3221_v54 = vrot.slane %v3219_v58, 6  ;;  %v1892_v2 = vrot.slane %v1891_v16, 4  ;;  %v1014_v61 = vshrl.u32 %v710_v28, 16  ;;  %5452 = vmatprep.mubr.bf16.mxu0 %v4965_v13  ;;  %v713_v15 = vld [vmem:[#allocation2 + $0x9c] sm:$0xf] }
 0x175   : > { %v1017_v23 = vshll.u32 %v710_v28, 16  ;;  %v1023_v37 = vshll.u32 %v12778_v36, 16  ;;  %v1902_v39 = vrot.slane %v1900_v25, 4  ;;  %v1027_v42 = vshrl.u32 %v12778_v36, 16 }
 0x176   : > { %v3222_v11 = vor.u32 %v3221_v54, %v3218_v33  ;;  %v1901_v52 = vsel %vm13509_vm6, %v1892_v2, %v1900_v25  ;;  %v1910_v31 = vor.u32 %v1909_v10, %v1906_v26  ;;  %v1016_v63 = vrot.slane %v1014_v61, 4  ;;  %v3557_v26 = vld [vmem:[#allocation2 + $0xb8] sm:$0xf]  ;;  %v1409_v33 = vpop.permute.xlu1 %1408  ;;  %v12780_v25 = vld [vmem:[#allocation2 + $0xa0] sm:$0xf] }
 0x177   : > { %v1019_v1 = vrot.slane %v1017_v23, 5  ;;  %v1025_v17 = vrot.slane %v1023_v37, 5  ;;  %v1029_v5 = vrot.slane %v1027_v42, 4  ;;  %v1033_v40 = vshll.u32 %v12779_v35, 16  ;;  %v3558_v61 = vld [vmem:[#allocation2 + $0xbc] sm:$0x1] }
 0x178   : > { %v3223_v18 = vsel %vm13509_vm6, %v3214_v30, %v3222_v11  ;;  %v1913_v43 = vshrl.u32 %v1536_v27, 16  ;;  %v1911_v32 = vsel %vm13509_vm6, %v1902_v39, %v1910_v31  ;;  %v1916_v6 = vshll.u32 %v1536_v27, 16  ;;  %v356_v11 = vld [vmem:[#allocation2 + $0xb0] sm:$0x2]  ;;  %v12781_v42 = vld [vmem:[#allocation2 + $0xa4] sm:$0x1] }
 0x179   : > { %v11636_v60 = vcombine.low %v3213_v29, %v3223_v18  ;;  %v1020_v41 = vor.u32 %v1019_v1, %v1016_v63  ;;  %v4964_v46 = vld [vmem:[#allocation3 + $0x1b8] sm:$0xff]  ;;  %v11572_v0 = vcombine.low %v1901_v52, %v1911_v32  ;;  %v1030_v48 = vor.u32 %v1029_v5, %v1025_v17  ;;  %v2675_v1 = vld [vmem:[#allocation2 + $0xa8] sm:$0xe] }
 0x17a   : > { %v1035_v49 = vrot.slane %v1033_v40, 5  ;;  %v1915_v55 = vrot.slane %v1913_v43, 5  ;;  %5453 = vmatmul.mubr.bf16.gmra.mrb[44].mxu0 %v4964_v46  ;;  %v1918_v62 = vrot.slane %v1916_v6, 6  ;;  %v1922_v3 = vshrl.u32 %v1537_v44, 16  ;;  %v2676_v40 = vld [vmem:[#allocation2 + $0xac] sm:$0xf] }
 0x17b   : > { %3428 = vrot.lane.b32.xlu1 %v11636_v60, %s12939_s27  ;;  %v1021_v59 = vrot.slane %v1020_v41, 4  ;;  %v1925_v50 = vshll.u32 %v1537_v44, 16  ;;  %v2606_v19 = vsel %vm1416_vm8, %v11572_v0, %v2549_v57  ;;  %v1031_v8 = vrot.slane %v1030_v48, 4 }
 0x17c   : > { %v1932_v9 = vshrl.u32 %v1538_v4, 16  ;;  %v1935_v12 = vshll.u32 %v1538_v4, 16  ;;  %2632 = vst [vmem:[#allocation3 + $0x1e8] sm:$0xff] %v2606_v19  ;;  %v1919_v7 = vor.u32 %v1918_v62, %v1915_v55  ;;  %v1924_v14 = vrot.slane %v1922_v3, 5  ;;  %v2551_v4 = vpop.permute.xlu0 %2550  ;;  %v1539_v62 = vld [vmem:[#allocation2 + $0xa8] sm:$0xe] }
 0x17d   : > { %v1026_v20 = vsel %vm13103_vm14, %v1021_v59, %v1025_v17  ;;  %v1927_v21 = vrot.slane %v1925_v50, 6  ;;  %v1036_v22 = vsel %vm13103_vm14, %v1031_v8, %v1035_v49  ;;  %v1038_v16 = vshrl.u32 %v713_v15, 16  ;;  %v1540_v8 = vld [vmem:[#allocation2 + $0xac] sm:$0xf] }
 0x17e   : > { %v1934_v53 = vrot.slane %v1932_v9, 5  ;;  %v1937_v58 = vrot.slane %v1935_v12, 6  ;;  %v11540_v24 = vcombine.low %v1026_v20, %v1036_v22  ;;  %v1920_v28 = vrot.slane %v1919_v7, 4  ;;  %v716_v9 = vld [vmem:[#allocation2 + $0xa8] sm:$0xf] }
 0x17f   : > { %v1928_v29 = vor.u32 %v1927_v21, %v1924_v14  ;;  %v1041_v30 = vshll.u32 %v713_v15, 16  ;;  %v1040_v2 = vrot.slane %v1038_v16, 4  ;;  %v1047_v13 = vshll.u32 %v12780_v25, 16 }
 0x180   : > { %v1938_v54 = vor.u32 %v1937_v58, %v1934_v53  ;;  %v1051_v10 = vshrl.u32 %v12780_v25, 16  ;;  %v1467_v23 = vsel %vm1416_vm8, %v11540_v24, %v1409_v33  ;;  %v1057_v31 = vshll.u32 %v12781_v42, 16  ;;  %v1411_v24 = vpop.permute.xlu1 %1410 }
 0x181   : > { %v1929_v36 = vsel %vm13509_vm6, %v1920_v28, %v1928_v29  ;;  %v1930_v37 = vrot.slane %v1928_v29, 4  ;;  %v1043_v27 = vrot.slane %v1041_v30, 5  ;;  %1493 = vst [vmem:[#allocation3 + $0x1e0] sm:$0xff] %v1467_v23  ;;  %v1049_v52 = vrot.slane %v1047_v13, 5 }
 0x182   : > { %v1053_v39 = vrot.slane %v1051_v10, 4  ;;  %v11653_v63 = vrot.slane %v3962_v38, 9  ;;  %v4106_v5 = vrot.slane %v3557_v26, 5  ;;  %v4109_v35 = vrot.slane %v3558_v61, 5 }
 0x183   : > { %v1939_v17 = vsel %vm13509_vm6, %v1930_v37, %v1938_v54  ;;  %v1044_v18 = vor.u32 %v1043_v27, %v1040_v2  ;;  %v1059_v60 = vrot.slane %v1057_v31, 5  ;;  %v357_v32 = vsel %vm13447_vm4, 0, %v356_v11  ;;  %v4970_v41 = vld [vmem:[#allocation3 + $0x1e8] sm:$0xff] }
 0x184   : > { %v11573_v44 = vcombine.low %v1929_v36, %v1939_v17  ;;  %v1054_v43 = vor.u32 %v1053_v39, %v1049_v52  ;;  %v4107_v46 = vsel %vm13040_vm13, %v11653_v63, %v4106_v5  ;;  %v4108_v0 = vrot.slane %v4106_v5, 4  ;;  %358 = vst [vmem:[#allocation2 + $0xb0] sm:$0x2] %v357_v32  ;;  %5460 = vmatprep.mubr.bf16.mxu0 %v4970_v41 }
 0x185   : > { %v1045_v6 = vrot.slane %v1044_v18, 4  ;;  %v3225_v48 = vshrl.u32 %v2675_v1, 16  ;;  %v3228_v57 = vshll.u32 %v2675_v1, 16  ;;  %v3234_v59 = vshrl.u32 %v2676_v40, 16 }
 0x186   : > { %v2610_v49 = vsel %vm1416_vm8, %v11573_v44, %v2551_v4  ;;  %v1055_v55 = vrot.slane %v1054_v43, 4  ;;  %v4110_v50 = vsel %vm13040_vm13, %v4108_v0, %v4109_v35  ;;  %v3237_v19 = vshll.u32 %v2676_v40, 16  ;;  %v12783_v4 = vld [vmem:[#allocation2 + $0xb0] sm:$0x1] }
 0x187   : > { %2633 = vst [vmem:[#allocation3 + $0x210] sm:$0xff] %v2610_v49  ;;  %v1050_v3 = vsel %vm13103_vm14, %v1045_v6, %v1049_v52  ;;  %v3227_v15 = vrot.slane %v3225_v48, 5  ;;  %v11685_v20 = vcombine.low %v4107_v46, %v4110_v50  ;;  %v3230_v7 = vrot.slane %v3228_v57, 6  ;;  %v359_v46 = vld [vmem:[#allocation2 + $0xbc] sm:$0x2] }
 0x188   : > { %v1060_v12 = vsel %vm13103_vm14, %v1055_v55, %v1059_v60  ;;  %v3236_v14 = vrot.slane %v3234_v59, 5  ;;  %v3239_v22 = vrot.slane %v3237_v19, 6  ;;  %v1941_v53 = vshrl.u32 %v1539_v62, 16  ;;  %v4969_v16 = vld [vmem:[#allocation3 + $0x1e0] sm:$0xff]  ;;  %v12782_v60 = vld [vmem:[#allocation2 + $0xac] sm:$0xf] }
 0x189   : > { %v11541_v21 = vcombine.low %v1050_v3, %v1060_v12  ;;  %v1944_v58 = vshll.u32 %v1539_v62, 16  ;;  %4247 = vrot.lane.b32.xlu0 %v11685_v20, %s12939_s27  ;;  %v3231_v28 = vor.u32 %v3230_v7, %v3227_v15  ;;  %v1950_v29 = vshrl.u32 %v1540_v8, 16  ;;  %5461 = vmatmul.mubr.bf16.gmra.mrb[48].mxu0 %v4969_v16  ;;  %v1542_v57 = vld [vmem:[#allocation2 + $0xb4] sm:$0xe]  ;;  %v1543_v59 = vld [vmem:[#allocation2 + $0xb8] sm:$0xf] }
 0x18a   : > { %v1953_v30 = vshll.u32 %v1540_v8, 16  ;;  %v1062_v26 = vshrl.u32 %v716_v9, 16  ;;  %v3240_v33 = vor.u32 %v3239_v22, %v3236_v14  ;;  %v1943_v54 = vrot.slane %v1941_v53, 5  ;;  %v719_v19 = vld [vmem:[#allocation2 + $0xb4] sm:$0xf] }
 0x18b   : > { %v1471_v38 = vsel %vm1416_vm8, %v11541_v21, %v1411_v24  ;;  %v1946_v2 = vrot.slane %v1944_v58, 6  ;;  %v2857_v25 = vld [vmem:[#allocation2 + $0xb0] sm:$0x3]  ;;  %v3232_v13 = vrot.slane %v3231_v28, 4  ;;  %v1952_v61 = vrot.slane %v1950_v29, 5  ;;  %v2553_v58 = vpop.permute.xlu0 %2552 }
 0x18c   : > { %1494 = vst [vmem:[#allocation3 + $0x208] sm:$0xff] %v1471_v38  ;;  %v1541_v10 = vld [vmem:[#allocation2 + $0xb0] sm:$0x3]  ;;  %v3242_v23 = vrot.slane %v3240_v33, 4  ;;  %v3244_v36 = vshrl.u32 %v2857_v25, 16  ;;  %v3247_v37 = vshll.u32 %v2857_v25, 16 }
 0x18d   : > { %v1947_v27 = vor.u32 %v1946_v2, %v1943_v54  ;;  %v3241_v11 = vsel %vm13509_vm6, %v3232_v13, %v3240_v33  ;;  %v1955_v52 = vrot.slane %v1953_v30, 6  ;;  %v1960_v39 = vshrl.u32 %v1541_v10, 16 }
 0x18e   : > { %v1963_v42 = vshll.u32 %v1541_v10, 16  ;;  %v4975_v31 = vld [vmem:[#allocation3 + $0x210] sm:$0xff]  ;;  %v3246_v63 = vrot.slane %v3244_v36, 5  ;;  %v3249_v1 = vrot.slane %v3247_v37, 6  ;;  %v1064_v18 = vrot.slane %v1062_v26, 4 }
 0x18f   : > { %v1948_v17 = vrot.slane %v1947_v27, 4  ;;  %5468 = vmatprep.mubr.bf16.mxu0 %v4975_v31  ;;  %v1956_v5 = vor.u32 %v1955_v52, %v1952_v61  ;;  %v1962_v35 = vrot.slane %v1960_v39, 5  ;;  %v1065_v44 = vshll.u32 %v716_v9, 16  ;;  %v3963_v10 = vld [vmem:[#allocation2 + $0xc0] sm:$0xe] }
 0x190   : > { %v1965_v40 = vrot.slane %v1963_v42, 6  ;;  %v3250_v43 = vor.u32 %v3249_v1, %v3246_v63  ;;  %v1071_v32 = vshll.u32 %v12782_v60, 16  ;;  %v1075_v41 = vshrl.u32 %v12782_v60, 16  ;;  %v12784_v37 = vld [vmem:[#allocation2 + $0xb8] sm:$0xf] }
 0x191   : > { %v1081_v6 = vshll.u32 %v12783_v4, 16  ;;  %v1957_v0 = vsel %vm13509_vm6, %v1948_v17, %v1956_v5  ;;  %v1958_v48 = vrot.slane %v1956_v5, 4  ;;  %v1067_v55 = vrot.slane %v1065_v44, 5  ;;  %v12785_v42 = vld [vmem:[#allocation2 + $0xbc] sm:$0x1]  ;;  %v1413_v17 = vpop.permute.xlu1 %1412 }
 0x192   : > { %v1966_v49 = vor.u32 %v1965_v40, %v1962_v35  ;;  %v3251_v62 = vsel %vm13509_vm6, %v3242_v23, %v3250_v43  ;;  %v1073_v3 = vrot.slane %v1071_v32, 5  ;;  %v1077_v50 = vrot.slane %v1075_v41, 4  ;;  %v3560_v63 = vld [vmem:[#allocation2 + $0xc4] sm:$0xf]  ;;  %v2678_v1 = vld [vmem:[#allocation2 + $0xb4] sm:$0xe] }
 0x193   : > { %v1083_v15 = vrot.slane %v1081_v6, 5  ;;  %v4974_v8 = vld [vmem:[#allocation3 + $0x208] sm:$0xff]  ;;  %v11637_v9 = vcombine.low %v3241_v11, %v3251_v62  ;;  %v1068_v20 = vor.u32 %v1067_v55, %v1064_v18  ;;  %v360_v7 = vsel %vm13447_vm4, 0, %v359_v46  ;;  %v3561_v40 = vld [vmem:[#allocation2 + $0xc8] sm:$0x1] }
 0x194   : > { %v1967_v12 = vsel %vm13509_vm6, %v1958_v48, %v1966_v49  ;;  %5469 = vmatmul.mubr.bf16.gmra.mrb[52].mxu0 %v4974_v8  ;;  %v1078_v21 = vor.u32 %v1077_v50, %v1073_v3  ;;  %361 = vst [vmem:[#allocation2 + $0xbc] sm:$0x2] %v360_v7  ;;  %v1969_v22 = vshrl.u32 %v1542_v57, 16  ;;  %v1972_v53 = vshll.u32 %v1542_v57, 16 }
 0x195   : > { %v11574_v14 = vcombine.low %v1957_v0, %v1967_v12  ;;  %3430 = vrot.lane.b32.xlu1 %v11637_v9, %s12939_s27  ;;  %v1069_v16 = vrot.slane %v1068_v20, 4  ;;  %v1978_v24 = vshrl.u32 %v1543_v59, 16  ;;  %v1981_v28 = vshll.u32 %v1543_v59, 16  ;;  %v2679_v59 = vld [vmem:[#allocation2 + $0xb8] sm:$0xf] }
 0x196   : > { %v1086_v29 = vshrl.u32 %v719_v19, 16  ;;  %v1079_v26 = vrot.slane %v1078_v21, 4  ;;  %v1971_v38 = vrot.slane %v1969_v22, 5  ;;  %v1974_v33 = vrot.slane %v1972_v53, 6 }
 0x197   : > { %v2614_v30 = vsel %vm1416_vm8, %v11574_v14, %v2553_v58  ;;  %v1074_v54 = vsel %vm13103_vm14, %v1069_v16, %v1073_v3  ;;  %v1980_v2 = vrot.slane %v1978_v24, 5  ;;  %v1983_v25 = vrot.slane %v1981_v28, 6 }
 0x198   : > { %v1088_v13 = vrot.slane %v1086_v29, 4  ;;  %5476 = vmatprep.mubr.bf16.mxu0 %v2614_v30  ;;  %v1084_v61 = vsel %vm13103_vm14, %v1079_v26, %v1083_v15  ;;  %v1975_v23 = vor.u32 %v1974_v33, %v1971_v38  ;;  %v1089_v36 = vshll.u32 %v719_v19, 16  ;;  %v3517_v29 = vld [vmem:[#allocation2 + $0x18] sm:$0xf] }
 0x199   : > { %v1095_v27 = vshll.u32 %v12784_v37, 16  ;;  %v11542_v11 = vcombine.low %v1074_v54, %v1084_v61  ;;  %v1984_v52 = vor.u32 %v1983_v25, %v1980_v2  ;;  %v1099_v39 = vshrl.u32 %v12784_v37, 16  ;;  %v1415_v2 = vpop.permute.xlu1 %1414  ;;  %v2555_v61 = vpop.permute.xlu0 %2554 }
 0x19a   : > { %v1105_v31 = vshll.u32 %v12785_v42, 16  ;;  %v1976_v18 = vrot.slane %v1975_v23, 4  ;;  %v1091_v5 = vrot.slane %v1089_v36, 5  ;;  %v11654_v44 = vrot.slane %v3963_v10, 9  ;;  %v12786_v42 = vld [vmem:[#allocation2 + $0x1c] sm:$0xf] }
 0x19b   : > { %v1097_v35 = vrot.slane %v1095_v27, 5  ;;  %v1475_v43 = vsel %vm1416_vm8, %v11542_v11, %v1413_v17  ;;  %v1544_v60 = vld [vmem:[#allocation2 + $0xbc] sm:$0x3]  ;;  %v1986_v32 = vrot.slane %v1984_v52, 4  ;;  %v1101_v41 = vrot.slane %v1099_v39, 4 }
 0x19c   : > { %v1107_v4 = vrot.slane %v1105_v31, 5  ;;  %v1985_v6 = vsel %vm13509_vm6, %v1976_v18, %v1984_v52  ;;  %v1988_v46 = vshrl.u32 %v1544_v60, 16  ;;  %v1991_v0 = vshll.u32 %v1544_v60, 16  ;;  %5477 = vmatmul.mubr.bf16.gmra.mrb[56].mxu0 %v1475_v43  ;;  %v2858_v19 = vld [vmem:[#allocation2 + $0xbc] sm:$0x3] }
 0x19d   : > { %v1092_v48 = vor.u32 %v1091_v5, %v1088_v13  ;;  %v1102_v49 = vor.u32 %v1101_v41, %v1097_v35  ;;  %v4113_v55 = vrot.slane %v3560_v63, 5  ;;  %v4116_v57 = vrot.slane %v3561_v40, 5  ;;  %v12787_v18 = vld [vmem:[#allocation2 + $0x20] sm:$0x1]  ;;  %v362_v41 = vld [vmem:[#allocation2 + $0xc8] sm:$0x2] }
 0x19e   : > { %v3253_v62 = vshrl.u32 %v2678_v1, 16  ;;  %v1990_v3 = vrot.slane %v1988_v46, 5  ;;  %v1993_v50 = vrot.slane %v1991_v0, 6  ;;  %v3256_v8 = vshll.u32 %v2678_v1, 16  ;;  %v12788_v0 = vld [vmem:[#allocation2 + $0xc] sm:$0xe] }
 0x19f   : > { %v1093_v15 = vrot.slane %v1092_v48, 4  ;;  %v1103_v9 = vrot.slane %v1102_v49, 4  ;;  %v4114_v12 = vsel %vm13040_vm13, %v11654_v44, %v4113_v55  ;;  %v4115_v20 = vrot.slane %v4113_v55, 4  ;;  %v13914_v49 = vld [vmem:[#allocation2 + $0xd0] sm:$0xf] }
 0x1a0   : > { %v3255_v7 = vrot.slane %v3253_v62, 5  ;;  %v1994_v14 = vor.u32 %v1993_v50, %v1990_v3  ;;  %v3258_v22 = vrot.slane %v3256_v8, 6  ;;  %v3262_v53 = vshrl.u32 %v2679_v59, 16  ;;  %v13916_v3 = vld [vmem:[#allocation2 + $0xd4] sm:$0x1] }
 0x1a1   : > { %v1098_v21 = vsel %vm13103_vm14, %v1093_v15, %v1097_v35  ;;  %v1108_v58 = vsel %vm13103_vm14, %v1103_v9, %v1107_v4  ;;  %v4117_v16 = vsel %vm13040_vm13, %v4115_v20, %v4116_v57  ;;  %v3265_v24 = vshll.u32 %v2679_v59, 16  ;;  %v2638_v35 = vld [vmem:[#allocation2 + $0x14] sm:$0x1]  ;;  %v12789_v57 = vld [vmem:[#allocation2 + $0x10] sm:$0xf] }
 0x1a2   : > { %v3272_v28 = vshrl.u32 %v2858_v19, 16  ;;  %v1995_v30 = vsel %vm13509_vm6, %v1986_v32, %v1994_v14  ;;  %v11543_v26 = vcombine.low %v1098_v21, %v1108_v58  ;;  %v11686_v38 = vcombine.low %v4114_v12, %v4117_v16  ;;  %v3964_v32 = vld [vmem:[#allocation2 + $0xcc] sm:$0xe]  ;;  %v2681_v12 = vld [vmem:[#allocation2 + $0xc0] sm:$0xe] }
 0x1a3   : > { %v3259_v33 = vor.u32 %v3258_v22, %v3255_v7  ;;  %v11575_v54 = vcombine.low %v1985_v6, %v1995_v30  ;;  %v3264_v25 = vrot.slane %v3262_v53, 5  ;;  %v3267_v13 = vrot.slane %v3265_v24, 6  ;;  %v2682_v24 = vld [vmem:[#allocation2 + $0xc4] sm:$0xf]  ;;  %v3405_v30 = vpop.permute.xlu1 %3404 }
 0x1a4   : > { %v3274_v10 = vrot.slane %v3272_v28, 5  ;;  %v1479_v23 = vsel %vm1416_vm8, %v11543_v26, %v1415_v2  ;;  %4249 = vrot.lane.b32.xlu0 %v11686_v38, %s12939_s27  ;;  %v3275_v37 = vshll.u32 %v2858_v19, 16  ;;  %v3566_v27 = vshrl.u32 %v3517_v29, 16  ;;  %v4222_v2 = vpop.permute.xlu0 %4221 }
 0x1a5   : > { %v3260_v36 = vrot.slane %v3259_v33, 4  ;;  %v2618_v11 = vsel %vm1416_vm8, %v11575_v54, %v2555_v61  ;;  %v3268_v52 = vor.u32 %v3267_v13, %v3264_v25  ;;  %v3569_v39 = vshll.u32 %v3517_v29, 16  ;;  %v3520_v33 = vld [vmem:[#allocation2 + $0x24] sm:$0xf] }
 0x1a6   : > { %v3575_v31 = vshll.u32 %v12786_v42, 16  ;;  %v3277_v63 = vrot.slane %v3275_v37, 6  ;;  %v3568_v1 = vrot.slane %v3566_v27, 4  ;;  %v3579_v17 = vshrl.u32 %v12786_v42, 16  ;;  %5484 = vmatprep.mubr.bf16.mxu0 %v2618_v11 }
 0x1a7   : > { %v3585_v5 = vshll.u32 %v12787_v18, 16  ;;  %v3269_v40 = vsel %vm13509_vm6, %v3260_v36, %v3268_v52  ;;  %v3270_v44 = vrot.slane %v3268_v52, 4  ;;  %v3571_v43 = vrot.slane %v3569_v39, 5  ;;  %5485 = vmatmul.mubr.bf16.gmra.mrb[60].mxu0 %v1479_v23 }
 0x1a8   : > { %v3577_v60 = vrot.slane %v3575_v31, 5  ;;  %v3278_v4 = vor.u32 %v3277_v63, %v3274_v10  ;;  %v3581_v6 = vrot.slane %v3579_v17, 4  ;;  %v11592_v48 = vrot.slane %v12788_v0, 9 }
 0x1a9   : > { %v3587_v46 = vrot.slane %v3585_v5, 5  ;;  %v3572_v55 = vor.u32 %v3571_v43, %v3568_v1  ;;  %v2734_v59 = vrot.slane %v12789_v57, 5  ;;  %v2737_v62 = vrot.slane %v2638_v35, 5  ;;  %v12790_v5 = vld [vmem:[#allocation2 + $0x28] sm:$0xf] }
 0x1aa   : > { %v3279_v15 = vsel %vm13509_vm6, %v3270_v44, %v3278_v4  ;;  %v3582_v19 = vor.u32 %v3581_v6, %v3577_v60  ;;  %v11655_v9 = vrot.slane %v3964_v32, 9  ;;  %v4120_v53 = vrot.slane %v13914_v49, 5  ;;  %v12791_v43 = vld [vmem:[#allocation2 + $0x2c] sm:$0x1]  ;;  %v2641_v32 = vld [vmem:[#allocation2 + $0x20] sm:$0x1] }
 0x1ab   : > { %v11638_v20 = vcombine.low %v3269_v40, %v3279_v15  ;;  %v3573_v7 = vrot.slane %v3572_v55, 4  ;;  %v2735_v14 = vsel %vm13040_vm13, %v11592_v48, %v2734_v59  ;;  %v2736_v21 = vrot.slane %v2734_v59, 4  ;;  %v12793_v55 = vld [vmem:[#allocation2 + $0x1c] sm:$0xf] }
 0x1ac   : > { %v3583_v22 = vrot.slane %v3582_v19, 4  ;;  %v4123_v58 = vrot.slane %v13916_v3, 5  ;;  %v363_v16 = vsel %vm13447_vm4, 0, %v362_v41  ;;  %v3281_v26 = vshrl.u32 %v2681_v12, 16  ;;  %v12792_v41 = vld [vmem:[#allocation2 + $0x18] sm:$0xe] }
 0x1ad   : > { %3432 = vrot.lane.b32.xlu1 %v11638_v20, %s12939_s27  ;;  %v3578_v28 = vsel %vm13103_vm14, %v3573_v7, %v3577_v60  ;;  %v2738_v29 = vsel %vm13040_vm13, %v2736_v21, %v2737_v62  ;;  %364 = vst [vmem:[#allocation2 + $0xc8] sm:$0x2] %v363_v16  ;;  %v3284_v38 = vshll.u32 %v2681_v12, 16  ;;  %v4121_v25 = vsel %vm13040_vm13, %v11655_v9, %v4120_v53  ;;  %v3523_v9 = vld [vmem:[#allocation2 + $0x30] sm:$0xf] }
 0x1ae   : > { %v3588_v54 = vsel %vm13103_vm14, %v3583_v22, %v3587_v46  ;;  %v11608_v45 = vcombine.low %v2735_v14, %v2738_v29  ;;  %v4122_v13 = vrot.slane %v4120_v53, 4  ;;  %v3283_v61 = vrot.slane %v3281_v26, 5 }
 0x1af   : > { %v11656_v10 = vcombine.low %v3578_v28, %v3588_v54  ;;  %v3286_v23 = vrot.slane %v3284_v38, 6  ;;  %v3290_v36 = vshrl.u32 %v2682_v24, 16  ;;  %v3293_v11 = vshll.u32 %v2682_v24, 16  ;;  %v12794_v38 = vld [vmem:[#allocation2 + $0x34] sm:$0xf] }
 0x1b0   : > { %v3438_v37 = vsel %vm1416_vm8, %v11608_v45, %v3405_v30  ;;  %v4124_v27 = vsel %vm13040_vm13, %v4122_v13, %v4123_v58  ;;  %v3590_v52 = vshrl.u32 %v3520_v33, 16  ;;  %v3593_v18 = vshll.u32 %v3520_v33, 16 }
 0x1b1   : > { %v4255_v39 = vsel %vm1416_vm8, %v11656_v10, %v4222_v2  ;;  %v11687_v42 = vcombine.low %v4121_v25, %v4124_v27  ;;  %v3287_v31 = vor.u32 %v3286_v23, %v3283_v61  ;;  %v3292_v63 = vrot.slane %v3290_v36, 5  ;;  %v3407_v25 = vpop.permute.xlu1 %3406  ;;  %v4224_v36 = vpop.permute.xlu0 %4223 }
 0x1b2   : > { %v3295_v1 = vrot.slane %v3293_v11, 6  ;;  %v3592_v17 = vrot.slane %v3590_v52, 4  ;;  %v3599_v35 = vshll.u32 %v12790_v5, 16  ;;  %5525 = vmatprep.mubr.bf16.mxu1 %v4255_v39  ;;  %v3603_v44 = vshrl.u32 %v12790_v5, 16  ;;  %v2644_v11 = vld [vmem:[#allocation2 + $0x2c] sm:$0x1] }
 0x1b3   : > { %4251 = vrot.lane.b32.xlu0 %v11687_v42, %s12939_s27  ;;  %v3288_v40 = vrot.slane %v3287_v31, 4  ;;  %v3609_v60 = vshll.u32 %v12791_v43, 16  ;;  %v11593_v4 = vrot.slane %v12792_v41, 9  ;;  %5526 = vmatmul.mubr.bf16.vlgmr.msra.gmra.mrb[0].mxu1 %v3438_v37  ;;  %v3595_v0 = vrot.slane %v3593_v18, 5  ;;  %v12796_v5 = vld [vmem:[#allocation2 + $0x24] sm:$0xe] }
 0x1b4   : > { %v2859_v6 = vld [vmem:[#allocation2 + $0xc8] sm:$0x3]  ;;  %v3296_v46 = vor.u32 %v3295_v1, %v3292_v63  ;;  %v3601_v48 = vrot.slane %v3599_v35, 5  ;;  %v2741_v57 = vrot.slane %v12793_v55, 5  ;;  %v3605_v15 = vrot.slane %v3603_v44, 4 }
 0x1b5   : > { %v3300_v59 = vshrl.u32 %v2859_v6, 16  ;;  %v3303_v62 = vshll.u32 %v2859_v6, 16  ;;  %v3611_v19 = vrot.slane %v3609_v60, 5  ;;  %v3596_v7 = vor.u32 %v3595_v0, %v3592_v17  ;;  %v3526_v63 = vld [vmem:[#allocation2 + $0x3c] sm:$0xf] }
 0x1b6   : > { %v3297_v12 = vsel %vm13509_vm6, %v3288_v40, %v3296_v46  ;;  %v3298_v20 = vrot.slane %v3296_v46, 4  ;;  %v2742_v14 = vsel %vm13040_vm13, %v11593_v4, %v2741_v57  ;;  %v3606_v53 = vor.u32 %v3605_v15, %v3601_v48  ;;  %v12795_v17 = vld [vmem:[#allocation2 + $0x38] sm:$0x1]  ;;  %v12797_v40 = vld [vmem:[#allocation2 + $0x28] sm:$0xf] }
 0x1b7   : > { %v3302_v21 = vrot.slane %v3300_v59, 5  ;;  %v3305_v22 = vrot.slane %v3303_v62, 6  ;;  %v2743_v58 = vrot.slane %v2741_v57, 4  ;;  %v3597_v16 = vrot.slane %v3596_v7, 4  ;;  %v12798_v59 = vld [vmem:[#allocation2 + $0x40] sm:$0xf] }
 0x1b8   : > { %v2744_v24 = vrot.slane %v2641_v32, 5  ;;  %v3614_v28 = vshrl.u32 %v3523_v9, 16  ;;  %v3617_v29 = vshll.u32 %v3523_v9, 16  ;;  %v3607_v26 = vrot.slane %v3606_v53, 4 }
 0x1b9   : > { %v3306_v30 = vor.u32 %v3305_v22, %v3302_v21  ;;  %v3623_v33 = vshll.u32 %v12794_v38, 16  ;;  %v3627_v54 = vshrl.u32 %v12794_v38, 16  ;;  %v3602_v2 = vsel %vm13103_vm14, %v3597_v16, %v3601_v48  ;;  %v4226_v22 = vpop.permute.xlu0 %4225 }
 0x1ba   : > { %v2745_v45 = vsel %vm13040_vm13, %v2743_v58, %v2744_v24  ;;  %v3616_v13 = vrot.slane %v3614_v28, 4  ;;  %v3619_v10 = vrot.slane %v3617_v29, 5  ;;  %v3612_v23 = vsel %vm13103_vm14, %v3607_v26, %v3611_v19  ;;  %v3409_v19 = vpop.permute.xlu1 %3408  ;;  %v3529_v24 = vld [vmem:[#allocation2 + $0x48] sm:$0xf]  ;;  %v12800_v26 = vld [vmem:[#allocation2 + $0x30] sm:$0xe] }
 0x1bb   : > { %v3307_v61 = vsel %vm13509_vm6, %v3298_v20, %v3306_v30  ;;  %v11609_v37 = vcombine.low %v2742_v14, %v2745_v45  ;;  %v3625_v27 = vrot.slane %v3623_v33, 5  ;;  %v11657_v39 = vcombine.low %v3602_v2, %v3612_v23  ;;  %v12799_v20 = vld [vmem:[#allocation2 + $0x44] sm:$0x1]  ;;  %v2647_v14 = vld [vmem:[#allocation2 + $0x38] sm:$0x1] }
 0x1bc   : > { %v11639_v52 = vcombine.low %v3297_v12, %v3307_v61  ;;  %v3620_v42 = vor.u32 %v3619_v10, %v3616_v13  ;;  %v3629_v31 = vrot.slane %v3627_v54, 4  ;;  %v3633_v18 = vshll.u32 %v12795_v17, 16  ;;  %v12801_v2 = vld [vmem:[#allocation2 + $0x34] sm:$0xf] }
 0x1bd   : > { %v3442_v1 = vsel %vm1416_vm8, %v11609_v37, %v3407_v25  ;;  %v11594_v35 = vrot.slane %v12796_v5, 9  ;;  %v2748_v44 = vrot.slane %v12797_v40, 5  ;;  %v4259_v43 = vsel %vm1416_vm8, %v11657_v39, %v4224_v36 }
 0x1be   : > { %3434 = vrot.lane.b32.xlu1 %v11639_v52, %s12939_s27  ;;  %v3621_v60 = vrot.slane %v3620_v42, 4  ;;  %v3630_v32 = vor.u32 %v3629_v31, %v3625_v27  ;;  %v2751_v41 = vrot.slane %v2644_v11, 5  ;;  %v3635_v4 = vrot.slane %v3633_v18, 5  ;;  %5533 = vmatprep.mubr.bf16.mxu1 %v4259_v43  ;;  %v12802_v11 = vld [vmem:[#allocation2 + $0x4c] sm:$0xf]  ;;  %v3411_v18 = vpop.permute.xlu1 %3410 }
 0x1bf   : > { %v2749_v6 = vsel %vm13040_vm13, %v11594_v35, %v2748_v44  ;;  %v2750_v46 = vrot.slane %v2748_v44, 4  ;;  %v3638_v0 = vshrl.u32 %v3526_v63, 16  ;;  %5534 = vmatmul.mubr.bf16.gmra.mrb[4].mxu1 %v3442_v1  ;;  %v3641_v57 = vshll.u32 %v3526_v63, 16  ;;  %v12803_v35 = vld [vmem:[#allocation2 + $0x50] sm:$0x1] }
 0x1c0   : > { %v3626_v48 = vsel %vm13103_vm14, %v3621_v60, %v3625_v27  ;;  %v3631_v55 = vrot.slane %v3630_v32, 4  ;;  %v3647_v62 = vshll.u32 %v12798_v59, 16  ;;  %v3651_v12 = vshrl.u32 %v12798_v59, 16  ;;  %v2650_v44 = vld [vmem:[#allocation2 + $0x44] sm:$0x1]  ;;  %v4228_v60 = vpop.permute.xlu0 %4227 }
 0x1c1   : > { %v2752_v15 = vsel %vm13040_vm13, %v2750_v46, %v2751_v41  ;;  %v3640_v9 = vrot.slane %v3638_v0, 4  ;;  %v3657_v7 = vshll.u32 %v12799_v20, 16  ;;  %v3643_v58 = vrot.slane %v3641_v57, 5  ;;  %v12805_v57 = vld [vmem:[#allocation2 + $0x40] sm:$0xf] }
 0x1c2   : > { %v3636_v21 = vsel %vm13103_vm14, %v3631_v55, %v3635_v4  ;;  %v11610_v53 = vcombine.low %v2749_v6, %v2752_v15  ;;  %v3649_v16 = vrot.slane %v3647_v62, 5  ;;  %v3653_v29 = vrot.slane %v3651_v12, 4  ;;  %v3532_v6 = vld [vmem:[#allocation2 + $0x54] sm:$0xf] }
 0x1c3   : > { %v11658_v28 = vcombine.low %v3626_v48, %v3636_v21  ;;  %v3659_v30 = vrot.slane %v3657_v7, 5  ;;  %v11595_v38 = vrot.slane %v12800_v26, 9  ;;  %v3644_v54 = vor.u32 %v3643_v58, %v3640_v9  ;;  %v12804_v48 = vld [vmem:[#allocation2 + $0x3c] sm:$0xe]  ;;  %v12806_v58 = vld [vmem:[#allocation2 + $0x58] sm:$0xf] }
 0x1c4   : > { %v3446_v33 = vsel %vm1416_vm8, %v11610_v53, %v3409_v19  ;;  %v2755_v45 = vrot.slane %v12801_v2, 5  ;;  %v2758_v25 = vrot.slane %v2647_v14, 5  ;;  %v3654_v10 = vor.u32 %v3653_v29, %v3649_v16  ;;  %v12807_v26 = vld [vmem:[#allocation2 + $0x5c] sm:$0x1]  ;;  %v4230_v2 = vpop.permute.xlu0 %4229 }
 0x1c5   : > { %v4263_v13 = vsel %vm1416_vm8, %v11658_v28, %v4226_v22  ;;  %v3662_v61 = vshrl.u32 %v3529_v24, 16  ;;  %v3665_v23 = vshll.u32 %v3529_v24, 16  ;;  %v3645_v36 = vrot.slane %v3644_v54, 4  ;;  %v3413_v28 = vpop.permute.xlu1 %3412 }
 0x1c6   : > { %v2756_v37 = vsel %vm13040_vm13, %v11595_v38, %v2755_v45  ;;  %v2757_v27 = vrot.slane %v2755_v45, 4  ;;  %5541 = vmatprep.mubr.bf16.mxu1 %v4263_v13  ;;  %v3671_v52 = vshll.u32 %v12802_v11, 16  ;;  %v3655_v39 = vrot.slane %v3654_v10, 4  ;;  %v3535_v10 = vld [vmem:[#allocation2 + $0x60] sm:$0xf] }
 0x1c7   : > { %v3664_v42 = vrot.slane %v3662_v61, 4  ;;  %v3667_v31 = vrot.slane %v3665_v23, 5  ;;  %v3675_v63 = vshrl.u32 %v12802_v11, 16  ;;  %v3650_v1 = vsel %vm13103_vm14, %v3645_v36, %v3649_v16  ;;  %5542 = vmatmul.mubr.bf16.gmra.mrb[8].mxu1 %v3446_v33  ;;  %v2653_v33 = vld [vmem:[#allocation2 + $0x50] sm:$0x1] }
 0x1c8   : > { %v2759_v17 = vsel %vm13040_vm13, %v2757_v27, %v2758_v25  ;;  %v3673_v5 = vrot.slane %v3671_v52, 5  ;;  %v3681_v40 = vshll.u32 %v12803_v35, 16  ;;  %v3660_v43 = vsel %vm13103_vm14, %v3655_v39, %v3659_v30  ;;  %v12809_v39 = vld [vmem:[#allocation2 + $0x4c] sm:$0xf] }
 0x1c9   : > { %v11611_v32 = vcombine.low %v2756_v37, %v2759_v17  ;;  %v3668_v41 = vor.u32 %v3667_v31, %v3664_v42  ;;  %v3677_v4 = vrot.slane %v3675_v63, 4  ;;  %v11659_v46 = vcombine.low %v3650_v1, %v3660_v43  ;;  %v12808_v37 = vld [vmem:[#allocation2 + $0x48] sm:$0xe] }
 0x1ca   : > { %v3683_v0 = vrot.slane %v3681_v40, 5  ;;  %v11596_v55 = vrot.slane %v12804_v48, 9  ;;  %v2762_v59 = vrot.slane %v12805_v57, 5  ;;  %v2765_v9 = vrot.slane %v2650_v44, 5  ;;  %v12810_v44 = vld [vmem:[#allocation2 + $0x64] sm:$0xf] }
 0x1cb   : > { %v3450_v62 = vsel %vm1416_vm8, %v11611_v32, %v3411_v18  ;;  %v3669_v15 = vrot.slane %v3668_v41, 4  ;;  %v3678_v19 = vor.u32 %v3677_v4, %v3673_v5  ;;  %v4267_v12 = vsel %vm1416_vm8, %v11659_v46, %v4228_v60 }
 0x1cc   : > { %v2763_v20 = vsel %vm13040_vm13, %v11596_v55, %v2762_v59  ;;  %v2764_v7 = vrot.slane %v2762_v59, 4  ;;  %v3686_v14 = vshrl.u32 %v3532_v6, 16  ;;  %5549 = vmatprep.mubr.bf16.mxu1 %v4267_v12  ;;  %v3689_v53 = vshll.u32 %v3532_v6, 16  ;;  %v12811_v55 = vld [vmem:[#allocation2 + $0x68] sm:$0x1] }
 0x1cd   : > { %v3674_v21 = vsel %vm13103_vm14, %v3669_v15, %v3673_v5  ;;  %v3679_v22 = vrot.slane %v3678_v19, 4  ;;  %v3695_v16 = vshll.u32 %v12806_v58, 16  ;;  %v3699_v30 = vshrl.u32 %v12806_v58, 16  ;;  %v2656_v59 = vld [vmem:[#allocation2 + $0x5c] sm:$0x1]  ;;  %v4232_v15 = vpop.permute.xlu0 %4231 }
 0x1ce   : > { %v2766_v24 = vsel %vm13040_vm13, %v2764_v7, %v2765_v9  ;;  %v3688_v29 = vrot.slane %v3686_v14, 4  ;;  %v3705_v38 = vshll.u32 %v12807_v26, 16  ;;  %v3691_v25 = vrot.slane %v3689_v53, 5  ;;  %v12813_v53 = vld [vmem:[#allocation2 + $0x58] sm:$0xf] }
 0x1cf   : > { %v3684_v54 = vsel %vm13103_vm14, %v3679_v22, %v3683_v0  ;;  %v11612_v45 = vcombine.low %v2763_v20, %v2766_v24  ;;  %v3697_v13 = vrot.slane %v3695_v16, 5  ;;  %5550 = vmatmul.mubr.bf16.gmra.mrb[12].mxu1 %v3450_v62  ;;  %v3701_v23 = vrot.slane %v3699_v30, 4  ;;  %v3415_v0 = vpop.permute.xlu1 %3414  ;;  %v3538_v20 = vld [vmem:[#allocation2 + $0x6c] sm:$0xf] }
 0x1d0   : > { %v11660_v61 = vcombine.low %v3674_v21, %v3684_v54  ;;  %v3707_v36 = vrot.slane %v3705_v38, 5  ;;  %v11597_v27 = vrot.slane %v12808_v37, 9  ;;  %v3692_v52 = vor.u32 %v3691_v25, %v3688_v29  ;;  %v12812_v21 = vld [vmem:[#allocation2 + $0x54] sm:$0xe]  ;;  %v12814_v25 = vld [vmem:[#allocation2 + $0x70] sm:$0xf] }
 0x1d1   : > { %v3454_v11 = vsel %vm1416_vm8, %v11612_v45, %v3413_v28  ;;  %v2769_v42 = vrot.slane %v12809_v39, 5  ;;  %v2772_v31 = vrot.slane %v2653_v33, 5  ;;  %v3702_v1 = vor.u32 %v3701_v23, %v3697_v13  ;;  %v12815_v37 = vld [vmem:[#allocation2 + $0x74] sm:$0x1]  ;;  %v4234_v39 = vpop.permute.xlu0 %4233 }
 0x1d2   : > { %v4271_v63 = vsel %vm1416_vm8, %v11660_v61, %v4230_v2  ;;  %v3710_v17 = vshrl.u32 %v3535_v10, 16  ;;  %v3713_v18 = vshll.u32 %v3535_v10, 16  ;;  %v3693_v5 = vrot.slane %v3692_v52, 4 }
 0x1d3   : > { %v2770_v35 = vsel %vm13040_vm13, %v11597_v27, %v2769_v42  ;;  %v2771_v40 = vrot.slane %v2769_v42, 4  ;;  %5557 = vmatprep.mubr.bf16.mxu1 %v4271_v63  ;;  %v3719_v43 = vshll.u32 %v12810_v44, 16  ;;  %v3703_v60 = vrot.slane %v3702_v1, 4  ;;  %v3417_v61 = vpop.permute.xlu1 %3416  ;;  %v3541_v1 = vld [vmem:[#allocation2 + $0x78] sm:$0xf] }
 0x1d4   : > { %v3712_v32 = vrot.slane %v3710_v17, 4  ;;  %v3715_v41 = vrot.slane %v3713_v18, 5  ;;  %v3723_v4 = vshrl.u32 %v12810_v44, 16  ;;  %v3698_v6 = vsel %vm13103_vm14, %v3693_v5, %v3697_v13 }
 0x1d5   : > { %v2773_v46 = vsel %vm13040_vm13, %v2771_v40, %v2772_v31  ;;  %v3721_v48 = vrot.slane %v3719_v43, 5  ;;  %v3729_v57 = vshll.u32 %v12811_v55, 16  ;;  %v3708_v62 = vsel %vm13103_vm14, %v3703_v60, %v3707_v36  ;;  %v12817_v60 = vld [vmem:[#allocation2 + $0x64] sm:$0xf] }
 0x1d6   : > { %v11613_v19 = vcombine.low %v2770_v35, %v2773_v46  ;;  %v3716_v9 = vor.u32 %v3715_v41, %v3712_v32  ;;  %v3725_v12 = vrot.slane %v3723_v4, 4  ;;  %v11661_v7 = vcombine.low %v3698_v6, %v3708_v62  ;;  %v12816_v35 = vld [vmem:[#allocation2 + $0x60] sm:$0xe] }
 0x1d7   : > { %v3731_v14 = vrot.slane %v3729_v57, 5  ;;  %v11598_v22 = vrot.slane %v12812_v21, 9  ;;  %v2776_v58 = vrot.slane %v12813_v53, 5  ;;  %5558 = vmatmul.mubr.bf16.gmra.mrb[16].mxu1 %v3454_v11  ;;  %v2779_v29 = vrot.slane %v2656_v59, 5  ;;  %v2659_v11 = vld [vmem:[#allocation2 + $0x68] sm:$0x1] }
 0x1d8   : > { %v3458_v16 = vsel %vm1416_vm8, %v11613_v19, %v3415_v0  ;;  %v3717_v24 = vrot.slane %v3716_v9, 4  ;;  %v3726_v28 = vor.u32 %v3725_v12, %v3721_v48  ;;  %v4275_v30 = vsel %vm1416_vm8, %v11661_v7, %v4232_v15  ;;  %v12818_v59 = vld [vmem:[#allocation2 + $0x7c] sm:$0xf] }
 0x1d9   : > { %v2777_v26 = vsel %vm13040_vm13, %v11598_v22, %v2776_v58  ;;  %v2778_v38 = vrot.slane %v2776_v58, 4  ;;  %v3734_v33 = vshrl.u32 %v3538_v20, 16  ;;  %5565 = vmatprep.mubr.bf16.mxu1 %v4275_v30  ;;  %v3737_v45 = vshll.u32 %v3538_v20, 16  ;;  %v12819_v22 = vld [vmem:[#allocation2 + $0x80] sm:$0x1] }
 0x1da   : > { %v3722_v54 = vsel %vm13103_vm14, %v3717_v24, %v3721_v48  ;;  %v3727_v2 = vrot.slane %v3726_v28, 4  ;;  %v3743_v13 = vshll.u32 %v12814_v25, 16  ;;  %v3747_v36 = vshrl.u32 %v12814_v25, 16  ;;  %v2662_v58 = vld [vmem:[#allocation2 + $0x74] sm:$0x1]  ;;  %v4236_v24 = vpop.permute.xlu0 %4235 }
 0x1db   : > { %v2780_v10 = vsel %vm13040_vm13, %v2778_v38, %v2779_v29  ;;  %v3736_v23 = vrot.slane %v3734_v33, 4  ;;  %v3753_v27 = vshll.u32 %v12815_v37, 16  ;;  %v3739_v31 = vrot.slane %v3737_v45, 5  ;;  %v12821_v45 = vld [vmem:[#allocation2 + $0x70] sm:$0xf] }
 0x1dc   : > { %v3732_v52 = vsel %vm13103_vm14, %v3727_v2, %v3731_v14  ;;  %v11614_v42 = vcombine.low %v2777_v26, %v2780_v10  ;;  %v3745_v63 = vrot.slane %v3743_v13, 5  ;;  %v3749_v18 = vrot.slane %v3747_v36, 4  ;;  %v3419_v14 = vpop.permute.xlu1 %3418  ;;  %v3544_v26 = vld [vmem:[#allocation2 + $0x84] sm:$0xf] }
 0x1dd   : > { %v11662_v17 = vcombine.low %v3722_v54, %v3732_v52  ;;  %v3755_v5 = vrot.slane %v3753_v27, 5  ;;  %v11599_v40 = vrot.slane %v12816_v35, 9  ;;  %v3740_v43 = vor.u32 %v3739_v31, %v3736_v23  ;;  %v12820_v54 = vld [vmem:[#allocation2 + $0x6c] sm:$0xe]  ;;  %v12822_v31 = vld [vmem:[#allocation2 + $0x88] sm:$0xf] }
 0x1de   : > { %v3462_v44 = vsel %vm1416_vm8, %v11614_v42, %v3417_v61  ;;  %v2783_v32 = vrot.slane %v12817_v60, 5  ;;  %v2786_v41 = vrot.slane %v2659_v11, 5  ;;  %v3750_v6 = vor.u32 %v3749_v18, %v3745_v63  ;;  %v12823_v35 = vld [vmem:[#allocation2 + $0x8c] sm:$0x1] }
 0x1df   : > { %v4279_v4 = vsel %vm1416_vm8, %v11662_v17, %v4234_v39  ;;  %v3758_v46 = vshrl.u32 %v3541_v1, 16  ;;  %v3761_v0 = vshll.u32 %v3541_v1, 16  ;;  %5566 = vmatmul.mubr.bf16.gmra.mrb[20].mxu1 %v3458_v16  ;;  %v3741_v48 = vrot.slane %v3740_v43, 4  ;;  %v2665_v43 = vld [vmem:[#allocation2 + $0x80] sm:$0x1] }
 0x1e0   : > { %v2784_v55 = vsel %vm13040_vm13, %v11599_v40, %v2783_v32  ;;  %v2785_v57 = vrot.slane %v2783_v32, 4  ;;  %v3767_v62 = vshll.u32 %v12818_v59, 16  ;;  %v3751_v15 = vrot.slane %v3750_v6, 4  ;;  %5573 = vmatprep.mubr.bf16.mxu1 %v4279_v4  ;;  %v3421_v17 = vpop.permute.xlu1 %3420  ;;  %v4238_v32 = vpop.permute.xlu0 %4237 }
 0x1e1   : > { %v3760_v19 = vrot.slane %v3758_v46, 4  ;;  %v3763_v9 = vrot.slane %v3761_v0, 5  ;;  %v3771_v12 = vshrl.u32 %v12818_v59, 16  ;;  %v3746_v20 = vsel %vm13103_vm14, %v3741_v48, %v3745_v63  ;;  %v4333_v46 = vld [vmem:[#allocation2 + $0x18] sm:$0xe] }
 0x1e2   : > { %v2787_v7 = vsel %vm13040_vm13, %v2785_v57, %v2786_v41  ;;  %v3769_v21 = vrot.slane %v3767_v62, 5  ;;  %v3777_v53 = vshll.u32 %v12819_v22, 16  ;;  %v3756_v16 = vsel %vm13103_vm14, %v3751_v15, %v3755_v5  ;;  %v4334_v59 = vld [vmem:[#allocation2 + $0x1c] sm:$0xf] }
 0x1e3   : > { %v11615_v28 = vcombine.low %v2784_v55, %v2787_v7  ;;  %v3764_v29 = vor.u32 %v3763_v9, %v3760_v19  ;;  %v3773_v30 = vrot.slane %v3771_v12, 4  ;;  %v11663_v38 = vcombine.low %v3746_v20, %v3756_v16  ;;  %v12824_v55 = vld [vmem:[#allocation2 + $0x78] sm:$0xe]  ;;  %v12825_v19 = vld [vmem:[#allocation2 + $0x7c] sm:$0xf] }
 0x1e4   : > { %v3779_v33 = vrot.slane %v3777_v53, 5  ;;  %v11600_v2 = vrot.slane %v12820_v54, 9  ;;  %v2790_v25 = vrot.slane %v12821_v45, 5  ;;  %v2793_v23 = vrot.slane %v2662_v58, 5 }
 0x1e5   : > { %v3466_v13 = vsel %vm1416_vm8, %v11615_v28, %v3419_v14  ;;  %v3765_v10 = vrot.slane %v3764_v29, 4  ;;  %v3774_v61 = vor.u32 %v3773_v30, %v3769_v21  ;;  %v4283_v36 = vsel %vm1416_vm8, %v11663_v38, %v4236_v24  ;;  %v4335_v14 = vld [vmem:[#allocation2 + $0x20] sm:$0x3]  ;;  %v4336_v38 = vld [vmem:[#allocation2 + $0x24] sm:$0xe] }
 0x1e6   : > { %v2791_v37 = vsel %vm13040_vm13, %v11600_v2, %v2790_v25  ;;  %v2792_v27 = vrot.slane %v2790_v25, 4  ;;  %v3782_v11 = vshrl.u32 %v3544_v26, 16  ;;  %v3785_v42 = vshll.u32 %v3544_v26, 16  ;;  %v3423_v2 = vpop.permute.xlu1 %3422 }
 0x1e7   : > { %v3770_v52 = vsel %vm13103_vm14, %v3765_v10, %v3769_v21  ;;  %v3775_v39 = vrot.slane %v3774_v61, 4  ;;  %v3791_v63 = vshll.u32 %v12822_v31, 16  ;;  %5574 = vmatmul.mubr.bf16.gmra.mrb[24].mxu1 %v3462_v44  ;;  %v3795_v5 = vshrl.u32 %v12822_v31, 16  ;;  %v4240_v61 = vpop.permute.xlu0 %4239 }
 0x1e8   : > { %v2794_v1 = vsel %vm13040_vm13, %v2792_v27, %v2793_v23  ;;  %v3784_v18 = vrot.slane %v3782_v11, 4  ;;  %v3801_v40 = vshll.u32 %v12823_v35, 16  ;;  %5581 = vmatprep.mubr.bf16.mxu1 %v4283_v36  ;;  %v3787_v4 = vrot.slane %v3785_v42, 5  ;;  %v4337_v27 = vld [vmem:[#allocation2 + $0x28] sm:$0xf] }
 0x1e9   : > { %v3780_v60 = vsel %vm13103_vm14, %v3775_v39, %v3779_v33  ;;  %v11616_v41 = vcombine.low %v2791_v37, %v2794_v1  ;;  %v3793_v6 = vrot.slane %v3791_v63, 5  ;;  %v3797_v44 = vrot.slane %v3795_v5, 4 }
 0x1ea   : > { %v11664_v0 = vcombine.low %v3770_v52, %v3780_v60  ;;  %v3803_v48 = vrot.slane %v3801_v40, 5  ;;  %v11601_v57 = vrot.slane %v12824_v55, 9  ;;  %v3788_v15 = vor.u32 %v3787_v4, %v3784_v18  ;;  %v14041_v60 = vpop.f32.mrb[0].mxu0 }
 0x1eb   : > { %v14026_v62 = vsel %vm1416_vm8, %v11616_v41, %v3421_v17  ;;  %v2797_v9 = vrot.slane %v12825_v19, 5  ;;  %v2800_v12 = vrot.slane %v2665_v43, 5  ;;  %v3798_v7 = vor.u32 %v3797_v44, %v3793_v6  ;;  %v4338_v17 = vld [vmem:[#allocation2 + $0x2c] sm:$0x3]  ;;  %v3547_v43 = vld [vmem:[#allocation2 + $0x90] sm:$0xf] }
 0x1ec   : > { %v4287_v20 = vsel %vm1416_vm8, %v11664_v0, %v4238_v32  ;;  %v4382_v21 = vshrl.u32 %v4333_v46, 16  ;;  %v4385_v22 = vshll.u32 %v4333_v46, 16  ;;  %v3789_v53 = vrot.slane %v3788_v15, 4  ;;  %v14045_v46 = vpop.f32.mrb[1].mxu0 }
 0x1ed   : > { %v2798_v58 = vsel %vm13040_vm13, %v11601_v57, %v2797_v9  ;;  %v2799_v16 = vrot.slane %v2797_v9, 4  ;;  %v4391_v24 = vshrl.u32 %v4334_v59, 16  ;;  %v3799_v28 = vrot.slane %v3798_v7, 4  ;;  %v14047_v57 = vpop.f32.mrb[2].mxu0 }
 0x1ee   : > { %v4384_v29 = vrot.slane %v4382_v21, 5  ;;  %v4387_v30 = vrot.slane %v4385_v22, 6  ;;  %v4394_v26 = vshll.u32 %v4334_v59, 16  ;;  %v3794_v33 = vsel %vm13103_vm14, %v3789_v53, %v3793_v6  ;;  %v12826_v21 = vld [vmem:[#allocation2 + $0x94] sm:$0xf] }
 0x1ef   : > { %v2801_v54 = vsel %vm13040_vm13, %v2799_v16, %v2800_v12  ;;  %v4393_v45 = vrot.slane %v4391_v24, 5  ;;  %v4401_v25 = vshrl.u32 %v4335_v14, 16  ;;  %5582 = vmatmul.mubr.bf16.gmra.mrb[28].mxu1 %v3466_v13  ;;  %v3804_v10 = vsel %vm13103_vm14, %v3799_v28, %v3803_v48  ;;  %v14049_v12 = vpop.f32.mrb[3].mxu0 }
 0x1f0   : > { %v11617_v23 = vcombine.low %v2798_v58, %v2801_v54  ;;  %v4388_v36 = vor.u32 %v4387_v30, %v4384_v29  ;;  %v4396_v37 = vrot.slane %v4394_v26, 6  ;;  %v11665_v11 = vcombine.low %v3794_v33, %v3804_v10  ;;  %5589 = vmatprep.mubr.bf16.mxu1 %v4287_v20  ;;  %v14053_v53 = vpop.f32.mrb[4].mxu0  ;;  %v2668_v29 = vld [vmem:[#allocation2 + $0x8c] sm:$0x1]  ;;  %v12827_v10 = vld [vmem:[#allocation2 + $0x98] sm:$0x1] }
 0x1f1   : > { %v4403_v52 = vrot.slane %v4401_v25, 5  ;;  %v4404_v39 = vshll.u32 %v4335_v14, 16  ;;  %v4410_v42 = vshrl.u32 %v4336_v38, 16  ;;  %v4413_v13 = vshll.u32 %v4336_v38, 16  ;;  %v14056_v30 = vpop.f32.mrb[5].mxu0 }
 0x1f2   : > { %v14038_v31 = vsel %vm1416_vm8, %v11617_v23, %v3423_v2  ;;  %v4389_v63 = vrot.slane %v4388_v36, 4  ;;  %v4397_v1 = vor.u32 %v4396_v37, %v4393_v45  ;;  %v4291_v18 = vsel %vm1416_vm8, %v11665_v11, %v4240_v61  ;;  %v4339_v2 = vld [vmem:[#allocation2 + $0x30] sm:$0xe]  ;;  %v14058_v45 = vpop.f32.mrb[6].mxu0  ;;  %v12828_v23 = vld [vmem:[#allocation2 + $0x84] sm:$0xe] }
 0x1f3   : > { %v4406_v5 = vrot.slane %v4404_v39, 6  ;;  %v4412_v35 = vrot.slane %v4410_v42, 5  ;;  %v4419_v40 = vshrl.u32 %v4337_v27, 16  ;;  %v4415_v4 = vrot.slane %v4413_v13, 6  ;;  %v14063_v37 = vpop.f32.mrb[7].mxu0 }
 0x1f4   : > { %v4398_v32 = vsel %vm13509_vm6, %v4389_v63, %v4397_v1  ;;  %v4399_v41 = vrot.slane %v4397_v1, 4  ;;  %v4422_v6 = vshll.u32 %v4337_v27, 16  ;;  %v4429_v48 = vshrl.u32 %v4338_v17, 16  ;;  %v4340_v63 = vld [vmem:[#allocation2 + $0x34] sm:$0xf]  ;;  %v14065_v1 = vpop.f32.mrb[8].mxu0 }
 0x1f5   : > { %v4407_v0 = vor.u32 %v4406_v5, %v4403_v52  ;;  %v4421_v44 = vrot.slane %v4419_v40, 5  ;;  %v4432_v55 = vshll.u32 %v4338_v17, 16  ;;  %v4416_v59 = vor.u32 %v4415_v4, %v4412_v35  ;;  %v12829_v52 = vld [vmem:[#allocation2 + $0x88] sm:$0xf]  ;;  %v14069_v40 = vpop.f32.mrb[9].mxu0 }
 0x1f6   : > { %v4424_v15 = vrot.slane %v4422_v6, 6  ;;  %v3806_v19 = vshrl.u32 %v3547_v43, 16  ;;  %v3809_v9 = vshll.u32 %v3547_v43, 16  ;;  %v4431_v7 = vrot.slane %v4429_v48, 5  ;;  %v14073_v6 = vpop.f32.mrb[10].mxu0 }
 0x1f7   : > { %v4408_v20 = vsel %vm13509_vm6, %v4399_v41, %v4407_v0  ;;  %v4434_v14 = vrot.slane %v4432_v55, 6  ;;  %v3815_v22 = vshll.u32 %v12826_v21, 16  ;;  %5590 = vmatmul.mubr.bf16.gmra.mrb[32].mxu1 %v14026_v62  ;;  %v4417_v16 = vrot.slane %v4416_v59, 4  ;;  %v14075_v59 = vpop.f32.mrb[11].mxu0 }
 0x1f8   : > { %v11688_v58 = vcombine.low %v4398_v32, %v4408_v20  ;;  %v4425_v24 = vor.u32 %v4424_v15, %v4421_v44  ;;  %v3808_v28 = vrot.slane %v3806_v19, 4  ;;  %v3811_v38 = vrot.slane %v3809_v9, 5  ;;  %5597 = vmatprep.mubr.bf16.mxu1 %v4291_v18  ;;  %v4341_v18 = vld [vmem:[#allocation2 + $0x38] sm:$0x3] }
 0x1f9   : > { %v4435_v26 = vor.u32 %v4434_v14, %v4431_v7  ;;  %v3817_v33 = vrot.slane %v3815_v22, 5  ;;  %v3819_v54 = vshrl.u32 %v12826_v21, 16  ;;  %v3825_v61 = vshll.u32 %v12827_v10, 16  ;;  %v4342_v7 = vld [vmem:[#allocation2 + $0x3c] sm:$0xe]  ;;  %v14080_v14 = vpop.f32.mrb[12].mxu0  ;;  %v3425_v22 = vpop.permute.xlu1 %3424 }
 0x1fa   : > { %4893 = vst.msk [vmem:[#allocation3 + $0x20] sm:$0xff] %vm1416_vm8, %v11688_v58  ;;  %v4426_v62 = vsel %vm13509_vm6, %v4417_v16, %v4425_v24  ;;  %v4427_v25 = vrot.slane %v4425_v24, 4  ;;  %v11602_v36 = vrot.slane %v12828_v23, 9  ;;  %v3812_v27 = vor.u32 %v3811_v38, %v3808_v28  ;;  %v4343_v28 = vld [vmem:[#allocation2 + $0x40] sm:$0xf] }
 0x1fb   : > { %v3821_v11 = vrot.slane %v3819_v54, 4  ;;  %v2804_v39 = vrot.slane %v12829_v52, 5  ;;  %v2807_v42 = vrot.slane %v2668_v29, 5  ;;  %v3827_v13 = vrot.slane %v3825_v61, 5  ;;  %v14085_v29 = vpop.f32.mrb[13].mxu0 }
 0x1fc   : > { %v4436_v17 = vsel %vm13509_vm6, %v4427_v25, %v4435_v26  ;;  %v4438_v5 = vshrl.u32 %v4339_v2, 16  ;;  %v4441_v35 = vshll.u32 %v4339_v2, 16  ;;  %v3813_v32 = vrot.slane %v3812_v27, 4  ;;  %v14089_v25 = vpop.f32.mrb[14].mxu0  ;;  %v4344_v23 = vld [vmem:[#allocation2 + $0x44] sm:$0x3] }
 0x1fd   : > { %v11689_v43 = vcombine.low %v4426_v62, %v4436_v17  ;;  %v3822_v41 = vor.u32 %v3821_v11, %v3817_v33  ;;  %v2805_v4 = vsel %vm13040_vm13, %v11602_v36, %v2804_v39  ;;  %v2806_v0 = vrot.slane %v2804_v39, 4  ;;  %v14092_v27 = vpop.f32.mrb[15].mxu0 }
 0x1fe   : > { %v4440_v44 = vrot.slane %v4438_v5, 5  ;;  %v4443_v48 = vrot.slane %v4441_v35, 6  ;;  %v4447_v55 = vshrl.u32 %v4340_v63, 16  ;;  %v3818_v15 = vsel %vm13103_vm14, %v3813_v32, %v3817_v33  ;;  %v4242_v33 = vpop.permute.xlu0 %4241  ;;  %v14095_v17 = vpop.f32.mrb[16].mxu0 }
 0x1ff   : > { %4894 = vst.msk [vmem:[#allocation3 + $0x48] sm:$0xff] %vm1416_vm8, %v11689_v43  ;;  %v3823_v19 = vrot.slane %v3822_v41, 4  ;;  %v4450_v9 = vshll.u32 %v4340_v63, 16  ;;  %v4457_v20 = vshrl.u32 %v4341_v18, 16  ;;  %v2808_v21 = vsel %vm13040_vm13, %v2806_v0, %v2807_v42  ;;  %5598 = vmatmul.mubr.bf16.gmra.mrb[36].mxu1 %v14038_v31  ;;  %v3550_v63 = vld [vmem:[#allocation2 + $0x9c] sm:$0xf] }
 0x200   : > { %v4444_v58 = vor.u32 %v4443_v48, %v4440_v44  ;;  %v4449_v16 = vrot.slane %v4447_v55, 5  ;;  %v4460_v24 = vshll.u32 %v4341_v18, 16  ;;  %v11618_v54 = vcombine.low %v2805_v4, %v2808_v21  ;;  %v14098_v43 = vpop.f32.mrb[17].mxu0 }
 0x201   : > { %v4913_v26 = vld [vmem:[#allocation3 + $0x20] sm:$0xff]  ;;  %v3828_v38 = vsel %vm13103_vm14, %v3823_v19, %v3827_v13  ;;  %v4452_v2 = vrot.slane %v4450_v9, 6  ;;  %v4459_v62 = vrot.slane %v4457_v20, 5  ;;  %v4466_v36 = vshrl.u32 %v4342_v7, 16  ;;  %v14102_v44 = vpop.f32.mrb[18].mxu0 }
 0x202   : > { %12599 = vmatprep.mubr.msk.bf16.mxu0 %vm1416_vm8, %v4913_v26  ;;  %v11666_v10 = vcombine.low %v3818_v15, %v3828_v38  ;;  %v4445_v31 = vrot.slane %v4444_v58, 4  ;;  %v4462_v61 = vrot.slane %v4460_v24, 6  ;;  %v3478_v11 = vsel %vm1416_vm8, %v11618_v54, %v3425_v22  ;;  %v14104_v20 = vpop.f32.mrb[19].mxu0  ;;  %v12830_v58 = vld [vmem:[#allocation2 + $0xa0] sm:$0xf] }
 0x203   : > { %v4453_v52 = vor.u32 %v4452_v2, %v4449_v16  ;;  %v4469_v39 = vshll.u32 %v4342_v7, 16  ;;  %v4475_v42 = vshrl.u32 %v4343_v28, 16  ;;  %v4468_v5 = vrot.slane %v4466_v36, 5  ;;  %v14109_v24 = vpop.f32.mrb[20].mxu0  ;;  %v2671_v54 = vld [vmem:[#allocation2 + $0x98] sm:$0x1] }
 0x204   : > { %v4295_v13 = vsel %vm1416_vm8, %v11666_v10, %v4242_v33  ;;  %v4463_v18 = vor.u32 %v4462_v61, %v4459_v62  ;;  %v4478_v35 = vshll.u32 %v4343_v28, 16  ;;  %v4485_v15 = vshrl.u32 %v4344_v23, 16  ;;  %v14111_v2 = vpop.f32.mrb[21].mxu0 }
 0x205   : > { %v4454_v32 = vsel %vm13509_vm6, %v4445_v31, %v4453_v52  ;;  %v4455_v41 = vrot.slane %v4453_v52, 4  ;;  %v4471_v4 = vrot.slane %v4469_v39, 6  ;;  %v4477_v0 = vrot.slane %v4475_v42, 5  ;;  %5605 = vmatprep.mubr.bf16.mxu1 %v4295_v13  ;;  %v12831_v42 = vld [vmem:[#allocation2 + $0xa4] sm:$0x1] }
 0x206   : > { %v4918_v48 = vld [vmem:[#allocation3 + $0x48] sm:$0xff]  ;;  %v4480_v55 = vrot.slane %v4478_v35, 6  ;;  %v4488_v19 = vshll.u32 %v4344_v23, 16  ;;  %v3830_v9 = vshrl.u32 %v3550_v63, 16  ;;  %v3833_v22 = vshll.u32 %v3550_v63, 16  ;;  %v14113_v23 = vpop.f32.mrb[22].mxu0 }
 0x207   : > { %12600 = vmatmul.mubr.msk.bf16.vlgmr.msra.gmra.mrb[64].mxu0 %vm1416_vm8, %v4918_v48  ;;  %v4464_v7 = vsel %vm13509_vm6, %v4455_v41, %v4463_v18  ;;  %v4472_v21 = vor.u32 %v4471_v4, %v4468_v5  ;;  %v3839_v16 = vshll.u32 %v12830_v58, 16  ;;  %v4487_v38 = vrot.slane %v4485_v15, 5  ;;  %5606 = vmatmul.mubr.bf16.gmra.mrb[40].mxu1 %v3478_v11  ;;  %v14116_v13 = vpop.f32.mrb[23].mxu0  ;;  %v12832_v5 = vld [vmem:[#allocation2 + $0x90] sm:$0xe] }
 0x208   : > { %v11690_v28 = vcombine.low %v4454_v32, %v4464_v7  ;;  %v4481_v26 = vor.u32 %v4480_v55, %v4477_v0  ;;  %v4490_v33 = vrot.slane %v4488_v19, 6  ;;  %v3832_v10 = vrot.slane %v3830_v9, 4  ;;  %v12833_v32 = vld [vmem:[#allocation2 + $0x94] sm:$0xf]  ;;  %v4345_v4 = vld [vmem:[#allocation2 + $0x48] sm:$0xe] }
 0x209   : > { %v4473_v62 = vrot.slane %v4472_v21, 4  ;;  %v3835_v31 = vrot.slane %v3833_v22, 5  ;;  %v3841_v61 = vrot.slane %v3839_v16, 5  ;;  %v3843_v39 = vshrl.u32 %v12830_v58, 16  ;;  %v4346_v0 = vld [vmem:[#allocation2 + $0x4c] sm:$0xf] }
 0x20a   : > { %4895 = vst.msk [vmem:[#allocation3 + $0x70] sm:$0xff] %vm1416_vm8, %v11690_v28  ;;  %v4483_v36 = vrot.slane %v4481_v26, 4  ;;  %v4491_v52 = vor.u32 %v4490_v33, %v4487_v38  ;;  %v3849_v63 = vshll.u32 %v12831_v42, 16  ;;  %v11603_v35 = vrot.slane %v12832_v5, 9  ;;  %v4347_v9 = vld [vmem:[#allocation2 + $0x50] sm:$0x3] }
 0x20b   : > { %v4482_v11 = vsel %vm13509_vm6, %v4473_v62, %v4481_v26  ;;  %v3836_v18 = vor.u32 %v3835_v31, %v3832_v10  ;;  %v2811_v41 = vrot.slane %v12833_v32, 5  ;;  %v3845_v55 = vrot.slane %v3843_v39, 4  ;;  %v3427_v31 = vpop.permute.xlu1 %3426  ;;  %v4348_v39 = vld [vmem:[#allocation2 + $0x54] sm:$0xe] }
 0x20c   : > { %v4492_v48 = vsel %vm13509_vm6, %v4483_v36, %v4491_v52  ;;  %v3851_v15 = vrot.slane %v3849_v63, 5  ;;  %v2814_v19 = vrot.slane %v2671_v54, 5  ;;  %v4494_v26 = vshrl.u32 %v4345_v4, 16 }
 0x20d   : > { %v11691_v7 = vcombine.low %v4482_v11, %v4492_v48  ;;  %v3837_v21 = vrot.slane %v3836_v18, 4  ;;  %v2812_v22 = vsel %vm13040_vm13, %v11603_v35, %v2811_v41  ;;  %v2813_v58 = vrot.slane %v2811_v41, 4  ;;  %v4349_v35 = vld [vmem:[#allocation2 + $0x58] sm:$0xf] }
 0x20e   : > { %v14124_v16 = vpop.f32.mrb[24].mxu0  ;;  %v3846_v28 = vor.u32 %v3845_v55, %v3841_v61  ;;  %v4497_v38 = vshll.u32 %v4345_v4, 16  ;;  %v4503_v33 = vshrl.u32 %v4346_v0, 16  ;;  %v4506_v36 = vshll.u32 %v4346_v0, 16 }
 0x20f   : > { %v14126_v62 = vpop.f32.mrb[25].mxu0  ;;  %4896 = vst.msk [vmem:[#allocation3 + $0x98] sm:$0xff] %vm1416_vm8, %v11691_v7  ;;  %v3842_v54 = vsel %vm13103_vm14, %v3837_v21, %v3841_v61  ;;  %v2815_v10 = vsel %vm13040_vm13, %v2813_v58, %v2814_v19  ;;  %v4513_v52 = vshrl.u32 %v4347_v9, 16  ;;  %v4496_v18 = vrot.slane %v4494_v26, 5  ;;  %v4244_v19 = vpop.permute.xlu0 %4243 }
 0x210   : > { %v14133_v42 = vpop.f32.mrb[26].mxu0  ;;  %v3847_v63 = vrot.slane %v3846_v28, 4  ;;  %v11619_v11 = vcombine.low %v2812_v22, %v2815_v10  ;;  %v4499_v5 = vrot.slane %v4497_v38, 6  ;;  %v4505_v4 = vrot.slane %v4503_v33, 5  ;;  %v4350_v38 = vld [vmem:[#allocation2 + $0x5c] sm:$0x3] }
 0x211   : > { %v14135_v32 = vpop.f32.mrb[27].mxu0  ;;  %v4923_v41 = vld [vmem:[#allocation3 + $0x70] sm:$0xff]  ;;  %v4508_v48 = vrot.slane %v4506_v36, 6  ;;  %v4515_v61 = vrot.slane %v4513_v52, 5  ;;  %v4516_v55 = vshll.u32 %v4347_v9, 16  ;;  %v4522_v22 = vshrl.u32 %v4348_v39, 16 }
 0x212   : > { %12603 = vmatprep.mubr.msk.bf16.mxu0 %vm1416_vm8, %v4923_v41  ;;  %v3852_v0 = vsel %vm13103_vm14, %v3847_v63, %v3851_v15  ;;  %v3482_v7 = vsel %vm1416_vm8, %v11619_v11, %v3427_v31  ;;  %v4500_v21 = vor.u32 %v4499_v5, %v4496_v18  ;;  %v4525_v10 = vshll.u32 %v4348_v39, 16  ;;  %v3553_v9 = vld [vmem:[#allocation2 + $0xa8] sm:$0xf] }
 0x213   : > { %v11667_v58 = vcombine.low %v3842_v54, %v3852_v0  ;;  %v4509_v28 = vor.u32 %v4508_v48, %v4505_v4  ;;  %v4518_v26 = vrot.slane %v4516_v55, 6  ;;  %v4524_v33 = vrot.slane %v4522_v22, 5 }
 0x214   : > { %v4501_v8 = vrot.slane %v4500_v21, 4  ;;  %v4531_v36 = vshrl.u32 %v4349_v35, 16  ;;  %v4534_v52 = vshll.u32 %v4349_v35, 16  ;;  %v4527_v15 = vrot.slane %v4525_v10, 6  ;;  %v4351_v21 = vld [vmem:[#allocation2 + $0x60] sm:$0xe] }
 0x215   : > { %v4299_v41 = vsel %vm1416_vm8, %v11667_v58, %v4244_v19  ;;  %v4511_v50 = vrot.slane %v4509_v28, 4  ;;  %v4519_v34 = vor.u32 %v4518_v26, %v4515_v61  ;;  %v4541_v18 = vshrl.u32 %v4350_v38, 16  ;;  %v12834_v10 = vld [vmem:[#allocation2 + $0xac] sm:$0xf] }
 0x216   : > { %v4928_v63 = vld [vmem:[#allocation3 + $0x98] sm:$0xff]  ;;  %v4510_v31 = vsel %vm13509_vm6, %v4501_v8, %v4509_v28  ;;  %v4533_v11 = vrot.slane %v4531_v36, 5  ;;  %v4536_v54 = vrot.slane %v4534_v52, 6  ;;  %5613 = vmatprep.mubr.bf16.mxu1 %v4299_v41  ;;  %v4528_v5 = vor.u32 %v4527_v15, %v4524_v33  ;;  %v2674_v8 = vld [vmem:[#allocation2 + $0xa4] sm:$0x1] }
 0x217   : > { %12604 = vmatmul.mubr.msk.bf16.gmra.mrb[68].mxu0 %vm1416_vm8, %v4928_v63  ;;  %v4520_v39 = vsel %vm13509_vm6, %v4511_v50, %v4519_v34  ;;  %v4544_v35 = vshll.u32 %v4350_v38, 16  ;;  %v3854_v4 = vshrl.u32 %v3553_v9, 16  ;;  %5614 = vmatmul.mubr.bf16.gmra.mrb[44].mxu1 %v3482_v7  ;;  %v4543_v0 = vrot.slane %v4541_v18, 5  ;;  %v12835_v33 = vld [vmem:[#allocation2 + $0xb0] sm:$0x1] }
 0x218   : > { %v14147_v48 = vpop.f32.mrb[28].mxu0  ;;  %v11692_v61 = vcombine.low %v4510_v31, %v4520_v39  ;;  %v4537_v55 = vor.u32 %v4536_v54, %v4533_v11  ;;  %v3857_v19 = vshll.u32 %v3553_v9, 16  ;;  %v4529_v58 = vrot.slane %v4528_v5, 4  ;;  %v12836_v31 = vld [vmem:[#allocation2 + $0x9c] sm:$0xe] }
 0x219   : > { %16402 = vst [vmem:[#allocation7_spill] sm:$0xff] %v14147_v48  ;;  %v14149_v22 = vpop.f32.mrb[29].mxu0  ;;  %v4546_v28 = vrot.slane %v4544_v35, 6  ;;  %v3856_v26 = vrot.slane %v3854_v4, 4  ;;  %v3863_v36 = vshll.u32 %v12834_v10, 16  ;;  %v3867_v38 = vshrl.u32 %v12834_v10, 16 }
 0x21a   : > { %16403 = vst [vmem:[#allocation8_spill] sm:$0xff] %v14149_v22  ;;  %v14151_v34 = vpop.f32.mrb[30].mxu0  ;;  %4897 = vst.msk [vmem:[#allocation3 + $0xc0] sm:$0xff] %vm1416_vm8, %v11692_v61  ;;  %v4539_v50 = vrot.slane %v4537_v55, 4  ;;  %v3859_v7 = vrot.slane %v3857_v19, 5  ;;  %v3873_v52 = vshll.u32 %v12835_v33, 16  ;;  %v4538_v9 = vsel %vm13509_vm6, %v4529_v58, %v4537_v55 }
 0x21b   : > { %16404 = vst [vmem:[#allocation9_spill] sm:$0xff] %v14151_v34  ;;  %v14154_v41 = vpop.f32.mrb[31].mxu0  ;;  %v4547_v15 = vor.u32 %v4546_v28, %v4543_v0  ;;  %v3865_v63 = vrot.slane %v3863_v36, 5  ;;  %v11604_v11 = vrot.slane %v12836_v31, 9  ;;  %v3869_v18 = vrot.slane %v3867_v38, 4 }
 0x21c   : > { %16405 = vst [vmem:[#allocation10_spill] sm:$0xff] %v14154_v41  ;;  %v3860_v54 = vor.u32 %v3859_v7, %v3856_v26  ;;  %v3875_v39 = vrot.slane %v3873_v52, 5  ;;  %v12837_v5 = vld [vmem:[#allocation2 + $0xa0] sm:$0xf]  ;;  %v4352_v4 = vld [vmem:[#allocation2 + $0x64] sm:$0xf] }
 0x21d   : > { %v2818_v35 = vrot.slane %v12837_v5, 5  ;;  %v4548_v61 = vsel %vm13509_vm6, %v4539_v50, %v4547_v15  ;;  %v2821_v19 = vrot.slane %v2674_v8, 5  ;;  %v4353_v10 = vld [vmem:[#allocation2 + $0x68] sm:$0x3]  ;;  %v4550_v33 = vshrl.u32 %v4351_v21, 16  ;;  %v3429_v15 = vpop.permute.xlu1 %3428 }
 0x21e   : > { %v4553_v41 = vshll.u32 %v4351_v21, 16  ;;  %v11693_v34 = vcombine.low %v4538_v9, %v4548_v61  ;;  %v3861_v22 = vrot.slane %v3860_v54, 4  ;;  %v3870_v55 = vor.u32 %v3869_v18, %v3865_v63  ;;  %v4354_v52 = vld [vmem:[#allocation2 + $0x6c] sm:$0xe]  ;;  %v4355_v18 = vld [vmem:[#allocation2 + $0x70] sm:$0xf] }
 0x21f   : > { %v2819_v0 = vsel %vm13040_vm13, %v11604_v11, %v2818_v35  ;;  %v2820_v58 = vrot.slane %v2818_v35, 4  ;;  %v4552_v28 = vrot.slane %v4550_v33, 5  ;;  %v4559_v36 = vshrl.u32 %v4352_v4, 16 }
 0x220   : > { %v4555_v26 = vrot.slane %v4553_v41, 6  ;;  %4898 = vst.msk [vmem:[#allocation3 + $0xe8] sm:$0xff] %vm1416_vm8, %v11693_v34  ;;  %v3866_v7 = vsel %vm13103_vm14, %v3861_v22, %v3865_v63  ;;  %v3871_v50 = vrot.slane %v3870_v55, 4  ;;  %v4562_v8 = vshll.u32 %v4352_v4, 16  ;;  %v4246_v41 = vpop.permute.xlu0 %4245 }
 0x221   : > { %v4569_v38 = vshrl.u32 %v4353_v10, 16  ;;  %v4933_v21 = vld [vmem:[#allocation3 + $0xc0] sm:$0xff]  ;;  %v2822_v9 = vsel %vm13040_vm13, %v2820_v58, %v2821_v19  ;;  %v4561_v11 = vrot.slane %v4559_v36, 5  ;;  %v4572_v54 = vshll.u32 %v4353_v10, 16  ;;  %v4356_v58 = vld [vmem:[#allocation2 + $0x74] sm:$0x3] }
 0x222   : > { %v4556_v31 = vor.u32 %v4555_v26, %v4552_v28  ;;  %12607 = vmatprep.mubr.msk.bf16.mxu0 %vm1416_vm8, %v4933_v21  ;;  %v3876_v34 = vsel %vm13103_vm14, %v3871_v50, %v3875_v39  ;;  %v11620_v22 = vcombine.low %v2819_v0, %v2822_v9  ;;  %v4564_v63 = vrot.slane %v4562_v8, 6  ;;  %v3556_v26 = vld [vmem:[#allocation2 + $0xb4] sm:$0xf] }
 0x223   : > { %v4571_v5 = vrot.slane %v4569_v38, 5  ;;  %v11668_v35 = vcombine.low %v3866_v7, %v3876_v34  ;;  %v4574_v61 = vrot.slane %v4572_v54, 6  ;;  %v4578_v33 = vshrl.u32 %v4354_v52, 16 }
 0x224   : > { %v4557_v4 = vrot.slane %v4556_v31, 4  ;;  %v3486_v19 = vsel %vm1416_vm8, %v11620_v22, %v3429_v15  ;;  %v4565_v55 = vor.u32 %v4564_v63, %v4561_v11  ;;  %v4581_v28 = vshll.u32 %v4354_v52, 16 }
 0x225   : > { %v4587_v10 = vshrl.u32 %v4355_v18, 16  ;;  %v4303_v36 = vsel %vm1416_vm8, %v11668_v35, %v4246_v41  ;;  %v4575_v21 = vor.u32 %v4574_v61, %v4571_v5  ;;  %v4580_v48 = vrot.slane %v4578_v33, 5  ;;  %v12838_v41 = vld [vmem:[#allocation2 + $0xb8] sm:$0xf]  ;;  %v2677_v33 = vld [vmem:[#allocation2 + $0xb0] sm:$0x1] }
 0x226   : > { %v4590_v39 = vshll.u32 %v4355_v18, 16  ;;  %v4566_v0 = vsel %vm13509_vm6, %v4557_v4, %v4565_v55  ;;  %v4567_v50 = vrot.slane %v4565_v55, 4  ;;  %v4583_v7 = vrot.slane %v4581_v28, 6  ;;  %5621 = vmatprep.mubr.bf16.mxu1 %v4303_v36 }
 0x227   : > { %v4589_v8 = vrot.slane %v4587_v10, 5  ;;  %v4938_v38 = vld [vmem:[#allocation3 + $0xe8] sm:$0xff]  ;;  %v4597_v15 = vshrl.u32 %v4356_v58, 16  ;;  %v4600_v31 = vshll.u32 %v4356_v58, 16  ;;  %v3878_v11 = vshrl.u32 %v3556_v26, 16  ;;  %5622 = vmatmul.mubr.bf16.gmra.mrb[48].mxu1 %v3486_v19  ;;  %v14174_v52 = vpop.f32.mrb[32].mxu0 }
 0x228   : > { %v4592_v9 = vrot.slane %v4590_v39, 6  ;;  %12608 = vmatmul.mubr.msk.bf16.gmra.mrb[72].mxu0 %vm1416_vm8, %v4938_v38  ;;  %v4576_v54 = vsel %vm13509_vm6, %v4567_v50, %v4575_v21  ;;  %v4584_v18 = vor.u32 %v4583_v7, %v4580_v48  ;;  %v3881_v34 = vshll.u32 %v3556_v26, 16  ;;  %v14179_v63 = vpop.f32.mrb[33].mxu0  ;;  %v12839_v39 = vld [vmem:[#allocation2 + $0xbc] sm:$0x1] }
 0x229   : > { %v3887_v22 = vshll.u32 %v12838_v41, 16  ;;  %16406 = vst [vmem:[#allocation11_spill] sm:$0xff] %v14179_v63  ;;  %v11694_v5 = vcombine.low %v4566_v0, %v4576_v54  ;;  %v4599_v4 = vrot.slane %v4597_v15, 5  ;;  %v4602_v61 = vrot.slane %v4600_v31, 6  ;;  %v14181_v55 = vpop.f32.mrb[34].mxu0 }
 0x22a   : > { %v4593_v35 = vor.u32 %v4592_v9, %v4589_v8  ;;  %16407 = vst [vmem:[#allocation12_spill] sm:$0xff] %v14181_v55  ;;  %v4585_v19 = vrot.slane %v4584_v18, 4  ;;  %v3880_v58 = vrot.slane %v3878_v11, 4  ;;  %v3883_v28 = vrot.slane %v3881_v34, 5  ;;  %v14183_v36 = vpop.f32.mrb[35].mxu0 }
 0x22b   : > { %v3889_v10 = vrot.slane %v3887_v22, 5  ;;  %16408 = vst [vmem:[#allocation13_spill] sm:$0xff] %v14183_v36  ;;  %4899 = vst.msk [vmem:[#allocation3 + $0x110] sm:$0xff] %vm1416_vm8, %v11694_v5  ;;  %v4603_v26 = vor.u32 %v4602_v61, %v4599_v4  ;;  %v3891_v21 = vshrl.u32 %v12838_v41, 16  ;;  %v3897_v50 = vshll.u32 %v12839_v39, 16 }
 0x22c   : > { %v4595_v48 = vrot.slane %v4593_v35, 4  ;;  %v4594_v0 = vsel %vm13509_vm6, %v4585_v19, %v4593_v35  ;;  %v3884_v7 = vor.u32 %v3883_v28, %v3880_v58  ;;  %v12840_v8 = vld [vmem:[#allocation2 + $0xa8] sm:$0xe]  ;;  %v12841_v9 = vld [vmem:[#allocation2 + $0xac] sm:$0xf]  ;;  %v2828_v22 = vrot.slane %v2677_v33, 5  ;;  %v3431_v33 = vpop.permute.xlu1 %3430 }
 0x22d   : > { %v11605_v38 = vrot.slane %v12840_v8, 9  ;;  %v2825_v15 = vrot.slane %v12841_v9, 5  ;;  %v4357_v31 = vld [vmem:[#allocation2 + $0x78] sm:$0xe]  ;;  %v4358_v11 = vld [vmem:[#allocation2 + $0x7c] sm:$0xf] }
 0x22e   : > { %v4604_v54 = vsel %vm13509_vm6, %v4595_v48, %v4603_v26  ;;  %v3893_v18 = vrot.slane %v3891_v21, 4  ;;  %v3899_v34 = vrot.slane %v3897_v50, 5  ;;  %v4359_v5 = vld [vmem:[#allocation2 + $0x80] sm:$0x3]  ;;  %v3885_v4 = vrot.slane %v3884_v7, 4 }
 0x22f   : > { %v11695_v41 = vcombine.low %v4594_v0, %v4604_v54  ;;  %v2826_v61 = vsel %vm13040_vm13, %v11605_v38, %v2825_v15  ;;  %v2827_v35 = vrot.slane %v2825_v15, 4  ;;  %v4606_v58 = vshrl.u32 %v4357_v31, 16  ;;  %v4360_v50 = vld [vmem:[#allocation2 + $0x84] sm:$0xe]  ;;  %v4361_v15 = vld [vmem:[#allocation2 + $0x88] sm:$0xf] }
 0x230   : > { %v3894_v19 = vor.u32 %v3893_v18, %v3889_v10  ;;  %v4609_v28 = vshll.u32 %v4357_v31, 16  ;;  %v4615_v39 = vshrl.u32 %v4358_v11, 16  ;;  %v3890_v8 = vsel %vm13103_vm14, %v3885_v4, %v3889_v10  ;;  %v3559_v63 = vld [vmem:[#allocation2 + $0xc0] sm:$0xf] }
 0x231   : > { %4900 = vst.msk [vmem:[#allocation3 + $0x138] sm:$0xff] %vm1416_vm8, %v11695_v41  ;;  %v2829_v48 = vsel %vm13040_vm13, %v2827_v35, %v2828_v22  ;;  %v4618_v26 = vshll.u32 %v4358_v11, 16  ;;  %v4625_v21 = vshrl.u32 %v4359_v5, 16  ;;  %v4608_v38 = vrot.slane %v4606_v58, 5  ;;  %v4248_v22 = vpop.permute.xlu0 %4247 }
 0x232   : > { %v3895_v0 = vrot.slane %v3894_v19, 4  ;;  %v11621_v7 = vcombine.low %v2826_v61, %v2829_v48  ;;  %v4611_v9 = vrot.slane %v4609_v28, 6  ;;  %v14197_v54 = vpop.f32.mrb[36].mxu0  ;;  %v4943_v31 = vld [vmem:[#allocation3 + $0x110] sm:$0xff]  ;;  %v4617_v18 = vrot.slane %v4615_v39, 5 }
 0x233   : > { %16409 = vst [vmem:[#allocation14_spill] sm:$0xff] %v14197_v54  ;;  %v4620_v41 = vrot.slane %v4618_v26, 6  ;;  %v4627_v36 = vrot.slane %v4625_v21, 5  ;;  %v4628_v55 = vshll.u32 %v4359_v5, 16  ;;  %v14199_v10 = vpop.f32.mrb[37].mxu0  ;;  %12611 = vmatprep.mubr.msk.bf16.mxu0 %vm1416_vm8, %v4943_v31  ;;  %v4634_v35 = vshrl.u32 %v4360_v50, 16 }
 0x234   : > { %16410 = vst [vmem:[#allocation15_spill] sm:$0xff] %v14199_v10  ;;  %v3900_v11 = vsel %vm13103_vm14, %v3895_v0, %v3899_v34  ;;  %v3490_v4 = vsel %vm1416_vm8, %v11621_v7, %v3431_v33  ;;  %v4612_v61 = vor.u32 %v4611_v9, %v4608_v38  ;;  %v14205_v19 = vpop.f32.mrb[38].mxu0  ;;  %v4362_v48 = vld [vmem:[#allocation2 + $0x8c] sm:$0x3]  ;;  %v4637_v26 = vshll.u32 %v4360_v50, 16 }
 0x235   : > { %16411 = vst [vmem:[#allocation16_spill] sm:$0xff] %v14205_v19  ;;  %v11669_v58 = vcombine.low %v3890_v8, %v3900_v11  ;;  %v4621_v28 = vor.u32 %v4620_v41, %v4617_v18  ;;  %v4630_v39 = vrot.slane %v4628_v55, 6  ;;  %v14207_v5 = vpop.f32.mrb[39].mxu0  ;;  %v4636_v10 = vrot.slane %v4634_v35, 5 }
 0x236   : > { %16412 = vst [vmem:[#allocation17_spill] sm:$0xff] %v14207_v5  ;;  %v4613_v21 = vrot.slane %v4612_v61, 4  ;;  %v4643_v31 = vshrl.u32 %v4361_v15, 16  ;;  %v4646_v54 = vshll.u32 %v4361_v15, 16  ;;  %v4639_v7 = vrot.slane %v4637_v26, 6 }
 0x237   : > { %v4307_v34 = vsel %vm1416_vm8, %v11669_v58, %v4248_v22  ;;  %v4623_v0 = vrot.slane %v4621_v28, 4  ;;  %v4631_v33 = vor.u32 %v4630_v39, %v4627_v36  ;;  %v4653_v18 = vshrl.u32 %v4362_v48, 16  ;;  %v12842_v26 = vld [vmem:[#allocation2 + $0xc4] sm:$0xf] }
 0x238   : > { %v4948_v38 = vld [vmem:[#allocation3 + $0x138] sm:$0xff]  ;;  %v4622_v8 = vsel %vm13509_vm6, %v4613_v21, %v4621_v28  ;;  %v4645_v9 = vrot.slane %v4643_v31, 5  ;;  %v4648_v55 = vrot.slane %v4646_v54, 6  ;;  %5629 = vmatprep.mubr.bf16.mxu1 %v4307_v34  ;;  %v4640_v15 = vor.u32 %v4639_v7, %v4636_v10 }
 0x239   : > { %12612 = vmatmul.mubr.msk.bf16.gmra.mrb[76].mxu0 %vm1416_vm8, %v4948_v38  ;;  %v4632_v50 = vsel %vm13509_vm6, %v4623_v0, %v4631_v33  ;;  %v4656_v41 = vshll.u32 %v4362_v48, 16  ;;  %v3902_v11 = vshrl.u32 %v3559_v63, 16  ;;  %5630 = vmatmul.mubr.bf16.gmra.mrb[52].mxu1 %v3490_v4  ;;  %v4655_v61 = vrot.slane %v4653_v18, 5  ;;  %v4363_v21 = vld [vmem:[#allocation2 + $0x90] sm:$0xe] }
 0x23a   : > { %v11696_v22 = vcombine.low %v4622_v8, %v4632_v50  ;;  %v4649_v36 = vor.u32 %v4648_v55, %v4645_v9  ;;  %v3905_v35 = vshll.u32 %v3559_v63, 16  ;;  %v4641_v58 = vrot.slane %v4640_v15, 4  ;;  %v12843_v0 = vld [vmem:[#allocation2 + $0xc8] sm:$0x1]  ;;  %v2680_v48 = vld [vmem:[#allocation2 + $0xbc] sm:$0x1] }
 0x23b   : > { %v4658_v39 = vrot.slane %v4656_v41, 6  ;;  %v3904_v28 = vrot.slane %v3902_v11, 4  ;;  %v3911_v54 = vshll.u32 %v12842_v26, 16  ;;  %v3915_v38 = vshrl.u32 %v12842_v26, 16  ;;  %v12844_v63 = vld [vmem:[#allocation2 + $0xb4] sm:$0xe] }
 0x23c   : > { %4901 = vst.msk [vmem:[#allocation3 + $0x160] sm:$0xff] %vm1416_vm8, %v11696_v22  ;;  %v4651_v31 = vrot.slane %v4649_v36, 4  ;;  %v3907_v34 = vrot.slane %v3905_v35, 5  ;;  %v3921_v10 = vshll.u32 %v12843_v0, 16  ;;  %v4650_v4 = vsel %vm13509_vm6, %v4641_v58, %v4649_v36  ;;  %v12845_v50 = vld [vmem:[#allocation2 + $0xb8] sm:$0xf] }
 0x23d   : > { %v4659_v33 = vor.u32 %v4658_v39, %v4655_v61  ;;  %v3913_v7 = vrot.slane %v3911_v54, 5  ;;  %v11606_v8 = vrot.slane %v12844_v63, 9  ;;  %v3917_v55 = vrot.slane %v3915_v38, 4  ;;  %v4364_v41 = vld [vmem:[#allocation2 + $0x94] sm:$0xf] }
 0x23e   : > { %v3908_v9 = vor.u32 %v3907_v34, %v3904_v28  ;;  %v3923_v18 = vrot.slane %v3921_v10, 5  ;;  %v2832_v15 = vrot.slane %v12845_v50, 5  ;;  %v2835_v22 = vrot.slane %v2680_v48, 5  ;;  %v4365_v35 = vld [vmem:[#allocation2 + $0x98] sm:$0x3] }
 0x23f   : > { %v4660_v11 = vsel %vm13509_vm6, %v4651_v31, %v4659_v33  ;;  %v4662_v26 = vshrl.u32 %v4363_v21, 16  ;;  %v4665_v0 = vshll.u32 %v4363_v21, 16  ;;  %v3918_v36 = vor.u32 %v3917_v55, %v3913_v7  ;;  %v4366_v48 = vld [vmem:[#allocation2 + $0x9c] sm:$0xe]  ;;  %v3433_v33 = vpop.permute.xlu1 %3432  ;;  %v4367_v55 = vld [vmem:[#allocation2 + $0xa0] sm:$0xf] }
 0x240   : > { %v11697_v5 = vcombine.low %v4650_v4, %v4660_v11  ;;  %v3909_v19 = vrot.slane %v3908_v9, 4  ;;  %v2833_v61 = vsel %vm13040_vm13, %v11606_v8, %v2832_v15  ;;  %v2834_v58 = vrot.slane %v2832_v15, 4 }
 0x241   : > { %v4664_v39 = vrot.slane %v4662_v26, 5  ;;  %v4667_v28 = vrot.slane %v4665_v0, 6  ;;  %v4671_v54 = vshrl.u32 %v4364_v41, 16  ;;  %v3919_v31 = vrot.slane %v3918_v36, 4  ;;  %v4368_v36 = vld [vmem:[#allocation2 + $0xa4] sm:$0x3] }
 0x242   : > { %4902 = vst.msk [vmem:[#allocation3 + $0x188] sm:$0xff] %vm1416_vm8, %v11697_v5  ;;  %v3914_v34 = vsel %vm13103_vm14, %v3909_v19, %v3913_v7  ;;  %v4674_v38 = vshll.u32 %v4364_v41, 16  ;;  %v4681_v10 = vshrl.u32 %v4365_v35, 16  ;;  %v2836_v4 = vsel %vm13040_vm13, %v2834_v58, %v2835_v22  ;;  %v4250_v5 = vpop.permute.xlu0 %4249 }
 0x243   : > { %v4953_v21 = vld [vmem:[#allocation3 + $0x160] sm:$0xff]  ;;  %v4668_v63 = vor.u32 %v4667_v28, %v4664_v39  ;;  %v4673_v8 = vrot.slane %v4671_v54, 5  ;;  %v4684_v9 = vshll.u32 %v4365_v35, 16  ;;  %v14227_v50 = vpop.f32.mrb[40].mxu0  ;;  %v3924_v19 = vsel %vm13103_vm14, %v3919_v31, %v3923_v18 }
 0x244   : > { %16413 = vst [vmem:[#allocation18_spill] sm:$0xff] %v14227_v50  ;;  %12615 = vmatprep.mubr.msk.bf16.mxu0 %vm1416_vm8, %v4953_v21  ;;  %v11622_v7 = vcombine.low %v2833_v61, %v2836_v4  ;;  %v4676_v15 = vrot.slane %v4674_v38, 6  ;;  %v4683_v41 = vrot.slane %v4681_v10, 5  ;;  %v14232_v11 = vpop.f32.mrb[41].mxu0  ;;  %v11670_v26 = vcombine.low %v3914_v34, %v3924_v19  ;;  %v3562_v50 = vld [vmem:[#allocation2 + $0xcc] sm:$0xf] }
 0x245   : > { %v4669_v22 = vrot.slane %v4668_v63, 4  ;;  %v4686_v0 = vrot.slane %v4684_v9, 6  ;;  %v4690_v58 = vshrl.u32 %v4366_v48, 16  ;;  %v14234_v35 = vpop.f32.mrb[42].mxu0  ;;  %v4693_v54 = vshll.u32 %v4366_v48, 16 }
 0x246   : > { %v3494_v39 = vsel %vm1416_vm8, %v11622_v7, %v3433_v33  ;;  %v4677_v28 = vor.u32 %v4676_v15, %v4673_v8  ;;  %v4699_v21 = vshrl.u32 %v4367_v55, 16  ;;  %v14237_v18 = vpop.f32.mrb[43].mxu0  ;;  %v4311_v61 = vsel %vm1416_vm8, %v11670_v26, %v4250_v5 }
 0x247   : > { %16414 = vst [vmem:[#allocation19_spill] sm:$0xff] %v14237_v18  ;;  %v4687_v31 = vor.u32 %v4686_v0, %v4683_v41  ;;  %v4692_v38 = vrot.slane %v4690_v58, 5  ;;  %v4702_v10 = vshll.u32 %v4367_v55, 16  ;;  %v4695_v63 = vrot.slane %v4693_v54, 6  ;;  %5637 = vmatprep.mubr.bf16.mxu1 %v4311_v61  ;;  %v12846_v41 = vld [vmem:[#allocation2 + $0xd0] sm:$0xf] }
 0x248   : > { %v4678_v34 = vsel %vm13509_vm6, %v4669_v22, %v4677_v28  ;;  %v4679_v4 = vrot.slane %v4677_v28, 4  ;;  %v4701_v9 = vrot.slane %v4699_v21, 5  ;;  %v4709_v8 = vshrl.u32 %v4368_v36, 16  ;;  %5638 = vmatmul.mubr.bf16.gmra.mrb[56].mxu1 %v3494_v39  ;;  %v4369_v54 = vld [vmem:[#allocation2 + $0xa8] sm:$0xe] }
 0x249   : > { %v4958_v19 = vld [vmem:[#allocation3 + $0x188] sm:$0xff]  ;;  %v4704_v33 = vrot.slane %v4702_v10, 6  ;;  %v4712_v48 = vshll.u32 %v4368_v36, 16  ;;  %v3926_v7 = vshrl.u32 %v3562_v50, 16  ;;  %v4696_v15 = vor.u32 %v4695_v63, %v4692_v38  ;;  %v2683_v18 = vld [vmem:[#allocation2 + $0xc8] sm:$0x1] }
 0x24a   : > { %12616 = vmatmul.mubr.msk.bf16.gmra.mrb[80].mxu0 %vm1416_vm8, %v4958_v19  ;;  %v4688_v5 = vsel %vm13509_vm6, %v4679_v4, %v4687_v31  ;;  %v3929_v55 = vshll.u32 %v3562_v50, 16  ;;  %v3935_v26 = vshll.u32 %v12846_v41, 16  ;;  %v4711_v58 = vrot.slane %v4709_v8, 5 }
 0x24b   : > { %v11698_v22 = vcombine.low %v4678_v34, %v4688_v5  ;;  %v4705_v0 = vor.u32 %v4704_v33, %v4701_v9  ;;  %v4714_v28 = vrot.slane %v4712_v48, 6  ;;  %v4697_v21 = vrot.slane %v4696_v15, 4  ;;  %v12847_v33 = vld [vmem:[#allocation2 + $0xc0] sm:$0xe]  ;;  %v12848_v48 = vld [vmem:[#allocation2 + $0xc4] sm:$0xf] }
 0x24c   : > { %v3928_v61 = vrot.slane %v3926_v7, 4  ;;  %v3931_v10 = vrot.slane %v3929_v55, 5  ;;  %v3937_v36 = vrot.slane %v3935_v26, 5  ;;  %v16415_v31 = vshrl.u32 %v13914_v49, 16  ;;  %v4370_v5 = vld [vmem:[#allocation2 + $0xac] sm:$0xf] }
 0x24d   : > { %4903 = vst.msk [vmem:[#allocation3 + $0x1b0] sm:$0xff] %vm1416_vm8, %v11698_v22  ;;  %v4707_v39 = vrot.slane %v4705_v0, 4  ;;  %v4715_v19 = vor.u32 %v4714_v28, %v4711_v58  ;;  %v16416_v50 = vshll.u32 %v13916_v3, 16  ;;  %v14250_v34 = vpop.f32.mrb[44].mxu0  ;;  %v4706_v63 = vsel %vm13509_vm6, %v4697_v21, %v4705_v0  ;;  %v4371_v3 = vld [vmem:[#allocation2 + $0xb0] sm:$0x3] }
 0x24e   : > { %v3941_v38 = vrot.slane %v16415_v31, 4  ;;  %v3932_v9 = vor.u32 %v3931_v10, %v3928_v61  ;;  %v11607_v8 = vrot.slane %v12847_v33, 9  ;;  %v2839_v7 = vrot.slane %v12848_v48, 5  ;;  %v14254_v15 = vpop.f32.mrb[45].mxu0  ;;  %v4252_v48 = vpop.permute.xlu0 %4251 }
 0x24f   : > { %v3947_v4 = vrot.slane %v16416_v50, 5  ;;  %v4716_v49 = vsel %vm13509_vm6, %v4707_v39, %v4715_v19  ;;  %v2842_v41 = vrot.slane %v2683_v18, 5  ;;  %v4718_v26 = vshrl.u32 %v4369_v54, 16  ;;  %v14258_v22 = vpop.f32.mrb[46].mxu0  ;;  %v3435_v19 = vpop.permute.xlu1 %3434 }
 0x250   : > { %v3942_v55 = vor.u32 %v3941_v38, %v3937_v36  ;;  %16417 = vst [vmem:[#allocation20_spill] sm:$0xff] %v14258_v22  ;;  %v11699_v58 = vcombine.low %v4706_v63, %v4716_v49  ;;  %v3933_v28 = vrot.slane %v3932_v9, 4  ;;  %v2840_v0 = vsel %vm13040_vm13, %v11607_v8, %v2839_v7  ;;  %v14262_v61 = vpop.f32.mrb[47].mxu0  ;;  %v4372_v9 = vld [vmem:[#allocation2 + $0xb4] sm:$0xe] }
 0x251   : > { %v2841_v21 = vrot.slane %v2839_v7, 4  ;;  %16418 = vst [vmem:[#allocation21_spill] sm:$0xff] %v14262_v61  ;;  %v4720_v31 = vrot.slane %v4718_v26, 5  ;;  %v4721_v50 = vshll.u32 %v4369_v54, 16  ;;  %v4727_v33 = vshrl.u32 %v4370_v5, 16 }
 0x252   : > { %v3943_v10 = vrot.slane %v3942_v55, 4  ;;  %4904 = vst.msk [vmem:[#allocation3 + $0x1d8] sm:$0xff] %vm1416_vm8, %v11699_v58  ;;  %v3938_v18 = vsel %vm13103_vm14, %v3933_v28, %v3937_v36  ;;  %v4730_v38 = vshll.u32 %v4370_v5, 16  ;;  %v4737_v63 = vshrl.u32 %v4371_v3, 16  ;;  %v4373_v55 = vld [vmem:[#allocation2 + $0xb8] sm:$0xf] }
 0x253   : > { %v2843_v39 = vsel %vm13040_vm13, %v2841_v21, %v2842_v41  ;;  %v4723_v49 = vrot.slane %v4721_v50, 6  ;;  %v4729_v54 = vrot.slane %v4727_v33, 5  ;;  %v4740_v36 = vshll.u32 %v4371_v3, 16  ;;  %v4374_v28 = vld [vmem:[#allocation2 + $0xbc] sm:$0x3] }
 0x254   : > { %v3948_v8 = vsel %vm13103_vm14, %v3943_v10, %v3947_v4  ;;  %v11623_v7 = vcombine.low %v2840_v0, %v2843_v39  ;;  %v4963_v26 = vld [vmem:[#allocation3 + $0x1b0] sm:$0xff]  ;;  %v4732_v61 = vrot.slane %v4730_v38, 6  ;;  %v4739_v22 = vrot.slane %v4737_v63, 5  ;;  %v4375_v38 = vld [vmem:[#allocation2 + $0xc0] sm:$0xe] }
 0x255   : > { %v11671_v58 = vcombine.low %v3938_v18, %v3948_v8  ;;  %12619 = vmatprep.mubr.msk.bf16.mxu0 %vm1416_vm8, %v4963_v26  ;;  %v4724_v5 = vor.u32 %v4723_v49, %v4720_v31  ;;  %v4746_v21 = vshrl.u32 %v4372_v9, 16  ;;  %v4749_v51 = vshll.u32 %v4372_v9, 16 }
 0x256   : > { %v3498_v41 = vsel %vm1416_vm8, %v11623_v7, %v3435_v19  ;;  %v4733_v10 = vor.u32 %v4732_v61, %v4729_v54  ;;  %v4742_v0 = vrot.slane %v4740_v36, 6  ;;  %v4755_v50 = vshrl.u32 %v4373_v55, 16  ;;  %v4376_v7 = vld [vmem:[#allocation2 + $0xc4] sm:$0xf]  ;;  %v4377_v54 = vld [vmem:[#allocation2 + $0xc8] sm:$0x3] }
 0x257   : > { %v4315_v4 = vsel %vm1416_vm8, %v11671_v58, %v4252_v48  ;;  %v4725_v33 = vrot.slane %v4724_v5, 4  ;;  %v4748_v39 = vrot.slane %v4746_v21, 5  ;;  %v4751_v47 = vrot.slane %v4749_v51, 6 }
 0x258   : > { %v4758_v18 = vshll.u32 %v4373_v55, 16  ;;  %5645 = vmatprep.mubr.bf16.mxu1 %v4315_v4  ;;  %v4735_v3 = vrot.slane %v4733_v10, 4  ;;  %v4743_v63 = vor.u32 %v4742_v0, %v4739_v22  ;;  %v4757_v8 = vrot.slane %v4755_v50, 5  ;;  %v4378_v0 = vld [vmem:[#allocation2 + $0xcc] sm:$0xe] }
 0x259   : > { %v4765_v26 = vshrl.u32 %v4374_v28, 16  ;;  %5646 = vmatmul.mubr.bf16.gmra.mrb[60].mxu1 %v3498_v41  ;;  %v4968_v31 = vld [vmem:[#allocation3 + $0x1d8] sm:$0xff]  ;;  %v4734_v19 = vsel %vm13509_vm6, %v4725_v33, %v4733_v10  ;;  %v4752_v9 = vor.u32 %v4751_v47, %v4748_v39  ;;  %v4768_v61 = vshll.u32 %v4374_v28, 16 }
 0x25a   : > { %v4760_v48 = vrot.slane %v4758_v18, 6  ;;  %12620 = vmatmul.mubr.msk.bf16.gmra.mrb[84].mxu0 %vm1416_vm8, %v4968_v31  ;;  %v4744_v51 = vsel %vm13509_vm6, %v4735_v3, %v4743_v63  ;;  %v4774_v55 = vshrl.u32 %v4375_v38, 16  ;;  %v4777_v22 = vshll.u32 %v4375_v38, 16 }
 0x25b   : > { %v4767_v49 = vrot.slane %v4765_v26, 5  ;;  %v11700_v58 = vcombine.low %v4734_v19, %v4744_v51  ;;  %v4753_v36 = vrot.slane %v4752_v9, 4  ;;  %v4770_v5 = vrot.slane %v4768_v61, 6  ;;  %v4379_v26 = vld [vmem:[#allocation2 + $0xd0] sm:$0xf] }
 0x25c   : > { %v4761_v41 = vor.u32 %v4760_v48, %v4757_v8  ;;  %v4776_v21 = vrot.slane %v4774_v55, 5  ;;  %v4779_v4 = vrot.slane %v4777_v22, 6  ;;  %v4783_v10 = vshrl.u32 %v4376_v7, 16  ;;  %v14282_v18 = vpop.f32.mrb[48].mxu0  ;;  %v4380_v48 = vld [vmem:[#allocation2 + $0xd4] sm:$0x3] }
 0x25d   : > { %v4786_v47 = vshll.u32 %v4376_v7, 16  ;;  %4905 = vst.msk [vmem:[#allocation3 + $0x200] sm:$0xff] %vm1416_vm8, %v11700_v58  ;;  %v4771_v33 = vor.u32 %v4770_v5, %v4767_v49  ;;  %v4793_v39 = vshrl.u32 %v4377_v54, 16  ;;  %v4796_v8 = vshll.u32 %v4377_v54, 16  ;;  %v14284_v31 = vpop.f32.mrb[49].mxu0 }
 0x25e   : > { %v4762_v28 = vsel %vm13509_vm6, %v4753_v36, %v4761_v41  ;;  %v4763_v50 = vrot.slane %v4761_v41, 4  ;;  %v4780_v38 = vor.u32 %v4779_v4, %v4776_v21  ;;  %v4785_v3 = vrot.slane %v4783_v10, 5  ;;  %v14288_v51 = vpop.f32.mrb[50].mxu0  ;;  %v9883_v4 = vld [vmem:[#allocation2 + $0xcc] sm:$0xe] }
 0x25f   : > { %v4788_v63 = vrot.slane %v4786_v47, 6  ;;  %v4795_v9 = vrot.slane %v4793_v39, 5  ;;  %v4802_v61 = vshrl.u32 %v4378_v0, 16  ;;  %v4805_v7 = vshll.u32 %v4378_v0, 16  ;;  %v14290_v36 = vpop.f32.mrb[51].mxu0 }
 0x260   : > { %v4772_v19 = vsel %vm13509_vm6, %v4763_v50, %v4771_v33  ;;  %v4781_v55 = vrot.slane %v4780_v38, 4  ;;  %v4798_v58 = vrot.slane %v4796_v8, 6  ;;  %v4811_v5 = vshrl.u32 %v4379_v26, 16 }
 0x261   : > { %v11701_v49 = vcombine.low %v4762_v28, %v4772_v19  ;;  %v4789_v22 = vor.u32 %v4788_v63, %v4785_v3  ;;  %v4804_v41 = vrot.slane %v4802_v61, 5  ;;  %v4807_v54 = vrot.slane %v4805_v7, 6  ;;  %v9884_v3 = vld [vmem:[#allocation2 + $0xd0] sm:$0xf] }
 0x262   : > { %v4814_v21 = vshll.u32 %v4379_v26, 16  ;;  %v4799_v0 = vor.u32 %v4798_v58, %v4795_v9  ;;  %v4821_v50 = vshrl.u32 %v4380_v48, 16  ;;  %v4813_v28 = vrot.slane %v4811_v5, 5  ;;  %v9885_v26 = vld [vmem:[#allocation2 + $0xd4] sm:$0x3] }
 0x263   : > { %4906 = vst.msk [vmem:[#allocation3 + $0x228] sm:$0xff] %vm1416_vm8, %v11701_v49  ;;  %v4790_v10 = vsel %vm13509_vm6, %v4781_v55, %v4789_v22  ;;  %v4791_v47 = vrot.slane %v4789_v22, 4  ;;  %v4808_v33 = vor.u32 %v4807_v54, %v4804_v41  ;;  %v4824_v38 = vshll.u32 %v4380_v48, 16 }
 0x264   : > { %v4816_v39 = vrot.slane %v4814_v21, 6  ;;  %v4973_v63 = vld [vmem:[#allocation3 + $0x200] sm:$0xff]  ;;  %v4823_v19 = vrot.slane %v4821_v50, 5  ;;  %v10307_v61 = vshrl.u32 %v9883_v4, 16  ;;  %v10310_v7 = vshll.u32 %v9883_v4, 16 }
 0x265   : > { %v4800_v8 = vsel %vm13509_vm6, %v4791_v47, %v4799_v0  ;;  %12623 = vmatprep.mubr.msk.bf16.mxu0 %vm1416_vm8, %v4973_v63  ;;  %v4809_v55 = vrot.slane %v4808_v33, 4  ;;  %v4826_v9 = vrot.slane %v4824_v38, 6  ;;  %v10316_v54 = vshrl.u32 %v9884_v3, 16 }
 0x266   : > { %v11702_v49 = vcombine.low %v4790_v10, %v4800_v8  ;;  %v4817_v22 = vor.u32 %v4816_v39, %v4813_v28  ;;  %v10309_v58 = vrot.slane %v10307_v61, 5  ;;  %v10312_v41 = vrot.slane %v10310_v7, 6 }
 0x267   : > { %v10319_v5 = vshll.u32 %v9884_v3, 16  ;;  %v4827_v47 = vor.u32 %v4826_v9, %v4823_v19  ;;  %v10326_v0 = vshrl.u32 %v9885_v26, 16  ;;  %v14301_v50 = vpop.f32.mrb[52].mxu0  ;;  %v10318_v63 = vrot.slane %v10316_v54, 5 }
 0x268   : > { %4907 = vst.msk [vmem:[#allocation3 + $0x250] sm:$0xff] %vm1416_vm8, %v11702_v49  ;;  %v4818_v48 = vsel %vm13509_vm6, %v4809_v55, %v4817_v22  ;;  %v4819_v21 = vrot.slane %v4817_v22, 4  ;;  %v10313_v4 = vor.u32 %v10312_v41, %v10309_v58  ;;  %v10329_v33 = vshll.u32 %v9885_v26, 16  ;;  %v12198_v28 = vpop.f32.mrb[53].mxu0 }
 0x269   : > { %v10321_v10 = vrot.slane %v10319_v5, 6  ;;  %v10328_v3 = vrot.slane %v10326_v0, 5  ;;  %v14307_v8 = vadd.f32 %v14045_v46, %v14041_v60  ;;  %v14311_v19 = vadd.f32 %v14049_v12, %v14047_v57  ;;  %v12200_v61 = vpop.f32.mrb[54].mxu0  ;;  %v16426_v0 = vld [vmem:[#allocation14_spill] sm:$0xff] }
 0x26a   : > { %v4978_v39 = vld [vmem:[#allocation3 + $0x228] sm:$0xff]  ;;  %v4828_v38 = vsel %vm13509_vm6, %v4819_v21, %v4827_v47  ;;  %v10314_v49 = vrot.slane %v10313_v4, 4  ;;  %v10331_v55 = vrot.slane %v10329_v33, 6  ;;  %v12201_v22 = vpop.f32.mrb[55].mxu0  ;;  %v14316_v9 = vadd.f32 %v14056_v30, %v14053_v53 }
 0x26b   : > { %12624 = vmatmul.mubr.msk.bf16.gmra.mrb[88].mxu0 %vm1416_vm8, %v4978_v39  ;;  %v11703_v7 = vcombine.low %v4818_v48, %v4828_v38  ;;  %v10322_v26 = vor.u32 %v10321_v10, %v10318_v63  ;;  %v14320_v60 = vadd.f32 %v14063_v37, %v14058_v45  ;;  %v14325_v12 = vadd.f32 %v14069_v40, %v14065_v1  ;;  %v16428_v63 = vld [vmem:[#allocation16_spill] sm:$0xff]  ;;  %v16429_v10 = vld [vmem:[#allocation17_spill] sm:$0xff]  ;;  %v16430_v38 = vld [vmem:[#allocation18_spill] sm:$0xff] }
 0x26c   : > { %v10332_v57 = vor.u32 %v10331_v55, %v10328_v3  ;;  %v14331_v41 = vadd.f32 %v14075_v59, %v14073_v6  ;;  %v14335_v53 = vadd.f32 %v14085_v29, %v14080_v14  ;;  %v14341_v37 = vadd.f32 %v14092_v27, %v14089_v25 }
 0x26d   : > { %4908 = vst.msk [vmem:[#allocation3 + $0x278] sm:$0xff] %vm1416_vm8, %v11703_v7  ;;  %v10324_v46 = vrot.slane %v10322_v26, 4  ;;  %v10323_v58 = vsel %vm13509_vm6, %v10314_v49, %v10322_v26  ;;  %v14345_v1 = vadd.f32 %v14098_v43, %v14095_v17  ;;  %v14350_v40 = vadd.f32 %v14104_v20, %v14102_v44  ;;  %v16419_v17 = vld [vmem:[#allocation7_spill] sm:$0xff]  ;;  %v16420_v43 = vld [vmem:[#allocation8_spill] sm:$0xff] }
 0x26e   : > { %v14354_v59 = vadd.f32 %v14111_v2, %v14109_v24  ;;  %v14358_v14 = vadd.f32 %v14116_v13, %v14113_v23  ;;  %v14362_v25 = vadd.f32 %v14126_v62, %v14124_v16  ;;  %v14366_v27 = vadd.f32 %v14135_v32, %v14133_v42  ;;  %v16421_v24 = vld [vmem:[#allocation9_spill] sm:$0xff]  ;;  %v16422_v2 = vld [vmem:[#allocation10_spill] sm:$0xff]  ;;  %v16423_v23 = vld [vmem:[#allocation11_spill] sm:$0xff] }
 0x26f   : > { %v4983_v30 = vld [vmem:[#allocation3 + $0x250] sm:$0xff]  ;;  %v10333_v45 = vsel %vm13509_vm6, %v10324_v46, %v10332_v57  ;;  %v12203_v29 = vpop.f32.mrb[56].mxu0  ;;  %v14370_v44 = vadd.f32 %v16420_v43, %v16419_v17  ;;  %v14374_v54 = vadd.f32 %v16422_v2, %v16421_v24  ;;  %v12169_v13 = vadd.f32 %v16423_v23, %v14174_v52  ;;  %v14381_v16 = vld [vmem:[%s16372_s2] ss:$0 sm:$0xff]  ;;  %v16424_v62 = vld [vmem:[#allocation12_spill] sm:$0xff] }
 0x270   : > { %12627 = vmatprep.mubr.msk.bf16.mxu0 %vm1416_vm8, %v4983_v30  ;;  %v11981_v6 = vcombine.low %v10323_v58, %v10333_v45  ;;  %v12204_v20 = vpop.f32.mrb[57].mxu0  ;;  %v16425_v42 = vld [vmem:[#allocation13_spill] sm:$0xff]  ;;  %v16427_v52 = vld [vmem:[#allocation15_spill] sm:$0xff]  ;;  %v12178_v33 = vadd.f32 %v16429_v10, %v16428_v63  ;;  %v12181_v3 = vadd.f32 %v14232_v11, %v16430_v38  ;;  %v12187_v26 = vadd.f32 %v14254_v15, %v14250_v34  ;;  %v16432_v57 = vld [vmem:[#allocation20_spill] sm:$0xff] }
 0x271   : > { %v12206_v5 = vpop.f32.mrb[58].mxu0  ;;  %v12172_v32 = vadd.f32 %v16425_v42, %v16424_v62  ;;  %v14388_v47 = vadd.f32 %v12169_v13, %v14381_v16  ;;  %v12175_v4 = vadd.f32 %v16427_v52, %v16426_v0  ;;  %v16431_v7 = vld [vmem:[#allocation19_spill] sm:$0xff]  ;;  %v16433_v58 = vld [vmem:[#allocation21_spill] sm:$0xff]  ;;  %v12193_v45 = vadd.f32 %v14284_v31, %v14282_v18 }
 0x272   : > { %v12207_v21 = vpop.f32.mrb[59].mxu0  ;;  %v12184_v49 = vadd.f32 %v16431_v7, %v14234_v35  ;;  %v14407_v46 = vadd.f32 %v12178_v33, %v14381_v16  ;;  %v12190_v30 = vadd.f32 %v16433_v58, %v16432_v57  ;;  %v14414_v11 = vadd.f32 %v12181_v3, %v14381_v16  ;;  %v14462_v57 = vld [vmem:[#allocation2 + $0x4] sm:$0xf] }
 0x273   : > { %v14395_v39 = vadd.f32 %v12172_v32, %v14381_v16  ;;  %v14404_v55 = vadd.f32 %v12175_v4, %v14381_v16  ;;  %v14420_v34 = vadd.f32 %v12187_v26, %v14381_v16  ;;  %v12196_v15 = vadd.f32 %v14290_v36, %v14288_v51 }
 0x274   : > { %v4988_v48 = vld [vmem:[#allocation3 + $0x278] sm:$0xff]  ;;  %v14417_v35 = vadd.f32 %v12184_v49, %v14381_v16  ;;  %v14428_v17 = vadd.f32 %v12193_v45, %v14381_v16  ;;  %v12199_v18 = vadd.f32 %v12198_v28, %v14301_v50  ;;  %v12202_v31 = vadd.f32 %v12201_v22, %v12200_v61 }
 0x275   : > { %12628 = vmatmul.mubr.msk.bf16.gmra.mrb[92].mxu0 %vm1416_vm8, %v4988_v48  ;;  %10413 = vst.msk [vmem:[#allocation3 + $0x278] sm:$0xff] %vm1416_vm8, %v11981_v6  ;;  %v14425_v6 = vadd.f32 %v12190_v30, %v14381_v16  ;;  %v14432_v43 = vadd.f32 %v12196_v15, %v14381_v16  ;;  %v12205_v24 = vadd.f32 %v12204_v20, %v12203_v29  ;;  %v6622_v30 = vld [vmem:[#allocation2] sm:$0xe]  ;;  %v6688_v45 = vrot.slane %v14462_v57, 5 }
 0x276   : > { %v12208_v2 = vadd.f32 %v12207_v21, %v12206_v5  ;;  %v14435_v23 = vadd.f32 %v12199_v18, %v14381_v16  ;;  %v14438_v13 = vadd.f32 %v12202_v31, %v14381_v16  ;;  %v5367_v32 = vadd.f32 %v14307_v8, %v14381_v16  ;;  %v14464_v8 = vld [vmem:[#allocation2 + $0x8] sm:$0x1] }
 0x277   : > { %v14441_v51 = vadd.f32 %v12205_v24, %v14381_v16  ;;  %v5370_v4 = vadd.f32 %v14311_v19, %v14381_v16  ;;  %v5375_v7 = vadd.f32 %v14316_v9, %v14381_v16  ;;  %v5378_v58 = vadd.f32 %v14320_v60, %v14381_v16  ;;  %v12717_v60 = vld [vmem:[%s16374_s4 + $0x40] sm:$0xff]  }
 0x278   : > { %v14444_v36 = vadd.f32 %v12208_v2, %v14381_v16  ;;  %v11790_v31 = vrot.slane %v6622_v30, 9  ;;  %v6691_v24 = vrot.slane %v14464_v8, 5  ;;  %v6690_v9 = vrot.slane %v6688_v45, 4  ;;  %12347 = vmatprep.subr.bf16.mxu1 %v12717_v60 }
 0x27a   : > { %v12209_v48 = vpop.f32.mrb[60].mxu0 }
 0x27b   : > { %v12210_v50 = vpop.f32.mrb[61].mxu0 }
 0x27c   : > { %v12211_v28 = vadd.f32 %v12210_v50, %v12209_v48  ;;  %v12212_v61 = vpop.f32.mrb[62].mxu0  ;;  %v6689_v50 = vsel %vm13040_vm13, %v11790_v31, %v6688_v45 }
 0x27d   : > { %v12213_v22 = vpop.f32.mrb[63].mxu0 }
 0x27e   : > { %v14447_v29 = vadd.f32 %v12211_v28, %v14381_v16  ;;  %v12214_v20 = vadd.f32 %v12213_v22, %v12212_v61  ;;  %v6692_v28 = vsel %vm13040_vm13, %v6690_v9, %v6691_v24  ;;  %v12718_v61 = vld [vmem:[%s16374_s4] sm:$0xff]   ;;  %v5399_v24 = vadd.f32 %v14345_v1, %v14381_v16 }
 0x27f   : > { %12348 = vmatpush3.bf16.msra.mxu1 %v12718_v61  ;;  %v5410_v1 = vadd.f32 %v14358_v14, %v14381_v16 }
 0x280   : > { %v14450_v5 = vadd.f32 %v12214_v20, %v14381_v16  ;;  %v11822_v20 = vcombine.low %v6689_v50, %v6692_v28 }
 0x282   : > { %6894 = vrot.lane.b32.xlu1 %v11822_v20, %s12939_s27 }
 0x286   : > { %v12231_v62 = vpop.f32.mrb[0].mxu1 }
 0x287   : > { %v12232_v42 = vpop.f32.mrb[1].mxu1 }
 0x288   : > { %v12233_v21 = vadd.f32 %v12232_v42, %v12231_v62  ;;  %v12234_v0 = vpop.f32.mrb[2].mxu1  ;;  %v5383_v42 = vadd.f32 %v14325_v12, %v14381_v16 }
 0x289   : > { %v12235_v52 = vpop.f32.mrb[3].mxu1 }
 0x28a   : > { %v12236_v63 = vadd.f32 %v12235_v52, %v12234_v0  ;;  %v14456_v10 = vadd.f32 %v12233_v21, %v5367_v32  ;;  %v5386_v52 = vadd.f32 %v14331_v41, %v14381_v16 }
 0x28c   : > { %v14458_v33 = vadd.f32 %v12236_v63, %v5370_v4 }
 0x292   : > { %v12237_v38 = vpop.f32.mrb[4].mxu1 }
 0x293   : > { %v12238_v3 = vpop.f32.mrb[5].mxu1 }
 0x294   : > { %v12239_v49 = vadd.f32 %v12238_v3, %v12237_v38  ;;  %v12240_v26 = vpop.f32.mrb[6].mxu1 }
 0x295   : > { %v12241_v19 = vpop.f32.mrb[7].mxu1 }
 0x296   : > { %v12242_v15 = vadd.f32 %v12241_v19, %v12240_v26  ;;  %v14469_v18 = vadd.f32 %v12239_v49, %v5375_v7  ;;  %v5391_v49 = vadd.f32 %v14335_v53, %v14381_v16  ;;  %v5394_v19 = vadd.f32 %v14341_v37, %v14381_v16 }
 0x297   : > { %v5402_v53 = vadd.f32 %v14350_v40, %v14381_v16 }
 0x298   : > { %v14472_v2 = vadd.f32 %v12242_v15, %v5378_v58 }
 0x29a   : > { %v12243_v22 = vpop.f32.mrb[8].mxu1 }
 0x29b   : > { %v12244_v62 = vpop.f32.mrb[9].mxu1 }
 0x29c   : > { %v12245_v32 = vadd.f32 %v12244_v62, %v12243_v22  ;;  %v12246_v21 = vpop.f32.mrb[10].mxu1  ;;  %v5407_v62 = vadd.f32 %v14354_v59, %v14381_v16  ;;  %v12720_v59 = vld [vmem:[%s16374_s4 + $0x8] sm:$0xff]  }
 0x29d   : > { %v12247_v0 = vpop.f32.mrb[11].mxu1 }
 0x29e   : > { %v12248_v4 = vadd.f32 %v12247_v0, %v12246_v21  ;;  %v14489_v63 = vadd.f32 %v12245_v32, %v5383_v42 }
 0x2a0   : > { %v14491_v38 = vadd.f32 %v12248_v4, %v5386_v52 }
 0x2a2   : > { %v12249_v3 = vpop.f32.mrb[12].mxu1 }
 0x2a3   : > { %v12250_v7 = vpop.f32.mrb[13].mxu1 }
 0x2a4   : > { %v12251_v12 = vadd.f32 %v12250_v7, %v12249_v3  ;;  %v12252_v26 = vpop.f32.mrb[14].mxu1  ;;  %v12719_v3 = vld [vmem:[%s16374_s4 + $0x48] sm:$0xff]  }
 0x2a5   : > { %v12253_v58 = vpop.f32.mrb[15].mxu1  ;;  %12349 = vmatprep.subr.bf16.mxu1 %v12719_v3 }
 0x2a6   : > { %v12254_v30 = vadd.f32 %v12253_v58, %v12252_v26  ;;  %v14497_v45 = vadd.f32 %v12251_v12, %v5391_v49  ;;  %v5415_v49 = vadd.f32 %v14362_v25, %v14381_v16  ;;  %12350 = vmatpush3.bf16.msra.mxu1 %v12720_v59  ;;  %v5418_v58 = vadd.f32 %v14366_v27, %v14381_v16 }
 0x2a8   : > { %v14499_v41 = vadd.f32 %v12254_v30, %v5394_v19 }
 0x2aa   : > { %v12255_v15 = vpop.f32.mrb[16].mxu1 }
 0x2ab   : > { %v12256_v31 = vpop.f32.mrb[17].mxu1 }
 0x2ac   : > { %v12257_v9 = vadd.f32 %v12256_v31, %v12255_v15  ;;  %v12258_v50 = vpop.f32.mrb[18].mxu1 }
 0x2ad   : > { %v12259_v28 = vpop.f32.mrb[19].mxu1 }
 0x2ae   : > { %v12260_v60 = vadd.f32 %v12259_v28, %v12258_v50  ;;  %v14505_v61 = vadd.f32 %v12257_v9, %v5399_v24  ;;  %v5423_v9 = vadd.f32 %v14370_v44, %v14381_v16 }
 0x2b0   : > { %v14507_v37 = vadd.f32 %v12260_v60, %v5402_v53  ;;  %v5426_v53 = vadd.f32 %v14374_v54, %v14381_v16 }
 0x2b2   : > { %v12261_v22 = vpop.f32.mrb[20].mxu1 }
 0x2b3   : > { %v12262_v20 = vpop.f32.mrb[21].mxu1 }
 0x2b4   : > { %v12263_v42 = vadd.f32 %v12262_v20, %v12261_v22  ;;  %v12264_v32 = vpop.f32.mrb[22].mxu1 }
 0x2b5   : > { %v12265_v21 = vpop.f32.mrb[23].mxu1 }
 0x2b6   : > { %v12266_v0 = vadd.f32 %v12265_v21, %v12264_v32  ;;  %v14513_v52 = vadd.f32 %v12263_v42, %v5407_v62 }
 0x2b8   : > { %v14515_v40 = vadd.f32 %v12266_v0, %v5410_v1 }
 0x2ba   : > { %v12267_v4 = vpop.f32.mrb[24].mxu1 }
 0x2bb   : > { %v12268_v7 = vpop.f32.mrb[25].mxu1 }
 0x2bc   : > { %v12269_v12 = vadd.f32 %v12268_v7, %v12267_v4  ;;  %v12270_v14 = vpop.f32.mrb[26].mxu1 }
 0x2bd   : > { %v12271_v26 = vpop.f32.mrb[27].mxu1 }
 0x2be   : > { %v12272_v19 = vadd.f32 %v12271_v26, %v12270_v14  ;;  %v14527_v30 = vadd.f32 %v12269_v12, %v5415_v49 }
 0x2c0   : > { %v14529_v15 = vadd.f32 %v12272_v19, %v5418_v58 }
 0x2c2   : > { %v12273_v31 = vpop.f32.mrb[28].mxu1 }
 0x2c3   : > { %v12274_v24 = vpop.f32.mrb[29].mxu1 }
 0x2c4   : > { %v12275_v50 = vadd.f32 %v12274_v24, %v12273_v31  ;;  %v12276_v25 = vpop.f32.mrb[30].mxu1 }
 0x2c5   : > { %v12277_v28 = vpop.f32.mrb[31].mxu1 }
 0x2c6   : > { %v12278_v60 = vadd.f32 %v12277_v28, %v12276_v25  ;;  %v14535_v22 = vadd.f32 %v12275_v50, %v5423_v9 }
 0x2c8   : > { %v14537_v27 = vadd.f32 %v12278_v60, %v5426_v53 }
 0x2ca   : > { %v12279_v20 = vpop.f32.mrb[32].mxu1 }
 0x2cb   : > { %v12280_v62 = vpop.f32.mrb[33].mxu1 }
 0x2cc   : > { %v12281_v42 = vadd.f32 %v12280_v62, %v12279_v20  ;;  %v12282_v32 = vpop.f32.mrb[34].mxu1 }
 0x2cd   : > { %v12283_v21 = vpop.f32.mrb[35].mxu1 }
 0x2ce   : > { %v12284_v1 = vadd.f32 %v12283_v21, %v12282_v32  ;;  %v14540_v0 = vadd.f32 %v12281_v42, %v14388_v47  ;;  %v14554_v47 = vld [vmem:[%s16373_s3] ss:$0 sm:$0xff] }
 0x2d0   : > { %v14543_v44 = vadd.f32 %v12284_v1, %v14395_v39 }
 0x2d2   : > { %v12285_v4 = vpop.f32.mrb[36].mxu1 }
 0x2d3   : > { %v12286_v3 = vpop.f32.mrb[37].mxu1 }
 0x2d4   : > { %v12287_v54 = vadd.f32 %v12286_v3, %v12285_v4  ;;  %v12288_v16 = vpop.f32.mrb[38].mxu1 }
 0x2d5   : > { %v12289_v59 = vpop.f32.mrb[39].mxu1 }
 0x2d6   : > { %v12290_v7 = vadd.f32 %v12289_v59, %v12288_v16  ;;  %v14546_v49 = vadd.f32 %v12287_v54, %v14404_v55 }
 0x2d8   : > { %v14549_v12 = vadd.f32 %v12290_v7, %v14407_v46 }
 0x2da   : > { %v12601_v14 = vpop.f32.mrb[64].mxu0  ;;  %v12291_v58 = vpop.f32.mrb[40].mxu1 }
 0x2db   : > { %v5697_v39 = vadd.f32 %v12601_v14, %v14469_v18  ;;  %v5688_v26 = vpop.f32.mrb[65].mxu0  ;;  %v12292_v24 = vpop.f32.mrb[41].mxu1  ;;  %v12722_v14 = vld [vmem:[%s16374_s4 + $0x10] sm:$0xff]  }
 0x2dc   : > { %v5689_v19 = vadd.f32 %v5688_v26, %v14456_v10  ;;  %v12602_v31 = vpop.f32.mrb[66].mxu0  ;;  %v12293_v50 = vadd.f32 %v12292_v24, %v12291_v58  ;;  %v12294_v25 = vpop.f32.mrb[42].mxu1 }
 0x2dd   : > { %vm5817_vm10 = vcmp.gt.f32.partialorder %v5697_v39, 0.0  ;;  %v5856_v55 = vmul.f32 %v14554_v47, %v5697_v39  ;;  %v5700_v46 = vadd.f32 %v12602_v31, %v14472_v2  ;;  %v5691_v9 = vpop.f32.mrb[67].mxu0  ;;  %v12295_v18 = vpop.f32.mrb[43].mxu1  ;;  %v12721_v2 = vld [vmem:[%s16374_s4 + $0x50] sm:$0xff]  }
 0x2de   : > { %vm5815_vm11 = vcmp.gt.f32.partialorder %v5689_v19, 0.0  ;;  %v5854_v28 = vmul.f32 %v14554_v47, %v5689_v19  ;;  %v5692_v53 = vadd.f32 %v5691_v9, %v14458_v33  ;;  %v12296_v20 = vadd.f32 %v12295_v18, %v12294_v25  ;;  %12351 = vmatprep.subr.bf16.mxu1 %v12721_v2 }
 0x2df   : > { %v5888_v60 = vsel %vm5817_vm10, %v5697_v39, %v5856_v55  ;;  %vm5818_vm12 = vcmp.gt.f32.partialorder %v5700_v46, 0.0  ;;  %v5857_v10 = vmul.f32 %v14554_v47, %v5700_v46  ;;  %v14568_v4 = vadd.f32 %v12293_v50, %v14414_v11  ;;  %12352 = vmatpush3.bf16.msra.mxu1 %v12722_v14 }
 0x2e0   : > { %v12073_v62 = vpack.c.bf16 %v5888_v60, %v5888_v60  ;;  %v5886_v42 = vsel %vm5815_vm11, %v5689_v19, %v5854_v28  ;;  %vm5816_vm15 = vcmp.gt.f32.partialorder %v5692_v53, 0.0  ;;  %v5855_v32 = vmul.f32 %v14554_v47, %v5692_v53 }
 0x2e1   : > { %v12071_v21 = vpack.c.bf16 %v5886_v42, %v5886_v42  ;;  %v5889_v1 = vsel %vm5818_vm12, %v5700_v46, %v5857_v10  ;;  %v14571_v33 = vadd.f32 %v12296_v20, %v14417_v35 }
 0x2e2   : > { %v6019_v3 = vrot.slane %v12073_v62, 7  ;;  %v12074_v54 = vpack.c.bf16 %v5889_v1, %v5889_v1  ;;  %v5887_v16 = vsel %vm5816_vm15, %v5692_v53, %v5855_v32 }
 0x2e3   : > { %v6014_v59 = vrot.slane %v12071_v21, 7  ;;  %v12072_v7 = vpack.c.bf16 %v5887_v16, %v5887_v16 }
 0x2e4   : > { %v6020_v39 = vrot.slane %v6019_v3, 4  ;;  %6145 = vst.msk [vmem:[#allocation2 + $0x18] sm:$0xe] %vm624_vm7, %v6019_v3  ;;  %v6021_v26 = vrot.slane %v12074_v54, 7 }
 0x2e5   : > { %v6015_v58 = vrot.slane %v6014_v59, 4  ;;  %6142 = vst.msk [vmem:[#allocation2 + $0xc] sm:$0xe] %vm624_vm7, %v6014_v59  ;;  %v6016_v11 = vrot.slane %v12072_v7, 7 }
 0x2e6   : > { %v6022_v19 = vsel %vm13026_vm9, %v6020_v39, %v6021_v26  ;;  %v6023_v31 = vrot.slane %v6021_v26, 4 }
 0x2e7   : > { %6146 = vst.msk [vmem:[#allocation2 + $0x1c] sm:$0xf] %vm253_vm3, %v6022_v19  ;;  %v6017_v24 = vsel %vm13026_vm9, %v6015_v58, %v6016_v11  ;;  %v6018_v55 = vrot.slane %v6016_v11, 4 }
 0x2e8   : > { %6147 = vst.msk [vmem:[#allocation2 + $0x20] sm:$0x1] %vm263_vm0, %v6023_v31 }
 0x2e9   : > { %6143 = vst.msk [vmem:[#allocation2 + $0x10] sm:$0xf] %vm253_vm3, %v6017_v24 }
 0x2ea   : > { %6144 = vst.msk [vmem:[#allocation2 + $0x14] sm:$0x1] %vm263_vm0, %v6018_v55  ;;  %v12605_v46 = vpop.f32.mrb[68].mxu0  ;;  %v12297_v9 = vpop.f32.mrb[44].mxu1 }
 0x2eb   : > { %v5713_v50 = vadd.f32 %v12605_v46, %v14497_v45  ;;  %v5704_v25 = vpop.f32.mrb[69].mxu0  ;;  %v12298_v28 = vpop.f32.mrb[45].mxu1 }
 0x2ec   : > { %v5705_v60 = vadd.f32 %v5704_v25, %v14489_v63  ;;  %v12606_v10 = vpop.f32.mrb[70].mxu0  ;;  %v14590_v20 = vadd.f32 %v12298_v28, %v12297_v9  ;;  %v12300_v62 = vpop.f32.mrb[46].mxu1  ;;  %v6623_v42 = vld [vmem:[#allocation2 + $0xc] sm:$0xe] }
 0x2ed   : > { %v7502_v32 = vld [vmem:[#allocation2 + $0xc] sm:$0xf]  ;;  %vm5821_vm1 = vcmp.gt.f32.partialorder %v5713_v50, 0.0  ;;  %v5860_v2 = vmul.f32 %v14554_v47, %v5713_v50  ;;  %v5716_v21 = vadd.f32 %v12606_v10, %v14499_v41  ;;  %v5707_v45 = vpop.f32.mrb[71].mxu0  ;;  %v12301_v1 = vpop.f32.mrb[47].mxu1  ;;  %v11791_v3 = vrot.slane %v6623_v42, 9 }
 0x2ee   : > { %vm5819_vm4 = vcmp.gt.f32.partialorder %v5705_v60, 0.0  ;;  %v5858_v54 = vmul.f32 %v14554_v47, %v5705_v60  ;;  %v5708_v16 = vadd.f32 %v5707_v45, %v14491_v38  ;;  %v14596_v63 = vadd.f32 %v12301_v1, %v12300_v62  ;;  %v6624_v42 = vld [vmem:[#allocation2 + $0x18] sm:$0xe] }
 0x2ef   : > { %v5892_v59 = vsel %vm5821_vm1, %v5713_v50, %v5860_v2  ;;  %vm5822_vm2 = vcmp.gt.f32.partialorder %v5716_v21, 0.0  ;;  %v5861_v7 = vmul.f32 %v14554_v47, %v5716_v21  ;;  %v7551_v39 = vshrl.u32 %v7502_v32, 16 }
 0x2f0   : > { %v14599_v14 = vld [vmem:[#allocation2 + $0x10] sm:$0xf]  ;;  %v12077_v26 = vpack.c.bf16 %v5892_v59, %v5892_v59  ;;  %v5890_v58 = vsel %vm5819_vm4, %v5705_v60, %v5858_v54  ;;  %vm5820_vm5 = vcmp.gt.f32.partialorder %v5708_v16, 0.0  ;;  %v5859_v41 = vmul.f32 %v14554_v47, %v5708_v16 }
 0x2f1   : > { %v14602_v11 = vld [vmem:[#allocation2 + $0x14] sm:$0x1]  ;;  %v12075_v19 = vpack.c.bf16 %v5890_v58, %v5890_v58  ;;  %v5893_v31 = vsel %vm5822_vm2, %v5716_v21, %v5861_v7  ;;  %v6695_v24 = vrot.slane %v14599_v14, 5  ;;  %v7503_v62 = vld [vmem:[#allocation2 + $0x10] sm:$0xf]  ;;  %v7553_v54 = vrot.slane %v7551_v39, 4 }
 0x2f2   : > { %v6029_v55 = vrot.slane %v12077_v26, 7  ;;  %v12078_v46 = vpack.c.bf16 %v5893_v31, %v5893_v31  ;;  %v5891_v9 = vsel %vm5820_vm5, %v5708_v16, %v5859_v41  ;;  %v6698_v50 = vrot.slane %v14602_v11, 5  ;;  %v7504_v1 = vld [vmem:[#allocation2 + $0x14] sm:$0x1] }
 0x2f3   : > { %v6024_v25 = vrot.slane %v12075_v19, 7  ;;  %v12076_v28 = vpack.c.bf16 %v5891_v9, %v5891_v9  ;;  %v6696_v60 = vsel %vm13040_vm13, %v11791_v3, %v6695_v24  ;;  %v6697_v10 = vrot.slane %v6695_v24, 4  ;;  %v14614_v3 = vld [vmem:[#allocation2 + $0x20] sm:$0x1]  ;;  %v14618_v24 = vld [vmem:[#allocation2 + $0x1c] sm:$0xf] }
 0x2f4   : > { %v6030_v2 = vrot.slane %v6029_v55, 4  ;;  %6151 = vst.msk [vmem:[#allocation2 + $0x30] sm:$0xe] %vm624_vm7, %v6029_v55  ;;  %v6031_v21 = vrot.slane %v12078_v46, 7  ;;  %v7554_v26 = vshll.u32 %v7502_v32, 16  ;;  %v7560_v31 = vshll.u32 %v7503_v62, 16 }
 0x2f5   : > { %v6025_v59 = vrot.slane %v6024_v25, 4  ;;  %6148 = vst.msk [vmem:[#allocation2 + $0x24] sm:$0xe] %vm624_vm7, %v6024_v25  ;;  %v6026_v16 = vrot.slane %v12076_v28, 7  ;;  %v6699_v7 = vsel %vm13040_vm13, %v6697_v10, %v6698_v50  ;;  %v7564_v9 = vshrl.u32 %v7503_v62, 16 }
 0x2f6   : > { %v6032_v58 = vsel %vm13026_vm9, %v6030_v2, %v6031_v21  ;;  %v6033_v41 = vrot.slane %v6031_v21, 4  ;;  %v11823_v19 = vcombine.low %v6696_v60, %v6699_v7  ;;  %v7556_v46 = vrot.slane %v7554_v26, 5  ;;  %v7505_v50 = vld [vmem:[#allocation2 + $0x18] sm:$0xf] }
 0x2f7   : > { %6152 = vst.msk [vmem:[#allocation2 + $0x34] sm:$0xf] %vm253_vm3, %v6032_v58  ;;  %v6027_v39 = vsel %vm13026_vm9, %v6025_v59, %v6026_v16  ;;  %v6028_v55 = vrot.slane %v6026_v16, 4  ;;  %v7562_v32 = vrot.slane %v7560_v31, 5  ;;  %v7570_v25 = vshll.u32 %v7504_v1, 16  ;;  %v12723_v1 = vld [vmem:[%s16374_s4 + $0x58] sm:$0xff]  }
 0x2f8   : > { %6153 = vst.msk [vmem:[#allocation2 + $0x38] sm:$0x1] %vm263_vm0, %v6033_v41  ;;  %6896 = vrot.lane.b32.xlu1 %v11823_v19, %s12939_s27  ;;  %v11792_v60 = vrot.slane %v6624_v42, 9  ;;  %v7557_v10 = vor.u32 %v7556_v46, %v7553_v54  ;;  %v7566_v2 = vrot.slane %v7564_v9, 4  ;;  %v6702_v21 = vrot.slane %v14618_v24, 5  ;;  %12353 = vmatprep.subr.bf16.mxu1 %v12723_v1 }
 0x2f9   : > { %6149 = vst.msk [vmem:[#allocation2 + $0x28] sm:$0xf] %vm253_vm3, %v6027_v39  ;;  %v6705_v62 = vrot.slane %v14614_v3, 5  ;;  %v7572_v16 = vrot.slane %v7570_v25, 5  ;;  %v7575_v26 = vshrl.u32 %v7505_v50, 16  ;;  %v7578_v58 = vshll.u32 %v7505_v50, 16 }
 0x2fa   : > { %6150 = vst.msk [vmem:[#allocation2 + $0x2c] sm:$0x1] %vm263_vm0, %v6028_v55  ;;  %v12303_v59 = vpop.f32.mrb[48].mxu1  ;;  %v7558_v19 = vrot.slane %v7557_v10, 4  ;;  %v7567_v31 = vor.u32 %v7566_v2, %v7562_v32  ;;  %v6703_v54 = vsel %vm13040_vm13, %v11792_v60, %v6702_v21  ;;  %v6704_v39 = vrot.slane %v6702_v21, 4 }
 0x2fb   : > { %v12609_v41 = vpop.f32.mrb[72].mxu0  ;;  %v12304_v42 = vpop.f32.mrb[49].mxu1  ;;  %v7577_v7 = vrot.slane %v7575_v26, 4  ;;  %v7580_v50 = vrot.slane %v7578_v58, 5 }
 0x2fc   : > { %v5729_v55 = vadd.f32 %v12609_v41, %v14513_v52  ;;  %v5720_v46 = vpop.f32.mrb[73].mxu0  ;;  %v14637_v9 = vadd.f32 %v12304_v42, %v12303_v59  ;;  %v12306_v25 = vpop.f32.mrb[50].mxu1  ;;  %v7563_v10 = vsel %vm13103_vm14, %v7558_v19, %v7562_v32  ;;  %v7568_v2 = vrot.slane %v7567_v31, 4 }
 0x2fd   : > { %v5721_v28 = vadd.f32 %v5720_v46, %v14505_v61  ;;  %v12610_v45 = vpop.f32.mrb[74].mxu0  ;;  %v12307_v38 = vpop.f32.mrb[51].mxu1  ;;  %v6706_v60 = vsel %vm13040_vm13, %v6704_v39, %v6705_v62  ;;  %v12724_v62 = vld [vmem:[%s16374_s4 + $0x18] sm:$0xff]   ;;  %v7507_v39 = vld [vmem:[#allocation2 + $0x20] sm:$0x1]  ;;  %v7581_v46 = vor.u32 %v7580_v50, %v7577_v7 }
 0x2fe   : > { %vm5825_vm10 = vcmp.gt.f32.partialorder %v5729_v55, 0.0  ;;  %v5864_v52 = vmul.f32 %v14554_v47, %v5729_v55  ;;  %v5732_v21 = vadd.f32 %v12610_v45, %v14515_v40  ;;  %v5723_v59 = vpop.f32.mrb[75].mxu0  ;;  %v14646_v26 = vadd.f32 %v12307_v38, %v12306_v25  ;;  %v7506_v45 = vld [vmem:[#allocation2 + $0x1c] sm:$0xf]  ;;  %12354 = vmatpush3.bf16.msra.mxu1 %v12724_v62 }
 0x2ff   : > { %vm5823_vm11 = vcmp.gt.f32.partialorder %v5721_v28, 0.0  ;;  %v5862_v61 = vmul.f32 %v14554_v47, %v5721_v28  ;;  %v5724_v58 = vadd.f32 %v5723_v59, %v14507_v37  ;;  %v7573_v32 = vsel %vm13103_vm14, %v7568_v2, %v7572_v16 }
 0x300   : > { %v5896_v1 = vsel %vm5825_vm10, %v5729_v55, %v5864_v52  ;;  %vm5826_vm12 = vcmp.gt.f32.partialorder %v5732_v21, 0.0  ;;  %v5865_v41 = vmul.f32 %v14554_v47, %v5732_v21  ;;  %v11854_v40 = vcombine.low %v7563_v10, %v7573_v32  ;;  %v14658_v59 = vld [vmem:[#allocation2 + $0x28] sm:$0xf] }
 0x301   : > { %v12081_v38 = vpack.c.bf16 %v5896_v1, %v5896_v1  ;;  %v5894_v42 = vsel %vm5823_vm11, %v5721_v28, %v5862_v61  ;;  %vm5824_vm15 = vcmp.gt.f32.partialorder %v5724_v58, 0.0  ;;  %v5863_v19 = vmul.f32 %v14554_v47, %v5724_v58 }
 0x302   : > { %v12079_v37 = vpack.c.bf16 %v5894_v42, %v5894_v42  ;;  %v5897_v31 = vsel %vm5826_vm12, %v5732_v21, %v5865_v41  ;;  %8030 = vrot.lane.b32.xlu0 %v11854_v40, %s12939_s27  ;;  %v11824_v16 = vcombine.low %v6703_v54, %v6706_v60  ;;  %v7584_v52 = vshll.u32 %v7506_v45, 16  ;;  %v14662_v60 = vld [vmem:[#allocation2 + $0x2c] sm:$0x1]  ;;  %v6625_v40 = vld [vmem:[#allocation2 + $0x24] sm:$0xe] }
 0x303   : > { %v6039_v25 = vrot.slane %v12081_v38, 7  ;;  %v12082_v55 = vpack.c.bf16 %v5897_v31, %v5897_v31  ;;  %v5895_v2 = vsel %vm5824_vm15, %v5724_v58, %v5863_v19  ;;  %v7582_v28 = vrot.slane %v7581_v46, 4  ;;  %v14670_v31 = vld [vmem:[#allocation2 + $0x28] sm:$0xf] }
 0x304   : > { %v6034_v10 = vrot.slane %v12079_v37, 7  ;;  %v12080_v32 = vpack.c.bf16 %v5895_v2, %v5895_v2  ;;  %6898 = vrot.lane.b32.xlu1 %v11824_v16, %s12939_s27  ;;  %v7588_v61 = vshrl.u32 %v7506_v45, 16  ;;  %v7586_v1 = vrot.slane %v7584_v52, 5  ;;  %v7508_v37 = vld [vmem:[#allocation2 + $0x24] sm:$0xf] }
 0x305   : > { %v6040_v62 = vrot.slane %v6039_v25, 4  ;;  %6157 = vst.msk [vmem:[#allocation2 + $0x48] sm:$0xe] %vm624_vm7, %v6039_v25  ;;  %v6041_v21 = vrot.slane %v12082_v55, 7  ;;  %v7594_v54 = vshll.u32 %v7507_v39, 16  ;;  %v11793_v2 = vrot.slane %v6625_v40, 9 }
 0x306   : > { %v6035_v7 = vrot.slane %v6034_v10, 4  ;;  %6154 = vst.msk [vmem:[#allocation2 + $0x3c] sm:$0xe] %vm624_vm7, %v6034_v10  ;;  %v6036_v50 = vrot.slane %v12080_v32, 7  ;;  %v7590_v58 = vrot.slane %v7588_v61, 4  ;;  %v7587_v42 = vsel %vm13103_vm14, %v7582_v28, %v7586_v1 }
 0x307   : > { %v6042_v38 = vsel %vm13026_vm9, %v6040_v62, %v6041_v21  ;;  %v6043_v45 = vrot.slane %v6041_v21, 4  ;;  %v7596_v19 = vrot.slane %v7594_v54, 5  ;;  %v14676_v55 = vld [vmem:[#allocation2 + $0x2c] sm:$0x1]  ;;  %v6709_v52 = vrot.slane %v14658_v59, 5 }
 0x308   : > { %6158 = vst.msk [vmem:[#allocation2 + $0x4c] sm:$0xf] %vm253_vm3, %v6042_v38  ;;  %v6037_v16 = vsel %vm13026_vm9, %v6035_v7, %v6036_v50  ;;  %v6038_v39 = vrot.slane %v6036_v50, 4  ;;  %v7591_v46 = vor.u32 %v7590_v58, %v7586_v1  ;;  %v6712_v10 = vrot.slane %v14662_v60, 5 }
 0x309   : > { %6159 = vst.msk [vmem:[#allocation2 + $0x50] sm:$0x1] %vm263_vm0, %v6043_v45  ;;  %v14684_v32 = vadd.f32 %v14590_v20, %v14420_v34  ;;  %v7599_v61 = vshrl.u32 %v7508_v37, 16  ;;  %v7602_v62 = vshll.u32 %v7508_v37, 16  ;;  %v7608_v21 = vshll.u32 %v14670_v31, 16 }
 0x30a   : > { %6155 = vst.msk [vmem:[#allocation2 + $0x40] sm:$0xf] %vm253_vm3, %v6037_v16  ;;  %v7592_v28 = vrot.slane %v7591_v46, 4  ;;  %v6710_v7 = vsel %vm13040_vm13, %v11793_v2, %v6709_v52  ;;  %v6711_v50 = vrot.slane %v6709_v52, 4  ;;  %v7612_v58 = vshrl.u32 %v14670_v31, 16 }
 0x30b   : > { %6156 = vst.msk [vmem:[#allocation2 + $0x44] sm:$0x1] %vm263_vm0, %v6038_v39  ;;  %v7618_v40 = vshll.u32 %v14676_v55, 16  ;;  %v7601_v37 = vrot.slane %v7599_v61, 4  ;;  %v7604_v16 = vrot.slane %v7602_v62, 5 }
 0x30c   : > { %v12613_v1 = vpop.f32.mrb[76].mxu0  ;;  %v12309_v54 = vpop.f32.mrb[52].mxu1  ;;  %v7597_v38 = vsel %vm13103_vm14, %v7592_v28, %v7596_v19  ;;  %v6713_v2 = vsel %vm13040_vm13, %v6711_v50, %v6712_v10 }
 0x30d   : > { %v5745_v34 = vadd.f32 %v12613_v1, %v14535_v22  ;;  %v5736_v20 = vpop.f32.mrb[77].mxu0  ;;  %v12310_v45 = vpop.f32.mrb[53].mxu1  ;;  %v11855_v25 = vcombine.low %v7587_v42, %v7597_v38  ;;  %v11825_v19 = vcombine.low %v6710_v7, %v6713_v2 }
 0x30e   : > { %v5737_v39 = vadd.f32 %v5736_v20, %v14527_v30  ;;  %v12614_v46 = vpop.f32.mrb[78].mxu0  ;;  %v14698_v52 = vadd.f32 %v12310_v45, %v12309_v54  ;;  %v12312_v31 = vpop.f32.mrb[54].mxu1  ;;  %v7605_v54 = vor.u32 %v7604_v16, %v7601_v37 }
 0x30f   : > { %vm5829_vm1 = vcmp.gt.f32.partialorder %v5745_v34, 0.0  ;;  %v5868_v22 = vmul.f32 %v14554_v47, %v5745_v34  ;;  %v5748_v55 = vadd.f32 %v12614_v46, %v14537_v27  ;;  %v5739_v1 = vpop.f32.mrb[79].mxu0  ;;  %v12313_v28 = vpop.f32.mrb[55].mxu1  ;;  %8032 = vrot.lane.b32.xlu0 %v11855_v25, %s12939_s27  ;;  %6900 = vrot.lane.b32.xlu1 %v11825_v19, %s12939_s27  ;;  %v14710_v46 = vld [vmem:[#allocation2 + $0x34] sm:$0xf] }
 0x310   : > { %vm5827_vm4 = vcmp.gt.f32.partialorder %v5737_v39, 0.0  ;;  %v5866_v61 = vmul.f32 %v14554_v47, %v5737_v39  ;;  %v5740_v30 = vadd.f32 %v5739_v1, %v14529_v15  ;;  %v14705_v42 = vadd.f32 %v12313_v28, %v12312_v31  ;;  %v6626_v1 = vld [vmem:[#allocation2 + $0x30] sm:$0xe] }
 0x311   : > { %v5900_v10 = vsel %vm5829_vm1, %v5745_v34, %v5868_v22  ;;  %vm5830_vm2 = vcmp.gt.f32.partialorder %v5748_v55, 0.0  ;;  %v5869_v62 = vmul.f32 %v14554_v47, %v5748_v55  ;;  %v7606_v45 = vrot.slane %v7605_v54, 4  ;;  %v14712_v22 = vld [vmem:[#allocation2 + $0x38] sm:$0x1]  ;;  %v7511_v54 = vld [vmem:[#allocation2 + $0x30] sm:$0xf] }
 0x312   : > { %v12085_v27 = vpack.c.bf16 %v5900_v10, %v5900_v10  ;;  %v5898_v50 = vsel %vm5827_vm4, %v5737_v39, %v5866_v61  ;;  %vm5828_vm5 = vcmp.gt.f32.partialorder %v5740_v30, 0.0  ;;  %v5867_v7 = vmul.f32 %v14554_v47, %v5740_v30 }
 0x313   : > { %v12083_v20 = vpack.c.bf16 %v5898_v50, %v5898_v50  ;;  %v5901_v38 = vsel %vm5830_vm2, %v5748_v55, %v5869_v62  ;;  %v7610_v15 = vrot.slane %v7608_v21, 5  ;;  %v7614_v31 = vrot.slane %v7612_v58, 4 }
 0x314   : > { %v6049_v25 = vrot.slane %v12085_v27, 7  ;;  %v12086_v2 = vpack.c.bf16 %v5901_v38, %v5901_v38  ;;  %v5899_v34 = vsel %vm5828_vm5, %v5740_v30, %v5867_v7  ;;  %v7620_v39 = vrot.slane %v7618_v40, 5  ;;  %v12725_v38 = vld [vmem:[%s16374_s4 + $0x60] sm:$0xff]  }
 0x315   : > { %v6044_v19 = vrot.slane %v12083_v20, 7  ;;  %v12084_v37 = vpack.c.bf16 %v5899_v34, %v5899_v34  ;;  %v7611_v16 = vsel %vm13103_vm14, %v7606_v45, %v7610_v15  ;;  %v7615_v21 = vor.u32 %v7614_v31, %v7610_v15  ;;  %v7512_v20 = vld [vmem:[#allocation2 + $0x34] sm:$0xf]  ;;  %v7513_v34 = vld [vmem:[#allocation2 + $0x38] sm:$0x1]  ;;  %12355 = vmatprep.subr.bf16.mxu1 %v12725_v38 }
 0x316   : > { %v6050_v28 = vrot.slane %v6049_v25, 4  ;;  %6163 = vst.msk [vmem:[#allocation2 + $0x60] sm:$0xe] %vm624_vm7, %v6049_v25  ;;  %v6051_v55 = vrot.slane %v12086_v2, 7  ;;  %v11794_v62 = vrot.slane %v6626_v1, 9  ;;  %v6716_v7 = vrot.slane %v14710_v46, 5 }
 0x317   : > { %v6045_v10 = vrot.slane %v6044_v19, 4  ;;  %6160 = vst.msk [vmem:[#allocation2 + $0x54] sm:$0xe] %vm624_vm7, %v6044_v19  ;;  %v6046_v58 = vrot.slane %v12084_v37, 7  ;;  %v7616_v40 = vrot.slane %v7615_v21, 4  ;;  %v6719_v25 = vrot.slane %v14712_v22, 5 }
 0x318   : > { %v6052_v27 = vsel %vm13026_vm9, %v6050_v28, %v6051_v55  ;;  %v6053_v50 = vrot.slane %v6051_v55, 4  ;;  %v14732_v2 = vadd.f32 %v14596_v63, %v14425_v6  ;;  %v14734_v31 = vld [vmem:[#allocation2 + $0x40] sm:$0xf]  ;;  %v6717_v19 = vsel %vm13040_vm13, %v11794_v62, %v6716_v7  ;;  %v14742_v55 = vld [vmem:[#allocation2 + $0x3c] sm:$0xe] }
 0x319   : > { %6164 = vst.msk [vmem:[#allocation2 + $0x64] sm:$0xf] %vm253_vm3, %v6052_v27  ;;  %v6047_v45 = vsel %vm13026_vm9, %v6045_v10, %v6046_v58  ;;  %v6048_v15 = vrot.slane %v6046_v58, 4  ;;  %v7621_v1 = vsel %vm13103_vm14, %v7616_v40, %v7620_v39  ;;  %v6718_v37 = vrot.slane %v6716_v7, 4  ;;  %v14745_v58 = vld [vmem:[#allocation2 + $0x44] sm:$0x1] }
 0x31a   : > { %6165 = vst.msk [vmem:[#allocation2 + $0x68] sm:$0x1] %vm263_vm0, %v6053_v50  ;;  %v7623_v28 = vshrl.u32 %v7511_v54, 16  ;;  %v11856_v6 = vcombine.low %v7611_v16, %v7621_v1  ;;  %v7626_v63 = vshll.u32 %v7511_v54, 16  ;;  %v7632_v21 = vshll.u32 %v7512_v20, 16  ;;  %v12726_v39 = vld [vmem:[%s16374_s4 + $0x20] sm:$0xff]  }
 0x31b   : > { %6161 = vst.msk [vmem:[#allocation2 + $0x58] sm:$0xf] %vm253_vm3, %v6047_v45  ;;  %v7636_v10 = vshrl.u32 %v7512_v20, 16  ;;  %v6720_v62 = vsel %vm13040_vm13, %v6718_v37, %v6719_v25  ;;  %v12315_v27 = vpop.f32.mrb[56].mxu1  ;;  %v7642_v40 = vshll.u32 %v7513_v34, 16  ;;  %12356 = vmatpush3.bf16.msra.mxu1 %v12726_v39  ;;  %v11795_v37 = vrot.slane %v14742_v55, 9 }
 0x31c   : > { %6162 = vst.msk [vmem:[#allocation2 + $0x5c] sm:$0x1] %vm263_vm0, %v6048_v15  ;;  %v7625_v50 = vrot.slane %v7623_v28, 4  ;;  %8034 = vrot.lane.b32.xlu0 %v11856_v6, %s12939_s27  ;;  %v11826_v16 = vcombine.low %v6717_v19, %v6720_v62  ;;  %v7628_v54 = vrot.slane %v7626_v63, 5  ;;  %v7634_v20 = vrot.slane %v7632_v21, 5  ;;  %v12316_v15 = vpop.f32.mrb[57].mxu1 }
 0x31d   : > { %v12617_v38 = vpop.f32.mrb[80].mxu0  ;;  %v7638_v45 = vrot.slane %v7636_v10, 4  ;;  %v7644_v61 = vrot.slane %v7642_v40, 5  ;;  %v12318_v34 = vpop.f32.mrb[58].mxu1  ;;  %v6723_v63 = vrot.slane %v14734_v31, 5  ;;  %v6726_v62 = vrot.slane %v14745_v58, 5 }
 0x31e   : > { %v5761_v1 = vadd.f32 %v12617_v38, %v14546_v49  ;;  %v5752_v30 = vpop.f32.mrb[81].mxu0  ;;  %6902 = vrot.lane.b32.xlu1 %v11826_v16, %s12939_s27  ;;  %v7629_v19 = vor.u32 %v7628_v54, %v7625_v50  ;;  %v12319_v21 = vpop.f32.mrb[59].mxu1 }
 0x31f   : > { %v5753_v28 = vadd.f32 %v5752_v30, %v14540_v0  ;;  %v12618_v7 = vpop.f32.mrb[82].mxu0  ;;  %v7639_v6 = vor.u32 %v7638_v45, %v7634_v20 }
 0x320   : > { %vm5833_vm10 = vcmp.gt.f32.partialorder %v5761_v1, 0.0  ;;  %v5872_v49 = vmul.f32 %v14554_v47, %v5761_v1  ;;  %v5764_v10 = vadd.f32 %v12618_v7, %v14549_v12  ;;  %v5755_v39 = vpop.f32.mrb[83].mxu0  ;;  %v7630_v30 = vrot.slane %v7629_v19, 4 }
 0x321   : > { %vm5831_vm11 = vcmp.gt.f32.partialorder %v5753_v28, 0.0  ;;  %v5870_v55 = vmul.f32 %v14554_v47, %v5753_v28  ;;  %v5756_v0 = vadd.f32 %v5755_v39, %v14543_v44  ;;  %v7640_v38 = vrot.slane %v7639_v6, 4 }
 0x322   : > { %v5904_v40 = vsel %vm5833_vm10, %v5761_v1, %v5872_v49  ;;  %vm5834_vm12 = vcmp.gt.f32.partialorder %v5764_v10, 0.0  ;;  %v5873_v50 = vmul.f32 %v14554_v47, %v5764_v10  ;;  %v7635_v25 = vsel %vm13103_vm14, %v7630_v30, %v7634_v20 }
 0x323   : > { %v12089_v16 = vpack.c.bf16 %v5904_v40, %v5904_v40  ;;  %v5902_v54 = vsel %vm5831_vm11, %v5753_v28, %v5870_v55  ;;  %vm5832_vm15 = vcmp.gt.f32.partialorder %v5756_v0, 0.0  ;;  %v5871_v45 = vmul.f32 %v14554_v47, %v5756_v0  ;;  %v14779_v40 = vld [vmem:[#allocation2 + $0x4c] sm:$0xf] }
 0x324   : > { %v12087_v12 = vpack.c.bf16 %v5902_v54, %v5902_v54  ;;  %v5905_v7 = vsel %vm5834_vm12, %v5764_v10, %v5873_v50  ;;  %v7645_v41 = vsel %vm13103_vm14, %v7640_v38, %v7644_v61  ;;  %v6724_v28 = vsel %vm13040_vm13, %v11795_v37, %v6723_v63  ;;  %v7514_v61 = vld [vmem:[#allocation2 + $0x3c] sm:$0xf]  ;;  %v7516_v50 = vld [vmem:[#allocation2 + $0x44] sm:$0x1]  ;;  %v14794_v38 = vld [vmem:[#allocation2 + $0x50] sm:$0x1] }
 0x325   : > { %v6059_v44 = vrot.slane %v12089_v16, 7  ;;  %v12090_v19 = vpack.c.bf16 %v5905_v7, %v5905_v7  ;;  %v5903_v1 = vsel %vm5832_vm15, %v5756_v0, %v5871_v45  ;;  %v11857_v49 = vcombine.low %v7635_v25, %v7645_v41  ;;  %v7515_v0 = vld [vmem:[#allocation2 + $0x40] sm:$0xf] }
 0x326   : > { %v6054_v39 = vrot.slane %v12087_v12, 7  ;;  %v12088_v53 = vpack.c.bf16 %v5903_v1, %v5903_v1  ;;  %v6725_v6 = vrot.slane %v6723_v63, 4  ;;  %v14775_v20 = vadd.f32 %v12316_v15, %v12315_v27 }
 0x327   : > { %v6060_v55 = vrot.slane %v6059_v44, 4  ;;  %6169 = vst.msk [vmem:[#allocation2 + $0x78] sm:$0xe] %vm624_vm7, %v6059_v44  ;;  %v6061_v10 = vrot.slane %v12090_v19, 7  ;;  %8036 = vrot.lane.b32.xlu0 %v11857_v49, %s12939_s27  ;;  %v14777_v30 = vadd.f32 %v12319_v21, %v12318_v34  ;;  %v14786_v63 = vadd.f32 %v14698_v52, %v14435_v23 }
 0x328   : > { %v6055_v41 = vrot.slane %v6054_v39, 4  ;;  %6166 = vst.msk [vmem:[#allocation2 + $0x6c] sm:$0xe] %vm624_vm7, %v6054_v39  ;;  %v6056_v25 = vrot.slane %v12088_v53, 7  ;;  %v6727_v37 = vsel %vm13040_vm13, %v6725_v6, %v6726_v62  ;;  %v14792_v21 = vadd.f32 %v14637_v9, %v14428_v17  ;;  %v6628_v53 = vld [vmem:[#allocation2 + $0x48] sm:$0xe] }
 0x329   : > { %v6062_v27 = vsel %vm13026_vm9, %v6060_v55, %v6061_v10  ;;  %v6063_v15 = vrot.slane %v6061_v10, 4  ;;  %v11827_v34 = vcombine.low %v6724_v28, %v6727_v37  ;;  %v7647_v62 = vshrl.u32 %v7514_v61, 16 }
 0x32a   : > { %6170 = vst.msk [vmem:[#allocation2 + $0x7c] sm:$0xf] %vm253_vm3, %v6062_v27  ;;  %v6057_v23 = vsel %vm13026_vm9, %v6055_v41, %v6056_v25  ;;  %v6058_v52 = vrot.slane %v6056_v25, 4  ;;  %v7650_v16 = vshll.u32 %v7514_v61, 16  ;;  %v7656_v54 = vshll.u32 %v7515_v0, 16 }
 0x32b   : > { %6171 = vst.msk [vmem:[#allocation2 + $0x80] sm:$0x1] %vm263_vm0, %v6063_v15  ;;  %6904 = vrot.lane.b32.xlu1 %v11827_v34, %s12939_s27  ;;  %v7660_v17 = vshrl.u32 %v7515_v0, 16  ;;  %v7666_v9 = vshll.u32 %v7516_v50, 16  ;;  %v7649_v7 = vrot.slane %v7647_v62, 4  ;;  %v11796_v1 = vrot.slane %v6628_v53, 9 }
 0x32c   : > { %6167 = vst.msk [vmem:[#allocation2 + $0x70] sm:$0xf] %vm253_vm3, %v6057_v23  ;;  %v14803_v12 = vpop.f32.mrb[60].mxu1  ;;  %v7652_v44 = vrot.slane %v7650_v16, 5  ;;  %v7658_v28 = vrot.slane %v7656_v54, 5  ;;  %v6730_v10 = vrot.slane %v14779_v40, 5  ;;  %v14816_v50 = vadd.f32 %v14705_v42, %v14438_v13 }
 0x32d   : > { %6168 = vst.msk [vmem:[#allocation2 + $0x74] sm:$0x1] %vm263_vm0, %v6058_v52  ;;  %v14807_v49 = vpop.f32.mrb[61].mxu1  ;;  %v12621_v39 = vpop.f32.mrb[84].mxu0  ;;  %v7662_v6 = vrot.slane %v7660_v17, 4  ;;  %v7668_v55 = vrot.slane %v7666_v9, 5 }
 0x32e   : > { %v14810_v61 = vpop.f32.mrb[62].mxu1  ;;  %v5777_v41 = vadd.f32 %v12621_v39, %v14684_v32  ;;  %v5768_v25 = vpop.f32.mrb[85].mxu0  ;;  %v7653_v37 = vor.u32 %v7652_v44, %v7649_v7  ;;  %v6733_v0 = vrot.slane %v14794_v38, 5  ;;  %v6731_v23 = vsel %vm13040_vm13, %v11796_v1, %v6730_v10  ;;  %v12727_v13 = vld [vmem:[%s16374_s4 + $0x68] sm:$0xff]  }
 0x32f   : > { %v14818_v27 = vpop.f32.mrb[63].mxu1  ;;  %v5769_v15 = vadd.f32 %v5768_v25, %v14568_v4  ;;  %v12622_v34 = vpop.f32.mrb[86].mxu0  ;;  %v7663_v53 = vor.u32 %v7662_v6, %v7658_v28  ;;  %v6732_v52 = vrot.slane %v6730_v10, 4  ;;  %12357 = vmatprep.subr.bf16.mxu1 %v12727_v13 }
 0x330   : > { %vm5837_vm1 = vcmp.gt.f32.partialorder %v5777_v41, 0.0  ;;  %v5876_v32 = vmul.f32 %v14554_v47, %v5777_v41  ;;  %v5780_v62 = vadd.f32 %v12622_v34, %v14732_v2  ;;  %v5771_v16 = vpop.f32.mrb[87].mxu0  ;;  %v7654_v54 = vrot.slane %v7653_v37, 4  ;;  %v12728_v37 = vld [vmem:[%s16374_s4 + $0x28] sm:$0xff]  }
 0x331   : > { %vm5835_vm4 = vcmp.gt.f32.partialorder %v5769_v15, 0.0  ;;  %v5874_v4 = vmul.f32 %v14554_v47, %v5769_v15  ;;  %v5772_v42 = vadd.f32 %v5771_v16, %v14571_v33  ;;  %v7664_v17 = vrot.slane %v7663_v53, 4  ;;  %12358 = vmatpush3.bf16.msra.mxu1 %v12728_v37 }
 0x332   : > { %v5908_v9 = vsel %vm5837_vm1, %v5777_v41, %v5876_v32  ;;  %vm5838_vm2 = vcmp.gt.f32.partialorder %v5780_v62, 0.0  ;;  %v5877_v7 = vmul.f32 %v14554_v47, %v5780_v62  ;;  %v7659_v44 = vsel %vm13103_vm14, %v7654_v54, %v7658_v28  ;;  %v7517_v41 = vld [vmem:[#allocation2 + $0x48] sm:$0xf]  ;;  %v7518_v32 = vld [vmem:[#allocation2 + $0x4c] sm:$0xf] }
 0x333   : > { %v12093_v2 = vpack.c.bf16 %v5908_v9, %v5908_v9  ;;  %v5906_v1 = vsel %vm5835_vm4, %v5769_v15, %v5874_v4  ;;  %vm5836_vm5 = vcmp.gt.f32.partialorder %v5772_v42, 0.0  ;;  %v5875_v39 = vmul.f32 %v14554_v47, %v5772_v42 }
 0x334   : > { %v12091_v6 = vpack.c.bf16 %v5906_v1, %v5906_v1  ;;  %v5909_v10 = vsel %vm5838_vm2, %v5780_v62, %v5877_v7  ;;  %v7669_v25 = vsel %vm13103_vm14, %v7664_v17, %v7668_v55  ;;  %v6734_v33 = vsel %vm13040_vm13, %v6732_v52, %v6733_v0  ;;  %v7519_v55 = vld [vmem:[#allocation2 + $0x50] sm:$0x1]  ;;  %v14845_v17 = vld [vmem:[#allocation2 + $0x58] sm:$0xf] }
 0x335   : > { %v6069_v28 = vrot.slane %v12093_v2, 7  ;;  %v12094_v34 = vpack.c.bf16 %v5909_v10, %v5909_v10  ;;  %v5907_v53 = vsel %vm5836_vm5, %v5772_v42, %v5875_v39  ;;  %v11858_v15 = vcombine.low %v7659_v44, %v7669_v25  ;;  %v6629_v39 = vld [vmem:[#allocation2 + $0x54] sm:$0xe] }
 0x336   : > { %v6064_v16 = vrot.slane %v12091_v6, 7  ;;  %v12092_v47 = vpack.c.bf16 %v5907_v53, %v5907_v53  ;;  %v11828_v54 = vcombine.low %v6731_v23, %v6734_v33  ;;  %v5627_v62 = vadd.f32 %v14646_v26, %v14432_v43  ;;  %v14849_v26 = vld [vmem:[#allocation2 + $0x5c] sm:$0x1] }
 0x337   : > { %v6070_v13 = vrot.slane %v6069_v28, 4  ;;  %6175 = vst.msk [vmem:[#allocation2 + $0x90] sm:$0xe] %vm624_vm7, %v6069_v28  ;;  %v6071_v0 = vrot.slane %v12094_v34, 7  ;;  %8038 = vrot.lane.b32.xlu0 %v11858_v15, %s12939_s27  ;;  %v7671_v52 = vshrl.u32 %v7517_v41, 16  ;;  %v7674_v4 = vshll.u32 %v7517_v41, 16 }
 0x338   : > { %v6065_v42 = vrot.slane %v6064_v16, 4  ;;  %6172 = vst.msk [vmem:[#allocation2 + $0x84] sm:$0xe] %vm624_vm7, %v6064_v16  ;;  %v6066_v9 = vrot.slane %v12092_v47, 7  ;;  %6906 = vrot.lane.b32.xlu1 %v11828_v54, %s12939_s27  ;;  %v7680_v23 = vshll.u32 %v7518_v32, 16  ;;  %v7684_v43 = vshrl.u32 %v7518_v32, 16 }
 0x339   : > { %v6072_v7 = vsel %vm13026_vm9, %v6070_v13, %v6071_v0  ;;  %v6073_v44 = vrot.slane %v6071_v0, 4  ;;  %v7673_v2 = vrot.slane %v7671_v52, 4  ;;  %v7676_v1 = vrot.slane %v7674_v4, 5 }
 0x33a   : > { %6176 = vst.msk [vmem:[#allocation2 + $0x94] sm:$0xf] %vm253_vm3, %v6072_v7  ;;  %v6067_v6 = vsel %vm13026_vm9, %v6065_v42, %v6066_v9  ;;  %v6068_v10 = vrot.slane %v6066_v9, 4  ;;  %v7682_v25 = vrot.slane %v7680_v23, 5  ;;  %v7686_v33 = vrot.slane %v7684_v43, 4 }
 0x33b   : > { %6177 = vst.msk [vmem:[#allocation2 + $0x98] sm:$0x1] %vm263_vm0, %v6073_v44  ;;  %v7677_v41 = vor.u32 %v7676_v1, %v7673_v2  ;;  %v7690_v37 = vshll.u32 %v7519_v55, 16  ;;  %v11797_v15 = vrot.slane %v6629_v39, 9  ;;  %v6737_v32 = vrot.slane %v14845_v17, 5 }
 0x33c   : > { %6173 = vst.msk [vmem:[#allocation2 + $0x88] sm:$0xf] %vm253_vm3, %v6067_v6  ;;  %v7687_v53 = vor.u32 %v7686_v33, %v7682_v25  ;;  %v6740_v16 = vrot.slane %v14849_v26, 5  ;;  %v12323_v0 = vadd.f32 %v14807_v49, %v14803_v12  ;;  %v14867_v55 = vadd.f32 %v14818_v27, %v14810_v61 }
 0x33d   : > { %6174 = vst.msk [vmem:[#allocation2 + $0x8c] sm:$0x1] %vm263_vm0, %v6068_v10  ;;  %v7678_v54 = vrot.slane %v7677_v41, 4  ;;  %v7692_v13 = vrot.slane %v7690_v37, 5  ;;  %v6738_v9 = vsel %vm13040_vm13, %v11797_v15, %v6737_v32  ;;  %v6739_v23 = vrot.slane %v6737_v32, 4 }
 0x33e   : > { %v12625_v47 = vpop.f32.mrb[88].mxu0  ;;  %v7688_v42 = vrot.slane %v7687_v53, 4  ;;  %v5648_v12 = vadd.f32 %v12323_v0, %v14447_v29  ;;  %v5640_v49 = vadd.f32 %v14775_v20, %v14441_v51  ;;  %v7520_v51 = vld [vmem:[#allocation2 + $0x54] sm:$0xf]  ;;  %v7521_v41 = vld [vmem:[#allocation2 + $0x58] sm:$0xf] }
 0x33f   : > { %v5793_v52 = vadd.f32 %v12625_v47, %v14786_v63  ;;  %v5784_v4 = vpop.f32.mrb[89].mxu0  ;;  %v7683_v44 = vsel %vm13103_vm14, %v7678_v54, %v7682_v25  ;;  %v14881_v63 = vld [vmem:[%s16373_s3] ss:$0 sm:$0xff]  ;;  %v6741_v10 = vsel %vm13040_vm13, %v6739_v23, %v6740_v16  ;;  %v7695_v15 = vshrl.u32 %v7520_v51, 16 }
 0x340   : > { %v5785_v43 = vadd.f32 %v5784_v4, %v14792_v21  ;;  %v12626_v7 = vpop.f32.mrb[90].mxu0  ;;  %v7693_v2 = vsel %vm13103_vm14, %v7688_v42, %v7692_v13  ;;  %v7698_v13 = vshll.u32 %v7520_v51, 16  ;;  %v7704_v4 = vshll.u32 %v7521_v41, 16  ;;  %v7522_v51 = vld [vmem:[#allocation2 + $0x5c] sm:$0x1] }
 0x341   : > { %vm5841_vm10 = vcmp.gt.f32.partialorder %v5793_v52, 0.0  ;;  %v5880_v61 = vmul.f32 %v14881_v63, %v5793_v52  ;;  %v5796_v27 = vadd.f32 %v12626_v7, %v14816_v50  ;;  %v5787_v21 = vpop.f32.mrb[91].mxu0  ;;  %v11859_v39 = vcombine.low %v7683_v44, %v7693_v2  ;;  %v6227_v28 = vld [vmem:[#allocation2 + $0x94] sm:$0xf] }
 0x342   : > { %vm5839_vm11 = vcmp.gt.f32.partialorder %v5785_v43, 0.0  ;;  %v5878_v29 = vmul.f32 %v14881_v63, %v5785_v43  ;;  %v5788_v1 = vadd.f32 %v5787_v21, %v5627_v62  ;;  %v11829_v62 = vcombine.low %v6738_v9, %v6741_v10 }
 0x343   : > { %v5912_v20 = vsel %vm5841_vm10, %v5793_v52, %v5880_v61  ;;  %vm5842_vm12 = vcmp.gt.f32.partialorder %v5796_v27, 0.0  ;;  %v5881_v6 = vmul.f32 %v14881_v63, %v5796_v27  ;;  %8040 = vrot.lane.b32.xlu0 %v11859_v39, %s12939_s27  ;;  %v7697_v16 = vrot.slane %v7695_v15, 4 }
 0x344   : > { %v12097_v25 = vpack.c.bf16 %v5912_v20, %v5912_v20  ;;  %v5910_v33 = vsel %vm5839_vm11, %v5785_v43, %v5878_v29  ;;  %vm5840_vm15 = vcmp.gt.f32.partialorder %v5788_v1, 0.0  ;;  %v5879_v50 = vmul.f32 %v14881_v63, %v5788_v1  ;;  %6908 = vrot.lane.b32.xlu1 %v11829_v62, %s12939_s27 }
 0x345   : > { %v12095_v37 = vpack.c.bf16 %v5910_v33, %v5910_v33  ;;  %v5913_v53 = vsel %vm5842_vm12, %v5796_v27, %v5881_v6  ;;  %v7700_v7 = vrot.slane %v7698_v13, 5  ;;  %v7708_v44 = vshrl.u32 %v7521_v41, 16  ;;  %v8142_v6 = vld [vmem:[#allocation2 + $0xc] sm:$0xe]  ;;  %v12729_v41 = vld [vmem:[%s16374_s4 + $0x70] sm:$0xff]  }
 0x346   : > { %v6079_v32 = vrot.slane %v12097_v25, 7  ;;  %v12098_v47 = vpack.c.bf16 %v5913_v53, %v5913_v53  ;;  %v5911_v54 = vsel %vm5840_vm15, %v5788_v1, %v5879_v50  ;;  %v7706_v2 = vrot.slane %v7704_v4, 5  ;;  %12359 = vmatprep.subr.bf16.mxu1 %v12729_v41  ;;  %v8350_v4 = vld [vmem:[#allocation2 + $0x14] sm:$0x3] }
 0x347   : > { %v6074_v0 = vrot.slane %v12095_v37, 7  ;;  %v12096_v52 = vpack.c.bf16 %v5911_v54, %v5911_v54  ;;  %v7701_v20 = vor.u32 %v7700_v7, %v7697_v16  ;;  %v7710_v53 = vrot.slane %v7708_v44, 4 }
 0x348   : > { %v6080_v42 = vrot.slane %v6079_v32, 4  ;;  %6181 = vst.msk [vmem:[#allocation2 + $0xa8] sm:$0xe] %vm624_vm7, %v6079_v32  ;;  %v6081_v23 = vrot.slane %v12098_v47, 7  ;;  %v12629_v43 = vpop.f32.mrb[92].mxu0  ;;  %v7714_v15 = vshll.u32 %v7522_v51, 16 }
 0x349   : > { %v6075_v61 = vrot.slane %v6074_v0, 4  ;;  %6178 = vst.msk [vmem:[#allocation2 + $0x9c] sm:$0xe] %vm624_vm7, %v6074_v0  ;;  %v6076_v9 = vrot.slane %v12096_v52, 7  ;;  %v5809_v27 = vadd.f32 %v12629_v43, %v5648_v12  ;;  %v5800_v21 = vpop.f32.mrb[93].mxu0  ;;  %v7702_v37 = vrot.slane %v7701_v20, 4 }
 0x34a   : > { %v6082_v29 = vsel %vm13026_vm9, %v6080_v42, %v6081_v23  ;;  %v6083_v1 = vrot.slane %v6081_v23, 4  ;;  %v5801_v39 = vadd.f32 %v5800_v21, %v5640_v49  ;;  %v14898_v10 = vpop.f32.mrb[94].mxu0  ;;  %v8143_v32 = vld [vmem:[#allocation2 + $0x10] sm:$0xf]  ;;  %v8367_v47 = vshrl.u32 %v8142_v6, 16 }
 0x34b   : > { %6182 = vst.msk [vmem:[#allocation2 + $0xac] sm:$0xf] %vm253_vm3, %v6082_v29  ;;  %v6077_v25 = vsel %vm13026_vm9, %v6075_v61, %v6076_v9  ;;  %v6078_v33 = vrot.slane %v6076_v9, 4  ;;  %vm5845_vm1 = vcmp.gt.f32.partialorder %v5809_v27, 0.0  ;;  %v5884_v12 = vmul.f32 %v14881_v63, %v5809_v27  ;;  %v5803_v50 = vpop.f32.mrb[95].mxu0 }
 0x34c   : > { %6183 = vst.msk [vmem:[#allocation2 + $0xb0] sm:$0x1] %vm263_vm0, %v6083_v1  ;;  %vm5843_vm4 = vcmp.gt.f32.partialorder %v5801_v39, 0.0  ;;  %v5882_v49 = vmul.f32 %v14881_v63, %v5801_v39  ;;  %v8370_v54 = vshll.u32 %v8142_v6, 16  ;;  %v7707_v52 = vsel %vm13103_vm14, %v7702_v37, %v7706_v2 }
 0x34d   : > { %6179 = vst.msk [vmem:[#allocation2 + $0xa0] sm:$0xf] %vm253_vm3, %v6077_v25  ;;  %v5916_v62 = vsel %vm5845_vm1, %v5809_v27, %v5884_v12  ;;  %v7711_v16 = vor.u32 %v7710_v53, %v7706_v2  ;;  %v7716_v23 = vrot.slane %v7714_v15, 5  ;;  %v8369_v43 = vrot.slane %v8367_v47, 5  ;;  %v12730_v53 = vld [vmem:[%s16374_s4 + $0x30] sm:$0xff]  }
 0x34e   : > { %6180 = vst.msk [vmem:[#allocation2 + $0xa4] sm:$0x1] %vm263_vm0, %v6078_v33  ;;  %v12101_v13 = vpack.c.bf16 %v5916_v62, %v5916_v62  ;;  %v5914_v0 = vsel %vm5843_vm4, %v5801_v39, %v5882_v49  ;;  %v8372_v7 = vrot.slane %v8370_v54, 6  ;;  %v8376_v9 = vshrl.u32 %v8143_v32, 16  ;;  %v7523_v39 = vld [vmem:[#allocation2 + $0x60] sm:$0xf]  ;;  %12360 = vmatpush3.bf16.msra.mxu1 %v12730_v53 }
 0x34f   : > { %v12099_v42 = vpack.c.bf16 %v5914_v0, %v5914_v0  ;;  %v7712_v61 = vrot.slane %v7711_v16, 4  ;;  %v8379_v27 = vshll.u32 %v8143_v32, 16  ;;  %v8386_v1 = vshrl.u32 %v8350_v4, 16  ;;  %v7524_v33 = vld [vmem:[#allocation2 + $0x64] sm:$0xf] }
 0x350   : > { %v14913_v44 = vrot.slane %v12101_v13, 7  ;;  %v8373_v29 = vor.u32 %v8372_v7, %v8369_v43  ;;  %v8389_v51 = vshll.u32 %v8350_v4, 16  ;;  %v8378_v6 = vrot.slane %v8376_v9, 5  ;;  %v7525_v43 = vld [vmem:[#allocation2 + $0x68] sm:$0x1] }
 0x351   : > { %v14915_v21 = vrot.slane %v12099_v42, 7  ;;  %v7717_v2 = vsel %vm13103_vm14, %v7712_v61, %v7716_v23  ;;  %v8381_v25 = vrot.slane %v8379_v27, 6  ;;  %v8388_v37 = vrot.slane %v8386_v1, 5  ;;  %v14947_v53 = vld [vmem:[#allocation2 + $0x1c] sm:$0xf] }
 0x352   : > { %v6090_v20 = vrot.slane %v14913_v44, 4  ;;  %6187 = vst.msk [vmem:[#allocation2 + $0xc0] sm:$0xe] %vm624_vm7, %v14913_v44  ;;  %v11860_v41 = vcombine.low %v7707_v52, %v7717_v2  ;;  %v8374_v49 = vrot.slane %v8373_v29, 4  ;;  %v8391_v15 = vrot.slane %v8389_v51, 6 }
 0x353   : > { %v6085_v12 = vrot.slane %v14915_v21, 4  ;;  %6184 = vst.msk [vmem:[#allocation2 + $0xb4] sm:$0xe] %vm624_vm7, %v14915_v21  ;;  %v8382_v62 = vor.u32 %v8381_v25, %v8378_v6  ;;  %v5651_v32 = vadd.f32 %v14867_v55, %v14450_v5  ;;  %v5643_v47 = vadd.f32 %v14777_v30, %v14444_v36  ;;  %v14936_v36 = vld [vmem:[#allocation2 + $0x64] sm:$0xf] }
 0x354   : > { %8042 = vrot.lane.b32.xlu0 %v11860_v41, %s12939_s27  ;;  %v7719_v54 = vshrl.u32 %v7523_v39, 16  ;;  %v7722_v13 = vshll.u32 %v7523_v39, 16  ;;  %v7728_v0 = vshll.u32 %v7524_v33, 16  ;;  %v7732_v52 = vshrl.u32 %v7524_v33, 16  ;;  %v14941_v29 = vld [vmem:[#allocation2 + $0x68] sm:$0x1] }
 0x355   : > { %v8383_v16 = vsel %vm13509_vm6, %v8374_v49, %v8382_v62  ;;  %v8384_v4 = vrot.slane %v8382_v62, 4  ;;  %v8392_v42 = vor.u32 %v8391_v15, %v8388_v37  ;;  %v5812_v23 = vadd.f32 %v14898_v10, %v5651_v32  ;;  %v14949_v62 = vld [vmem:[#allocation2 + $0x20] sm:$0x1] }
 0x356   : > { %v5804_v7 = vadd.f32 %v5803_v50, %v5643_v47  ;;  %v7721_v5 = vrot.slane %v7719_v54, 4  ;;  %v7724_v55 = vrot.slane %v7722_v13, 5  ;;  %v7730_v61 = vrot.slane %v7728_v0, 5  ;;  %v6630_v50 = vld [vmem:[#allocation2 + $0x60] sm:$0xe] }
 0x357   : > { %v8393_v30 = vsel %vm13509_vm6, %v8384_v4, %v8392_v42  ;;  %vm5846_vm7 = vcmp.gt.f32.partialorder %v5812_v23, 0.0  ;;  %v5885_v9 = vmul.f32 %v14881_v63, %v5812_v23  ;;  %v7734_v27 = vrot.slane %v7732_v52, 4 }
 0x358   : > { %v11902_v1 = vcombine.low %v8383_v16, %v8393_v30  ;;  %vm5844_vm2 = vcmp.gt.f32.partialorder %v5804_v7, 0.0  ;;  %v5883_v10 = vmul.f32 %v14881_v63, %v5804_v7  ;;  %v7725_v51 = vor.u32 %v7724_v55, %v7721_v5  ;;  %v9454_v16 = vld [vmem:[#allocation2 + $0x18] sm:$0xe] }
 0x359   : > { %v5917_v39 = vsel %vm5846_vm7, %v5812_v23, %v5885_v9  ;;  %v7735_v2 = vor.u32 %v7734_v27, %v7730_v61  ;;  %v7738_v6 = vshll.u32 %v7525_v43, 16  ;;  %v11798_v47 = vrot.slane %v6630_v50, 9  ;;  %v8146_v9 = vld [vmem:[#allocation2 + $0x1c] sm:$0xf]  ;;  %v8351_v27 = vld [vmem:[#allocation2 + $0x20] sm:$0x3] }
 0x35a   : > { %8910 = vrot.lane.b32.xlu1 %v11902_v1, %s12939_s27  ;;  %v12102_v33 = vpack.c.bf16 %v5917_v39, %v5917_v39  ;;  %v5915_v41 = vsel %vm5844_vm2, %v5804_v7, %v5883_v10  ;;  %v7726_v49 = vrot.slane %v7725_v51, 4  ;;  %v6744_v0 = vrot.slane %v14936_v36, 5  ;;  %v8145_v7 = vld [vmem:[#allocation2 + $0x18] sm:$0xe]  ;;  %v7533_v43 = vld [vmem:[#allocation2 + $0x88] sm:$0xf] }
 0x35b   : > { %v12100_v15 = vpack.c.bf16 %v5915_v41, %v5915_v41  ;;  %v7736_v63 = vrot.slane %v7735_v2, 4  ;;  %v7740_v32 = vrot.slane %v7738_v6, 5  ;;  %v6747_v52 = vrot.slane %v14941_v29, 5 }
 0x35c   : > { %v6091_v54 = vrot.slane %v12102_v33, 7  ;;  %v7731_v13 = vsel %vm13103_vm14, %v7726_v49, %v7730_v61  ;;  %v6745_v30 = vsel %vm13040_vm13, %v11798_v47, %v6744_v0  ;;  %v6746_v51 = vrot.slane %v6744_v0, 4  ;;  %v7526_v33 = vld [vmem:[#allocation2 + $0x6c] sm:$0xf] }
 0x35d   : > { %v6086_v4 = vrot.slane %v12100_v15, 7  ;;  %v7741_v42 = vsel %vm13103_vm14, %v7736_v63, %v7740_v32  ;;  %v11918_v44 = vrot.slane %v9454_v16, 9  ;;  %v9523_v50 = vrot.slane %v14949_v62, 5  ;;  %v7527_v32 = vld [vmem:[#allocation2 + $0x70] sm:$0xf] }
 0x35e   : > { %v6092_v5 = vsel %vm13026_vm9, %v6090_v20, %v6091_v54  ;;  %v6093_v55 = vrot.slane %v6091_v54, 4  ;;  %v11861_v61 = vcombine.low %v7731_v13, %v7741_v42  ;;  %v9520_v20 = vrot.slane %v14947_v53, 5 }
 0x35f   : > { %6188 = vst.msk [vmem:[#allocation2 + $0xc4] sm:$0xf] %vm253_vm3, %v6092_v5  ;;  %v6087_v1 = vsel %vm13026_vm9, %v6085_v12, %v6086_v4  ;;  %v6088_v10 = vrot.slane %v6086_v4, 4  ;;  %v8395_v39 = vshrl.u32 %v8145_v7, 16  ;;  %v8398_v2 = vshll.u32 %v8145_v7, 16 }
 0x360   : > { %6189 = vst.msk [vmem:[#allocation2 + $0xc8] sm:$0x1] %vm263_vm0, %v6093_v55  ;;  %8044 = vrot.lane.b32.xlu0 %v11861_v61, %s12939_s27  ;;  %v6748_v35 = vsel %vm13040_vm13, %v6746_v51, %v6747_v52  ;;  %v8404_v21 = vshrl.u32 %v8146_v9, 16  ;;  %v8407_v12 = vshll.u32 %v8146_v9, 16  ;;  %v8414_v6 = vshrl.u32 %v8351_v27, 16 }
 0x361   : > { %6185 = vst.msk [vmem:[#allocation2 + $0xb8] sm:$0xf] %vm253_vm3, %v6087_v1  ;;  %v11830_v41 = vcombine.low %v6745_v30, %v6748_v35  ;;  %v9521_v49 = vsel %vm13040_vm13, %v11918_v44, %v9520_v20  ;;  %v9522_v15 = vrot.slane %v9520_v20, 4  ;;  %v8397_v63 = vrot.slane %v8395_v39, 5  ;;  %v7528_v4 = vld [vmem:[#allocation2 + $0x74] sm:$0x1] }
 0x362   : > { %6186 = vst.msk [vmem:[#allocation2 + $0xbc] sm:$0x1] %vm263_vm0, %v6088_v10  ;;  %v8400_v47 = vrot.slane %v8398_v2, 6  ;;  %v8406_v54 = vrot.slane %v8404_v21, 5  ;;  %v8409_v13 = vrot.slane %v8407_v12, 6  ;;  %v8416_v0 = vrot.slane %v8414_v6, 5 }
 0x363   : > { %6910 = vrot.lane.b32.xlu1 %v11830_v41, %s12939_s27  ;;  %v9524_v52 = vsel %vm13040_vm13, %v9522_v15, %v9523_v50  ;;  %v8417_v16 = vshll.u32 %v8351_v27, 16  ;;  %v7743_v42 = vshrl.u32 %v7526_v33, 16  ;;  %v7746_v7 = vshll.u32 %v7526_v33, 16  ;;  %v14983_v9 = vld [vmem:[#allocation2 + $0x70] sm:$0xf] }
 0x364   : > { %v11950_v5 = vcombine.low %v9521_v49, %v9524_v52  ;;  %v8401_v55 = vor.u32 %v8400_v47, %v8397_v63  ;;  %v8410_v61 = vor.u32 %v8409_v13, %v8406_v54  ;;  %v7752_v30 = vshll.u32 %v7527_v32, 16  ;;  %v6631_v1 = vld [vmem:[#allocation2 + $0x6c] sm:$0xe]  ;;  %v14985_v39 = vld [vmem:[#allocation2 + $0x74] sm:$0x1] }
 0x365   : > { %v8419_v10 = vrot.slane %v8417_v16, 6  ;;  %v7745_v51 = vrot.slane %v7743_v42, 4  ;;  %v7748_v44 = vrot.slane %v7746_v7, 5  ;;  %v7756_v20 = vshrl.u32 %v7527_v32, 16  ;;  %v14989_v41 = vld [vmem:[#allocation2 + $0x28] sm:$0xf] }
 0x366   : > { %9726 = vrot.lane.b32.xlu0 %v11950_v5, %s12939_s27  ;;  %v8402_v50 = vrot.slane %v8401_v55, 4  ;;  %v8412_v27 = vrot.slane %v8410_v61, 4  ;;  %v7754_v2 = vrot.slane %v7752_v30, 5  ;;  %v7762_v35 = vshll.u32 %v7528_v4, 16  ;;  %v14991_v49 = vld [vmem:[#allocation2 + $0x2c] sm:$0x1] }
 0x367   : > { %v8420_v21 = vor.u32 %v8419_v10, %v8416_v0  ;;  %v7749_v12 = vor.u32 %v7748_v44, %v7745_v51  ;;  %v7758_v6 = vrot.slane %v7756_v20, 4  ;;  %v11799_v47 = vrot.slane %v6631_v1, 9  ;;  %v9455_v16 = vld [vmem:[#allocation2 + $0x24] sm:$0xe]  ;;  %v12731_v30 = vld [vmem:[%s16374_s4 + $0x78] sm:$0xff]  }
 0x368   : > { %v8411_v15 = vsel %vm13509_vm6, %v8402_v50, %v8410_v61  ;;  %v7764_v63 = vrot.slane %v7762_v35, 5  ;;  %v6751_v52 = vrot.slane %v14983_v9, 5  ;;  %v8148_v4 = vld [vmem:[#allocation2 + $0x24] sm:$0xe]  ;;  %v6754_v7 = vrot.slane %v14985_v39, 5  ;;  %12361 = vmatprep.subr.bf16.mxu1 %v12731_v30 }
 0x369   : > { %v8421_v54 = vsel %vm13509_vm6, %v8412_v27, %v8420_v21  ;;  %v7750_v13 = vrot.slane %v7749_v12, 4  ;;  %v7759_v0 = vor.u32 %v7758_v6, %v7754_v2  ;;  %v8149_v61 = vld [vmem:[#allocation2 + $0x28] sm:$0xf]  ;;  %v11919_v20 = vrot.slane %v9455_v16, 9  ;;  %v8352_v12 = vld [vmem:[#allocation2 + $0x2c] sm:$0x3] }
 0x36a   : > { %v11903_v42 = vcombine.low %v8411_v15, %v8421_v54  ;;  %v6752_v51 = vsel %vm13040_vm13, %v11799_v47, %v6751_v52  ;;  %v6753_v44 = vrot.slane %v6751_v52, 4  ;;  %v9527_v50 = vrot.slane %v14989_v41, 5  ;;  %v7529_v47 = vld [vmem:[#allocation2 + $0x78] sm:$0xf]  ;;  %v7530_v5 = vld [vmem:[#allocation2 + $0x7c] sm:$0xf] }
 0x36b   : > { %v7755_v1 = vsel %vm13103_vm14, %v7750_v13, %v7754_v2  ;;  %v7760_v10 = vrot.slane %v7759_v0, 4  ;;  %v9530_v27 = vrot.slane %v14991_v49, 5  ;;  %v8423_v35 = vshrl.u32 %v8148_v4, 16  ;;  %v15027_v32 = vld [vmem:[#allocation2 + $0x80] sm:$0x1] }
 0x36c   : > { %8912 = vrot.lane.b32.xlu1 %v11903_v42, %s12939_s27  ;;  %v6755_v2 = vsel %vm13040_vm13, %v6753_v44, %v6754_v7  ;;  %v8426_v6 = vshll.u32 %v8148_v4, 16  ;;  %v8432_v15 = vshrl.u32 %v8149_v61, 16  ;;  %v9528_v0 = vsel %vm13040_vm13, %v11919_v20, %v9527_v50 }
 0x36d   : > { %v7765_v21 = vsel %vm13103_vm14, %v7760_v10, %v7764_v63  ;;  %v11831_v13 = vcombine.low %v6752_v51, %v6755_v2  ;;  %v9529_v52 = vrot.slane %v9527_v50, 4  ;;  %v8425_v16 = vrot.slane %v8423_v35, 5  ;;  %v15022_v10 = vld [vmem:[#allocation2 + $0x7c] sm:$0xf]  ;;  %v7531_v50 = vld [vmem:[#allocation2 + $0x80] sm:$0x1] }
 0x36e   : > { %v11862_v54 = vcombine.low %v7755_v1, %v7765_v21  ;;  %v8428_v42 = vrot.slane %v8426_v6, 6  ;;  %v8434_v55 = vrot.slane %v8432_v15, 5  ;;  %v8435_v30 = vshll.u32 %v8149_v61, 16  ;;  %v12732_v61 = vld [vmem:[%s16374_s4 + $0x38] sm:$0xff]  }
 0x36f   : > { %v9531_v63 = vsel %vm13040_vm13, %v9529_v52, %v9530_v27  ;;  %v8442_v4 = vshrl.u32 %v8352_v12, 16  ;;  %v8445_v7 = vshll.u32 %v8352_v12, 16  ;;  %v7767_v1 = vshrl.u32 %v7529_v47, 16  ;;  %12362 = vmatpush3.bf16.msra.mxu1 %v12732_v61 }
 0x370   : > { %8046 = vrot.lane.b32.xlu0 %v11862_v54, %s12939_s27  ;;  %6912 = vrot.lane.b32.xlu1 %v11831_v13, %s12939_s27  ;;  %v11951_v51 = vcombine.low %v9528_v0, %v9531_v63  ;;  %v8429_v44 = vor.u32 %v8428_v42, %v8425_v16  ;;  %v8437_v20 = vrot.slane %v8435_v30, 6  ;;  %v7770_v35 = vshll.u32 %v7529_v47, 16  ;;  %v6632_v54 = vld [vmem:[#allocation2 + $0x78] sm:$0xe] }
 0x371   : > { %v8444_v21 = vrot.slane %v8442_v4, 5  ;;  %v8447_v2 = vrot.slane %v8445_v7, 6  ;;  %v7769_v6 = vrot.slane %v7767_v1, 4  ;;  %v7776_v15 = vshll.u32 %v7530_v5, 16  ;;  %v15033_v1 = vld [vmem:[#allocation2 + $0x34] sm:$0xf] }
 0x372   : > { %v8430_v27 = vrot.slane %v8429_v44, 4  ;;  %v8438_v13 = vor.u32 %v8437_v20, %v8434_v55  ;;  %v7772_v12 = vrot.slane %v7770_v35, 5  ;;  %v7780_v52 = vshrl.u32 %v7530_v5, 16  ;;  %v15035_v55 = vld [vmem:[#allocation2 + $0x38] sm:$0x1] }
 0x373   : > { %v8448_v0 = vor.u32 %v8447_v2, %v8444_v21  ;;  %v7778_v47 = vrot.slane %v7776_v15, 5  ;;  %v7786_v16 = vshll.u32 %v7531_v50, 16  ;;  %v11800_v20 = vrot.slane %v6632_v54, 9  ;;  %v9456_v35 = vld [vmem:[#allocation2 + $0x30] sm:$0xe] }
 0x374   : > { %9728 = vrot.lane.b32.xlu0 %v11951_v51, %s12939_s27  ;;  %v8439_v30 = vsel %vm13509_vm6, %v8430_v27, %v8438_v13  ;;  %v8440_v63 = vrot.slane %v8438_v13, 4  ;;  %v7773_v4 = vor.u32 %v7772_v12, %v7769_v6  ;;  %v7782_v7 = vrot.slane %v7780_v52, 4  ;;  %v8151_v6 = vld [vmem:[#allocation2 + $0x30] sm:$0xe]  ;;  %v8152_v52 = vld [vmem:[#allocation2 + $0x34] sm:$0xf] }
 0x375   : > { %v7788_v5 = vrot.slane %v7786_v16, 5  ;;  %v6758_v51 = vrot.slane %v15022_v10, 5  ;;  %v6761_v2 = vrot.slane %v15027_v32, 5  ;;  %v8463_v42 = vshll.u32 %v8152_v52, 16 }
 0x376   : > { %v8449_v50 = vsel %vm13509_vm6, %v8440_v63, %v8448_v0  ;;  %v7774_v61 = vrot.slane %v7773_v4, 4  ;;  %v7783_v21 = vor.u32 %v7782_v7, %v7778_v47  ;;  %v11920_v0 = vrot.slane %v9456_v35, 9  ;;  %v8353_v7 = vld [vmem:[#allocation2 + $0x38] sm:$0x3] }
 0x377   : > { %v11904_v15 = vcombine.low %v8439_v30, %v8449_v50  ;;  %v6759_v27 = vsel %vm13040_vm13, %v11800_v20, %v6758_v51  ;;  %v6760_v13 = vrot.slane %v6758_v51, 4  ;;  %v9534_v30 = vrot.slane %v15033_v1, 5 }
 0x378   : > { %v7779_v54 = vsel %vm13103_vm14, %v7774_v61, %v7778_v47  ;;  %v7784_v16 = vrot.slane %v7783_v21, 4  ;;  %v9537_v4 = vrot.slane %v15035_v55, 5  ;;  %v8451_v20 = vshrl.u32 %v8151_v6, 16  ;;  %v7532_v21 = vld [vmem:[#allocation2 + $0x84] sm:$0xf] }
 0x379   : > { %8914 = vrot.lane.b32.xlu1 %v11904_v15, %s12939_s27  ;;  %v6762_v63 = vsel %vm13040_vm13, %v6760_v13, %v6761_v2  ;;  %v8454_v47 = vshll.u32 %v8151_v6, 16  ;;  %v8460_v61 = vshrl.u32 %v8152_v52, 16  ;;  %v9535_v35 = vsel %vm13040_vm13, %v11920_v0, %v9534_v30 }
 0x37a   : > { %v7789_v51 = vsel %vm13103_vm14, %v7784_v16, %v7788_v5  ;;  %v11832_v50 = vcombine.low %v6759_v27, %v6762_v63  ;;  %v9536_v15 = vrot.slane %v9534_v30, 4  ;;  %v8453_v12 = vrot.slane %v8451_v20, 5  ;;  %v7534_v27 = vld [vmem:[#allocation2 + $0x8c] sm:$0x1] }
 0x37b   : > { %v11863_v44 = vcombine.low %v7779_v54, %v7789_v51  ;;  %v8456_v2 = vrot.slane %v8454_v47, 6  ;;  %v8462_v13 = vrot.slane %v8460_v61, 5  ;;  %v8470_v33 = vshrl.u32 %v8353_v7, 16  ;;  %v15061_v51 = vld [vmem:[#allocation2 + $0x88] sm:$0xf] }
 0x37c   : > { %v9538_v5 = vsel %vm13040_vm13, %v9536_v15, %v9537_v4  ;;  %v8473_v6 = vshll.u32 %v8353_v7, 16  ;;  %v7791_v54 = vshrl.u32 %v7532_v21, 16  ;;  %v7794_v16 = vshll.u32 %v7532_v21, 16  ;;  %v15063_v4 = vld [vmem:[#allocation2 + $0x8c] sm:$0x1] }
 0x37d   : > { %8048 = vrot.lane.b32.xlu0 %v11863_v44, %s12939_s27  ;;  %6914 = vrot.lane.b32.xlu1 %v11832_v50, %s12939_s27  ;;  %v11952_v63 = vcombine.low %v9535_v35, %v9538_v5  ;;  %v8457_v0 = vor.u32 %v8456_v2, %v8453_v12  ;;  %v8465_v30 = vrot.slane %v8463_v42, 6  ;;  %v8472_v20 = vrot.slane %v8470_v33, 5  ;;  %v6633_v44 = vld [vmem:[#allocation2 + $0x84] sm:$0xe]  ;;  %v15067_v42 = vld [vmem:[#allocation2 + $0x40] sm:$0xf] }
 0x37e   : > { %v8475_v52 = vrot.slane %v8473_v6, 6  ;;  %v7793_v47 = vrot.slane %v7791_v54, 4  ;;  %v7796_v61 = vrot.slane %v7794_v16, 5  ;;  %v7800_v23 = vshll.u32 %v7533_v43, 16  ;;  %16437 = vst [vmem:[#allocation7_spill] sm:$0xff] %v15067_v42 }
 0x37f   : > { %v8458_v37 = vrot.slane %v8457_v0, 4  ;;  %v8466_v50 = vor.u32 %v8465_v30, %v8462_v13  ;;  %v7804_v25 = vshrl.u32 %v7533_v43, 16  ;;  %v7810_v34 = vshll.u32 %v7534_v27, 16  ;;  %v15071_v13 = vld [vmem:[#allocation2 + $0x44] sm:$0x1] }
 0x380   : > { %v8476_v7 = vor.u32 %v8475_v52, %v8472_v20  ;;  %v7797_v21 = vor.u32 %v7796_v61, %v7793_v47  ;;  %v7802_v12 = vrot.slane %v7800_v23, 5  ;;  %16438 = vst [vmem:[#allocation8_spill] sm:$0xff] %v15071_v13  ;;  %v11801_v27 = vrot.slane %v6633_v44, 9  ;;  %v9457_v16 = vld [vmem:[#allocation2 + $0x3c] sm:$0xe] }
 0x381   : > { %9730 = vrot.lane.b32.xlu0 %v11952_v63, %s12939_s27  ;;  %v8467_v35 = vsel %vm13509_vm6, %v8458_v37, %v8466_v50  ;;  %v8468_v15 = vrot.slane %v8466_v50, 4  ;;  %v7806_v2 = vrot.slane %v7804_v25, 4  ;;  %v7812_v5 = vrot.slane %v7810_v34, 5  ;;  %v8154_v30 = vld [vmem:[#allocation2 + $0x3c] sm:$0xe] }
 0x382   : > { %v7798_v43 = vrot.slane %v7797_v21, 4  ;;  %v6765_v54 = vrot.slane %v15061_v51, 5  ;;  %v6768_v0 = vrot.slane %v15063_v4, 5  ;;  %v11921_v44 = vrot.slane %v9457_v16, 9 }
 0x383   : > { %v8477_v23 = vsel %vm13509_vm6, %v8468_v15, %v8476_v7  ;;  %v7807_v63 = vor.u32 %v7806_v2, %v7802_v12  ;;  %v9541_v50 = vrot.slane %v15067_v42, 5  ;;  %v8155_v7 = vld [vmem:[#allocation2 + $0x40] sm:$0xf]  ;;  %v8354_v15 = vld [vmem:[#allocation2 + $0x44] sm:$0x3]  ;;  %v8482_v2 = vshll.u32 %v8154_v30, 16 }
 0x384   : > { %v11905_v25 = vcombine.low %v8467_v35, %v8477_v23  ;;  %v7803_v34 = vsel %vm13103_vm14, %v7798_v43, %v7802_v12  ;;  %v6766_v20 = vsel %vm13040_vm13, %v11801_v27, %v6765_v54  ;;  %v6767_v52 = vrot.slane %v6765_v54, 4  ;;  %v7535_v23 = vld [vmem:[#allocation2 + $0x90] sm:$0xf] }
 0x385   : > { %v7808_v47 = vrot.slane %v7807_v63, 4  ;;  %v9544_v35 = vrot.slane %v15071_v13, 5  ;;  %v8479_v12 = vshrl.u32 %v8154_v30, 16  ;;  %v9542_v54 = vsel %vm13040_vm13, %v11921_v44, %v9541_v50  ;;  %v7536_v30 = vld [vmem:[#allocation2 + $0x94] sm:$0xf] }
 0x386   : > { %8916 = vrot.lane.b32.xlu1 %v11905_v25, %s12939_s27  ;;  %v6769_v21 = vsel %vm13040_vm13, %v6767_v52, %v6768_v0  ;;  %v9543_v16 = vrot.slane %v9541_v50, 4  ;;  %v8484_v25 = vrot.slane %v8482_v2, 6  ;;  %v8488_v37 = vshrl.u32 %v8155_v7, 16  ;;  %v7537_v44 = vld [vmem:[#allocation2 + $0x98] sm:$0x1] }
 0x387   : > { %v7813_v43 = vsel %vm13103_vm14, %v7808_v47, %v7812_v5  ;;  %v11833_v27 = vcombine.low %v6766_v20, %v6769_v21  ;;  %v8481_v61 = vrot.slane %v8479_v12, 5  ;;  %v8491_v52 = vshll.u32 %v8155_v7, 16 }
 0x388   : > { %v11864_v63 = vcombine.low %v7803_v34, %v7813_v43  ;;  %v9545_v0 = vsel %vm13040_vm13, %v9543_v16, %v9544_v35  ;;  %v8498_v6 = vshrl.u32 %v8354_v15, 16  ;;  %v8501_v33 = vshll.u32 %v8354_v15, 16  ;;  %v6634_v34 = vld [vmem:[#allocation2 + $0x90] sm:$0xe] }
 0x389   : > { %v11953_v5 = vcombine.low %v9542_v54, %v9545_v0  ;;  %v8485_v20 = vor.u32 %v8484_v25, %v8481_v61  ;;  %v8490_v47 = vrot.slane %v8488_v37, 5  ;;  %v7815_v50 = vshrl.u32 %v7535_v23, 16  ;;  %v15097_v54 = vld [vmem:[#allocation2 + $0x4c] sm:$0xf] }
 0x38a   : > { %8050 = vrot.lane.b32.xlu0 %v11864_v63, %s12939_s27  ;;  %6916 = vrot.lane.b32.xlu1 %v11833_v27, %s12939_s27  ;;  %v8493_v21 = vrot.slane %v8491_v52, 6  ;;  %v8500_v12 = vrot.slane %v8498_v6, 5  ;;  %v8503_v2 = vrot.slane %v8501_v33, 6  ;;  %v7818_v43 = vshll.u32 %v7535_v23, 16  ;;  %v6228_v27 = vld [vmem:[#allocation2 + $0x98] sm:$0x1] }
 0x38b   : > { %v8486_v35 = vrot.slane %v8485_v20, 4  ;;  %v7817_v7 = vrot.slane %v7815_v50, 4  ;;  %v7824_v16 = vshll.u32 %v7536_v30, 16  ;;  %v7828_v15 = vshrl.u32 %v7536_v30, 16  ;;  %16439 = vst [vmem:[#allocation9_spill] sm:$0xff] %v15097_v54 }
 0x38c   : > { %v8494_v19 = vor.u32 %v8493_v21, %v8490_v47  ;;  %v8504_v45 = vor.u32 %v8503_v2, %v8500_v12  ;;  %v7820_v63 = vrot.slane %v7818_v43, 5  ;;  %v7834_v13 = vshll.u32 %v7537_v44, 16  ;;  %v15100_v33 = vld [vmem:[#allocation2 + $0x50] sm:$0x1]  ;;  %v9458_v20 = vld [vmem:[#allocation2 + $0x48] sm:$0xe] }
 0x38d   : > { %v7826_v37 = vrot.slane %v7824_v16, 5  ;;  %v7830_v61 = vrot.slane %v7828_v15, 4  ;;  %v11802_v25 = vrot.slane %v6634_v34, 9  ;;  %v6772_v6 = vrot.slane %v6227_v28, 5  ;;  %16440 = vst [vmem:[#allocation10_spill] sm:$0xff] %v15100_v33 }
 0x38e   : > { %9732 = vrot.lane.b32.xlu0 %v11953_v5, %s12939_s27  ;;  %v8495_v23 = vsel %vm13509_vm6, %v8486_v35, %v8494_v19  ;;  %v8496_v0 = vrot.slane %v8494_v19, 4  ;;  %v7821_v52 = vor.u32 %v7820_v63, %v7817_v7  ;;  %v7836_v30 = vrot.slane %v7834_v13, 5  ;;  %v8157_v5 = vld [vmem:[#allocation2 + $0x48] sm:$0xe]  ;;  %v8158_v43 = vld [vmem:[#allocation2 + $0x4c] sm:$0xf] }
 0x38f   : > { %v7831_v47 = vor.u32 %v7830_v61, %v7826_v37  ;;  %v6773_v44 = vsel %vm13040_vm13, %v11802_v25, %v6772_v6  ;;  %v6774_v50 = vrot.slane %v6772_v6, 4  ;;  %v6775_v21 = vrot.slane %v6228_v27, 5  ;;  %v8355_v27 = vld [vmem:[#allocation2 + $0x50] sm:$0x3]  ;;  %v12733_v61 = vld [vmem:[%s16374_s4 + $0xc0] sm:$0xff]  }
 0x390   : > { %v8505_v34 = vsel %vm13509_vm6, %v8496_v0, %v8504_v45  ;;  %v7822_v28 = vrot.slane %v7821_v52, 4  ;;  %v11922_v7 = vrot.slane %v9458_v20, 9  ;;  %v9548_v63 = vrot.slane %v15097_v54, 5  ;;  %v12734_v25 = vld [vmem:[%s16374_s4 + $0x80] sm:$0xff]   ;;  %v7538_v52 = vld [vmem:[#allocation2 + $0x9c] sm:$0xf]  ;;  %12459 = vmatprep.subr.bf16.mxu0 %v12733_v61 }
 0x391   : > { %v11906_v19 = vcombine.low %v8495_v23, %v8505_v34  ;;  %v7832_v35 = vrot.slane %v7831_v47, 4  ;;  %v6776_v13 = vsel %vm13040_vm13, %v6774_v50, %v6775_v21  ;;  %v9551_v45 = vrot.slane %v15100_v33, 5  ;;  %v7539_v2 = vld [vmem:[#allocation2 + $0xa0] sm:$0xf]  ;;  %12460 = vmatpush3.bf16.msra.mxu0 %v12734_v25 }
 0x392   : > { %v7827_v16 = vsel %vm13103_vm14, %v7822_v28, %v7826_v37  ;;  %v11834_v15 = vcombine.low %v6773_v44, %v6776_v13  ;;  %v8507_v37 = vshrl.u32 %v8157_v5, 16  ;;  %v8510_v23 = vshll.u32 %v8157_v5, 16 }
 0x393   : > { %8918 = vrot.lane.b32.xlu1 %v11906_v19, %s12939_s27  ;;  %v7837_v6 = vsel %vm13103_vm14, %v7832_v35, %v7836_v30  ;;  %v8516_v0 = vshrl.u32 %v8158_v43, 16  ;;  %v9549_v47 = vsel %vm13040_vm13, %v11922_v7, %v9548_v63  ;;  %v9550_v44 = vrot.slane %v9548_v63, 4  ;;  %v7540_v35 = vld [vmem:[#allocation2 + $0xa4] sm:$0x1] }
 0x394   : > { %v11865_v20 = vcombine.low %v7827_v16, %v7837_v6  ;;  %v8519_v50 = vshll.u32 %v8158_v43, 16  ;;  %v8509_v21 = vrot.slane %v8507_v37, 5  ;;  %v8512_v34 = vrot.slane %v8510_v23, 6  ;;  %v6635_v6 = vld [vmem:[#allocation2 + $0x9c] sm:$0xe] }
 0x395   : > { %v8518_v28 = vrot.slane %v8516_v0, 5  ;;  %v8526_v13 = vshrl.u32 %v8355_v27, 16  ;;  %v9552_v30 = vsel %vm13040_vm13, %v9550_v44, %v9551_v45  ;;  %v8529_v19 = vshll.u32 %v8355_v27, 16  ;;  %v9459_v37 = vld [vmem:[#allocation2 + $0x54] sm:$0xe] }
 0x396   : > { %8052 = vrot.lane.b32.xlu0 %v11865_v20, %s12939_s27  ;;  %v8521_v5 = vrot.slane %v8519_v50, 6  ;;  %v7839_v16 = vshrl.u32 %v7538_v52, 16  ;;  %v11954_v7 = vcombine.low %v9549_v47, %v9552_v30  ;;  %v8513_v43 = vor.u32 %v8512_v34, %v8509_v21  ;;  %v6230_v20 = vld [vmem:[#allocation2 + $0xa0] sm:$0xf]  ;;  %v6231_v27 = vld [vmem:[#allocation2 + $0xa4] sm:$0x1] }
 0x397   : > { %6918 = vrot.lane.b32.xlu1 %v11834_v15, %s12939_s27  ;;  %v8528_v63 = vrot.slane %v8526_v13, 5  ;;  %v7842_v61 = vshll.u32 %v7538_v52, 16  ;;  %v8531_v0 = vrot.slane %v8529_v19, 6  ;;  %v7848_v12 = vshll.u32 %v7539_v2, 16  ;;  %v9038_v34 = vld [vmem:[#allocation2 + $0x58] sm:$0xf] }
 0x398   : > { %v8522_v23 = vor.u32 %v8521_v5, %v8518_v28  ;;  %v7841_v25 = vrot.slane %v7839_v16, 4  ;;  %v8514_v33 = vrot.slane %v8513_v43, 4  ;;  %v7852_v45 = vshrl.u32 %v7539_v2, 16  ;;  %v9039_v5 = vld [vmem:[#allocation2 + $0x5c] sm:$0x1] }
 0x399   : > { %v7844_v54 = vrot.slane %v7842_v61, 5  ;;  %v7858_v44 = vshll.u32 %v7540_v35, 16  ;;  %v8532_v15 = vor.u32 %v8531_v0, %v8528_v63  ;;  %v7850_v47 = vrot.slane %v7848_v12, 5  ;;  %v8160_v19 = vld [vmem:[#allocation2 + $0x54] sm:$0xe] }
 0x39a   : > { %9734 = vrot.lane.b32.xlu0 %v11954_v7, %s12939_s27  ;;  %v8524_v50 = vrot.slane %v8522_v23, 4  ;;  %v11803_v21 = vrot.slane %v6635_v6, 9  ;;  %v8523_v52 = vsel %vm13509_vm6, %v8514_v33, %v8522_v23  ;;  %v7854_v13 = vrot.slane %v7852_v45, 4  ;;  %v8161_v6 = vld [vmem:[#allocation2 + $0x58] sm:$0xf]  ;;  %v12735_v33 = vld [vmem:[%s16374_s4 + $0x100] sm:$0xff]  }
 0x39b   : > { %v7845_v28 = vor.u32 %v7844_v54, %v7841_v25  ;;  %v7860_v30 = vrot.slane %v7858_v44, 5  ;;  %v6779_v35 = vrot.slane %v6230_v20, 5  ;;  %v6782_v16 = vrot.slane %v6231_v27, 5  ;;  %v8356_v27 = vld [vmem:[#allocation2 + $0x5c] sm:$0x3]  ;;  %12631 = vmatprep.subr.bf16.mxu1 %v12735_v33 }
 0x39c   : > { %v8533_v2 = vsel %vm13509_vm6, %v8524_v50, %v8532_v15  ;;  %v11923_v43 = vrot.slane %v9459_v37, 9  ;;  %v7855_v63 = vor.u32 %v7854_v13, %v7850_v47  ;;  %v9555_v12 = vrot.slane %v9038_v34, 5 }
 0x39d   : > { %v11907_v7 = vcombine.low %v8523_v52, %v8533_v2  ;;  %v7846_v61 = vrot.slane %v7845_v28, 4  ;;  %v6780_v54 = vsel %vm13040_vm13, %v11803_v21, %v6779_v35  ;;  %v6781_v23 = vrot.slane %v6779_v35, 4  ;;  %v7541_v52 = vld [vmem:[#allocation2 + $0xa8] sm:$0xf]  ;;  %v7542_v2 = vld [vmem:[#allocation2 + $0xac] sm:$0xf] }
 0x39e   : > { %v9558_v0 = vrot.slane %v9039_v5, 5  ;;  %v8535_v25 = vshrl.u32 %v8160_v19, 16  ;;  %v7856_v20 = vrot.slane %v7855_v63, 4  ;;  %v9556_v45 = vsel %vm13040_vm13, %v11923_v43, %v9555_v12 }
 0x39f   : > { %8920 = vrot.lane.b32.xlu1 %v11907_v7, %s12939_s27  ;;  %v7851_v37 = vsel %vm13103_vm14, %v7846_v61, %v7850_v47  ;;  %v9557_v44 = vrot.slane %v9555_v12, 4  ;;  %v6783_v50 = vsel %vm13040_vm13, %v6781_v23, %v6782_v16  ;;  %v8538_v21 = vshll.u32 %v8160_v19, 16  ;;  %v7543_v12 = vld [vmem:[#allocation2 + $0xb0] sm:$0x1] }
 0x3a0   : > { %v8537_v15 = vrot.slane %v8535_v25, 5  ;;  %v8544_v34 = vshrl.u32 %v8161_v6, 16  ;;  %v7861_v28 = vsel %vm13103_vm14, %v7856_v20, %v7860_v30  ;;  %v11835_v13 = vcombine.low %v6780_v54, %v6783_v50  ;;  %v6233_v50 = vld [vmem:[#allocation2 + $0xac] sm:$0xf] }
 0x3a1   : > { %v9559_v47 = vsel %vm13040_vm13, %v9557_v44, %v9558_v0  ;;  %v8547_v5 = vshll.u32 %v8161_v6, 16  ;;  %v11866_v35 = vcombine.low %v7851_v37, %v7861_v28  ;;  %v8540_v7 = vrot.slane %v8538_v21, 6  ;;  %v6636_v0 = vld [vmem:[#allocation2 + $0xa8] sm:$0xe]  ;;  %v9460_v6 = vld [vmem:[#allocation2 + $0x60] sm:$0xe] }
 0x3a2   : > { %v11955_v43 = vcombine.low %v9556_v45, %v9559_v47  ;;  %v8546_v61 = vrot.slane %v8544_v34, 5  ;;  %v8554_v63 = vshrl.u32 %v8356_v27, 16  ;;  %v8557_v19 = vshll.u32 %v8356_v27, 16  ;;  %v6234_v27 = vld [vmem:[#allocation2 + $0xb0] sm:$0x1] }
 0x3a3   : > { %6920 = vrot.lane.b32.xlu1 %v11835_v13, %s12939_s27  ;;  %v8549_v16 = vrot.slane %v8547_v5, 6  ;;  %v7863_v33 = vshrl.u32 %v7541_v52, 16  ;;  %8054 = vrot.lane.b32.xlu0 %v11866_v35, %s12939_s27  ;;  %v8541_v30 = vor.u32 %v8540_v7, %v8537_v15  ;;  %v7866_v54 = vshll.u32 %v7541_v52, 16  ;;  %v9041_v47 = vld [vmem:[#allocation2 + $0x64] sm:$0xf]  ;;  %v12736_v52 = vld [vmem:[%s16374_s4 + $0xc8] sm:$0xff]  }
 0x3a4   : > { %v7872_v23 = vshll.u32 %v7542_v2, 16  ;;  %v7876_v25 = vshrl.u32 %v7542_v2, 16  ;;  %v8556_v37 = vrot.slane %v8554_v63, 5  ;;  %v8559_v45 = vrot.slane %v8557_v19, 6  ;;  %v12737_v2 = vld [vmem:[%s16374_s4 + $0x88] sm:$0xff]   ;;  %12461 = vmatprep.subr.bf16.mxu0 %v12736_v52 }
 0x3a5   : > { %v8550_v20 = vor.u32 %v8549_v16, %v8546_v61  ;;  %v7865_v44 = vrot.slane %v7863_v33, 4  ;;  %v8542_v21 = vrot.slane %v8541_v30, 4  ;;  %v7868_v34 = vrot.slane %v7866_v54, 5  ;;  %v9042_v19 = vld [vmem:[#allocation2 + $0x68] sm:$0x1]  ;;  %12462 = vmatpush3.bf16.msra.mxu0 %v12737_v2 }
 0x3a6   : > { %v7874_v28 = vrot.slane %v7872_v23, 5  ;;  %v7878_v13 = vrot.slane %v7876_v25, 4  ;;  %v8560_v42 = vor.u32 %v8559_v45, %v8556_v37  ;;  %v7882_v35 = vshll.u32 %v7543_v12, 16  ;;  %v8163_v33 = vld [vmem:[#allocation2 + $0x60] sm:$0xe] }
 0x3a7   : > { %v8552_v5 = vrot.slane %v8550_v20, 4  ;;  %v11804_v15 = vrot.slane %v6636_v0, 9  ;;  %9736 = vrot.lane.b32.xlu0 %v11955_v43, %s12939_s27  ;;  %v8551_v7 = vsel %vm13509_vm6, %v8542_v21, %v8550_v20  ;;  %v7869_v61 = vor.u32 %v7868_v34, %v7865_v44  ;;  %v8164_v25 = vld [vmem:[#allocation2 + $0x64] sm:$0xf]  ;;  %v8357_v34 = vld [vmem:[#allocation2 + $0x68] sm:$0x3] }
 0x3a8   : > { %v7879_v16 = vor.u32 %v7878_v13, %v7874_v28  ;;  %v6786_v63 = vrot.slane %v6233_v50, 5  ;;  %v7884_v30 = vrot.slane %v7882_v35, 5  ;;  %v6789_v54 = vrot.slane %v6234_v27, 5  ;;  %v7544_v52 = vld [vmem:[#allocation2 + $0xb4] sm:$0xf] }
 0x3a9   : > { %v8561_v12 = vsel %vm13509_vm6, %v8552_v5, %v8560_v42  ;;  %v11924_v23 = vrot.slane %v9460_v6, 9  ;;  %v7870_v37 = vrot.slane %v7869_v61, 4  ;;  %v9562_v44 = vrot.slane %v9041_v47, 5 }
 0x3aa   : > { %v11908_v0 = vcombine.low %v8551_v7, %v8561_v12  ;;  %v7880_v45 = vrot.slane %v7879_v16, 4  ;;  %v6787_v43 = vsel %vm13040_vm13, %v11804_v15, %v6786_v63  ;;  %v6788_v20 = vrot.slane %v6786_v63, 4 }
 0x3ab   : > { %v9565_v50 = vrot.slane %v9042_v19, 5  ;;  %v8563_v21 = vshrl.u32 %v8163_v33, 16  ;;  %v7875_v42 = vsel %vm13103_vm14, %v7870_v37, %v7874_v28  ;;  %v8566_v13 = vshll.u32 %v8163_v33, 16  ;;  %v7545_v28 = vld [vmem:[#allocation2 + $0xb8] sm:$0xf] }
 0x3ac   : > { %8922 = vrot.lane.b32.xlu1 %v11908_v0, %s12939_s27  ;;  %v7885_v6 = vsel %vm13103_vm14, %v7880_v45, %v7884_v30  ;;  %v8572_v27 = vshrl.u32 %v8164_v25, 16  ;;  %v6790_v35 = vsel %vm13040_vm13, %v6788_v20, %v6789_v54  ;;  %v9563_v47 = vsel %vm13040_vm13, %v11924_v23, %v9562_v44  ;;  %v12738_v30 = vld [vmem:[%s16374_s4 + $0xd0] sm:$0xff]   ;;  %v7546_v37 = vld [vmem:[#allocation2 + $0xbc] sm:$0x1] }
 0x3ad   : > { %v11867_v5 = vcombine.low %v7875_v42, %v7885_v6  ;;  %v9564_v15 = vrot.slane %v9562_v44, 4  ;;  %v11836_v2 = vcombine.low %v6787_v43, %v6790_v35  ;;  %v8565_v7 = vrot.slane %v8563_v21, 5  ;;  %v12739_v54 = vld [vmem:[%s16374_s4 + $0x90] sm:$0xff]   ;;  %v6236_v42 = vld [vmem:[#allocation2 + $0xb8] sm:$0xf]  ;;  %12463 = vmatprep.subr.bf16.mxu0 %v12738_v30 }
 0x3ae   : > { %v8568_v61 = vrot.slane %v8566_v13, 6  ;;  %v8574_v16 = vrot.slane %v8572_v27, 5  ;;  %v8575_v19 = vshll.u32 %v8164_v25, 16  ;;  %v8582_v33 = vshrl.u32 %v8357_v34, 16  ;;  %v6637_v20 = vld [vmem:[#allocation2 + $0xb4] sm:$0xe]  ;;  %12464 = vmatpush3.bf16.msra.mxu0 %v12739_v54 }
 0x3af   : > { %8056 = vrot.lane.b32.xlu0 %v11867_v5, %s12939_s27  ;;  %v9566_v63 = vsel %vm13040_vm13, %v9564_v15, %v9565_v50  ;;  %v8585_v12 = vshll.u32 %v8357_v34, 16  ;;  %v7887_v45 = vshrl.u32 %v7544_v52, 16  ;;  %v7890_v43 = vshll.u32 %v7544_v52, 16  ;;  %v6237_v5 = vld [vmem:[#allocation2 + $0xbc] sm:$0x1] }
 0x3b0   : > { %6922 = vrot.lane.b32.xlu1 %v11836_v2, %s12939_s27  ;;  %v11956_v23 = vcombine.low %v9563_v47, %v9566_v63  ;;  %v8569_v0 = vor.u32 %v8568_v61, %v8565_v7  ;;  %v8577_v44 = vrot.slane %v8575_v19, 6  ;;  %v8584_v25 = vrot.slane %v8582_v33, 5  ;;  %v9044_v52 = vld [vmem:[#allocation2 + $0x70] sm:$0xf]  ;;  %v9461_v7 = vld [vmem:[#allocation2 + $0x6c] sm:$0xe] }
 0x3b1   : > { %v8587_v50 = vrot.slane %v8585_v12, 6  ;;  %v7896_v21 = vshll.u32 %v7545_v28, 16  ;;  %v7889_v34 = vrot.slane %v7887_v45, 4  ;;  %v7892_v13 = vrot.slane %v7890_v43, 5  ;;  %v9045_v12 = vld [vmem:[#allocation2 + $0x74] sm:$0x1] }
 0x3b2   : > { %v8570_v6 = vrot.slane %v8569_v0, 4  ;;  %v7900_v27 = vshrl.u32 %v7545_v28, 16  ;;  %v8578_v35 = vor.u32 %v8577_v44, %v8574_v16  ;;  %v7906_v2 = vshll.u32 %v7546_v37, 16  ;;  %v8166_v37 = vld [vmem:[#allocation2 + $0x6c] sm:$0xe] }
 0x3b3   : > { %9738 = vrot.lane.b32.xlu0 %v11956_v23, %s12939_s27  ;;  %v8588_v47 = vor.u32 %v8587_v50, %v8584_v25  ;;  %v7898_v15 = vrot.slane %v7896_v21, 5  ;;  %v7893_v61 = vor.u32 %v7892_v13, %v7889_v34  ;;  %v11805_v19 = vrot.slane %v6637_v20, 9  ;;  %v8167_v21 = vld [vmem:[#allocation2 + $0x70] sm:$0xf] }
 0x3b4   : > { %v7902_v63 = vrot.slane %v7900_v27, 4  ;;  %v6793_v33 = vrot.slane %v6236_v42, 5  ;;  %v8579_v30 = vsel %vm13509_vm6, %v8570_v6, %v8578_v35  ;;  %v8580_v0 = vrot.slane %v8578_v35, 4  ;;  %v8358_v27 = vld [vmem:[#allocation2 + $0x74] sm:$0x3] }
 0x3b5   : > { %v7908_v28 = vrot.slane %v7906_v2, 5  ;;  %v6796_v45 = vrot.slane %v6237_v5, 5  ;;  %v7894_v54 = vrot.slane %v7893_v61, 4  ;;  %v11925_v25 = vrot.slane %v9461_v7, 9 }
 0x3b6   : > { %v7903_v43 = vor.u32 %v7902_v63, %v7898_v15  ;;  %v6794_v16 = vsel %vm13040_vm13, %v11805_v19, %v6793_v33  ;;  %v6795_v23 = vrot.slane %v6793_v33, 4  ;;  %v8589_v44 = vsel %vm13509_vm6, %v8580_v0, %v8588_v47  ;;  %v12740_v47 = vld [vmem:[%s16374_s4 + $0xd8] sm:$0xff]   ;;  %v7547_v33 = vld [vmem:[#allocation2 + $0xc0] sm:$0xf] }
 0x3b7   : > { %v9569_v20 = vrot.slane %v9044_v52, 5  ;;  %v9572_v50 = vrot.slane %v9045_v12, 5  ;;  %v11909_v42 = vcombine.low %v8579_v30, %v8589_v44  ;;  %v7899_v6 = vsel %vm13103_vm14, %v7894_v54, %v7898_v15  ;;  %v12741_v52 = vld [vmem:[%s16374_s4 + $0x98] sm:$0xff]   ;;  %v7548_v54 = vld [vmem:[#allocation2 + $0xc4] sm:$0xf]  ;;  %12465 = vmatprep.subr.bf16.mxu0 %v12740_v47 }
 0x3b8   : > { %v7904_v34 = vrot.slane %v7903_v43, 4  ;;  %v6797_v13 = vsel %vm13040_vm13, %v6795_v23, %v6796_v45  ;;  %v8591_v61 = vshrl.u32 %v8166_v37, 16  ;;  %v8594_v7 = vshll.u32 %v8166_v37, 16  ;;  %12466 = vmatpush3.bf16.msra.mxu0 %v12741_v52 }
 0x3b9   : > { %v11837_v5 = vcombine.low %v6794_v16, %v6797_v13  ;;  %v9570_v35 = vsel %vm13040_vm13, %v11925_v25, %v9569_v20  ;;  %v9571_v2 = vrot.slane %v9569_v20, 4  ;;  %8924 = vrot.lane.b32.xlu1 %v11909_v42, %s12939_s27  ;;  %v8600_v63 = vshrl.u32 %v8167_v21, 16  ;;  %v7549_v25 = vld [vmem:[#allocation2 + $0xc8] sm:$0x1]  ;;  %v8169_v13 = vld [vmem:[#allocation2 + $0x78] sm:$0xe] }
 0x3ba   : > { %v7909_v15 = vsel %vm13103_vm14, %v7904_v34, %v7908_v28  ;;  %v8603_v19 = vshll.u32 %v8167_v21, 16  ;;  %v8593_v0 = vrot.slane %v8591_v61, 5  ;;  %v8610_v45 = vshrl.u32 %v8358_v27, 16 }
 0x3bb   : > { %v11868_v12 = vcombine.low %v7899_v6, %v7909_v15  ;;  %v9573_v30 = vsel %vm13040_vm13, %v9571_v2, %v9572_v50  ;;  %v8596_v16 = vrot.slane %v8594_v7, 6  ;;  %v8602_v23 = vrot.slane %v8600_v63, 5  ;;  %v12743_v2 = vld [vmem:[%s16374_s4 + $0xa0] sm:$0xff]   ;;  %v8170_v15 = vld [vmem:[#allocation2 + $0x7c] sm:$0xf] }
 0x3bc   : > { %v11957_v43 = vcombine.low %v9570_v35, %v9573_v30  ;;  %v8605_v44 = vrot.slane %v8603_v19, 6  ;;  %v8612_v28 = vrot.slane %v8610_v45, 5  ;;  %v8613_v37 = vshll.u32 %v8358_v27, 16  ;;  %v12742_v35 = vld [vmem:[%s16374_s4 + $0xe0] sm:$0xff]  }
 0x3bd   : > { %8058 = vrot.lane.b32.xlu0 %v11868_v12, %s12939_s27  ;;  %v7911_v20 = vshrl.u32 %v7547_v33, 16  ;;  %v7914_v21 = vshll.u32 %v7547_v33, 16  ;;  %6924 = vrot.lane.b32.xlu1 %v11837_v5, %s12939_s27  ;;  %v8597_v42 = vor.u32 %v8596_v16, %v8593_v0  ;;  %v7920_v6 = vshll.u32 %v7548_v54, 16  ;;  %v8359_v16 = vld [vmem:[#allocation2 + $0x80] sm:$0x3] }
 0x3be   : > { %v8606_v50 = vor.u32 %v8605_v44, %v8602_v23  ;;  %v7924_v34 = vshrl.u32 %v7548_v54, 16  ;;  %v8615_v61 = vrot.slane %v8613_v37, 6  ;;  %v7930_v52 = vshll.u32 %v7549_v25, 16  ;;  %12467 = vmatprep.subr.bf16.mxu0 %v12742_v35  ;;  %v9047_v25 = vld [vmem:[#allocation2 + $0x7c] sm:$0xf] }
 0x3bf   : > { %v7913_v47 = vrot.slane %v7911_v20, 4  ;;  %v7916_v27 = vrot.slane %v7914_v21, 5  ;;  %v8598_v7 = vrot.slane %v8597_v42, 4  ;;  %v7922_v63 = vrot.slane %v7920_v6, 5  ;;  %12468 = vmatpush3.bf16.msra.mxu0 %v12743_v2 }
 0x3c0   : > { %v8608_v5 = vrot.slane %v8606_v50, 4  ;;  %v7926_v19 = vrot.slane %v7924_v34, 4  ;;  %v8616_v33 = vor.u32 %v8615_v61, %v8612_v28  ;;  %v7932_v30 = vrot.slane %v7930_v52, 5 }
 0x3c1   : > { %9740 = vrot.lane.b32.xlu0 %v11957_v43, %s12939_s27  ;;  %v7917_v12 = vor.u32 %v7916_v27, %v7913_v47  ;;  %v8619_v0 = vshrl.u32 %v8169_v13, 16  ;;  %v8607_v45 = vsel %vm13509_vm6, %v8598_v7, %v8606_v50  ;;  %v8622_v23 = vshll.u32 %v8169_v13, 16  ;;  %v9462_v43 = vld [vmem:[#allocation2 + $0x78] sm:$0xe]  ;;  %v9048_v13 = vld [vmem:[#allocation2 + $0x80] sm:$0x1] }
 0x3c2   : > { %v7927_v54 = vor.u32 %v7926_v19, %v7922_v63  ;;  %v8628_v44 = vshrl.u32 %v8170_v15, 16  ;;  %v8617_v37 = vsel %vm13509_vm6, %v8608_v5, %v8616_v33  ;;  %v8631_v42 = vshll.u32 %v8170_v15, 16  ;;  %v8172_v5 = vld [vmem:[#allocation2 + $0x84] sm:$0xe] }
 0x3c3   : > { %v7918_v20 = vrot.slane %v7917_v12, 4  ;;  %v8621_v21 = vrot.slane %v8619_v0, 5  ;;  %v11910_v28 = vcombine.low %v8607_v45, %v8617_v37  ;;  %v8624_v34 = vrot.slane %v8622_v23, 6  ;;  %v8173_v45 = vld [vmem:[#allocation2 + $0x88] sm:$0xf] }
 0x3c4   : > { %v7928_v6 = vrot.slane %v7927_v54, 4  ;;  %v8630_v35 = vrot.slane %v8628_v44, 5  ;;  %v8633_v50 = vrot.slane %v8631_v42, 6  ;;  %v8638_v61 = vshrl.u32 %v8359_v16, 16  ;;  %v8360_v44 = vld [vmem:[#allocation2 + $0x8c] sm:$0x3] }
 0x3c5   : > { %v7923_v2 = vsel %vm13103_vm14, %v7918_v20, %v7922_v63  ;;  %v8641_v47 = vshll.u32 %v8359_v16, 16  ;;  %8926 = vrot.lane.b32.xlu1 %v11910_v28, %s12939_s27  ;;  %v8625_v52 = vor.u32 %v8624_v34, %v8621_v21  ;;  %v11926_v7 = vrot.slane %v9462_v43, 9  ;;  %v9463_v34 = vld [vmem:[#allocation2 + $0x84] sm:$0xe] }
 0x3c6   : > { %v7933_v27 = vsel %vm13103_vm14, %v7928_v6, %v7932_v30  ;;  %v9576_v15 = vrot.slane %v9047_v25, 5  ;;  %v8634_v33 = vor.u32 %v8633_v50, %v8630_v35  ;;  %v8640_v12 = vrot.slane %v8638_v61, 5  ;;  %v9050_v25 = vld [vmem:[#allocation2 + $0x88] sm:$0xf] }
 0x3c7   : > { %v11869_v19 = vcombine.low %v7923_v2, %v7933_v27  ;;  %v8643_v0 = vrot.slane %v8641_v47, 6  ;;  %v8626_v54 = vrot.slane %v8625_v52, 4  ;;  %v9579_v23 = vrot.slane %v9048_v13, 5  ;;  %v12744_v35 = vld [vmem:[%s16374_s4 + $0xe8] sm:$0xff]   ;;  %v8175_v52 = vld [vmem:[#allocation2 + $0x90] sm:$0xe] }
 0x3c8   : > { %v9577_v63 = vsel %vm13040_vm13, %v11926_v7, %v9576_v15  ;;  %v9578_v16 = vrot.slane %v9576_v15, 4  ;;  %v8636_v37 = vrot.slane %v8634_v33, 4  ;;  %v8647_v20 = vshrl.u32 %v8172_v5, 16  ;;  %v12745_v2 = vld [vmem:[%s16374_s4 + $0xa8] sm:$0xff]   ;;  %12469 = vmatprep.subr.bf16.mxu0 %v12744_v35 }
 0x3c9   : > { %8060 = vrot.lane.b32.xlu0 %v11869_v19, %s12939_s27  ;;  %v8644_v30 = vor.u32 %v8643_v0, %v8640_v12  ;;  %v8650_v21 = vshll.u32 %v8172_v5, 16  ;;  %v8635_v42 = vsel %vm13509_vm6, %v8626_v54, %v8634_v33  ;;  %v8656_v28 = vshrl.u32 %v8173_v45, 16  ;;  %v9051_v27 = vld [vmem:[#allocation2 + $0x8c] sm:$0x1]  ;;  %v8176_v33 = vld [vmem:[#allocation2 + $0x94] sm:$0xf]  ;;  %12470 = vmatpush3.bf16.msra.mxu0 %v12745_v2 }
 0x3ca   : > { %v9580_v43 = vsel %vm13040_vm13, %v9578_v16, %v9579_v23  ;;  %v8659_v6 = vshll.u32 %v8173_v45, 16  ;;  %v8649_v47 = vrot.slane %v8647_v20, 5  ;;  %v8666_v19 = vshrl.u32 %v8360_v44, 16  ;;  %v12747_v16 = vld [vmem:[%s16374_s4 + $0xb0] sm:$0xff]  }
 0x3cb   : > { %v8645_v50 = vsel %vm13509_vm6, %v8636_v37, %v8644_v30  ;;  %v11958_v61 = vcombine.low %v9577_v63, %v9580_v43  ;;  %v8652_v13 = vrot.slane %v8650_v21, 6  ;;  %v8658_v15 = vrot.slane %v8656_v28, 5  ;;  %v12746_v63 = vld [vmem:[%s16374_s4 + $0xf0] sm:$0xff]   ;;  %v8361_v43 = vld [vmem:[#allocation2 + $0x98] sm:$0x3] }
 0x3cc   : > { %v11911_v7 = vcombine.low %v8635_v42, %v8645_v50  ;;  %v8661_v5 = vrot.slane %v8659_v6, 6  ;;  %v8669_v0 = vshll.u32 %v8360_v44, 16  ;;  %v11927_v45 = vrot.slane %v9463_v34, 9  ;;  %12471 = vmatprep.subr.bf16.mxu0 %v12746_v63  ;;  %v9464_v2 = vld [vmem:[#allocation2 + $0x90] sm:$0xe] }
 0x3cd   : > { %9742 = vrot.lane.b32.xlu0 %v11958_v61, %s12939_s27  ;;  %v8653_v12 = vor.u32 %v8652_v13, %v8649_v47  ;;  %v9583_v54 = vrot.slane %v9050_v25, 5  ;;  %v8668_v37 = vrot.slane %v8666_v19, 5  ;;  %v9586_v30 = vrot.slane %v9051_v27, 5  ;;  %v9053_v27 = vld [vmem:[#allocation2 + $0x94] sm:$0xf]  ;;  %12472 = vmatpush3.bf16.msra.mxu0 %v12747_v16 }
 0x3ce   : > { %8928 = vrot.lane.b32.xlu1 %v11911_v7, %s12939_s27  ;;  %v8662_v23 = vor.u32 %v8661_v5, %v8658_v15  ;;  %v8675_v20 = vshrl.u32 %v8175_v52, 16  ;;  %v8671_v42 = vrot.slane %v8669_v0, 6  ;;  %v8678_v34 = vshll.u32 %v8175_v52, 16  ;;  %v9054_v7 = vld [vmem:[#allocation2 + $0x98] sm:$0x1] }
 0x3cf   : > { %v8654_v21 = vrot.slane %v8653_v12, 4  ;;  %v9584_v44 = vsel %vm13040_vm13, %v11927_v45, %v9583_v54  ;;  %v9585_v25 = vrot.slane %v9583_v54, 4  ;;  %v8684_v35 = vshrl.u32 %v8176_v33, 16  ;;  %v8178_v0 = vld [vmem:[#allocation2 + $0x9c] sm:$0xe] }
 0x3d0   : > { %v8664_v28 = vrot.slane %v8662_v23, 4  ;;  %v8677_v6 = vrot.slane %v8675_v20, 5  ;;  %v8672_v61 = vor.u32 %v8671_v42, %v8668_v37  ;;  %v8687_v13 = vshll.u32 %v8176_v33, 16  ;;  %v8179_v20 = vld [vmem:[#allocation2 + $0xa0] sm:$0xf] }
 0x3d1   : > { %v8663_v50 = vsel %vm13509_vm6, %v8654_v21, %v8662_v23  ;;  %v9587_v47 = vsel %vm13040_vm13, %v9585_v25, %v9586_v30  ;;  %v8680_v5 = vrot.slane %v8678_v34, 6  ;;  %v8686_v19 = vrot.slane %v8684_v35, 5 }
 0x3d2   : > { %v11959_v15 = vcombine.low %v9584_v44, %v9587_v47  ;;  %v8694_v12 = vshrl.u32 %v8361_v43, 16  ;;  %v8673_v52 = vsel %vm13509_vm6, %v8664_v28, %v8672_v61  ;;  %v8689_v45 = vrot.slane %v8687_v13, 6 }
 0x3d3   : > { %v8697_v54 = vshll.u32 %v8361_v43, 16  ;;  %v11928_v63 = vrot.slane %v9464_v2, 9  ;;  %v11912_v23 = vcombine.low %v8663_v50, %v8673_v52  ;;  %v8681_v37 = vor.u32 %v8680_v5, %v8677_v6  ;;  %v8362_v43 = vld [vmem:[#allocation2 + $0xa4] sm:$0x3] }
 0x3d4   : > { %9744 = vrot.lane.b32.xlu0 %v11959_v15, %s12939_s27  ;;  %v8696_v30 = vrot.slane %v8694_v12, 5  ;;  %v9590_v33 = vrot.slane %v9053_v27, 5  ;;  %v8690_v21 = vor.u32 %v8689_v45, %v8686_v19  ;;  %v9593_v42 = vrot.slane %v9054_v7, 5  ;;  %v6190_v15 = vld [vmem:[#allocation2] sm:$0xf] }
 0x3d5   : > { %v8699_v16 = vrot.slane %v8697_v54, 6  ;;  %v8703_v44 = vshrl.u32 %v8178_v0, 16  ;;  %8930 = vrot.lane.b32.xlu1 %v11912_v23, %s12939_s27  ;;  %v8682_v25 = vrot.slane %v8681_v37, 4  ;;  %v8706_v35 = vshll.u32 %v8178_v0, 16  ;;  %v9056_v23 = vld [vmem:[#allocation2 + $0xa0] sm:$0xf] }
 0x3d6   : > { %v9591_v28 = vsel %vm13040_vm13, %v11928_v63, %v9590_v33  ;;  %v9592_v34 = vrot.slane %v9590_v33, 4  ;;  %v8692_v2 = vrot.slane %v8690_v21, 4  ;;  %v8712_v6 = vshrl.u32 %v8179_v20, 16  ;;  %v9057_v37 = vld [vmem:[#allocation2 + $0xa4] sm:$0x1]  ;;  %v12749_v33 = vld [vmem:[%s16374_s4 + $0xb8] sm:$0xff]  }
 0x3d7   : > { %v8700_v50 = vor.u32 %v8699_v16, %v8696_v30  ;;  %v8705_v61 = vrot.slane %v8703_v44, 5  ;;  %v8691_v47 = vsel %vm13509_vm6, %v8682_v25, %v8690_v21  ;;  %v8708_v27 = vrot.slane %v8706_v35, 6  ;;  %v12748_v30 = vld [vmem:[%s16374_s4 + $0xf8] sm:$0xff]  }
 0x3d8   : > { %v9594_v13 = vsel %vm13040_vm13, %v9592_v34, %v9593_v42  ;;  %v8715_v7 = vshll.u32 %v8179_v20, 16  ;;  %v8714_v12 = vrot.slane %v8712_v6, 5  ;;  %v8722_v52 = vshrl.u32 %v8362_v43, 16  ;;  %v12850_v42 = vld [vmem:[#allocation2 + $0x4] sm:$0xf]  ;;  %12473 = vmatprep.subr.bf16.mxu0 %v12748_v30 }
 0x3d9   : > { %v8701_v5 = vsel %vm13509_vm6, %v8692_v2, %v8700_v50  ;;  %v11960_v19 = vcombine.low %v9591_v28, %v9594_v13  ;;  %v8709_v45 = vor.u32 %v8708_v27, %v8705_v61  ;;  %v8725_v63 = vshll.u32 %v8362_v43, 16  ;;  %v9465_v25 = vld [vmem:[#allocation2 + $0x9c] sm:$0xe]  ;;  %v8181_v50 = vld [vmem:[#allocation2 + $0xa8] sm:$0xe]  ;;  %12474 = vmatpush3.bf16.msra.mxu0 %v12749_v33 }
 0x3da   : > { %v11913_v0 = vcombine.low %v8691_v47, %v8701_v5  ;;  %v8717_v54 = vrot.slane %v8715_v7, 6  ;;  %v8724_v20 = vrot.slane %v8722_v52, 5  ;;  %v6239_v21 = vshrl.u32 %v6190_v15, 16  ;;  %v8182_v7 = vld [vmem:[#allocation2 + $0xac] sm:$0xf] }
 0x3db   : > { %9746 = vrot.lane.b32.xlu0 %v11960_v19, %s12939_s27  ;;  %v6242_v16 = vshll.u32 %v6190_v15, 16  ;;  %v6248_v44 = vshll.u32 %v12850_v42, 16  ;;  %v8710_v28 = vrot.slane %v8709_v45, 4  ;;  %v8727_v43 = vrot.slane %v8725_v63, 6  ;;  %v8363_v63 = vld [vmem:[#allocation2 + $0xb0] sm:$0x3] }
 0x3dc   : > { %8932 = vrot.lane.b32.xlu1 %v11913_v0, %s12939_s27  ;;  %v8718_v34 = vor.u32 %v8717_v54, %v8714_v12  ;;  %v16441_v35 = vshrl.u32 %v14462_v57, 16  ;;  %v6241_v61 = vrot.slane %v6239_v21, 4  ;;  %v16442_v13 = vshll.u32 %v14464_v8, 16 }
 0x3dd   : > { %v6244_v6 = vrot.slane %v6242_v16, 5  ;;  %v6250_v47 = vrot.slane %v6248_v44, 5  ;;  %v8728_v19 = vor.u32 %v8727_v43, %v8724_v20  ;;  %v11929_v12 = vrot.slane %v9465_v25, 9  ;;  %v6193_v43 = vld [vmem:[#allocation2 + $0xc] sm:$0xf] }
 0x3de   : > { %v6254_v2 = vrot.slane %v16441_v35, 4  ;;  %v6260_v27 = vrot.slane %v16442_v13, 5  ;;  %v8719_v15 = vsel %vm13509_vm6, %v8710_v28, %v8718_v34  ;;  %v8720_v5 = vrot.slane %v8718_v34, 4 }
 0x3df   : > { %v6245_v52 = vor.u32 %v6244_v6, %v6241_v61  ;;  %v9597_v57 = vrot.slane %v9056_v23, 5  ;;  %v9600_v45 = vrot.slane %v9057_v37, 5  ;;  %v8731_v30 = vshrl.u32 %v8181_v50, 16 }
 0x3e0   : > { %v6255_v0 = vor.u32 %v6254_v2, %v6250_v47  ;;  %v8729_v54 = vsel %vm13509_vm6, %v8720_v5, %v8728_v19  ;;  %v8734_v21 = vshll.u32 %v8181_v50, 16  ;;  %v8740_v8 = vshrl.u32 %v8182_v7, 16  ;;  %v6895_v5 = vpop.permute.xlu1 %6894 }
 0x3e1   : > { %v11914_v16 = vcombine.low %v8719_v15, %v8729_v54  ;;  %v6246_v42 = vrot.slane %v6245_v52, 4  ;;  %v9598_v44 = vsel %vm13040_vm13, %v11929_v12, %v9597_v57  ;;  %v9599_v28 = vrot.slane %v9597_v57, 4  ;;  %v9059_v15 = vld [vmem:[#allocation2 + $0xac] sm:$0xf]  ;;  %v9466_v57 = vld [vmem:[#allocation2 + $0xa8] sm:$0xe] }
 0x3e2   : > { %v6256_v33 = vrot.slane %v6255_v0, 4  ;;  %v8733_v20 = vrot.slane %v8731_v30, 5  ;;  %v8736_v25 = vrot.slane %v8734_v21, 6  ;;  %v8742_v34 = vrot.slane %v8740_v8, 5  ;;  %v9060_v30 = vld [vmem:[#allocation2 + $0xb0] sm:$0x1] }
 0x3e3   : > { %8934 = vrot.lane.b32.xlu1 %v11914_v16, %s12939_s27  ;;  %v6251_v23 = vsel %vm13103_vm14, %v6246_v42, %v6250_v47  ;;  %v8743_v35 = vshll.u32 %v8182_v7, 16  ;;  %v8750_v2 = vshrl.u32 %v8363_v63, 16  ;;  %v9601_v61 = vsel %vm13040_vm13, %v9599_v28, %v9600_v45  ;;  %v12851_v16 = vld [vmem:[#allocation2 + $0x10] sm:$0xf] }
 0x3e4   : > { %v6261_v37 = vsel %vm13103_vm14, %v6256_v33, %v6260_v27  ;;  %v8737_v6 = vor.u32 %v8736_v25, %v8733_v20  ;;  %v8753_v13 = vshll.u32 %v8363_v63, 16  ;;  %v11961_v19 = vcombine.low %v9598_v44, %v9601_v61  ;;  %v8184_v33 = vld [vmem:[#allocation2 + $0xb4] sm:$0xe]  ;;  %v8185_v61 = vld [vmem:[#allocation2 + $0xb8] sm:$0xf] }
 0x3e5   : > { %v11806_v50 = vcombine.low %v6251_v23, %v6261_v37  ;;  %v8745_v12 = vrot.slane %v8743_v35, 6  ;;  %v8752_v52 = vrot.slane %v8750_v2, 5  ;;  %v6263_v0 = vshrl.u32 %v6193_v43, 16 }
 0x3e6   : > { %v8738_v54 = vrot.slane %v8737_v6, 4  ;;  %v8755_v27 = vrot.slane %v8753_v13, 6  ;;  %v6266_v7 = vshll.u32 %v6193_v43, 16  ;;  %9748 = vrot.lane.b32.xlu0 %v11961_v19, %s12939_s27  ;;  %v16443_v63 = vshll.u32 %v14602_v11, 16 }
 0x3e7   : > { %v15295_v47 = vsel %vm1416_vm8, %v11806_v50, %v6895_v5  ;;  %v8746_v21 = vor.u32 %v8745_v12, %v8742_v34  ;;  %v6265_v45 = vrot.slane %v6263_v0, 4  ;;  %v6272_v42 = vshll.u32 %v12851_v16, 16  ;;  %v8364_v12 = vld [vmem:[#allocation2 + $0xbc] sm:$0x3] }
 0x3e8   : > { %v6284_v8 = vrot.slane %v16443_v63, 5  ;;  %v8756_v44 = vor.u32 %v8755_v27, %v8752_v52  ;;  %v6268_v28 = vrot.slane %v6266_v7, 5  ;;  %v16444_v20 = vshrl.u32 %v14599_v14, 16 }
 0x3e9   : > { %v11930_v23 = vrot.slane %v9466_v57, 9  ;;  %v8747_v43 = vsel %vm13509_vm6, %v8738_v54, %v8746_v21  ;;  %v8748_v37 = vrot.slane %v8746_v21, 4  ;;  %v6274_v35 = vrot.slane %v6272_v42, 5  ;;  %v7006_v21 = vld [vmem:[#allocation2] sm:$0xe] }
 0x3ea   : > { %v6278_v25 = vrot.slane %v16444_v20, 4  ;;  %v9604_v2 = vrot.slane %v9059_v15, 5  ;;  %v6269_v34 = vor.u32 %v6268_v28, %v6265_v45  ;;  %v9607_v50 = vrot.slane %v9060_v30, 5 }
 0x3eb   : > { %v8759_v11 = vshrl.u32 %v8184_v33, 16  ;;  %v8762_v6 = vshll.u32 %v8184_v33, 16  ;;  %v8757_v13 = vsel %vm13509_vm6, %v8748_v37, %v8756_v44  ;;  %v8768_v7 = vshrl.u32 %v8185_v61, 16  ;;  %v7007_v33 = vld [vmem:[#allocation2 + $0x4] sm:$0xf]  ;;  %v6897_v44 = vpop.permute.xlu1 %6896 }
 0x3ec   : > { %v6279_v5 = vor.u32 %v6278_v25, %v6274_v35  ;;  %v9605_v14 = vsel %vm13040_vm13, %v11930_v23, %v9604_v2  ;;  %v9606_v19 = vrot.slane %v9604_v2, 4  ;;  %v11915_v52 = vcombine.low %v8747_v43, %v8757_v13  ;;  %v7008_v43 = vld [vmem:[#allocation2 + $0x8] sm:$0x3] }
 0x3ed   : > { %v6270_v0 = vrot.slane %v6269_v34, 4  ;;  %v8761_v57 = vrot.slane %v8759_v11, 5  ;;  %v8764_v54 = vrot.slane %v8762_v6, 6  ;;  %v8771_v30 = vshll.u32 %v8185_v61, 16 }
 0x3ee   : > { %v6280_v27 = vrot.slane %v6279_v5, 4  ;;  %v9608_v15 = vsel %vm13040_vm13, %v9606_v19, %v9607_v50  ;;  %8936 = vrot.lane.b32.xlu1 %v11915_v52, %s12939_s27  ;;  %v8778_v42 = vshrl.u32 %v8364_v12, 16  ;;  %v8770_v20 = vrot.slane %v8768_v7, 5  ;;  %v6196_v19 = vld [vmem:[#allocation2 + $0x18] sm:$0xf] }
 0x3ef   : > { %v6275_v45 = vsel %vm13103_vm14, %v6270_v0, %v6274_v35  ;;  %v11962_v63 = vcombine.low %v9605_v14, %v9608_v15  ;;  %v8765_v16 = vor.u32 %v8764_v54, %v8761_v57  ;;  %v8773_v25 = vrot.slane %v8771_v30, 6 }
 0x3f0   : > { %v6285_v28 = vsel %vm13103_vm14, %v6280_v27, %v6284_v8  ;;  %v8781_v23 = vshll.u32 %v8364_v12, 16  ;;  %v8780_v34 = vrot.slane %v8778_v42, 5  ;;  %v7055_v50 = vshrl.u32 %v7006_v21, 16 }
 0x3f1   : > { %v11807_v37 = vcombine.low %v6275_v45, %v6285_v28  ;;  %9750 = vrot.lane.b32.xlu0 %v11962_v63, %s12939_s27  ;;  %v8766_v2 = vrot.slane %v8765_v16, 4  ;;  %v8774_v61 = vor.u32 %v8773_v25, %v8770_v20  ;;  %v7058_v11 = vshll.u32 %v7006_v21, 16  ;;  %v9467_v16 = vld [vmem:[#allocation2 + $0xb4] sm:$0xe]  ;;  %v9062_v25 = vld [vmem:[#allocation2 + $0xb8] sm:$0xf] }
 0x3f2   : > { %v8783_v35 = vrot.slane %v8781_v23, 6  ;;  %v7064_v6 = vshrl.u32 %v7007_v33, 16  ;;  %v7057_v5 = vrot.slane %v7055_v50, 5  ;;  %v7067_v14 = vshll.u32 %v7007_v33, 16  ;;  %v9063_v23 = vld [vmem:[#allocation2 + $0xbc] sm:$0x1] }
 0x3f3   : > { %v15317_v13 = vsel %vm1416_vm8, %v11807_v37, %v6897_v44  ;;  %v7074_v8 = vshrl.u32 %v7008_v43, 16  ;;  %v8775_v12 = vsel %vm13509_vm6, %v8766_v2, %v8774_v61  ;;  %v8776_v52 = vrot.slane %v8774_v61, 4  ;;  %v12852_v50 = vld [vmem:[#allocation2 + $0x1c] sm:$0xf]  ;;  %v8187_v61 = vld [vmem:[#allocation2 + $0xc0] sm:$0xe] }
 0x3f4   : > { %v8784_v0 = vor.u32 %v8783_v35, %v8780_v34  ;;  %v7060_v57 = vrot.slane %v7058_v11, 6  ;;  %v7066_v54 = vrot.slane %v7064_v6, 5  ;;  %v7069_v27 = vrot.slane %v7067_v14, 6 }
 0x3f5   : > { %v7076_v15 = vrot.slane %v7074_v8, 5  ;;  %v7077_v7 = vshll.u32 %v7008_v43, 16  ;;  %v6287_v45 = vshrl.u32 %v6196_v19, 16  ;;  %v6290_v63 = vshll.u32 %v6196_v19, 16 }
 0x3f6   : > { %v8785_v30 = vsel %vm13509_vm6, %v8776_v52, %v8784_v0  ;;  %v7061_v21 = vor.u32 %v7060_v57, %v7057_v5  ;;  %v7070_v33 = vor.u32 %v7069_v27, %v7066_v54  ;;  %v16445_v28 = vshll.u32 %v14614_v3, 16  ;;  %v8188_v52 = vld [vmem:[#allocation2 + $0xc4] sm:$0xf]  ;;  %v8031_v57 = vpop.permute.xlu0 %8030 }
 0x3f7   : > { %v11916_v42 = vcombine.low %v8775_v12, %v8785_v30  ;;  %v7079_v44 = vrot.slane %v7077_v7, 6  ;;  %v6289_v2 = vrot.slane %v6287_v45, 4  ;;  %v6292_v34 = vrot.slane %v6290_v63, 5  ;;  %v8365_v45 = vld [vmem:[#allocation2 + $0xc8] sm:$0x3] }
 0x3f8   : > { %v6308_v20 = vrot.slane %v16445_v28, 5  ;;  %v7062_v37 = vrot.slane %v7061_v21, 4  ;;  %v6296_v43 = vshll.u32 %v12852_v50, 16  ;;  %v7072_v35 = vrot.slane %v7070_v33, 4 }
 0x3f9   : > { %8938 = vrot.lane.b32.xlu1 %v11916_v42, %s12939_s27  ;;  %v7080_v11 = vor.u32 %v7079_v44, %v7076_v15  ;;  %v16446_v6 = vshrl.u32 %v14618_v24, 16  ;;  %v11931_v14 = vrot.slane %v9467_v16, 9  ;;  %v6293_v8 = vor.u32 %v6292_v34, %v6289_v2  ;;  %v12750_v2 = vld [vmem:[%s16374_s4 + $0x108] sm:$0xff]  }
 0x3fa   : > { %v7071_v3 = vsel %vm13509_vm6, %v7062_v37, %v7070_v33  ;;  %v6298_v19 = vrot.slane %v6296_v43, 5  ;;  %v9611_v12 = vrot.slane %v9062_v25, 5  ;;  %v9614_v54 = vrot.slane %v9063_v23, 5  ;;  %v7009_v37 = vld [vmem:[#allocation2 + $0xc] sm:$0xe] }
 0x3fb   : > { %v6302_v5 = vrot.slane %v16446_v6, 4  ;;  %v7081_v0 = vsel %vm13509_vm6, %v7072_v35, %v7080_v11  ;;  %v8787_v27 = vshrl.u32 %v8187_v61, 16  ;;  %v8790_v7 = vshll.u32 %v8187_v61, 16  ;;  %v7010_v35 = vld [vmem:[#allocation2 + $0x10] sm:$0xf]  ;;  %v6899_v11 = vpop.permute.xlu1 %6898 }
 0x3fc   : > { %v11838_v30 = vcombine.low %v7071_v3, %v7081_v0  ;;  %v6294_v15 = vrot.slane %v6293_v8, 4  ;;  %v9612_v24 = vsel %vm13040_vm13, %v11931_v14, %v9611_v12  ;;  %v9613_v63 = vrot.slane %v9611_v12, 4  ;;  %v7011_v8 = vld [vmem:[#allocation2 + $0x14] sm:$0x3] }
 0x3fd   : > { %v6303_v21 = vor.u32 %v6302_v5, %v6298_v19  ;;  %v8789_v16 = vrot.slane %v8787_v27, 5  ;;  %v8792_v42 = vrot.slane %v8790_v7, 6  ;;  %v8796_v33 = vshrl.u32 %v8188_v52, 16 }
 0x3fe   : > { %v8064_v44 = vsel %vm1416_vm8, %v11838_v30, %v8031_v57  ;;  %v6299_v28 = vsel %vm13103_vm14, %v6294_v15, %v6298_v19  ;;  %v8799_v23 = vshll.u32 %v8188_v52, 16  ;;  %v9615_v34 = vsel %vm13040_vm13, %v9613_v63, %v9614_v54  ;;  %v12853_v57 = vld [vmem:[%s16374_s4 + $0x100] sm:$0xff]  }
 0x3ff   : > { %v6304_v25 = vrot.slane %v6303_v21, 4  ;;  %v8793_v50 = vor.u32 %v8792_v42, %v8789_v16  ;;  %v8798_v43 = vrot.slane %v8796_v33, 5  ;;  %v8806_v61 = vshrl.u32 %v8365_v45, 16  ;;  %10869 = vmatprep.mubr.bf16.mxu1 %v8064_v44 }
 0x400   : > { %v11963_v5 = vcombine.low %v9612_v24, %v9615_v34  ;;  %v8801_v14 = vrot.slane %v8799_v23, 6  ;;  %v8809_v3 = vshll.u32 %v8365_v45, 16  ;;  %10870 = vmatmul.mubr.bf16.vlgmr.msra.gmra.mrb[64].mxu1 %v15295_v47  ;;  %v7083_v0 = vshrl.u32 %v7009_v37, 16  ;;  %v6199_v24 = vld [vmem:[#allocation2 + $0x24] sm:$0xf] }
 0x401   : > { %v6309_v6 = vsel %vm13103_vm14, %v6304_v25, %v6308_v20  ;;  %v8794_v12 = vrot.slane %v8793_v50, 4  ;;  %v8808_v52 = vrot.slane %v8806_v61, 5  ;;  %12632 = vmatpush3.bf16.msra.mxu1 %v12853_v57  ;;  %v7086_v20 = vshll.u32 %v7009_v37, 16 }
 0x402   : > { %v11808_v19 = vcombine.low %v6299_v28, %v6309_v6  ;;  %9752 = vrot.lane.b32.xlu0 %v11963_v5, %s12939_s27  ;;  %v8802_v54 = vor.u32 %v8801_v14, %v8798_v43  ;;  %v8811_v27 = vrot.slane %v8809_v3, 6  ;;  %v7092_v7 = vshrl.u32 %v7010_v35, 16  ;;  %12633 = vmatprep.subr.bf16.mxu1 %v12750_v2  ;;  %v7012_v43 = vld [vmem:[#allocation2 + $0x18] sm:$0xe]  ;;  %v12854_v6 = vld [vmem:[#allocation2 + $0x28] sm:$0xf] }
 0x403   : > { %v7085_v47 = vrot.slane %v7083_v0, 5  ;;  %v7095_v15 = vshll.u32 %v7010_v35, 16  ;;  %v7102_v21 = vshrl.u32 %v7011_v8, 16  ;;  %v7088_v42 = vrot.slane %v7086_v20, 6  ;;  %v9065_v14 = vld [vmem:[#allocation2 + $0xc4] sm:$0xf] }
 0x404   : > { %v15350_v30 = vsel %vm1416_vm8, %v11808_v19, %v6899_v11  ;;  %v8803_v45 = vsel %vm13509_vm6, %v8794_v12, %v8802_v54  ;;  %v8804_v63 = vrot.slane %v8802_v54, 4  ;;  %v8812_v16 = vor.u32 %v8811_v27, %v8808_v52  ;;  %v9468_v3 = vld [vmem:[#allocation2 + $0xc0] sm:$0xe]  ;;  %v9066_v0 = vld [vmem:[#allocation2 + $0xc8] sm:$0x1] }
 0x405   : > { %v7094_v33 = vrot.slane %v7092_v7, 5  ;;  %v7097_v44 = vrot.slane %v7095_v15, 6  ;;  %v7104_v28 = vrot.slane %v7102_v21, 5  ;;  %v7105_v25 = vshll.u32 %v7011_v8, 16  ;;  %12634 = vmatpush3.bf16.msra.mxu1 %v12750_v2 }
 0x406   : > { %v8813_v23 = vsel %vm13509_vm6, %v8804_v63, %v8812_v16  ;;  %v7089_v37 = vor.u32 %v7088_v42, %v7085_v47  ;;  %v6311_v34 = vshrl.u32 %v6199_v24, 16  ;;  %v6314_v50 = vshll.u32 %v6199_v24, 16  ;;  %v8033_v63 = vpop.permute.xlu0 %8032 }
 0x407   : > { %v11917_v61 = vcombine.low %v8803_v45, %v8813_v23  ;;  %v7098_v35 = vor.u32 %v7097_v44, %v7094_v33  ;;  %v7107_v11 = vrot.slane %v7105_v25, 6  ;;  %v6320_v5 = vshll.u32 %v12854_v6, 16  ;;  %v7014_v45 = vld [vmem:[#allocation2 + $0x20] sm:$0x3] }
 0x408   : > { %v7090_v19 = vrot.slane %v7089_v37, 4  ;;  %v6313_v12 = vrot.slane %v6311_v34, 4  ;;  %v6316_v52 = vrot.slane %v6314_v50, 5  ;;  %v16447_v8 = vshrl.u32 %v14658_v59, 16 }
 0x409   : > { %8940 = vrot.lane.b32.xlu1 %v11917_v61, %s12939_s27  ;;  %v7100_v57 = vrot.slane %v7098_v35, 4  ;;  %v7108_v54 = vor.u32 %v7107_v11, %v7104_v28  ;;  %v6322_v27 = vrot.slane %v6320_v5, 5  ;;  %v16448_v20 = vshll.u32 %v14662_v60, 16  ;;  %v7013_v61 = vld [vmem:[#allocation2 + $0x1c] sm:$0xf] }
 0x40a   : > { %v6326_v2 = vrot.slane %v16447_v8, 4  ;;  %v7099_v47 = vsel %vm13509_vm6, %v7090_v19, %v7098_v35  ;;  %v6317_v15 = vor.u32 %v6316_v52, %v6313_v12  ;;  %v11932_v21 = vrot.slane %v9468_v3, 9  ;;  %v6901_v19 = vpop.permute.xlu1 %6900 }
 0x40b   : > { %v6332_v7 = vrot.slane %v16448_v20, 5  ;;  %v9618_v24 = vrot.slane %v9065_v14, 5  ;;  %v7109_v59 = vsel %vm13509_vm6, %v7100_v57, %v7108_v54  ;;  %v9621_v42 = vrot.slane %v9066_v0, 5  ;;  %v6202_v14 = vld [vmem:[#allocation2 + $0x30] sm:$0xf] }
 0x40c   : > { %v6327_v16 = vor.u32 %v6326_v2, %v6322_v27  ;;  %v7111_v33 = vshrl.u32 %v7012_v43, 16  ;;  %v11839_v44 = vcombine.low %v7099_v47, %v7109_v59  ;;  %v6318_v28 = vrot.slane %v6317_v15, 4  ;;  %v12855_v47 = vld [vmem:[#allocation2 + $0x34] sm:$0xf] }
 0x40d   : > { %v9619_v60 = vsel %vm13040_vm13, %v11932_v21, %v9618_v24  ;;  %v9620_v25 = vrot.slane %v9618_v24, 4  ;;  %v7114_v34 = vshll.u32 %v7012_v43, 16  ;;  %v7130_v50 = vshrl.u32 %v7014_v45, 16  ;;  %v7015_v21 = vld [vmem:[#allocation2 + $0x24] sm:$0xe] }
 0x40e   : > { %v6328_v23 = vrot.slane %v6327_v16, 4  ;;  %v7113_v37 = vrot.slane %v7111_v33, 5  ;;  %v8068_v35 = vsel %vm1416_vm8, %v11839_v44, %v8033_v63  ;;  %v6323_v11 = vsel %vm13103_vm14, %v6318_v28, %v6322_v27  ;;  %v7016_v63 = vld [vmem:[#allocation2 + $0x28] sm:$0xf] }
 0x40f   : > { %v9622_v6 = vsel %vm13040_vm13, %v9620_v25, %v9621_v42  ;;  %v7133_v5 = vshll.u32 %v7014_v45, 16  ;;  %v7116_v52 = vrot.slane %v7114_v34, 6  ;;  %v7132_v8 = vrot.slane %v7130_v50, 5  ;;  %10877 = vmatprep.mubr.bf16.mxu1 %v8068_v35  ;;  %v7017_v50 = vld [vmem:[#allocation2 + $0x2c] sm:$0x3] }
 0x410   : > { %v6333_v3 = vsel %vm13103_vm14, %v6328_v23, %v6332_v7  ;;  %v11964_v12 = vcombine.low %v9619_v60, %v9622_v6  ;;  %v7120_v0 = vshrl.u32 %v7013_v61, 16  ;;  %v7123_v57 = vshll.u32 %v7013_v61, 16  ;;  %10878 = vmatmul.mubr.bf16.gmra.mrb[68].mxu1 %v15317_v13 }
 0x411   : > { %v11809_v43 = vcombine.low %v6323_v11, %v6333_v3  ;;  %v7135_v2 = vrot.slane %v7133_v5, 6  ;;  %v7117_v54 = vor.u32 %v7116_v52, %v7113_v37  ;;  %v6335_v27 = vshrl.u32 %v6202_v14, 16 }
 0x412   : > { %9754 = vrot.lane.b32.xlu0 %v11964_v12, %s12939_s27  ;;  %v6338_v20 = vshll.u32 %v6202_v14, 16  ;;  %v6344_v15 = vshll.u32 %v12855_v47, 16  ;;  %v7122_v45 = vrot.slane %v7120_v0, 5  ;;  %v7125_v59 = vrot.slane %v7123_v57, 6 }
 0x413   : > { %v15377_v7 = vsel %vm1416_vm8, %v11809_v43, %v6901_v19  ;;  %v7136_v24 = vor.u32 %v7135_v2, %v7132_v8  ;;  %v7118_v16 = vrot.slane %v7117_v54, 4  ;;  %v6337_v42 = vrot.slane %v6335_v27, 4  ;;  %v6205_v8 = vld [vmem:[#allocation2 + $0x3c] sm:$0xf]  ;;  %v8035_v43 = vpop.permute.xlu0 %8034 }
 0x414   : > { %v6340_v33 = vrot.slane %v6338_v20, 5  ;;  %v6346_v44 = vrot.slane %v6344_v15, 5  ;;  %v7126_v13 = vor.u32 %v7125_v59, %v7122_v45  ;;  %v16449_v28 = vshrl.u32 %v14710_v46, 16 }
 0x415   : > { %v16450_v25 = vshll.u32 %v14712_v22, 16  ;;  %v7139_v37 = vshrl.u32 %v7015_v21, 16  ;;  %v7142_v61 = vshll.u32 %v7015_v21, 16  ;;  %v7148_v35 = vshrl.u32 %v7016_v63, 16  ;;  %v6903_v21 = vpop.permute.xlu1 %6902 }
 0x416   : > { %v6350_v60 = vrot.slane %v16449_v28, 4  ;;  %v6341_v34 = vor.u32 %v6340_v33, %v6337_v42  ;;  %v7151_v11 = vshll.u32 %v7016_v63, 16  ;;  %v7127_v6 = vsel %vm13509_vm6, %v7118_v16, %v7126_v13 }
 0x417   : > { %v6356_v23 = vrot.slane %v16450_v25, 5  ;;  %v7128_v5 = vrot.slane %v7126_v13, 4  ;;  %v7141_v3 = vrot.slane %v7139_v37, 5  ;;  %v7144_v12 = vrot.slane %v7142_v61, 6  ;;  %v7018_v13 = vld [vmem:[#allocation2 + $0x30] sm:$0xe] }
 0x418   : > { %v6351_v14 = vor.u32 %v6350_v60, %v6346_v44  ;;  %v6342_v19 = vrot.slane %v6341_v34, 4  ;;  %v7150_v52 = vrot.slane %v7148_v35, 5  ;;  %v7153_v46 = vrot.slane %v7151_v11, 6  ;;  %v12856_v37 = vld [vmem:[#allocation2 + $0x40] sm:$0xf] }
 0x419   : > { %v7137_v22 = vsel %vm13509_vm6, %v7128_v5, %v7136_v24  ;;  %v7158_v0 = vshrl.u32 %v7017_v50, 16  ;;  %v7161_v57 = vshll.u32 %v7017_v50, 16  ;;  %v7145_v20 = vor.u32 %v7144_v12, %v7141_v3  ;;  %v7019_v34 = vld [vmem:[#allocation2 + $0x34] sm:$0xf]  ;;  %v7020_v5 = vld [vmem:[#allocation2 + $0x38] sm:$0x3]  ;;  %v8037_v3 = vpop.permute.xlu0 %8036 }
 0x41a   : > { %v6352_v2 = vrot.slane %v6351_v14, 4  ;;  %v11840_v54 = vcombine.low %v7127_v6, %v7137_v22  ;;  %v6347_v27 = vsel %vm13103_vm14, %v6342_v19, %v6346_v44  ;;  %v7154_v47 = vor.u32 %v7153_v46, %v7150_v52  ;;  %v12751_v46 = vld [vmem:[%s16374_s4 + $0x110] sm:$0xff]  }
 0x41b   : > { %v7160_v45 = vrot.slane %v7158_v0, 5  ;;  %v7163_v59 = vrot.slane %v7161_v57, 6  ;;  %v6359_v63 = vshrl.u32 %v6205_v8, 16  ;;  %v7146_v24 = vrot.slane %v7145_v20, 4  ;;  %12635 = vmatprep.subr.bf16.mxu1 %v12751_v46 }
 0x41c   : > { %v6357_v15 = vsel %vm13103_vm14, %v6352_v2, %v6356_v23  ;;  %v8072_v16 = vsel %vm1416_vm8, %v11840_v54, %v8035_v43  ;;  %v7156_v33 = vrot.slane %v7154_v47, 4  ;;  %v6362_v25 = vshll.u32 %v6205_v8, 16  ;;  %12636 = vmatpush3.bf16.msra.mxu1 %v12751_v46 }
 0x41d   : > { %v11810_v42 = vcombine.low %v6347_v27, %v6357_v15  ;;  %v7164_v28 = vor.u32 %v7163_v59, %v7160_v45  ;;  %v6361_v60 = vrot.slane %v6359_v63, 4  ;;  %v6368_v44 = vshll.u32 %v12856_v37, 16  ;;  %10885 = vmatprep.mubr.bf16.mxu1 %v8072_v16 }
 0x41e   : > { %v7155_v23 = vsel %vm13509_vm6, %v7146_v24, %v7154_v47  ;;  %v16451_v61 = vshrl.u32 %v14734_v31, 16  ;;  %v16452_v11 = vshll.u32 %v14745_v58, 16  ;;  %10886 = vmatmul.mubr.bf16.gmra.mrb[72].mxu1 %v15350_v30  ;;  %v6364_v19 = vrot.slane %v6362_v25, 5  ;;  %v6208_v30 = vld [vmem:[#allocation2 + $0x48] sm:$0xf] }
 0x41f   : > { %v15393_v50 = vsel %vm1416_vm8, %v11810_v42, %v6903_v21  ;;  %v7165_v14 = vsel %vm13509_vm6, %v7156_v33, %v7164_v28  ;;  %v6370_v12 = vrot.slane %v6368_v44, 5  ;;  %v7167_v52 = vshrl.u32 %v7018_v13, 16  ;;  %v6905_v28 = vpop.permute.xlu1 %6904  ;;  %v12857_v25 = vld [vmem:[#allocation2 + $0x4c] sm:$0xf]  ;;  %v7021_v44 = vld [vmem:[#allocation2 + $0x3c] sm:$0xe] }
 0x420   : > { %v6374_v35 = vrot.slane %v16451_v61, 4  ;;  %v6380_v6 = vrot.slane %v16452_v11, 5  ;;  %v11841_v8 = vcombine.low %v7155_v23, %v7165_v14  ;;  %v7170_v31 = vshll.u32 %v7018_v13, 16 }
 0x421   : > { %v7176_v43 = vshrl.u32 %v7019_v34, 16  ;;  %v7179_v22 = vshll.u32 %v7019_v34, 16  ;;  %v6365_v58 = vor.u32 %v6364_v19, %v6361_v60  ;;  %v7169_v0 = vrot.slane %v7167_v52, 5 }
 0x422   : > { %v6375_v2 = vor.u32 %v6374_v35, %v6370_v12  ;;  %v7186_v57 = vshrl.u32 %v7020_v5, 16  ;;  %v8076_v54 = vsel %vm1416_vm8, %v11841_v8, %v8037_v3  ;;  %v7172_v27 = vrot.slane %v7170_v31, 6  ;;  %v7023_v31 = vld [vmem:[#allocation2 + $0x44] sm:$0x3] }
 0x423   : > { %v7178_v20 = vrot.slane %v7176_v43, 5  ;;  %v7181_v47 = vrot.slane %v7179_v22, 6  ;;  %v6366_v15 = vrot.slane %v6365_v58, 4  ;;  %v7189_v59 = vshll.u32 %v7020_v5, 16  ;;  %10893 = vmatprep.mubr.bf16.mxu1 %v8076_v54  ;;  %v8039_v22 = vpop.permute.xlu0 %8038 }
 0x424   : > { %v6376_v21 = vrot.slane %v6375_v2, 4  ;;  %v7188_v45 = vrot.slane %v7186_v57, 5  ;;  %v7173_v63 = vor.u32 %v7172_v27, %v7169_v0  ;;  %v6383_v42 = vshrl.u32 %v6208_v30, 16 }
 0x425   : > { %v7182_v16 = vor.u32 %v7181_v47, %v7178_v20  ;;  %v6386_v24 = vshll.u32 %v6208_v30, 16  ;;  %v6371_v33 = vsel %vm13103_vm14, %v6366_v15, %v6370_v12  ;;  %v7191_v60 = vrot.slane %v7189_v59, 6  ;;  %v7022_v12 = vld [vmem:[#allocation2 + $0x40] sm:$0xf]  ;;  %v6211_v15 = vld [vmem:[#allocation2 + $0x54] sm:$0xf] }
 0x426   : > { %v6381_v13 = vsel %vm13103_vm14, %v6376_v21, %v6380_v6  ;;  %v6392_v37 = vshll.u32 %v12857_v25, 16  ;;  %v7174_v23 = vrot.slane %v7173_v63, 4  ;;  %v6385_v35 = vrot.slane %v6383_v42, 4  ;;  %10894 = vmatmul.mubr.bf16.gmra.mrb[76].mxu1 %v15377_v7 }
 0x427   : > { %v11811_v34 = vcombine.low %v6371_v33, %v6381_v13  ;;  %v7184_v61 = vrot.slane %v7182_v16, 4  ;;  %v7192_v11 = vor.u32 %v7191_v60, %v7188_v45  ;;  %v6388_v5 = vrot.slane %v6386_v24, 5  ;;  %v6907_v24 = vpop.permute.xlu1 %6906 }
 0x428   : > { %v6394_v14 = vrot.slane %v6392_v37, 5  ;;  %v16453_v3 = vshrl.u32 %v14779_v40, 16  ;;  %v7183_v52 = vsel %vm13509_vm6, %v7174_v23, %v7182_v16  ;;  %v16454_v46 = vshll.u32 %v14794_v38, 16 }
 0x429   : > { %v15416_v6 = vsel %vm1416_vm8, %v11811_v34, %v6905_v28  ;;  %v7195_v43 = vshrl.u32 %v7021_v44, 16  ;;  %v7193_v7 = vsel %vm13509_vm6, %v7184_v61, %v7192_v11  ;;  %v6389_v40 = vor.u32 %v6388_v5, %v6385_v35  ;;  %v12858_v61 = vld [vmem:[#allocation2 + $0x58] sm:$0xf] }
 0x42a   : > { %v6398_v19 = vrot.slane %v16453_v3, 4  ;;  %v6404_v8 = vrot.slane %v16454_v46, 5  ;;  %6995 = vst [vmem:[#allocation3 + $0xc8] sm:$0xff] %v15416_v6  ;;  %v7198_v2 = vshll.u32 %v7021_v44, 16  ;;  %v11842_v0 = vcombine.low %v7183_v52, %v7193_v7  ;;  %v7024_v44 = vld [vmem:[#allocation2 + $0x48] sm:$0xe] }
 0x42b   : > { %v7197_v57 = vrot.slane %v7195_v43, 5  ;;  %v7204_v30 = vshrl.u32 %v7022_v12, 16  ;;  %v7207_v54 = vshll.u32 %v7022_v12, 16  ;;  %v6390_v27 = vrot.slane %v6389_v40, 4  ;;  %v7026_v7 = vld [vmem:[#allocation2 + $0x50] sm:$0x3] }
 0x42c   : > { %v6399_v58 = vor.u32 %v6398_v19, %v6394_v14  ;;  %v7200_v47 = vrot.slane %v7198_v2, 6  ;;  %v7214_v38 = vshrl.u32 %v7023_v31, 16  ;;  %v8080_v21 = vsel %vm1416_vm8, %v11842_v0, %v8039_v22  ;;  %v8041_v22 = vpop.permute.xlu0 %8040 }
 0x42d   : > { %v7206_v45 = vrot.slane %v7204_v30, 5  ;;  %v7209_v59 = vrot.slane %v7207_v54, 6  ;;  %v7217_v63 = vshll.u32 %v7023_v31, 16  ;;  %v6395_v16 = vsel %vm13103_vm14, %v6390_v27, %v6394_v14  ;;  %10901 = vmatprep.mubr.bf16.mxu1 %v8080_v21  ;;  %v7025_v14 = vld [vmem:[#allocation2 + $0x4c] sm:$0xf] }
 0x42e   : > { %v6400_v20 = vrot.slane %v6399_v58, 4  ;;  %v7201_v33 = vor.u32 %v7200_v47, %v7197_v57  ;;  %v7216_v13 = vrot.slane %v7214_v38, 5  ;;  %v6407_v37 = vshrl.u32 %v6211_v15, 16  ;;  %10902 = vmatmul.mubr.bf16.gmra.mrb[80].mxu1 %v15393_v50 }
 0x42f   : > { %v7210_v60 = vor.u32 %v7209_v59, %v7206_v45  ;;  %v7219_v25 = vrot.slane %v7217_v63, 6  ;;  %v6410_v23 = vshll.u32 %v6211_v15, 16  ;;  %v6416_v35 = vshll.u32 %v12858_v61, 16  ;;  %v6909_v45 = vpop.permute.xlu1 %6908  ;;  %v8144_v63 = vld [vmem:[#allocation2 + $0x14] sm:$0x1] }
 0x430   : > { %v6405_v42 = vsel %vm13103_vm14, %v6400_v20, %v6404_v8  ;;  %v7202_v34 = vrot.slane %v7201_v33, 4  ;;  %v16455_v11 = vshrl.u32 %v14845_v17, 16  ;;  %v6409_v52 = vrot.slane %v6407_v37, 4  ;;  %v12859_v33 = vld [vmem:[#allocation2 + $0xc] sm:$0xe] }
 0x431   : > { %v11812_v28 = vcombine.low %v6395_v16, %v6405_v42  ;;  %v7212_v19 = vrot.slane %v7210_v60, 4  ;;  %v7220_v12 = vor.u32 %v7219_v25, %v7216_v13  ;;  %v6412_v50 = vrot.slane %v6410_v23, 5 }
 0x432   : > { %v6422_v5 = vrot.slane %v16455_v11, 4  ;;  %v7211_v46 = vsel %vm13509_vm6, %v7202_v34, %v7210_v60  ;;  %v6418_v8 = vrot.slane %v6416_v35, 5  ;;  %v16456_v31 = vshll.u32 %v14849_v26, 16 }
 0x433   : > { %v15434_v3 = vsel %vm1416_vm8, %v11812_v28, %v6907_v24  ;;  %v7221_v17 = vsel %vm13509_vm6, %v7212_v19, %v7220_v12  ;;  %v7223_v40 = vshrl.u32 %v7024_v44, 16  ;;  %v7226_v58 = vshll.u32 %v7024_v44, 16  ;;  %v7027_v28 = vld [vmem:[#allocation2 + $0x54] sm:$0xe]  ;;  %v12860_v44 = vld [vmem:[#allocation2 + $0x10] sm:$0xf] }
 0x434   : > { %6996 = vst [vmem:[#allocation3 + $0xf0] sm:$0xff] %v15434_v3  ;;  %v6428_v43 = vrot.slane %v16456_v31, 5  ;;  %v7232_v2 = vshrl.u32 %v7025_v14, 16  ;;  %v11843_v0 = vcombine.low %v7211_v46, %v7221_v17  ;;  %v6413_v57 = vor.u32 %v6412_v50, %v6409_v52  ;;  %v7029_v52 = vld [vmem:[#allocation2 + $0x5c] sm:$0x3] }
 0x435   : > { %v6423_v30 = vor.u32 %v6422_v5, %v6418_v8  ;;  %v7235_v54 = vshll.u32 %v7025_v14, 16  ;;  %v7225_v27 = vrot.slane %v7223_v40, 5  ;;  %v7228_v20 = vrot.slane %v7226_v58, 6  ;;  %v7028_v5 = vld [vmem:[#allocation2 + $0x58] sm:$0xf] }
 0x436   : > { %v7234_v47 = vrot.slane %v7232_v2, 5  ;;  %v7242_v38 = vshrl.u32 %v7026_v7, 16  ;;  %v8084_v15 = vsel %vm1416_vm8, %v11843_v0, %v8041_v22  ;;  %v6414_v26 = vrot.slane %v6413_v57, 4  ;;  %v6214_v58 = vld [vmem:[#allocation2 + $0x60] sm:$0xf]  ;;  %v8043_v0 = vpop.permute.xlu0 %8042 }
 0x437   : > { %v6424_v21 = vrot.slane %v6423_v30, 4  ;;  %v7237_v59 = vrot.slane %v7235_v54, 6  ;;  %8131 = vst [vmem:[#allocation3 + $0xd0] sm:$0xff] %v8084_v15  ;;  %v7229_v16 = vor.u32 %v7228_v20, %v7225_v27  ;;  %v7245_v24 = vshll.u32 %v7026_v7, 16  ;;  %10909 = vmatprep.mubr.bf16.mxu1 %v8084_v15  ;;  %v8911_v7 = vpop.permute.xlu1 %8910 }
 0x438   : > { %v7244_v42 = vrot.slane %v7242_v38, 5  ;;  %v11870_v13 = vrot.slane %v12859_v33, 9  ;;  %v6419_v60 = vsel %vm13103_vm14, %v6414_v26, %v6418_v8  ;;  %v8240_v34 = vrot.slane %v12860_v44, 5  ;;  %10910 = vmatmul.mubr.bf16.gmra.mrb[84].mxu1 %v15416_v6 }
 0x439   : > { %v6429_v25 = vsel %vm13103_vm14, %v6424_v21, %v6428_v43  ;;  %v7238_v37 = vor.u32 %v7237_v59, %v7234_v47  ;;  %v7230_v61 = vrot.slane %v7229_v16, 4  ;;  %v7247_v35 = vrot.slane %v7245_v24, 6  ;;  %v9022_v24 = vld [vmem:[#allocation2 + $0x18] sm:$0xf] }
 0x43a   : > { %v11813_v23 = vcombine.low %v6419_v60, %v6429_v25  ;;  %v8243_v11 = vrot.slane %v8144_v63, 5  ;;  %v8241_v19 = vsel %vm13040_vm13, %v11870_v13, %v8240_v34  ;;  %v8242_v12 = vrot.slane %v8240_v34, 4 }
 0x43b   : > { %v7240_v14 = vrot.slane %v7238_v37, 4  ;;  %v7251_v46 = vshrl.u32 %v7027_v28, 16  ;;  %v7239_v8 = vsel %vm13509_vm6, %v7230_v61, %v7238_v37  ;;  %v7248_v31 = vor.u32 %v7247_v35, %v7244_v42 }
 0x43c   : > { %v15452_v50 = vsel %vm1416_vm8, %v11813_v23, %v6909_v45  ;;  %v7254_v6 = vshll.u32 %v7027_v28, 16  ;;  %v8244_v43 = vsel %vm13040_vm13, %v8242_v12, %v8243_v11  ;;  %v7260_v22 = vshrl.u32 %v7028_v5, 16  ;;  %v12861_v28 = vld [vmem:[#allocation2 + $0x64] sm:$0xf] }
 0x43d   : > { %6997 = vst [vmem:[#allocation3 + $0x118] sm:$0xff] %v15452_v50  ;;  %v7253_v17 = vrot.slane %v7251_v46, 5  ;;  %v7263_v40 = vshll.u32 %v7028_v5, 16  ;;  %v7249_v2 = vsel %vm13509_vm6, %v7240_v14, %v7248_v31  ;;  %v11886_v57 = vcombine.low %v8241_v19, %v8244_v43  ;;  %v12862_v46 = vld [vmem:[#allocation2 + $0x1c] sm:$0xf] }
 0x43e   : > { %v7256_v30 = vrot.slane %v7254_v6, 6  ;;  %v7270_v54 = vshrl.u32 %v7029_v52, 16  ;;  %v11844_v27 = vcombine.low %v7239_v8, %v7249_v2  ;;  %v7262_v20 = vrot.slane %v7260_v22, 5  ;;  %v8147_v22 = vld [vmem:[#allocation2 + $0x20] sm:$0x1] }
 0x43f   : > { %v7265_v47 = vrot.slane %v7263_v40, 6  ;;  %v7273_v38 = vshll.u32 %v7029_v52, 16  ;;  %v15462_v15 = vsel %vm1416_vm8, %v11886_v57, %v8911_v7  ;;  %v6431_v45 = vshrl.u32 %v6214_v58, 16  ;;  %v6911_v7 = vpop.permute.xlu1 %6910  ;;  %v7030_v40 = vld [vmem:[#allocation2 + $0x60] sm:$0xe] }
 0x440   : > { %v7257_v26 = vor.u32 %v7256_v30, %v7253_v17  ;;  %v7272_v21 = vrot.slane %v7270_v54, 5  ;;  %v8088_v59 = vsel %vm1416_vm8, %v11844_v27, %v8043_v0  ;;  %v6434_v42 = vshll.u32 %v6214_v58, 16  ;;  %v12863_v30 = vld [vmem:[#allocation2 + $0x18] sm:$0xe] }
 0x441   : > { %v7266_v63 = vor.u32 %v7265_v47, %v7262_v20  ;;  %v7275_v16 = vrot.slane %v7273_v38, 6  ;;  %8132 = vst [vmem:[#allocation3 + $0xf8] sm:$0xff] %v8088_v59  ;;  %v6433_v13 = vrot.slane %v6431_v45, 4  ;;  %v6440_v60 = vshll.u32 %v12861_v28, 16  ;;  %10917 = vmatprep.mubr.bf16.mxu1 %v8088_v59  ;;  %v7031_v59 = vld [vmem:[#allocation2 + $0x64] sm:$0xf] }
 0x442   : > { %v7258_v33 = vrot.slane %v7257_v26, 4  ;;  %v16457_v25 = vshrl.u32 %v14936_v36, 16  ;;  %v6436_v23 = vrot.slane %v6434_v42, 5  ;;  %v16458_v61 = vshll.u32 %v14941_v29, 16  ;;  %10918 = vmatmul.mubr.bf16.gmra.mrb[88].mxu1 %v15434_v3  ;;  %v8045_v36 = vpop.permute.xlu0 %8044  ;;  %v7032_v28 = vld [vmem:[#allocation2 + $0x68] sm:$0x3] }
 0x443   : > { %v7268_v44 = vrot.slane %v7266_v63, 4  ;;  %v7276_v34 = vor.u32 %v7275_v16, %v7272_v21  ;;  %v6442_v5 = vrot.slane %v6440_v60, 5  ;;  %v9071_v14 = vshrl.u32 %v9022_v24, 16 }
 0x444   : > { %v6446_v37 = vrot.slane %v16457_v25, 4  ;;  %v6452_v35 = vrot.slane %v16458_v61, 5  ;;  %v7267_v11 = vsel %vm13509_vm6, %v7258_v33, %v7266_v63  ;;  %v9074_v19 = vshll.u32 %v9022_v24, 16 }
 0x445   : > { %v7277_v12 = vsel %vm13509_vm6, %v7268_v44, %v7276_v34  ;;  %v6437_v52 = vor.u32 %v6436_v23, %v6433_v13  ;;  %v9080_v8 = vshll.u32 %v12862_v46, 16  ;;  %v16459_v31 = vshrl.u32 %v14947_v53, 16  ;;  %v12864_v53 = vld [vmem:[#allocation2 + $0x1c] sm:$0xf]  ;;  %v8913_v34 = vpop.permute.xlu1 %8912 }
 0x446   : > { %v11845_v29 = vcombine.low %v7267_v11, %v7277_v12  ;;  %v6447_v43 = vor.u32 %v6446_v37, %v6442_v5  ;;  %v9073_v3 = vrot.slane %v9071_v14, 4  ;;  %v9076_v17 = vrot.slane %v9074_v19, 5  ;;  %v9727_v14 = vpop.permute.xlu0 %9726 }
 0x447   : > { %v9086_v6 = vrot.slane %v16459_v31, 4  ;;  %v6438_v58 = vrot.slane %v6437_v52, 4  ;;  %v9082_v2 = vrot.slane %v9080_v8, 5  ;;  %v16460_v0 = vshll.u32 %v14949_v62, 16 }
 0x448   : > { %v11871_v54 = vrot.slane %v12863_v30, 9  ;;  %v8092_v27 = vsel %vm1416_vm8, %v11845_v29, %v8045_v36  ;;  %v6448_v20 = vrot.slane %v6447_v43, 4  ;;  %v9077_v47 = vor.u32 %v9076_v17, %v9073_v3  ;;  %v9025_v43 = vld [vmem:[#allocation2 + $0x24] sm:$0xf]  ;;  %v12865_v30 = vld [vmem:[#allocation2 + $0x70] sm:$0xf] }
 0x449   : > { %v9092_v57 = vrot.slane %v16460_v0, 5  ;;  %v8247_v38 = vrot.slane %v12864_v53, 5  ;;  %8133 = vst [vmem:[#allocation3 + $0x120] sm:$0xff] %v8092_v27  ;;  %v6443_v26 = vsel %vm13103_vm14, %v6438_v58, %v6442_v5  ;;  %v9087_v21 = vor.u32 %v9086_v6, %v9082_v2  ;;  %10925 = vmatprep.mubr.bf16.mxu1 %v8092_v27  ;;  %v9469_v58 = vld [vmem:[#allocation2 + $0xcc] sm:$0xe] }
 0x44a   : > { %v8250_v45 = vrot.slane %v8147_v22, 5  ;;  %v7279_v63 = vshrl.u32 %v7030_v40, 16  ;;  %v6453_v62 = vsel %vm13103_vm14, %v6448_v20, %v6452_v35  ;;  %v9078_v16 = vrot.slane %v9077_v47, 4  ;;  %10926 = vmatmul.mubr.bf16.gmra.mrb[92].mxu1 %v15452_v50  ;;  %v6217_v35 = vld [vmem:[#allocation2 + $0x6c] sm:$0xf] }
 0x44b   : > { %v8248_v42 = vsel %vm13040_vm13, %v11871_v54, %v8247_v38  ;;  %v8249_v24 = vrot.slane %v8247_v38, 4  ;;  %v11814_v33 = vcombine.low %v6443_v26, %v6453_v62  ;;  %v9088_v13 = vrot.slane %v9087_v21, 4  ;;  %v9069_v27 = vld [vmem:[#allocation2 + $0xd4] sm:$0x1] }
 0x44c   : > { %v7281_v60 = vrot.slane %v7279_v63, 5  ;;  %v7282_v25 = vshll.u32 %v7030_v40, 16  ;;  %v9083_v37 = vsel %vm13103_vm14, %v9078_v16, %v9082_v2  ;;  %v7288_v23 = vshrl.u32 %v7031_v59, 16  ;;  %v9068_v40 = vld [vmem:[#allocation2 + $0xd0] sm:$0xf] }
 0x44d   : > { %v8251_v44 = vsel %vm13040_vm13, %v8249_v24, %v8250_v45  ;;  %v7291_v61 = vshll.u32 %v7031_v59, 16  ;;  %v15491_v11 = vsel %vm1416_vm8, %v11814_v33, %v6911_v7  ;;  %v9093_v5 = vsel %vm13103_vm14, %v9088_v13, %v9092_v57 }
 0x44e   : > { %v11887_v19 = vcombine.low %v8248_v42, %v8251_v44  ;;  %v7284_v12 = vrot.slane %v7282_v25, 6  ;;  %6998 = vst [vmem:[#allocation3 + $0x140] sm:$0xff] %v15491_v11  ;;  %v11934_v50 = vcombine.low %v9083_v37, %v9093_v5  ;;  %v7290_v36 = vrot.slane %v7288_v23, 5 }
 0x44f   : > { %v7293_v52 = vrot.slane %v7291_v61, 6  ;;  %v7298_v46 = vshrl.u32 %v7032_v28, 16  ;;  %v7301_v6 = vshll.u32 %v7032_v28, 16  ;;  %v6455_v29 = vshrl.u32 %v6217_v35, 16 }
 0x450   : > { %v15497_v8 = vsel %vm1416_vm8, %v11887_v19, %v8913_v34  ;;  %v7285_v31 = vor.u32 %v7284_v12, %v7281_v60  ;;  %v9760_v7 = vsel %vm1416_vm8, %v11934_v50, %v9727_v14  ;;  %v6458_v22 = vshll.u32 %v6217_v35, 16  ;;  %v6913_v12 = vpop.permute.xlu1 %6912 }
 0x451   : > { %v7294_v3 = vor.u32 %v7293_v52, %v7290_v36  ;;  %v7300_v17 = vrot.slane %v7298_v46, 5  ;;  %v7303_v0 = vrot.slane %v7301_v6, 6  ;;  %v6457_v57 = vrot.slane %v6455_v29, 4  ;;  %11030 = vmatprep.mubr.bf16.mxu0 %v9760_v7  ;;  %v8150_v46 = vld [vmem:[#allocation2 + $0x2c] sm:$0x1] }
 0x452   : > { %v7286_v2 = vrot.slane %v7285_v31, 4  ;;  %v6464_v54 = vshll.u32 %v12865_v30, 16  ;;  %v6460_v47 = vrot.slane %v6458_v22, 5  ;;  %v16461_v53 = vshrl.u32 %v14983_v9, 16  ;;  %11031 = vmatmul.mubr.bf16.vlgmr.msra.gmra.mrb[96].mxu0 %v15462_v15  ;;  %v8047_v9 = vpop.permute.xlu0 %8046  ;;  %v7033_v31 = vld [vmem:[#allocation2 + $0x6c] sm:$0xe] }
 0x453   : > { %v7296_v20 = vrot.slane %v7294_v3, 4  ;;  %v16462_v26 = vshll.u32 %v14985_v39, 16  ;;  %v7304_v59 = vor.u32 %v7303_v0, %v7300_v17  ;;  %v11933_v62 = vrot.slane %v9469_v58, 9  ;;  %v12866_v39 = vld [vmem:[#allocation2 + $0x28] sm:$0xf] }
 0x454   : > { %v6470_v38 = vrot.slane %v16461_v53, 4  ;;  %v7295_v45 = vsel %vm13509_vm6, %v7286_v2, %v7294_v3  ;;  %v6466_v63 = vrot.slane %v6464_v54, 5  ;;  %v6461_v16 = vor.u32 %v6460_v47, %v6457_v57  ;;  %v12868_v2 = vld [vmem:[#allocation2 + $0x28] sm:$0xf]  ;;  %v7035_v54 = vld [vmem:[#allocation2 + $0x74] sm:$0x3] }
 0x455   : > { %v6476_v21 = vrot.slane %v16462_v26, 5  ;;  %v9625_v42 = vrot.slane %v9068_v40, 5  ;;  %v9628_v24 = vrot.slane %v9069_v27, 5  ;;  %v9095_v33 = vshrl.u32 %v9025_v43, 16  ;;  %v12867_v40 = vld [vmem:[#allocation2 + $0x24] sm:$0xe] }
 0x456   : > { %v7305_v13 = vsel %vm13509_vm6, %v7296_v20, %v7304_v59  ;;  %v6471_v28 = vor.u32 %v6470_v38, %v6466_v63  ;;  %v9098_v60 = vshll.u32 %v9025_v43, 16  ;;  %v9104_v25 = vshll.u32 %v12866_v39, 16  ;;  %v6220_v59 = vld [vmem:[#allocation2 + $0x78] sm:$0xf] }
 0x457   : > { %v11846_v37 = vcombine.low %v7295_v45, %v7305_v13  ;;  %v6462_v15 = vrot.slane %v6461_v16, 4  ;;  %v9626_v44 = vsel %vm13040_vm13, %v11933_v62, %v9625_v42  ;;  %v9627_v34 = vrot.slane %v9625_v42, 4  ;;  %v9729_v16 = vpop.permute.xlu0 %9728 }
 0x458   : > { %v6472_v23 = vrot.slane %v6471_v28, 4  ;;  %v9097_v61 = vrot.slane %v9095_v33, 4  ;;  %v9100_v35 = vrot.slane %v9098_v60, 5  ;;  %v9106_v5 = vrot.slane %v9104_v25, 5 }
 0x459   : > { %v8096_v14 = vsel %vm1416_vm8, %v11846_v37, %v8047_v9  ;;  %v6467_v19 = vsel %vm13103_vm14, %v6462_v15, %v6466_v63  ;;  %v9629_v50 = vsel %vm13040_vm13, %v9627_v34, %v9628_v24  ;;  %v16463_v36 = vshrl.u32 %v14989_v41, 16  ;;  %v7034_v41 = vld [vmem:[#allocation2 + $0x70] sm:$0xf]  ;;  %v12752_v63 = vld [vmem:[%s16374_s4 + $0x118] sm:$0xff]   ;;  %v8915_v24 = vpop.permute.xlu1 %8914 }
 0x45a   : > { %8134 = vst [vmem:[#allocation3 + $0x148] sm:$0xff] %v8096_v14  ;;  %v6477_v6 = vsel %vm13103_vm14, %v6472_v23, %v6476_v21  ;;  %v11965_v29 = vcombine.low %v9626_v44, %v9629_v50  ;;  %v9101_v43 = vor.u32 %v9100_v35, %v9097_v61  ;;  %v16464_v7 = vshll.u32 %v14991_v49, 16  ;;  %10933 = vmatprep.mubr.bf16.mxu1 %v8096_v14  ;;  %v9028_v34 = vld [vmem:[#allocation2 + $0x30] sm:$0xf]  ;;  %v12869_v50 = vld [vmem:[#allocation2 + $0x7c] sm:$0xf] }
 0x45b   : > { %v9110_v52 = vrot.slane %v16463_v36, 4  ;;  %v11815_v17 = vcombine.low %v6467_v19, %v6477_v6  ;;  %v11872_v58 = vrot.slane %v12867_v40, 9  ;;  %v8254_v0 = vrot.slane %v12868_v2, 5  ;;  %10934 = vmatmul.mubr.bf16.gmra.mrb[96].mxu1 %v15491_v11  ;;  %12637 = vmatprep.subr.bf16.mxu1 %v12752_v63 }
 0x45c   : > { %v9116_v3 = vrot.slane %v16464_v7, 5  ;;  %9756 = vrot.lane.b32.xlu0 %v11965_v29, %s12939_s27  ;;  %v9102_v57 = vrot.slane %v9101_v43, 4  ;;  %v8257_v30 = vrot.slane %v8150_v46, 5  ;;  %v7307_v27 = vshrl.u32 %v7033_v31, 16  ;;  %12638 = vmatpush3.bf16.msra.mxu1 %v12752_v63 }
 0x45d   : > { %v9111_v22 = vor.u32 %v9110_v52, %v9106_v5  ;;  %v7310_v20 = vshll.u32 %v7033_v31, 16  ;;  %v15525_v49 = vsel %vm1416_vm8, %v11815_v17, %v6913_v12  ;;  %v8255_v53 = vsel %vm13040_vm13, %v11872_v58, %v8254_v0 }
 0x45e   : > { %v8256_v38 = vrot.slane %v8254_v0, 4  ;;  %6999 = vst [vmem:[#allocation3 + $0x168] sm:$0xff] %v15525_v49  ;;  %v9107_v11 = vsel %vm13103_vm14, %v9102_v57, %v9106_v5  ;;  %v7309_v26 = vrot.slane %v7307_v27, 5  ;;  %v7316_v45 = vshrl.u32 %v7034_v41, 16  ;;  %v12870_v0 = vld [vmem:[#allocation2 + $0x34] sm:$0xf] }
 0x45f   : > { %v9112_v47 = vrot.slane %v9111_v22, 4  ;;  %v7312_v21 = vrot.slane %v7310_v20, 6  ;;  %v7319_v33 = vshll.u32 %v7034_v41, 16  ;;  %v7326_v13 = vshrl.u32 %v7035_v54, 16  ;;  %v8153_v57 = vld [vmem:[#allocation2 + $0x38] sm:$0x1] }
 0x460   : > { %v8258_v42 = vsel %vm13040_vm13, %v8256_v38, %v8257_v30  ;;  %v7318_v39 = vrot.slane %v7316_v45, 5  ;;  %v7329_v15 = vshll.u32 %v7035_v54, 16  ;;  %v6479_v44 = vshrl.u32 %v6220_v59, 16  ;;  %v6915_v54 = vpop.permute.xlu1 %6914 }
 0x461   : > { %v9117_v62 = vsel %vm13103_vm14, %v9112_v47, %v9116_v3  ;;  %v11888_v28 = vcombine.low %v8255_v53, %v8258_v42  ;;  %v7313_v60 = vor.u32 %v7312_v21, %v7309_v26  ;;  %v7321_v25 = vrot.slane %v7319_v33, 6  ;;  %v7036_v21 = vld [vmem:[#allocation2 + $0x78] sm:$0xe] }
 0x462   : > { %v11935_v9 = vcombine.low %v9107_v11, %v9117_v62  ;;  %v7328_v37 = vrot.slane %v7326_v13, 5  ;;  %v6482_v5 = vshll.u32 %v6220_v59, 16  ;;  %v7331_v19 = vrot.slane %v7329_v15, 6  ;;  %v12871_v59 = vld [vmem:[#allocation2 + $0x30] sm:$0xe] }
 0x463   : > { %v15541_v61 = vsel %vm1416_vm8, %v11888_v28, %v8915_v24  ;;  %v7314_v35 = vrot.slane %v7313_v60, 4  ;;  %v7322_v14 = vor.u32 %v7321_v25, %v7318_v39  ;;  %v6481_v12 = vrot.slane %v6479_v44, 4  ;;  %v12872_v62 = vld [vmem:[#allocation2 + $0x34] sm:$0xf]  ;;  %v7038_v44 = vld [vmem:[#allocation2 + $0x80] sm:$0x3] }
 0x464   : > { %v9764_v23 = vsel %vm1416_vm8, %v11935_v9, %v9729_v16  ;;  %v6488_v36 = vshll.u32 %v12869_v50, 16  ;;  %v6484_v52 = vrot.slane %v6482_v5, 5  ;;  %v16465_v46 = vshrl.u32 %v15022_v10, 16 }
 0x465   : > { %11038 = vmatprep.mubr.bf16.mxu0 %v9764_v23  ;;  %v16466_v6 = vshll.u32 %v15027_v32, 16  ;;  %v9119_v43 = vshrl.u32 %v9028_v34, 16  ;;  %v7323_v7 = vsel %vm13509_vm6, %v7314_v35, %v7322_v14  ;;  %v7324_v3 = vrot.slane %v7322_v14, 4  ;;  %v8049_v32 = vpop.permute.xlu0 %8048  ;;  %v8917_v35 = vpop.permute.xlu1 %8916 }
 0x466   : > { %v6494_v31 = vrot.slane %v16465_v46, 4  ;;  %11039 = vmatmul.mubr.bf16.gmra.mrb[100].mxu0 %v15497_v8  ;;  %v7332_v17 = vor.u32 %v7331_v19, %v7328_v37  ;;  %v6490_v22 = vrot.slane %v6488_v36, 5  ;;  %v6485_v40 = vor.u32 %v6484_v52, %v6481_v12  ;;  %v6223_v12 = vld [vmem:[#allocation2 + $0x84] sm:$0xf] }
 0x467   : > { %v6500_v29 = vrot.slane %v16466_v6, 5  ;;  %v9121_v58 = vrot.slane %v9119_v43, 4  ;;  %v9122_v2 = vshll.u32 %v9028_v34, 16  ;;  %v9128_v41 = vshll.u32 %v12870_v0, 16 }
 0x468   : > { %v7333_v10 = vsel %vm13509_vm6, %v7324_v3, %v7332_v17  ;;  %v6495_v30 = vor.u32 %v6494_v31, %v6490_v22  ;;  %v16467_v8 = vshrl.u32 %v15033_v1, 16  ;;  %v16468_v20 = vshll.u32 %v15035_v55, 16  ;;  %v7037_v55 = vld [vmem:[#allocation2 + $0x7c] sm:$0xf] }
 0x469   : > { %v11847_v53 = vcombine.low %v7323_v7, %v7333_v10  ;;  %v6486_v38 = vrot.slane %v6485_v40, 4  ;;  %v9124_v11 = vrot.slane %v9122_v2, 5  ;;  %v9130_v26 = vrot.slane %v9128_v41, 5  ;;  %v9731_v46 = vpop.permute.xlu0 %9730  ;;  %v9031_v41 = vld [vmem:[#allocation2 + $0x3c] sm:$0xf] }
 0x46a   : > { %v9134_v27 = vrot.slane %v16467_v8, 4  ;;  %v9140_v47 = vrot.slane %v16468_v20, 5  ;;  %v6496_v45 = vrot.slane %v6495_v30, 4  ;;  %v11873_v63 = vrot.slane %v12871_v59, 9  ;;  %v12873_v30 = vld [vmem:[#allocation2 + $0x88] sm:$0xf] }
 0x46b   : > { %v8261_v16 = vrot.slane %v12872_v62, 5  ;;  %v8264_v42 = vrot.slane %v8153_v57, 5  ;;  %v8100_v24 = vsel %vm1416_vm8, %v11847_v53, %v8049_v32  ;;  %v6491_v1 = vsel %vm13103_vm14, %v6486_v38, %v6490_v22 }
 0x46c   : > { %v9125_v33 = vor.u32 %v9124_v11, %v9121_v58  ;;  %v9135_v13 = vor.u32 %v9134_v27, %v9130_v26  ;;  %8135 = vst [vmem:[#allocation3 + $0x170] sm:$0xff] %v8100_v24  ;;  %v6501_v9 = vsel %vm13103_vm14, %v6496_v45, %v6500_v29  ;;  %v7335_v39 = vshrl.u32 %v7036_v21, 16  ;;  %10941 = vmatprep.mubr.bf16.mxu1 %v8100_v24 }
 0x46d   : > { %v8262_v28 = vsel %vm13040_vm13, %v11873_v63, %v8261_v16  ;;  %v8263_v60 = vrot.slane %v8261_v16, 4  ;;  %v11816_v25 = vcombine.low %v6491_v1, %v6501_v9  ;;  %v7338_v34 = vshll.u32 %v7036_v21, 16  ;;  %10942 = vmatmul.mubr.bf16.gmra.mrb[100].mxu1 %v15525_v49  ;;  %v12874_v16 = vld [vmem:[#allocation2 + $0x40] sm:$0xf] }
 0x46e   : > { %v9126_v37 = vrot.slane %v9125_v33, 4  ;;  %v9136_v15 = vrot.slane %v9135_v13, 4  ;;  %v7337_v5 = vrot.slane %v7335_v39, 5  ;;  %v7344_v14 = vshrl.u32 %v7037_v55, 16  ;;  %v6917_v33 = vpop.permute.xlu1 %6916  ;;  %v16471_v13 = vld [vmem:[#allocation7_spill] sm:$0xff] }
 0x46f   : > { %v8265_v23 = vsel %vm13040_vm13, %v8263_v60, %v8264_v42  ;;  %v7347_v19 = vshll.u32 %v7037_v55, 16  ;;  %v15567_v50 = vsel %vm1416_vm8, %v11816_v25, %v6915_v54  ;;  %v7340_v6 = vrot.slane %v7338_v34, 6  ;;  %v8156_v25 = vld [vmem:[#allocation2 + $0x44] sm:$0x1] }
 0x470   : > { %v9131_v36 = vsel %vm13103_vm14, %v9126_v37, %v9130_v26  ;;  %v9141_v52 = vsel %vm13103_vm14, %v9136_v15, %v9140_v47  ;;  %v11889_v31 = vcombine.low %v8262_v28, %v8265_v23  ;;  %7000 = vst [vmem:[#allocation3 + $0x190] sm:$0xff] %v15567_v50  ;;  %v7346_v29 = vrot.slane %v7344_v14, 5  ;;  %v16473_v15 = vld [vmem:[#allocation8_spill] sm:$0xff] }
 0x471   : > { %v11936_v49 = vcombine.low %v9131_v36, %v9141_v52  ;;  %v7349_v43 = vrot.slane %v7347_v19, 6  ;;  %v7354_v3 = vshrl.u32 %v7038_v44, 16  ;;  %v7357_v17 = vshll.u32 %v7038_v44, 16  ;;  %v12875_v23 = vld [vmem:[#allocation2 + $0x3c] sm:$0xe] }
 0x472   : > { %v15575_v7 = vsel %vm1416_vm8, %v11889_v31, %v8917_v35  ;;  %v6503_v22 = vshrl.u32 %v6223_v12, 16  ;;  %v7341_v58 = vor.u32 %v7340_v6, %v7337_v5  ;;  %v6506_v0 = vshll.u32 %v6223_v12, 16  ;;  %v12876_v5 = vld [vmem:[#allocation2 + $0x40] sm:$0xf]  ;;  %v7039_v19 = vld [vmem:[#allocation2 + $0x84] sm:$0xe] }
 0x473   : > { %v9768_v40 = vsel %vm1416_vm8, %v11936_v49, %v9731_v46  ;;  %v7350_v2 = vor.u32 %v7349_v43, %v7346_v29  ;;  %v7356_v57 = vrot.slane %v7354_v3, 5  ;;  %v7359_v10 = vrot.slane %v7357_v17, 6  ;;  %v7040_v31 = vld [vmem:[#allocation2 + $0x88] sm:$0xf] }
 0x474   : > { %v6505_v32 = vrot.slane %v6503_v22, 4  ;;  %v6512_v54 = vshll.u32 %v12873_v30, 16  ;;  %11046 = vmatprep.mubr.bf16.mxu0 %v9768_v40  ;;  %v7342_v8 = vrot.slane %v7341_v58, 4  ;;  %v6508_v20 = vrot.slane %v6506_v0, 5  ;;  %v7041_v0 = vld [vmem:[#allocation2 + $0x8c] sm:$0x3] }
 0x475   : > { %v7352_v27 = vrot.slane %v7350_v2, 4  ;;  %v16469_v47 = vshrl.u32 %v15061_v51, 16  ;;  %11047 = vmatmul.mubr.bf16.gmra.mrb[104].mxu0 %v15541_v61  ;;  %v7360_v38 = vor.u32 %v7359_v10, %v7356_v57  ;;  %v16470_v26 = vshll.u32 %v15063_v4, 16  ;;  %v8051_v51 = vpop.permute.xlu0 %8050 }
 0x476   : > { %v6514_v11 = vrot.slane %v6512_v54, 5  ;;  %v9143_v45 = vshrl.u32 %v9031_v41, 16  ;;  %v7351_v59 = vsel %vm13509_vm6, %v7342_v8, %v7350_v2  ;;  %v6509_v63 = vor.u32 %v6508_v20, %v6505_v32  ;;  %v8919_v2 = vpop.permute.xlu1 %8918 }
 0x477   : > { %v6518_v53 = vrot.slane %v16469_v47, 4  ;;  %v6524_v21 = vrot.slane %v16470_v26, 5  ;;  %v9146_v62 = vshll.u32 %v9031_v41, 16  ;;  %v9152_v42 = vshll.u32 %v12874_v16, 16 }
 0x478   : > { %v7361_v24 = vsel %vm13509_vm6, %v7352_v27, %v7360_v38  ;;  %v9145_v61 = vrot.slane %v9143_v45, 4  ;;  %v16472_v55 = vshrl.u32 %v16471_v13, 16  ;;  %v6510_v28 = vrot.slane %v6509_v63, 4 }
 0x479   : > { %v6519_v1 = vor.u32 %v6518_v53, %v6514_v11  ;;  %v11848_v4 = vcombine.low %v7351_v59, %v7361_v24  ;;  %v9148_v60 = vrot.slane %v9146_v62, 5  ;;  %v9154_v39 = vrot.slane %v9152_v42, 5  ;;  %v9733_v8 = vpop.permute.xlu0 %9732 }
 0x47a   : > { %v9158_v9 = vrot.slane %v16472_v55, 4  ;;  %v16474_v44 = vshll.u32 %v16473_v15, 16  ;;  %v11874_v35 = vrot.slane %v12875_v23, 9  ;;  %v8268_v14 = vrot.slane %v12876_v5, 5 }
 0x47b   : > { %v6520_v37 = vrot.slane %v6519_v1, 4  ;;  %v8104_v12 = vsel %vm1416_vm8, %v11848_v4, %v8051_v51  ;;  %v6515_v36 = vsel %vm13103_vm14, %v6510_v28, %v6514_v11  ;;  %v9149_v52 = vor.u32 %v9148_v60, %v9145_v61  ;;  %v12877_v1 = vld [vmem:[#allocation2 + $0x94] sm:$0xf]  ;;  %v9034_v61 = vld [vmem:[#allocation2 + $0x48] sm:$0xf] }
 0x47c   : > { %v9164_v34 = vrot.slane %v16474_v44, 5  ;;  %v9159_v46 = vor.u32 %v9158_v9, %v9154_v39  ;;  %8136 = vst [vmem:[#allocation3 + $0x198] sm:$0xff] %v8104_v12  ;;  %v8269_v6 = vsel %vm13040_vm13, %v11874_v35, %v8268_v14  ;;  %v8270_v29 = vrot.slane %v8268_v14, 4  ;;  %10949 = vmatprep.mubr.bf16.mxu1 %v8104_v12  ;;  %v12879_v12 = vld [vmem:[#allocation2 + $0x4c] sm:$0xf] }
 0x47d   : > { %v6525_v49 = vsel %vm13103_vm14, %v6520_v37, %v6524_v21  ;;  %v8271_v43 = vrot.slane %v8156_v25, 5  ;;  %v9150_v17 = vrot.slane %v9149_v52, 4  ;;  %v7363_v40 = vshrl.u32 %v7039_v19, 16  ;;  %10950 = vmatmul.mubr.bf16.gmra.mrb[104].mxu1 %v15567_v50  ;;  %v6226_v50 = vld [vmem:[#allocation2 + $0x90] sm:$0xf]  ;;  %v8053_v5 = vpop.permute.xlu0 %8052 }
 0x47e   : > { %v11817_v3 = vcombine.low %v6515_v36, %v6525_v49  ;;  %v9160_v22 = vrot.slane %v9159_v46, 4  ;;  %v7366_v41 = vshll.u32 %v7039_v19, 16  ;;  %v7372_v57 = vshrl.u32 %v7040_v31, 16  ;;  %v12878_v25 = vld [vmem:[#allocation2 + $0x98] sm:$0x1] }
 0x47f   : > { %v8272_v58 = vsel %vm13040_vm13, %v8270_v29, %v8271_v43  ;;  %v7375_v10 = vshll.u32 %v7040_v31, 16  ;;  %v9155_v30 = vsel %vm13103_vm14, %v9150_v17, %v9154_v39  ;;  %v7365_v47 = vrot.slane %v7363_v40, 5  ;;  %v8159_v49 = vld [vmem:[#allocation2 + $0x50] sm:$0x1]  ;;  %v16477_v40 = vld [vmem:[#allocation10_spill] sm:$0xff] }
 0x480   : > { %v15602_v32 = vsel %vm1416_vm8, %v11817_v3, %v6917_v33  ;;  %v9165_v54 = vsel %vm13103_vm14, %v9160_v22, %v9164_v34  ;;  %v11890_v27 = vcombine.low %v8269_v6, %v8272_v58  ;;  %v7368_v53 = vrot.slane %v7366_v41, 6  ;;  %v7042_v6 = vld [vmem:[#allocation2 + $0x90] sm:$0xe]  ;;  %v16475_v3 = vld [vmem:[#allocation9_spill] sm:$0xff] }
 0x481   : > { %7001 = vst [vmem:[#allocation3 + $0x1b8] sm:$0xff] %v15602_v32  ;;  %v11937_v20 = vcombine.low %v9155_v30, %v9165_v54  ;;  %v7374_v38 = vrot.slane %v7372_v57, 5  ;;  %v7377_v26 = vrot.slane %v7375_v10, 6  ;;  %v7382_v21 = vshrl.u32 %v7041_v0, 16  ;;  %v6919_v30 = vpop.permute.xlu1 %6918  ;;  %v12880_v54 = vld [vmem:[#allocation2 + $0x48] sm:$0xe] }
 0x482   : > { %v15610_v11 = vsel %vm1416_vm8, %v11890_v27, %v8919_v2  ;;  %v7385_v45 = vshll.u32 %v7041_v0, 16  ;;  %v7369_v63 = vor.u32 %v7368_v53, %v7365_v47  ;;  %v6527_v62 = vshrl.u32 %v6226_v50, 16  ;;  %v7043_v0 = vld [vmem:[#allocation2 + $0x94] sm:$0xf] }
 0x483   : > { %v9772_v59 = vsel %vm1416_vm8, %v11937_v20, %v9733_v8  ;;  %v6530_v16 = vshll.u32 %v6226_v50, 16  ;;  %v7378_v42 = vor.u32 %v7377_v26, %v7374_v38  ;;  %v7384_v24 = vrot.slane %v7382_v21, 5  ;;  %v12881_v20 = vld [vmem:[#allocation2 + $0x4c] sm:$0xf] }
 0x484   : > { %v7387_v51 = vrot.slane %v7385_v45, 6  ;;  %v6536_v33 = vshll.u32 %v12877_v1, 16  ;;  %11054 = vmatprep.mubr.bf16.mxu0 %v9772_v59  ;;  %v7370_v13 = vrot.slane %v7369_v63, 4  ;;  %v6529_v55 = vrot.slane %v6527_v62, 4 }
 0x485   : > { %v6532_v9 = vrot.slane %v6530_v16, 5  ;;  %v6540_v4 = vshrl.u32 %v12877_v1, 16  ;;  %11055 = vmatmul.mubr.bf16.gmra.mrb[108].mxu0 %v15575_v7  ;;  %v7380_v28 = vrot.slane %v7378_v42, 4  ;;  %v6546_v37 = vshll.u32 %v12878_v25, 16 }
 0x486   : > { %v7388_v60 = vor.u32 %v7387_v51, %v7384_v24  ;;  %v6538_v39 = vrot.slane %v6536_v33, 5  ;;  %v7379_v15 = vsel %vm13509_vm6, %v7370_v13, %v7378_v42  ;;  %v9167_v23 = vshrl.u32 %v9034_v61, 16  ;;  %v7044_v42 = vld [vmem:[#allocation2 + $0x98] sm:$0x3] }
 0x487   : > { %v6533_v44 = vor.u32 %v6532_v9, %v6529_v55  ;;  %v6542_v34 = vrot.slane %v6540_v4, 4  ;;  %v6548_v14 = vrot.slane %v6546_v37, 5  ;;  %v9170_v19 = vshll.u32 %v9034_v61, 16  ;;  %v6229_v61 = vld [vmem:[#allocation2 + $0x9c] sm:$0xf]  ;;  %v9735_v9 = vpop.permute.xlu0 %9734 }
 0x488   : > { %v7389_v35 = vsel %vm13509_vm6, %v7380_v28, %v7388_v60  ;;  %v9176_v36 = vshll.u32 %v12879_v12, 16  ;;  %v9169_v31 = vrot.slane %v9167_v23, 4  ;;  %v16476_v17 = vshrl.u32 %v16475_v3, 16  ;;  %v9037_v12 = vld [vmem:[#allocation2 + $0x54] sm:$0xf] }
 0x489   : > { %v11849_v7 = vcombine.low %v7379_v15, %v7389_v35  ;;  %v6534_v52 = vrot.slane %v6533_v44, 4  ;;  %v6543_v46 = vor.u32 %v6542_v34, %v6538_v39  ;;  %v9172_v29 = vrot.slane %v9170_v19, 5 }
 0x48a   : > { %v9178_v43 = vrot.slane %v9176_v36, 5  ;;  %v9182_v22 = vrot.slane %v16476_v17, 4  ;;  %v16478_v58 = vshll.u32 %v16477_v40, 16  ;;  %v11875_v8 = vrot.slane %v12880_v54, 9 }
 0x48b   : > { %v8108_v41 = vsel %vm1416_vm8, %v11849_v7, %v8053_v5  ;;  %v6539_v57 = vsel %vm13103_vm14, %v6534_v52, %v6538_v39  ;;  %v6544_v10 = vrot.slane %v6543_v46, 4  ;;  %v9173_v27 = vor.u32 %v9172_v29, %v9169_v31  ;;  %v8921_v39 = vpop.permute.xlu1 %8920 }
 0x48c   : > { %v9188_v2 = vrot.slane %v16478_v58, 5  ;;  %8137 = vst [vmem:[#allocation3 + $0x1c0] sm:$0xff] %v8108_v41  ;;  %v9183_v50 = vor.u32 %v9182_v22, %v9178_v43  ;;  %v8275_v47 = vrot.slane %v12881_v20, 5  ;;  %v8278_v53 = vrot.slane %v8159_v49, 5  ;;  %10957 = vmatprep.mubr.bf16.mxu1 %v8108_v41  ;;  %v12882_v49 = vld [vmem:[#allocation2 + $0xa0] sm:$0xf] }
 0x48d   : > { %v6549_v38 = vsel %vm13103_vm14, %v6544_v10, %v6548_v14  ;;  %v7391_v26 = vshrl.u32 %v7042_v6, 16  ;;  %v7394_v21 = vshll.u32 %v7042_v6, 16  ;;  %v7400_v45 = vshrl.u32 %v7043_v0, 16  ;;  %10958 = vmatmul.mubr.bf16.gmra.mrb[108].mxu1 %v15602_v32 }
 0x48e   : > { %v11818_v59 = vcombine.low %v6539_v57, %v6549_v38  ;;  %v9174_v63 = vrot.slane %v9173_v27, 4  ;;  %v9184_v62 = vrot.slane %v9183_v50, 4  ;;  %v8276_v16 = vsel %vm13040_vm13, %v11875_v8, %v8275_v47  ;;  %v12884_v27 = vld [vmem:[#allocation2 + $0x58] sm:$0xf]  ;;  %v8162_v38 = vld [vmem:[#allocation2 + $0x5c] sm:$0x1] }
 0x48f   : > { %v8277_v24 = vrot.slane %v8275_v47, 4  ;;  %v7393_v51 = vrot.slane %v7391_v26, 5  ;;  %v7396_v1 = vrot.slane %v7394_v21, 6  ;;  %v7402_v33 = vrot.slane %v7400_v45, 5  ;;  %v6921_v26 = vpop.permute.xlu1 %6920 }
 0x490   : > { %v15631_v13 = vsel %vm1416_vm8, %v11818_v59, %v6919_v30  ;;  %v9179_v55 = vsel %vm13103_vm14, %v9174_v63, %v9178_v43  ;;  %v9189_v32 = vsel %vm13103_vm14, %v9184_v62, %v9188_v2  ;;  %v7403_v4 = vshll.u32 %v7043_v0, 16  ;;  %v12883_v43 = vld [vmem:[#allocation2 + $0xa4] sm:$0x1]  ;;  %v8055_v30 = vpop.permute.xlu0 %8054  ;;  %v12885_v59 = vld [vmem:[#allocation2 + $0x5c] sm:$0x1] }
 0x491   : > { %7002 = vst [vmem:[#allocation3 + $0x1e0] sm:$0xff] %v15631_v13  ;;  %v11938_v28 = vcombine.low %v9179_v55, %v9189_v32  ;;  %v8279_v60 = vsel %vm13040_vm13, %v8277_v24, %v8278_v53  ;;  %v7397_v25 = vor.u32 %v7396_v1, %v7393_v51  ;;  %v7410_v37 = vshrl.u32 %v7044_v42, 16  ;;  %v12886_v62 = vld [vmem:[#allocation2 + $0x54] sm:$0xe]  ;;  %v12887_v32 = vld [vmem:[#allocation2 + $0x58] sm:$0xf] }
 0x492   : > { %v11891_v15 = vcombine.low %v8276_v16, %v8279_v60  ;;  %v7405_v44 = vrot.slane %v7403_v4, 6  ;;  %v7413_v34 = vshll.u32 %v7044_v42, 16  ;;  %v6551_v23 = vshrl.u32 %v6229_v61, 16  ;;  %v7045_v42 = vld [vmem:[#allocation2 + $0x9c] sm:$0xe] }
 0x493   : > { %v9776_v35 = vsel %vm1416_vm8, %v11938_v28, %v9735_v9  ;;  %v7398_v5 = vrot.slane %v7397_v25, 4  ;;  %v7412_v14 = vrot.slane %v7410_v37, 5  ;;  %v6554_v19 = vshll.u32 %v6229_v61, 16  ;;  %v7046_v28 = vld [vmem:[#allocation2 + $0xa0] sm:$0xf] }
 0x494   : > { %v15642_v36 = vsel %vm1416_vm8, %v11891_v15, %v8921_v39  ;;  %v7406_v7 = vor.u32 %v7405_v44, %v7402_v33  ;;  %v7415_v52 = vrot.slane %v7413_v34, 6  ;;  %v6553_v46 = vrot.slane %v6551_v23, 4  ;;  %11062 = vmatprep.mubr.bf16.mxu0 %v9776_v35 }
 0x495   : > { %v6556_v31 = vrot.slane %v6554_v19, 5  ;;  %v6560_v6 = vshll.u32 %v12882_v49, 16  ;;  %v6564_v29 = vshrl.u32 %v12882_v49, 16  ;;  %v6570_v3 = vshll.u32 %v12883_v43, 16  ;;  %11063 = vmatmul.mubr.bf16.gmra.mrb[112].mxu0 %v15610_v11  ;;  %v6232_v49 = vld [vmem:[#allocation2 + $0xa8] sm:$0xf] }
 0x496   : > { %v7407_v17 = vsel %vm13509_vm6, %v7398_v5, %v7406_v7  ;;  %v7408_v22 = vrot.slane %v7406_v7, 4  ;;  %v7416_v40 = vor.u32 %v7415_v52, %v7412_v14  ;;  %v9191_v58 = vshrl.u32 %v9037_v12, 16  ;;  %v7047_v5 = vld [vmem:[#allocation2 + $0xa4] sm:$0x3] }
 0x497   : > { %v6557_v2 = vor.u32 %v6556_v31, %v6553_v46  ;;  %v6562_v0 = vrot.slane %v6560_v6, 5  ;;  %v6566_v41 = vrot.slane %v6564_v29, 4  ;;  %v6572_v57 = vrot.slane %v6570_v3, 5  ;;  %v8923_v46 = vpop.permute.xlu1 %8922  ;;  %v9737_v29 = vpop.permute.xlu0 %9736 }
 0x498   : > { %v7417_v10 = vsel %vm13509_vm6, %v7408_v22, %v7416_v40  ;;  %v9193_v54 = vrot.slane %v9191_v58, 4  ;;  %v9194_v8 = vshll.u32 %v9037_v12, 16  ;;  %v9200_v50 = vshll.u32 %v12884_v27, 16 }
 0x499   : > { %v11850_v20 = vcombine.low %v7407_v17, %v7417_v10  ;;  %v6558_v11 = vrot.slane %v6557_v2, 4  ;;  %v6567_v47 = vor.u32 %v6566_v41, %v6562_v0  ;;  %v9204_v53 = vshrl.u32 %v12884_v27, 16 }
 0x49a   : > { %v9196_v21 = vrot.slane %v9194_v8, 5  ;;  %v9202_v45 = vrot.slane %v9200_v50, 5  ;;  %v9210_v63 = vshll.u32 %v12885_v59, 16  ;;  %v11876_v16 = vrot.slane %v12886_v62, 9  ;;  %v9040_v50 = vld [vmem:[#allocation2 + $0x60] sm:$0xf] }
 0x49b   : > { %v8112_v24 = vsel %vm1416_vm8, %v11850_v20, %v8055_v30  ;;  %v6563_v51 = vsel %vm13103_vm14, %v6558_v11, %v6562_v0  ;;  %v6568_v1 = vrot.slane %v6567_v47, 4  ;;  %v9206_v33 = vrot.slane %v9204_v53, 4  ;;  %v12888_v47 = vld [vmem:[#allocation2 + $0xac] sm:$0xf]  ;;  %v12889_v59 = vld [vmem:[#allocation2 + $0xb0] sm:$0x1] }
 0x49c   : > { %8138 = vst [vmem:[#allocation3 + $0x1e8] sm:$0xff] %v8112_v24  ;;  %v9197_v61 = vor.u32 %v9196_v21, %v9193_v54  ;;  %v9212_v55 = vrot.slane %v9210_v63, 5  ;;  %v8282_v9 = vrot.slane %v12887_v32, 5  ;;  %v8285_v4 = vrot.slane %v8162_v38, 5  ;;  %10965 = vmatprep.mubr.bf16.mxu1 %v8112_v24 }
 0x49d   : > { %v6573_v60 = vsel %vm13103_vm14, %v6568_v1, %v6572_v57  ;;  %v9207_v39 = vor.u32 %v9206_v33, %v9202_v45  ;;  %v7419_v25 = vshrl.u32 %v7045_v42, 16  ;;  %v7422_v37 = vshll.u32 %v7045_v42, 16  ;;  %10966 = vmatmul.mubr.bf16.gmra.mrb[112].mxu1 %v15631_v13  ;;  %v8057_v1 = vpop.permute.xlu0 %8056 }
 0x49e   : > { %v11819_v15 = vcombine.low %v6563_v51, %v6573_v60  ;;  %v9198_v44 = vrot.slane %v9197_v61, 4  ;;  %v8283_v34 = vsel %vm13040_vm13, %v11876_v16, %v8282_v9  ;;  %v8284_v23 = vrot.slane %v8282_v9, 4 }
 0x49f   : > { %v9208_v35 = vrot.slane %v9207_v39, 4  ;;  %v7421_v14 = vrot.slane %v7419_v25, 5  ;;  %v7424_v19 = vrot.slane %v7422_v37, 6  ;;  %v7428_v12 = vshrl.u32 %v7046_v28, 16  ;;  %v8165_v39 = vld [vmem:[#allocation2 + $0x68] sm:$0x1] }
 0x4a0   : > { %v15658_v7 = vsel %vm1416_vm8, %v11819_v15, %v6921_v26  ;;  %v9203_v52 = vsel %vm13103_vm14, %v9198_v44, %v9202_v45  ;;  %v8286_v13 = vsel %vm13040_vm13, %v8284_v23, %v8285_v4  ;;  %v7431_v31 = vshll.u32 %v7046_v28, 16  ;;  %v12891_v15 = vld [vmem:[#allocation2 + $0x68] sm:$0x1] }
 0x4a1   : > { %7003 = vst [vmem:[#allocation3 + $0x208] sm:$0xff] %v15658_v7  ;;  %v9213_v6 = vsel %vm13103_vm14, %v9208_v35, %v9212_v55  ;;  %v11892_v43 = vcombine.low %v8283_v34, %v8286_v13  ;;  %v7425_v3 = vor.u32 %v7424_v19, %v7421_v14  ;;  %v7430_v17 = vrot.slane %v7428_v12, 5  ;;  %v12890_v55 = vld [vmem:[#allocation2 + $0x64] sm:$0xf]  ;;  %v7048_v34 = vld [vmem:[#allocation2 + $0xa8] sm:$0xe]  ;;  %v6923_v14 = vpop.permute.xlu1 %6922 }
 0x4a2   : > { %v11939_v22 = vcombine.low %v9203_v52, %v9213_v6  ;;  %v7433_v40 = vrot.slane %v7431_v31, 6  ;;  %v7438_v58 = vshrl.u32 %v7047_v5, 16  ;;  %v7441_v2 = vshll.u32 %v7047_v5, 16  ;;  %v12892_v19 = vld [vmem:[#allocation2 + $0x60] sm:$0xe] }
 0x4a3   : > { %v15668_v0 = vsel %vm1416_vm8, %v11892_v43, %v8923_v46  ;;  %v7426_v41 = vrot.slane %v7425_v3, 4  ;;  %v6575_v57 = vshrl.u32 %v6232_v49, 16  ;;  %v6578_v10 = vshll.u32 %v6232_v49, 16  ;;  %v12893_v31 = vld [vmem:[#allocation2 + $0x64] sm:$0xf] }
 0x4a4   : > { %v9780_v30 = vsel %vm1416_vm8, %v11939_v22, %v9737_v29  ;;  %v7434_v54 = vor.u32 %v7433_v40, %v7430_v17  ;;  %v7440_v8 = vrot.slane %v7438_v58, 5  ;;  %v7443_v27 = vrot.slane %v7441_v2, 6  ;;  %v7049_v6 = vld [vmem:[#allocation2 + $0xac] sm:$0xf] }
 0x4a5   : > { %v6577_v20 = vrot.slane %v6575_v57, 4  ;;  %v6580_v11 = vrot.slane %v6578_v10, 5  ;;  %v6584_v53 = vshll.u32 %v12888_v47, 16  ;;  %v6588_v38 = vshrl.u32 %v12888_v47, 16  ;;  %11070 = vmatprep.mubr.bf16.mxu0 %v9780_v30  ;;  %v8925_v47 = vpop.permute.xlu1 %8924 }
 0x4a6   : > { %v7435_v26 = vsel %vm13509_vm6, %v7426_v41, %v7434_v54  ;;  %v7436_v21 = vrot.slane %v7434_v54, 4  ;;  %v7444_v45 = vor.u32 %v7443_v27, %v7440_v8  ;;  %v6594_v63 = vshll.u32 %v12889_v59, 16  ;;  %11071 = vmatmul.mubr.bf16.gmra.mrb[116].mxu0 %v15642_v36  ;;  %v7050_v41 = vld [vmem:[#allocation2 + $0xb0] sm:$0x3] }
 0x4a7   : > { %v6581_v62 = vor.u32 %v6580_v11, %v6577_v20  ;;  %v6586_v16 = vrot.slane %v6584_v53, 5  ;;  %v6590_v42 = vrot.slane %v6588_v38, 4  ;;  %v9215_v24 = vshrl.u32 %v9040_v50, 16 }
 0x4a8   : > { %v7445_v51 = vsel %vm13509_vm6, %v7436_v21, %v7444_v45  ;;  %v6596_v33 = vrot.slane %v6594_v63, 5  ;;  %v9218_v61 = vshll.u32 %v9040_v50, 16  ;;  %v9224_v32 = vshll.u32 %v12890_v55, 16  ;;  %v9739_v45 = vpop.permute.xlu0 %9738 }
 0x4a9   : > { %v11851_v9 = vcombine.low %v7435_v26, %v7445_v51  ;;  %v6582_v4 = vrot.slane %v6581_v62, 4  ;;  %v6591_v28 = vor.u32 %v6590_v42, %v6586_v16  ;;  %v9217_v60 = vrot.slane %v9215_v24, 4 }
 0x4aa   : > { %v9220_v25 = vrot.slane %v9218_v61, 5  ;;  %v9226_v37 = vrot.slane %v9224_v32, 5  ;;  %v9228_v36 = vshrl.u32 %v12890_v55, 16  ;;  %v9234_v44 = vshll.u32 %v12891_v15, 16  ;;  %v9043_v32 = vld [vmem:[#allocation2 + $0x6c] sm:$0xf] }
 0x4ab   : > { %v8116_v23 = vsel %vm1416_vm8, %v11851_v9, %v8057_v1  ;;  %v6587_v35 = vsel %vm13103_vm14, %v6582_v4, %v6586_v16  ;;  %v6592_v5 = vrot.slane %v6591_v28, 4  ;;  %v11877_v12 = vrot.slane %v12892_v19, 9  ;;  %v12894_v28 = vld [vmem:[#allocation2 + $0xb8] sm:$0xf] }
 0x4ac   : > { %8139 = vst [vmem:[#allocation3 + $0x210] sm:$0xff] %v8116_v23  ;;  %v9221_v52 = vor.u32 %v9220_v25, %v9217_v60  ;;  %v9230_v13 = vrot.slane %v9228_v36, 4  ;;  %v9236_v46 = vrot.slane %v9234_v44, 5  ;;  %v8289_v49 = vrot.slane %v12893_v31, 5  ;;  %10973 = vmatprep.mubr.bf16.mxu1 %v8116_v23  ;;  %v12895_v23 = vld [vmem:[#allocation2 + $0xbc] sm:$0x1]  ;;  %v8059_v19 = vpop.permute.xlu0 %8058 }
 0x4ad   : > { %v6597_v29 = vsel %vm13103_vm14, %v6592_v5, %v6596_v33  ;;  %v8292_v43 = vrot.slane %v8165_v39, 5  ;;  %v7447_v3 = vshrl.u32 %v7048_v34, 16  ;;  %v7450_v17 = vshll.u32 %v7048_v34, 16  ;;  %10974 = vmatmul.mubr.bf16.gmra.mrb[116].mxu1 %v15658_v7  ;;  %v6235_v7 = vld [vmem:[#allocation2 + $0xb4] sm:$0xf] }
 0x4ae   : > { %v11820_v22 = vcombine.low %v6587_v35, %v6597_v29  ;;  %v9222_v40 = vrot.slane %v9221_v52, 4  ;;  %v9231_v58 = vor.u32 %v9230_v13, %v9226_v37  ;;  %v8290_v2 = vsel %vm13040_vm13, %v11877_v12, %v8289_v49  ;;  %v12896_v13 = vld [vmem:[#allocation2 + $0x70] sm:$0xf] }
 0x4af   : > { %v8291_v57 = vrot.slane %v8289_v49, 4  ;;  %v7449_v10 = vrot.slane %v7447_v3, 5  ;;  %v7452_v30 = vrot.slane %v7450_v17, 6  ;;  %v7456_v54 = vshrl.u32 %v7049_v6, 16 }
 0x4b0   : > { %v15685_v8 = vsel %vm1416_vm8, %v11820_v22, %v6923_v14  ;;  %v9227_v27 = vsel %vm13103_vm14, %v9222_v40, %v9226_v37  ;;  %v9232_v50 = vrot.slane %v9231_v58, 4  ;;  %v7459_v20 = vshll.u32 %v7049_v6, 16  ;;  %v7051_v58 = vld [vmem:[#allocation2 + $0xb4] sm:$0xe] }
 0x4b1   : > { %v8293_v11 = vsel %vm13040_vm13, %v8291_v57, %v8292_v43  ;;  %v7453_v53 = vor.u32 %v7452_v30, %v7449_v10  ;;  %v7458_v38 = vrot.slane %v7456_v54, 5  ;;  %v7466_v26 = vshrl.u32 %v7050_v41, 16  ;;  %v8168_v43 = vld [vmem:[#allocation2 + $0x74] sm:$0x1]  ;;  %v12898_v30 = vld [vmem:[#allocation2 + $0x6c] sm:$0xe] }
 0x4b2   : > { %v9237_v21 = vsel %vm13103_vm14, %v9232_v50, %v9236_v46  ;;  %v11893_v59 = vcombine.low %v8290_v2, %v8293_v11  ;;  %v7461_v63 = vrot.slane %v7459_v20, 6  ;;  %v7469_v62 = vshll.u32 %v7050_v41, 16  ;;  %v6925_v41 = vpop.permute.xlu1 %6924  ;;  %v12897_v57 = vld [vmem:[#allocation2 + $0x74] sm:$0x1] }
 0x4b3   : > { %v11940_v16 = vcombine.low %v9227_v27, %v9237_v21  ;;  %v7454_v42 = vrot.slane %v7453_v53, 4  ;;  %v7468_v24 = vrot.slane %v7466_v26, 5  ;;  %v6599_v51 = vshrl.u32 %v6235_v7, 16 }
 0x4b4   : > { %v15694_v1 = vsel %vm1416_vm8, %v11893_v59, %v8925_v47  ;;  %v7462_v33 = vor.u32 %v7461_v63, %v7458_v38  ;;  %v7471_v61 = vrot.slane %v7469_v62, 6  ;;  %v6602_v55 = vshll.u32 %v6235_v7, 16  ;;  %v12899_v7 = vld [vmem:[#allocation2 + $0x70] sm:$0xf]  ;;  %v7052_v47 = vld [vmem:[#allocation2 + $0xb8] sm:$0xf] }
 0x4b5   : > { %v9784_v9 = vsel %vm1416_vm8, %v11940_v16, %v9739_v45  ;;  %v6601_v4 = vrot.slane %v6599_v51, 4  ;;  %v6608_v60 = vshll.u32 %v12894_v28, 16  ;;  %v6612_v39 = vshrl.u32 %v12894_v28, 16  ;;  %v7053_v16 = vld [vmem:[#allocation2 + $0xbc] sm:$0x3] }
 0x4b6   : > { %v7463_v25 = vsel %vm13509_vm6, %v7454_v42, %v7462_v33  ;;  %v7464_v37 = vrot.slane %v7462_v33, 4  ;;  %v7472_v36 = vor.u32 %v7471_v61, %v7468_v24  ;;  %v6604_v15 = vrot.slane %v6602_v55, 5  ;;  %11078 = vmatprep.mubr.bf16.mxu0 %v9784_v9 }
 0x4b7   : > { %v6610_v44 = vrot.slane %v6608_v60, 5  ;;  %v6614_v34 = vrot.slane %v6612_v39, 4  ;;  %v6618_v35 = vshll.u32 %v12895_v23, 16  ;;  %v9239_v5 = vshrl.u32 %v9043_v32, 16  ;;  %11079 = vmatmul.mubr.bf16.gmra.mrb[120].mxu0 %v15668_v0  ;;  %v9046_v23 = vld [vmem:[#allocation2 + $0x78] sm:$0xf] }
 0x4b8   : > { %v7473_v14 = vsel %vm13509_vm6, %v7464_v37, %v7472_v36  ;;  %v6605_v12 = vor.u32 %v6604_v15, %v6601_v4  ;;  %v9242_v52 = vshll.u32 %v9043_v32, 16  ;;  %v9248_v46 = vshll.u32 %v12896_v13, 16  ;;  %v8927_v4 = vpop.permute.xlu1 %8926  ;;  %v9741_v37 = vpop.permute.xlu0 %9740 }
 0x4b9   : > { %v11852_v31 = vcombine.low %v7463_v25, %v7473_v14  ;;  %v6615_v49 = vor.u32 %v6614_v34, %v6610_v44  ;;  %v6620_v6 = vrot.slane %v6618_v35, 5  ;;  %v9241_v29 = vrot.slane %v9239_v5, 4  ;;  %v8171_v34 = vld [vmem:[#allocation2 + $0x80] sm:$0x1] }
 0x4ba   : > { %v6606_v3 = vrot.slane %v6605_v12, 4  ;;  %v9244_v17 = vrot.slane %v9242_v52, 5  ;;  %v9250_v22 = vrot.slane %v9248_v46, 5  ;;  %v9252_v40 = vshrl.u32 %v12896_v13, 16 }
 0x4bb   : > { %v8120_v0 = vsel %vm1416_vm8, %v11852_v31, %v8059_v19  ;;  %v6616_v2 = vrot.slane %v6615_v49, 4  ;;  %v9258_v10 = vshll.u32 %v12897_v57, 16  ;;  %v11878_v54 = vrot.slane %v12898_v30, 9  ;;  %v12900_v19 = vld [vmem:[#allocation2 + $0x78] sm:$0xe] }
 0x4bc   : > { %v6611_v27 = vsel %vm13103_vm14, %v6606_v3, %v6610_v44  ;;  %v9245_v50 = vor.u32 %v9244_v17, %v9241_v29  ;;  %v9254_v20 = vrot.slane %v9252_v40, 4  ;;  %v8296_v11 = vrot.slane %v12899_v7, 5  ;;  %10981 = vmatprep.mubr.bf16.mxu1 %v8120_v0  ;;  %v12901_v31 = vld [vmem:[#allocation2 + $0x7c] sm:$0xf]  ;;  %v12903_v7 = vld [vmem:[#allocation2 + $0x80] sm:$0x1] }
 0x4bd   : > { %v6621_v53 = vsel %vm13103_vm14, %v6616_v2, %v6620_v6  ;;  %v9260_v38 = vrot.slane %v9258_v10, 5  ;;  %v8299_v26 = vrot.slane %v8168_v43, 5  ;;  %v7475_v21 = vshrl.u32 %v7051_v58, 16  ;;  %10982 = vmatmul.mubr.bf16.gmra.mrb[120].mxu1 %v15685_v8  ;;  %v12902_v57 = vld [vmem:[#allocation2 + $0x7c] sm:$0xf] }
 0x4be   : > { %v11821_v45 = vcombine.low %v6611_v27, %v6621_v53  ;;  %v9246_v59 = vrot.slane %v9245_v50, 4  ;;  %v9255_v63 = vor.u32 %v9254_v20, %v9250_v22  ;;  %v8297_v62 = vsel %vm13040_vm13, %v11878_v54, %v8296_v11  ;;  %v8061_v54 = vpop.permute.xlu0 %8060  ;;  %v8929_v50 = vpop.permute.xlu1 %8928 }
 0x4bf   : > { %v8298_v42 = vrot.slane %v8296_v11, 4  ;;  %v7477_v24 = vrot.slane %v7475_v21, 5  ;;  %v7478_v51 = vshll.u32 %v7051_v58, 16  ;;  %v7484_v33 = vshrl.u32 %v7052_v47, 16 }
 0x4c0   : > { %v15711_v61 = vsel %vm1416_vm8, %v11821_v45, %v6925_v41  ;;  %v9251_v55 = vsel %vm13103_vm14, %v9246_v59, %v9250_v22  ;;  %v9256_v32 = vrot.slane %v9255_v63, 4  ;;  %v7487_v9 = vshll.u32 %v7052_v47, 16  ;;  %v8174_v47 = vld [vmem:[#allocation2 + $0x8c] sm:$0x1]  ;;  %v9049_v45 = vld [vmem:[#allocation2 + $0x84] sm:$0xf] }
 0x4c1   : > { %v8300_v8 = vsel %vm13040_vm13, %v8298_v42, %v8299_v26  ;;  %v7480_v28 = vrot.slane %v7478_v51, 6  ;;  %v7486_v60 = vrot.slane %v7484_v33, 5  ;;  %v7494_v39 = vshrl.u32 %v7053_v16, 16 }
 0x4c2   : > { %v9261_v25 = vsel %vm13103_vm14, %v9256_v32, %v9260_v38  ;;  %v11894_v36 = vcombine.low %v8297_v62, %v8300_v8  ;;  %v7489_v15 = vrot.slane %v7487_v9, 6  ;;  %v7497_v44 = vshll.u32 %v7053_v16, 16  ;;  %v12905_v16 = vld [vmem:[#allocation2 + $0x88] sm:$0xf] }
 0x4c3   : > { %v11941_v35 = vcombine.low %v9251_v55, %v9261_v25  ;;  %v7481_v5 = vor.u32 %v7480_v28, %v7477_v24  ;;  %v7496_v14 = vrot.slane %v7494_v39, 5  ;;  %v11879_v12 = vrot.slane %v12900_v19, 9  ;;  %v12906_v39 = vld [vmem:[#allocation2 + $0x88] sm:$0xf] }
 0x4c4   : > { %v15720_v52 = vsel %vm1416_vm8, %v11894_v36, %v8927_v4  ;;  %v7490_v13 = vor.u32 %v7489_v15, %v7486_v60  ;;  %v7499_v46 = vrot.slane %v7497_v44, 6  ;;  %v8303_v49 = vrot.slane %v12901_v31, 5  ;;  %v8931_v44 = vpop.permute.xlu1 %8930 }
 0x4c5   : > { %v9788_v6 = vsel %vm1416_vm8, %v11941_v35, %v9741_v37  ;;  %v7482_v29 = vrot.slane %v7481_v5, 4  ;;  %v8306_v43 = vrot.slane %v8171_v34, 5  ;;  %v9263_v3 = vshrl.u32 %v9046_v23, 16 }
 0x4c6   : > { %v7492_v17 = vrot.slane %v7490_v13, 4  ;;  %v7500_v22 = vor.u32 %v7499_v46, %v7496_v14  ;;  %v8304_v40 = vsel %vm13040_vm13, %v11879_v12, %v8303_v49  ;;  %v8305_v58 = vrot.slane %v8303_v49, 4  ;;  %11086 = vmatprep.mubr.bf16.mxu0 %v9788_v6  ;;  %v9052_v46 = vld [vmem:[#allocation2 + $0x90] sm:$0xf] }
 0x4c7   : > { %v7491_v0 = vsel %vm13509_vm6, %v7482_v29, %v7490_v13  ;;  %v9265_v2 = vrot.slane %v9263_v3, 4  ;;  %v9266_v41 = vshll.u32 %v9046_v23, 16  ;;  %v9272_v10 = vshll.u32 %v12902_v57, 16  ;;  %11087 = vmatmul.mubr.bf16.gmra.mrb[124].mxu0 %v15694_v1  ;;  %v12904_v1 = vld [vmem:[#allocation2 + $0x84] sm:$0xe] }
 0x4c8   : > { %v7501_v30 = vsel %vm13509_vm6, %v7492_v17, %v7500_v22  ;;  %v8307_v27 = vsel %vm13040_vm13, %v8305_v58, %v8306_v43  ;;  %v9276_v20 = vshrl.u32 %v12902_v57, 16  ;;  %v9282_v11 = vshll.u32 %v12903_v7, 16  ;;  %v12907_v23 = vld [vmem:[#allocation2 + $0x8c] sm:$0x1]  ;;  %v8177_v13 = vld [vmem:[#allocation2 + $0x98] sm:$0x1] }
 0x4c9   : > { %v11853_v53 = vcombine.low %v7491_v0, %v7501_v30  ;;  %v11895_v38 = vcombine.low %v8304_v40, %v8307_v27  ;;  %v9268_v26 = vrot.slane %v9266_v41, 5  ;;  %v9274_v21 = vrot.slane %v9272_v10, 5  ;;  %v12908_v29 = vld [vmem:[#allocation2 + $0x90] sm:$0xe]  ;;  %v12909_v40 = vld [vmem:[#allocation2 + $0x94] sm:$0xf] }
 0x4ca   : > { %v9278_v59 = vrot.slane %v9276_v20, 4  ;;  %v9284_v63 = vrot.slane %v9282_v11, 5  ;;  %v11880_v62 = vrot.slane %v12904_v1, 9  ;;  %v8310_v42 = vrot.slane %v12905_v16, 5  ;;  %v12910_v11 = vld [vmem:[#allocation2 + $0x94] sm:$0xf] }
 0x4cb   : > { %v8124_v24 = vsel %vm1416_vm8, %v11853_v53, %v8061_v54  ;;  %v15734_v51 = vsel %vm1416_vm8, %v11895_v38, %v8929_v50  ;;  %v9269_v33 = vor.u32 %v9268_v26, %v9265_v2  ;;  %v8313_v55 = vrot.slane %v8174_v47, 5  ;;  %v8933_v26 = vpop.permute.xlu1 %8932 }
 0x4cc   : > { %v9279_v32 = vor.u32 %v9278_v59, %v9274_v21  ;;  %v8311_v9 = vsel %vm13040_vm13, %v11880_v62, %v8310_v42  ;;  %v8312_v8 = vrot.slane %v8310_v42, 4  ;;  %v9287_v4 = vshrl.u32 %v9049_v45, 16  ;;  %10989 = vmatprep.mubr.bf16.mxu1 %v8124_v24 }
 0x4cd   : > { %v9270_v28 = vrot.slane %v9269_v33, 4  ;;  %v9290_v60 = vshll.u32 %v9049_v45, 16  ;;  %v9296_v25 = vshll.u32 %v12906_v39, 16  ;;  %v9300_v37 = vshrl.u32 %v12906_v39, 16  ;;  %10990 = vmatmul.mubr.bf16.gmra.mrb[124].mxu1 %v15711_v61  ;;  %v9743_v61 = vpop.permute.xlu0 %9742  ;;  %v12911_v45 = vld [vmem:[#allocation2 + $0x98] sm:$0x1] }
 0x4ce   : > { %v9280_v36 = vrot.slane %v9279_v32, 4  ;;  %v8314_v15 = vsel %vm13040_vm13, %v8312_v8, %v8313_v55  ;;  %v9289_v34 = vrot.slane %v9287_v4, 4  ;;  %v9306_v35 = vshll.u32 %v12907_v23, 16  ;;  %v9055_v33 = vld [vmem:[#allocation2 + $0x9c] sm:$0xf] }
 0x4cf   : > { %v9275_v5 = vsel %vm13103_vm14, %v9270_v28, %v9274_v21  ;;  %v11896_v14 = vcombine.low %v8311_v9, %v8314_v15  ;;  %v9292_v19 = vrot.slane %v9290_v60, 5  ;;  %v9298_v12 = vrot.slane %v9296_v25, 5  ;;  %v12912_v8 = vld [vmem:[#allocation2 + $0x9c] sm:$0xe]  ;;  %v12913_v39 = vld [vmem:[#allocation2 + $0xa0] sm:$0xf] }
 0x4d0   : > { %v9285_v31 = vsel %vm13103_vm14, %v9280_v36, %v9284_v63  ;;  %v9302_v49 = vrot.slane %v9300_v37, 4  ;;  %v9308_v6 = vrot.slane %v9306_v35, 5  ;;  %v11881_v43 = vrot.slane %v12908_v29, 9  ;;  %v8180_v63 = vld [vmem:[#allocation2 + $0xa4] sm:$0x1]  ;;  %v8935_v29 = vpop.permute.xlu1 %8934 }
 0x4d1   : > { %v11942_v3 = vcombine.low %v9275_v5, %v9285_v31  ;;  %v15746_v17 = vsel %vm1416_vm8, %v11896_v14, %v8931_v44  ;;  %v9293_v22 = vor.u32 %v9292_v19, %v9289_v34  ;;  %v8317_v58 = vrot.slane %v12909_v40, 5  ;;  %v9745_v62 = vpop.permute.xlu0 %9744  ;;  %v12914_v5 = vld [vmem:[#allocation2 + $0xa0] sm:$0xf]  ;;  %v8183_v19 = vld [vmem:[#allocation2 + $0xb0] sm:$0x1] }
 0x4d2   : > { %v9303_v0 = vor.u32 %v9302_v49, %v9298_v12  ;;  %v8320_v2 = vrot.slane %v8177_v13, 5  ;;  %v9311_v41 = vshrl.u32 %v9052_v46, 16  ;;  %v9314_v57 = vshll.u32 %v9052_v46, 16  ;;  %v12916_v40 = vld [vmem:[#allocation2 + $0xa8] sm:$0xe] }
 0x4d3   : > { %v9792_v10 = vsel %vm1416_vm8, %v11942_v3, %v9743_v61  ;;  %v9294_v30 = vrot.slane %v9293_v22, 4  ;;  %v8318_v54 = vsel %vm13040_vm13, %v11881_v43, %v8317_v58  ;;  %v8319_v27 = vrot.slane %v8317_v58, 4  ;;  %v12915_v3 = vld [vmem:[#allocation2 + $0xa4] sm:$0x1] }
 0x4d4   : > { %v9304_v50 = vrot.slane %v9303_v0, 4  ;;  %v9313_v20 = vrot.slane %v9311_v41, 4  ;;  %v9316_v7 = vrot.slane %v9314_v57, 5  ;;  %v9320_v47 = vshll.u32 %v12910_v11, 16  ;;  %11094 = vmatprep.mubr.bf16.mxu0 %v9792_v10  ;;  %v9058_v0 = vld [vmem:[#allocation2 + $0xa8] sm:$0xf] }
 0x4d5   : > { %v9299_v53 = vsel %vm13103_vm14, %v9294_v30, %v9298_v12  ;;  %v8321_v38 = vsel %vm13040_vm13, %v8319_v27, %v8320_v2  ;;  %v9324_v21 = vshrl.u32 %v12910_v11, 16  ;;  %v9330_v59 = vshll.u32 %v12911_v45, 16  ;;  %11095 = vmatmul.mubr.bf16.gmra.mrb[128].mxu0 %v15720_v52  ;;  %v15766_v12 = vpop.f32.mrb[64].mxu1  ;;  %v9747_v57 = vpop.permute.xlu0 %9746 }
 0x4d6   : > { %v9309_v1 = vsel %vm13103_vm14, %v9304_v50, %v9308_v6  ;;  %v11897_v16 = vcombine.low %v8318_v54, %v8321_v38  ;;  %v9317_v42 = vor.u32 %v9316_v7, %v9313_v20  ;;  %v9322_v24 = vrot.slane %v9320_v47, 5  ;;  %v15768_v49 = vpop.f32.mrb[65].mxu1  ;;  %v12917_v7 = vld [vmem:[#allocation2 + $0xac] sm:$0xf] }
 0x4d7   : > { %v11943_v55 = vcombine.low %v9299_v53, %v9309_v1  ;;  %v9326_v32 = vrot.slane %v9324_v21, 4  ;;  %v9332_v9 = vrot.slane %v9330_v59, 5  ;;  %v11882_v4 = vrot.slane %v12912_v8, 9  ;;  %v15772_v2 = vpop.f32.mrb[66].mxu1 }
 0x4d8   : > { %v15759_v28 = vsel %vm1416_vm8, %v11897_v16, %v8933_v26  ;;  %v9318_v60 = vrot.slane %v9317_v42, 4  ;;  %v8324_v25 = vrot.slane %v12913_v39, 5  ;;  %v8327_v52 = vrot.slane %v8180_v63, 5  ;;  %v15777_v27 = vpop.f32.mrb[67].mxu1  ;;  %v12918_v42 = vld [vmem:[#allocation2 + $0xac] sm:$0xf] }
 0x4d9   : > { %v9796_v37 = vsel %vm1416_vm8, %v11943_v55, %v9745_v62  ;;  %v9327_v36 = vor.u32 %v9326_v32, %v9322_v24  ;;  %v9335_v15 = vshrl.u32 %v9055_v33, 16  ;;  %v9338_v44 = vshll.u32 %v9055_v33, 16  ;;  %v9061_v33 = vld [vmem:[#allocation2 + $0xb4] sm:$0xf]  ;;  %v8937_v32 = vpop.permute.xlu1 %8936  ;;  %v8186_v39 = vld [vmem:[#allocation2 + $0xbc] sm:$0x1] }
 0x4da   : > { %v9323_v34 = vsel %vm13103_vm14, %v9318_v60, %v9322_v24  ;;  %v8325_v23 = vsel %vm13040_vm13, %v11882_v4, %v8324_v25  ;;  %v8326_v35 = vrot.slane %v8324_v25, 4  ;;  %v9344_v14 = vshll.u32 %v12914_v5, 16  ;;  %11102 = vmatprep.mubr.bf16.mxu0 %v9796_v37  ;;  %v12919_v4 = vld [vmem:[#allocation2 + $0xb0] sm:$0x1] }
 0x4db   : > { %v9328_v13 = vrot.slane %v9327_v36, 4  ;;  %v9337_v46 = vrot.slane %v9335_v15, 4  ;;  %v9340_v31 = vrot.slane %v9338_v44, 5  ;;  %v9348_v61 = vshrl.u32 %v12914_v5, 16  ;;  %v12920_v15 = vld [vmem:[#allocation2 + $0xb4] sm:$0xe] }
 0x4dc   : > { %v8328_v6 = vsel %vm13040_vm13, %v8326_v35, %v8327_v52  ;;  %v9346_v43 = vrot.slane %v9344_v14, 5  ;;  %v9354_v22 = vshll.u32 %v12915_v3, 16  ;;  %v11883_v58 = vrot.slane %v12916_v40, 9  ;;  %v9749_v52 = vpop.permute.xlu0 %9748 }
 0x4dd   : > { %v9333_v41 = vsel %vm13103_vm14, %v9328_v13, %v9332_v9  ;;  %v11898_v10 = vcombine.low %v8325_v23, %v8328_v6  ;;  %v9341_v30 = vor.u32 %v9340_v31, %v9337_v46  ;;  %v9350_v54 = vrot.slane %v9348_v61, 4  ;;  %11103 = vmatmul.mubr.bf16.gmra.mrb[132].mxu0 %v15734_v51 }
 0x4de   : > { %v11944_v50 = vcombine.low %v9323_v34, %v9333_v41  ;;  %v9356_v20 = vrot.slane %v9354_v22, 5  ;;  %v8331_v11 = vrot.slane %v12917_v7, 5  ;;  %v8334_v47 = vrot.slane %v8183_v19, 5  ;;  %v12921_v19 = vld [vmem:[#allocation2 + $0xb8] sm:$0xf] }
 0x4df   : > { %v15780_v53 = vsel %vm1416_vm8, %v11898_v10, %v8935_v29  ;;  %v9342_v38 = vrot.slane %v9341_v30, 4  ;;  %v9351_v26 = vor.u32 %v9350_v54, %v9346_v43  ;;  %v9359_v21 = vshrl.u32 %v9058_v0, 16  ;;  %v12923_v7 = vld [vmem:[#allocation2 + $0xbc] sm:$0x1] }
 0x4e0   : > { %v9800_v45 = vsel %vm1416_vm8, %v11944_v50, %v9747_v57  ;;  %v8332_v59 = vsel %vm13040_vm13, %v11883_v58, %v8331_v11  ;;  %v8333_v63 = vrot.slane %v8331_v11, 4  ;;  %v9362_v51 = vshll.u32 %v9058_v0, 16  ;;  %v12922_v58 = vld [vmem:[#allocation2 + $0xb8] sm:$0xf]  ;;  %v8939_v50 = vpop.permute.xlu1 %8938 }
 0x4e1   : > { %v9347_v1 = vsel %vm13103_vm14, %v9342_v38, %v9346_v43  ;;  %v9352_v62 = vrot.slane %v9351_v26, 4  ;;  %v9361_v16 = vrot.slane %v9359_v21, 4  ;;  %v9368_v24 = vshll.u32 %v12918_v42, 16  ;;  %11110 = vmatprep.mubr.bf16.mxu0 %v9800_v45  ;;  %v9064_v26 = vld [vmem:[#allocation2 + $0xc0] sm:$0xf]  ;;  %v9751_v45 = vpop.permute.xlu0 %9750 }
 0x4e2   : > { %v8335_v55 = vsel %vm13040_vm13, %v8333_v63, %v8334_v47  ;;  %v9364_v9 = vrot.slane %v9362_v51, 5  ;;  %v9372_v8 = vshrl.u32 %v12918_v42, 16  ;;  %v9378_v60 = vshll.u32 %v12919_v4, 16  ;;  %v12924_v47 = vld [vmem:[#allocation2 + $0xc0] sm:$0xe] }
 0x4e3   : > { %v9357_v25 = vsel %vm13103_vm14, %v9352_v62, %v9356_v20  ;;  %v11899_v37 = vcombine.low %v8332_v59, %v8335_v55  ;;  %v9370_v36 = vrot.slane %v9368_v24, 5  ;;  %v11884_v44 = vrot.slane %v12920_v15, 9  ;;  %v12925_v42 = vld [vmem:[#allocation2 + $0xc4] sm:$0xf] }
 0x4e4   : > { %v11945_v34 = vcombine.low %v9347_v1, %v9357_v25  ;;  %v9365_v23 = vor.u32 %v9364_v9, %v9361_v16  ;;  %v9374_v35 = vrot.slane %v9372_v8, 4  ;;  %v9380_v5 = vrot.slane %v9378_v60, 5  ;;  %v15804_v1 = vpop.f32.mrb[68].mxu1 }
 0x4e5   : > { %v15792_v14 = vsel %vm1416_vm8, %v11899_v37, %v8937_v32  ;;  %v8338_v13 = vrot.slane %v12921_v19, 5  ;;  %v8341_v46 = vrot.slane %v8186_v39, 5  ;;  %v9383_v31 = vshrl.u32 %v9061_v33, 16  ;;  %11111 = vmatmul.mubr.bf16.gmra.mrb[136].mxu0 %v15746_v17  ;;  %v8189_v17 = vld [vmem:[#allocation2 + $0xc8] sm:$0x1]  ;;  %v15806_v55 = vpop.f32.mrb[69].mxu1 }
 0x4e6   : > { %v9804_v61 = vsel %vm1416_vm8, %v11945_v34, %v9749_v52  ;;  %v9366_v6 = vrot.slane %v9365_v23, 4  ;;  %v9375_v29 = vor.u32 %v9374_v35, %v9370_v36  ;;  %v9386_v43 = vshll.u32 %v9061_v33, 16  ;;  %v15811_v60 = vpop.f32.mrb[70].mxu1  ;;  %v12926_v35 = vld [vmem:[#allocation2 + $0xc4] sm:$0xf] }
 0x4e7   : > { %v8339_v3 = vsel %vm13040_vm13, %v11884_v44, %v8338_v13  ;;  %v8340_v22 = vrot.slane %v8338_v13, 4  ;;  %v9385_v40 = vrot.slane %v9383_v31, 4  ;;  %v9392_v0 = vshll.u32 %v12922_v58, 16  ;;  %11118 = vmatprep.mubr.bf16.mxu0 %v9804_v61  ;;  %v15817_v15 = vpop.f32.mrb[71].mxu1  ;;  %v8941_v13 = vpop.permute.xlu1 %8940  ;;  %v12927_v61 = vld [vmem:[#allocation2 + $0xc8] sm:$0x1] }
 0x4e8   : > { %v9371_v41 = vsel %vm13103_vm14, %v9366_v6, %v9370_v36  ;;  %v9376_v57 = vrot.slane %v9375_v29, 4  ;;  %v9388_v10 = vrot.slane %v9386_v43, 5  ;;  %v9396_v30 = vshrl.u32 %v12922_v58, 16  ;;  %v9838_v36 = vld [vmem:[#allocation2 + $0x18] sm:$0xe]  ;;  %v9753_v43 = vpop.permute.xlu0 %9752 }
 0x4e9   : > { %v8342_v54 = vsel %vm13040_vm13, %v8340_v22, %v8341_v46  ;;  %v9394_v20 = vrot.slane %v9392_v0, 5  ;;  %v9402_v11 = vshll.u32 %v12923_v7, 16  ;;  %v11885_v38 = vrot.slane %v12924_v47, 9 }
 0x4ea   : > { %v9381_v21 = vsel %vm13103_vm14, %v9376_v57, %v9380_v5  ;;  %v11900_v59 = vcombine.low %v8339_v3, %v8342_v54  ;;  %v9389_v63 = vor.u32 %v9388_v10, %v9385_v40  ;;  %v9398_v51 = vrot.slane %v9396_v30, 4  ;;  %v9840_v10 = vld [vmem:[#allocation2 + $0x20] sm:$0x3] }
 0x4eb   : > { %v11946_v62 = vcombine.low %v9371_v41, %v9381_v21  ;;  %v9404_v16 = vrot.slane %v9402_v11, 5  ;;  %v8345_v24 = vrot.slane %v12925_v42, 5  ;;  %v8348_v33 = vrot.slane %v8189_v17, 5 }
 0x4ec   : > { %v15809_v32 = vsel %vm1416_vm8, %v11900_v59, %v8939_v50  ;;  %v9390_v9 = vrot.slane %v9389_v63, 4  ;;  %v9399_v8 = vor.u32 %v9398_v51, %v9394_v20  ;;  %v9407_v4 = vshrl.u32 %v9064_v26, 16  ;;  %v9841_v50 = vld [vmem:[#allocation2 + $0x24] sm:$0xe]  ;;  %v9842_v59 = vld [vmem:[#allocation2 + $0x28] sm:$0xf] }
 0x4ed   : > { %v9808_v39 = vsel %vm1416_vm8, %v11946_v62, %v9751_v45  ;;  %v8346_v25 = vsel %vm13040_vm13, %v11885_v38, %v8345_v24  ;;  %v8347_v52 = vrot.slane %v8345_v24, 4  ;;  %v9410_v37 = vshll.u32 %v9064_v26, 16  ;;  %11119 = vmatmul.mubr.bf16.gmra.mrb[140].mxu0 %v15759_v28  ;;  %v9839_v28 = vld [vmem:[#allocation2 + $0x1c] sm:$0xf] }
 0x4ee   : > { %v9395_v44 = vsel %vm13103_vm14, %v9390_v9, %v9394_v20  ;;  %v9400_v34 = vrot.slane %v9399_v8, 4  ;;  %v9409_v23 = vrot.slane %v9407_v4, 4  ;;  %v9416_v5 = vshll.u32 %v12926_v35, 16  ;;  %11126 = vmatprep.mubr.bf16.mxu0 %v9808_v39  ;;  %v9843_v9 = vld [vmem:[#allocation2 + $0x2c] sm:$0x3]  ;;  %v9755_v39 = vpop.permute.xlu0 %9754 }
 0x4ef   : > { %v8349_v19 = vsel %vm13040_vm13, %v8347_v52, %v8348_v33  ;;  %v9412_v46 = vrot.slane %v9410_v37, 5  ;;  %v9420_v31 = vshrl.u32 %v12926_v35, 16  ;;  %v9426_v6 = vshll.u32 %v12927_v61, 16  ;;  %v9844_v35 = vld [vmem:[#allocation2 + $0x30] sm:$0xe] }
 0x4f0   : > { %v9405_v29 = vsel %vm13103_vm14, %v9400_v34, %v9404_v16  ;;  %v11901_v3 = vcombine.low %v8346_v25, %v8349_v19  ;;  %v9418_v22 = vrot.slane %v9416_v5, 5  ;;  %v9887_v40 = vshrl.u32 %v9838_v36, 16 }
 0x4f1   : > { %v11947_v58 = vcombine.low %v9395_v44, %v9405_v29  ;;  %v9413_v0 = vor.u32 %v9412_v46, %v9409_v23  ;;  %v9422_v41 = vrot.slane %v9420_v31, 4  ;;  %v9428_v57 = vrot.slane %v9426_v6, 5 }
 0x4f2   : > { %v15826_v48 = vsel %vm1416_vm8, %v11901_v3, %v8941_v13  ;;  %v9889_v30 = vrot.slane %v9887_v40, 5  ;;  %v9890_v17 = vshll.u32 %v9838_v36, 16  ;;  %v9896_v54 = vshrl.u32 %v9839_v28, 16  ;;  %v15834_v36 = vpop.f32.mrb[72].mxu1  ;;  %v9845_v3 = vld [vmem:[#allocation2 + $0x34] sm:$0xf] }
 0x4f3   : > { %v9812_v20 = vsel %vm1416_vm8, %v11947_v58, %v9753_v43  ;;  %v9414_v7 = vrot.slane %v9413_v0, 4  ;;  %v9423_v11 = vor.u32 %v9422_v41, %v9418_v22  ;;  %v9899_v47 = vshll.u32 %v9839_v28, 16  ;;  %v15836_v5 = vpop.f32.mrb[73].mxu1  ;;  %v9846_v41 = vld [vmem:[#allocation2 + $0x38] sm:$0x3] }
 0x4f4   : > { %v9892_v38 = vrot.slane %v9890_v17, 6  ;;  %v9898_v26 = vrot.slane %v9896_v54, 5  ;;  %v9906_v21 = vshrl.u32 %v9840_v10, 16  ;;  %v9909_v45 = vshll.u32 %v9840_v10, 16  ;;  %v15838_v61 = vpop.f32.mrb[74].mxu1 }
 0x4f5   : > { %v9419_v63 = vsel %vm13103_vm14, %v9414_v7, %v9418_v22  ;;  %v9424_v51 = vrot.slane %v9423_v11, 4  ;;  %v9901_v62 = vrot.slane %v9899_v47, 6  ;;  %11127 = vmatmul.mubr.bf16.gmra.mrb[144].mxu0 %v15780_v53  ;;  %v9915_v16 = vshrl.u32 %v9841_v50, 16  ;;  %v15843_v22 = vpop.f32.mrb[75].mxu1  ;;  %v9847_v47 = vld [vmem:[#allocation2 + $0x3c] sm:$0xe] }
 0x4f6   : > { %v9893_v42 = vor.u32 %v9892_v38, %v9889_v30  ;;  %v9908_v24 = vrot.slane %v9906_v21, 5  ;;  %v9911_v33 = vrot.slane %v9909_v45, 6  ;;  %v9918_v8 = vshll.u32 %v9841_v50, 16  ;;  %11134 = vmatprep.mubr.bf16.mxu0 %v9812_v20 }
 0x4f7   : > { %v9429_v4 = vsel %vm13103_vm14, %v9424_v51, %v9428_v57  ;;  %v9902_v25 = vor.u32 %v9901_v62, %v9898_v26  ;;  %v9917_v52 = vrot.slane %v9915_v16, 5  ;;  %v9924_v37 = vshrl.u32 %v9842_v59, 16 }
 0x4f8   : > { %v11948_v44 = vcombine.low %v9419_v63, %v9429_v4  ;;  %v9894_v34 = vrot.slane %v9893_v42, 4  ;;  %v9912_v23 = vor.u32 %v9911_v33, %v9908_v24  ;;  %v9920_v53 = vrot.slane %v9918_v8, 6  ;;  %v9850_v8 = vld [vmem:[#allocation2 + $0x48] sm:$0xe] }
 0x4f9   : > { %v9904_v19 = vrot.slane %v9902_v25, 4  ;;  %v9926_v13 = vrot.slane %v9924_v37, 5  ;;  %v9927_v46 = vshll.u32 %v9842_v59, 16  ;;  %v9934_v31 = vshrl.u32 %v9843_v9, 16  ;;  %v9848_v59 = vld [vmem:[#allocation2 + $0x40] sm:$0xf] }
 0x4fa   : > { %v9816_v6 = vsel %vm1416_vm8, %v11948_v44, %v9755_v39  ;;  %v9903_v28 = vsel %vm13509_vm6, %v9894_v34, %v9902_v25  ;;  %v9921_v29 = vor.u32 %v9920_v53, %v9917_v52  ;;  %v9937_v43 = vshll.u32 %v9843_v9, 16  ;;  %v15851_v42 = vpop.f32.mrb[76].mxu1  ;;  %v9849_v52 = vld [vmem:[#allocation2 + $0x44] sm:$0x3] }
 0x4fb   : > { %v9913_v40 = vsel %vm13509_vm6, %v9904_v19, %v9912_v23  ;;  %v9929_v58 = vrot.slane %v9927_v46, 6  ;;  %v9936_v0 = vrot.slane %v9934_v31, 5  ;;  %v9943_v57 = vshrl.u32 %v9844_v35, 16  ;;  %v15853_v4 = vpop.f32.mrb[77].mxu1 }
 0x4fc   : > { %v11966_v10 = vcombine.low %v9903_v28, %v9913_v40  ;;  %v9922_v30 = vrot.slane %v9921_v29, 4  ;;  %v9939_v17 = vrot.slane %v9937_v43, 6  ;;  %v9946_v54 = vshll.u32 %v9844_v35, 16  ;;  %v15857_v34 = vpop.f32.mrb[78].mxu1  ;;  %v9851_v40 = vld [vmem:[#allocation2 + $0x4c] sm:$0xf] }
 0x4fd   : > { %v9930_v50 = vor.u32 %v9929_v58, %v9926_v13  ;;  %v9945_v20 = vrot.slane %v9943_v57, 5  ;;  %v9952_v7 = vshrl.u32 %v9845_v3, 16  ;;  %v9955_v11 = vshll.u32 %v9845_v3, 16  ;;  %11135 = vmatmul.mubr.bf16.gmra.mrb[148].mxu0 %v15792_v14  ;;  %v15859_v13 = vpop.f32.mrb[79].mxu1 }
 0x4fe   : > { %10398 = vst.msk [vmem:[#allocation3 + $0x20] sm:$0xff] %vm1416_vm8, %v11966_v10  ;;  %v9940_v38 = vor.u32 %v9939_v17, %v9936_v0  ;;  %v9948_v26 = vrot.slane %v9946_v54, 6  ;;  %v9962_v21 = vshrl.u32 %v9846_v41, 16  ;;  %v9965_v45 = vshll.u32 %v9846_v41, 16  ;;  %11142 = vmatprep.mubr.bf16.mxu0 %v9816_v6 }
 0x4ff   : > { %v9931_v63 = vsel %vm13509_vm6, %v9922_v30, %v9930_v50  ;;  %v9932_v51 = vrot.slane %v9930_v50, 4  ;;  %v9954_v62 = vrot.slane %v9952_v7, 5  ;;  %v9957_v16 = vrot.slane %v9955_v11, 6  ;;  %v9852_v30 = vld [vmem:[#allocation2 + $0x50] sm:$0x3] }
 0x500   : > { %v9949_v24 = vor.u32 %v9948_v26, %v9945_v20  ;;  %v9964_v33 = vrot.slane %v9962_v21, 5  ;;  %v9967_v14 = vrot.slane %v9965_v45, 6  ;;  %v9971_v9 = vshrl.u32 %v9847_v47, 16  ;;  %v9067_v21 = vld [vmem:[#allocation2 + $0xcc] sm:$0xf] }
 0x501   : > { %v9941_v39 = vsel %vm13509_vm6, %v9932_v51, %v9940_v38  ;;  %v9958_v25 = vor.u32 %v9957_v16, %v9954_v62  ;;  %v9974_v37 = vshll.u32 %v9847_v47, 16  ;;  %v9980_v44 = vshrl.u32 %v9848_v59, 16  ;;  %v15868_v45 = vpop.f32.mrb[80].mxu1 }
 0x502   : > { %v11967_v23 = vcombine.low %v9931_v63, %v9941_v39  ;;  %v9950_v53 = vrot.slane %v9949_v24, 4  ;;  %v9968_v35 = vor.u32 %v9967_v14, %v9964_v33  ;;  %v9973_v19 = vrot.slane %v9971_v9, 5 }
 0x503   : > { %v9960_v46 = vrot.slane %v9958_v25, 4  ;;  %v9976_v31 = vrot.slane %v9974_v37, 6  ;;  %v9982_v6 = vrot.slane %v9980_v44, 5  ;;  %v9983_v28 = vshll.u32 %v9848_v59, 16 }
 0x504   : > { %10399 = vst.msk [vmem:[#allocation3 + $0x48] sm:$0xff] %vm1416_vm8, %v11967_v23  ;;  %v9959_v29 = vsel %vm13509_vm6, %v9950_v53, %v9958_v25  ;;  %v9990_v43 = vshrl.u32 %v9849_v52, 16  ;;  %v9993_v3 = vshll.u32 %v9849_v52, 16  ;;  %v9999_v58 = vshrl.u32 %v9850_v8, 16 }
 0x505   : > { %v10418_v0 = vld [vmem:[#allocation3 + $0x20] sm:$0xff]  ;;  %v9969_v41 = vsel %vm13509_vm6, %v9960_v46, %v9968_v35  ;;  %v9977_v57 = vor.u32 %v9976_v31, %v9973_v19  ;;  %v9985_v10 = vrot.slane %v9983_v28, 6  ;;  %v10002_v17 = vshll.u32 %v9850_v8, 16  ;;  %11143 = vmatmul.mubr.bf16.gmra.mrb[152].mxu0 %v15809_v32  ;;  %v15871_v32 = vpop.f32.mrb[81].mxu1  ;;  %v12928_v19 = vld [vmem:[#allocation2 + $0xd0] sm:$0xf] }
 0x506   : > { %12639 = vmatprep.mubr.msk.bf16.mxu1 %vm1416_vm8, %v10418_v0  ;;  %v11968_v54 = vcombine.low %v9959_v29, %v9969_v41  ;;  %v9992_v50 = vrot.slane %v9990_v43, 5  ;;  %v9995_v20 = vrot.slane %v9993_v3, 6  ;;  %v10001_v7 = vrot.slane %v9999_v58, 5  ;;  %v15875_v9 = vpop.f32.mrb[82].mxu1  ;;  %v9853_v31 = vld [vmem:[#allocation2 + $0x54] sm:$0xe] }
 0x507   : > { %v9978_v11 = vrot.slane %v9977_v57, 4  ;;  %v9986_v47 = vor.u32 %v9985_v10, %v9982_v6  ;;  %v10004_v38 = vrot.slane %v10002_v17, 6  ;;  %v10008_v26 = vshrl.u32 %v9851_v40, 16  ;;  %v15877_v37 = vpop.f32.mrb[83].mxu1  ;;  %v9854_v3 = vld [vmem:[#allocation2 + $0x58] sm:$0xf] }
 0x508   : > { %10400 = vst.msk [vmem:[#allocation3 + $0x70] sm:$0xff] %vm1416_vm8, %v11968_v54  ;;  %v9996_v59 = vor.u32 %v9995_v20, %v9992_v50  ;;  %v10011_v63 = vshll.u32 %v9851_v40, 16  ;;  %v10018_v51 = vshrl.u32 %v9852_v30, 16  ;;  %v10021_v62 = vshll.u32 %v9852_v30, 16  ;;  %v12929_v41 = vld [vmem:[#allocation2 + $0xd4] sm:$0x1] }
 0x509   : > { %v9987_v16 = vsel %vm13509_vm6, %v9978_v11, %v9986_v47  ;;  %v9988_v24 = vrot.slane %v9986_v47, 4  ;;  %v10005_v33 = vor.u32 %v10004_v38, %v10001_v7  ;;  %v10010_v14 = vrot.slane %v10008_v26, 5  ;;  %v9855_v47 = vld [vmem:[#allocation2 + $0x5c] sm:$0x3] }
 0x50a   : > { %v10013_v8 = vrot.slane %v10011_v63, 6  ;;  %v10020_v39 = vrot.slane %v10018_v51, 5  ;;  %v10023_v25 = vrot.slane %v10021_v62, 6  ;;  %v9431_v52 = vshrl.u32 %v9067_v21, 16  ;;  %v9856_v51 = vld [vmem:[#allocation2 + $0x60] sm:$0xe] }
 0x50b   : > { %v10423_v44 = vld [vmem:[#allocation3 + $0x48] sm:$0xff]  ;;  %v9997_v23 = vsel %vm13509_vm6, %v9988_v24, %v9996_v59  ;;  %v10006_v53 = vrot.slane %v10005_v33, 4  ;;  %v9434_v35 = vshll.u32 %v9067_v21, 16  ;;  %v9440_v46 = vshll.u32 %v12928_v19, 16  ;;  %v15888_v62 = vpop.f32.mrb[84].mxu1 }
 0x50c   : > { %12640 = vmatmul.mubr.msk.bf16.vlgmr.msra.gmra.mrb[128].mxu1 %vm1416_vm8, %v10423_v44  ;;  %v11969_v6 = vcombine.low %v9987_v16, %v9997_v23  ;;  %v10014_v28 = vor.u32 %v10013_v8, %v10010_v14  ;;  %v10024_v29 = vor.u32 %v10023_v25, %v10020_v39  ;;  %v9433_v43 = vrot.slane %v9431_v52, 4  ;;  %v15890_v8 = vpop.f32.mrb[85].mxu1  ;;  %v9857_v23 = vld [vmem:[#allocation2 + $0x64] sm:$0xf] }
 0x50d   : > { %v9436_v40 = vrot.slane %v9434_v35, 5  ;;  %v9442_v58 = vrot.slane %v9440_v46, 5  ;;  %v9444_v0 = vshrl.u32 %v12928_v19, 16  ;;  %v9450_v57 = vshll.u32 %v12929_v41, 16 }
 0x50e   : > { %10401 = vst.msk [vmem:[#allocation3 + $0x98] sm:$0xff] %vm1416_vm8, %v11969_v6  ;;  %v10015_v10 = vsel %vm13509_vm6, %v10006_v53, %v10014_v28  ;;  %v10016_v30 = vrot.slane %v10014_v28, 4  ;;  %v10027_v17 = vshrl.u32 %v9853_v31, 16  ;;  %v10030_v54 = vshll.u32 %v9853_v31, 16  ;;  %v15892_v53 = vpop.f32.mrb[86].mxu1 }
 0x50f   : > { %v10428_v50 = vld [vmem:[#allocation3 + $0x70] sm:$0xff]  ;;  %v9437_v20 = vor.u32 %v9436_v40, %v9433_v43  ;;  %v9446_v7 = vrot.slane %v9444_v0, 4  ;;  %v9452_v11 = vrot.slane %v9450_v57, 5  ;;  %v10036_v38 = vshrl.u32 %v9854_v3, 16  ;;  %v15897_v6 = vpop.f32.mrb[87].mxu1  ;;  %v9757_v57 = vpop.permute.xlu0 %9756 }
 0x510   : > { %12643 = vmatprep.mubr.msk.bf16.mxu1 %vm1416_vm8, %v10428_v50  ;;  %v10025_v26 = vsel %vm13509_vm6, %v10016_v30, %v10024_v29  ;;  %v10029_v21 = vrot.slane %v10027_v17, 5  ;;  %v10032_v59 = vrot.slane %v10030_v54, 6  ;;  %v10039_v63 = vshll.u32 %v9854_v3, 16  ;;  %v9858_v40 = vld [vmem:[#allocation2 + $0x68] sm:$0x3] }
 0x511   : > { %v11970_v16 = vcombine.low %v10015_v10, %v10025_v26  ;;  %v9438_v24 = vrot.slane %v9437_v20, 4  ;;  %v9447_v33 = vor.u32 %v9446_v7, %v9442_v58  ;;  %v10038_v14 = vrot.slane %v10036_v38, 5  ;;  %v9859_v54 = vld [vmem:[#allocation2 + $0x6c] sm:$0xe] }
 0x512   : > { %v10033_v39 = vor.u32 %v10032_v59, %v10029_v21  ;;  %v10041_v25 = vrot.slane %v10039_v63, 6  ;;  %v10046_v52 = vshrl.u32 %v9855_v47, 16  ;;  %v10049_v44 = vshll.u32 %v9855_v47, 16  ;;  %v9860_v59 = vld [vmem:[#allocation2 + $0x70] sm:$0xf] }
 0x513   : > { %10402 = vst.msk [vmem:[#allocation3 + $0xc0] sm:$0xff] %vm1416_vm8, %v11970_v16  ;;  %v9443_v35 = vsel %vm13103_vm14, %v9438_v24, %v9442_v58  ;;  %v9448_v19 = vrot.slane %v9447_v33, 4  ;;  %v10055_v46 = vshrl.u32 %v9856_v51, 16  ;;  %v10058_v31 = vshll.u32 %v9856_v51, 16  ;;  %v9861_v51 = vld [vmem:[#allocation2 + $0x74] sm:$0x3] }
 0x514   : > { %v10034_v28 = vrot.slane %v10033_v39, 4  ;;  %v10042_v29 = vor.u32 %v10041_v25, %v10038_v14  ;;  %v10048_v43 = vrot.slane %v10046_v52, 5  ;;  %v10051_v3 = vrot.slane %v10049_v44, 6  ;;  %v9862_v25 = vld [vmem:[#allocation2 + $0x78] sm:$0xe] }
 0x515   : > { %v10433_v0 = vld [vmem:[#allocation3 + $0x98] sm:$0xff]  ;;  %v9453_v41 = vsel %vm13103_vm14, %v9448_v19, %v9452_v11  ;;  %v10057_v10 = vrot.slane %v10055_v46, 5  ;;  %v10060_v30 = vrot.slane %v10058_v31, 6  ;;  %v10064_v17 = vshrl.u32 %v9857_v23, 16  ;;  %v15908_v46 = vpop.f32.mrb[88].mxu1 }
 0x516   : > { %12644 = vmatmul.mubr.msk.bf16.gmra.mrb[132].mxu1 %vm1416_vm8, %v10433_v0  ;;  %v11949_v58 = vcombine.low %v9443_v35, %v9453_v41  ;;  %v10043_v50 = vsel %vm13509_vm6, %v10034_v28, %v10042_v29  ;;  %v10044_v20 = vrot.slane %v10042_v29, 4  ;;  %v10052_v7 = vor.u32 %v10051_v3, %v10048_v43  ;;  %v15912_v3 = vpop.f32.mrb[89].mxu1 }
 0x517   : > { %v10061_v47 = vor.u32 %v10060_v30, %v10057_v10  ;;  %v10066_v38 = vrot.slane %v10064_v17, 5  ;;  %v10067_v26 = vshll.u32 %v9857_v23, 16  ;;  %v10074_v21 = vshrl.u32 %v9858_v40, 16  ;;  %v15914_v10 = vpop.f32.mrb[90].mxu1 }
 0x518   : > { %v9820_v18 = vsel %vm1416_vm8, %v11949_v58, %v9757_v57  ;;  %v10053_v11 = vsel %vm13509_vm6, %v10044_v20, %v10052_v7  ;;  %v10077_v63 = vshll.u32 %v9858_v40, 16  ;;  %v10083_v16 = vshrl.u32 %v9859_v54, 16  ;;  %v9863_v57 = vld [vmem:[#allocation2 + $0x7c] sm:$0xf] }
 0x519   : > { %v11971_v24 = vcombine.low %v10043_v50, %v10053_v11  ;;  %v10062_v33 = vrot.slane %v10061_v47, 4  ;;  %v10069_v14 = vrot.slane %v10067_v26, 6  ;;  %v10076_v39 = vrot.slane %v10074_v21, 5  ;;  %11150 = vmatprep.mubr.bf16.mxu0 %v9820_v18  ;;  %v15918_v50 = vpop.f32.mrb[91].mxu1  ;;  %v9864_v47 = vld [vmem:[#allocation2 + $0x80] sm:$0x3] }
 0x51a   : > { %v10438_v52 = vld [vmem:[#allocation3 + $0xc0] sm:$0xff]  ;;  %v10079_v44 = vrot.slane %v10077_v63, 6  ;;  %11151 = vmatmul.mubr.bf16.gmra.mrb[156].mxu0 %v15826_v48  ;;  %v10085_v23 = vrot.slane %v10083_v16, 5  ;;  %v10086_v35 = vshll.u32 %v9859_v54, 16  ;;  %v10092_v19 = vshrl.u32 %v9860_v59, 16 }
 0x51b   : > { %12647 = vmatprep.mubr.msk.bf16.mxu1 %vm1416_vm8, %v10438_v52  ;;  %10403 = vst.msk [vmem:[#allocation3 + $0xe8] sm:$0xff] %vm1416_vm8, %v11971_v24  ;;  %v10070_v31 = vor.u32 %v10069_v14, %v10066_v38  ;;  %v10095_v28 = vshll.u32 %v9860_v59, 16  ;;  %v10102_v29 = vshrl.u32 %v9861_v51, 16  ;;  %v10105_v43 = vshll.u32 %v9861_v51, 16  ;;  %v9865_v63 = vld [vmem:[#allocation2 + $0x84] sm:$0xe] }
 0x51c   : > { %v10080_v40 = vor.u32 %v10079_v44, %v10076_v39  ;;  %v10088_v0 = vrot.slane %v10086_v35, 6  ;;  %v10094_v41 = vrot.slane %v10092_v19, 5  ;;  %v10111_v48 = vshrl.u32 %v9862_v25, 16 }
 0x51d   : > { %v10071_v30 = vsel %vm13509_vm6, %v10062_v33, %v10070_v31  ;;  %v10072_v17 = vrot.slane %v10070_v31, 4  ;;  %v10097_v54 = vrot.slane %v10095_v28, 6  ;;  %v10104_v58 = vrot.slane %v10102_v29, 5  ;;  %v9866_v31 = vld [vmem:[#allocation2 + $0x88] sm:$0xf]  ;;  %v15925_v29 = vpop.f32.mrb[92].mxu1 }
 0x51e   : > { %v10089_v20 = vor.u32 %v10088_v0, %v10085_v23  ;;  %v10107_v7 = vrot.slane %v10105_v43, 6  ;;  %v10113_v38 = vrot.slane %v10111_v48, 5  ;;  %v10114_v26 = vshll.u32 %v9862_v25, 16  ;;  %v15930_v48 = vpop.f32.mrb[93].mxu1 }
 0x51f   : > { %v10081_v21 = vsel %vm13509_vm6, %v10072_v17, %v10080_v40  ;;  %v10098_v59 = vor.u32 %v10097_v54, %v10094_v41  ;;  %v10120_v18 = vshrl.u32 %v9863_v57, 16  ;;  %v10123_v11 = vshll.u32 %v9863_v57, 16  ;;  %v9867_v41 = vld [vmem:[#allocation2 + $0x8c] sm:$0x3]  ;;  %16479 = vst [vmem:[#allocation11_spill] sm:$0xff] %v15930_v48 }
 0x520   : > { %v11972_v51 = vcombine.low %v10071_v30, %v10081_v21  ;;  %v10090_v16 = vrot.slane %v10089_v20, 4  ;;  %v10108_v24 = vor.u32 %v10107_v7, %v10104_v58  ;;  %v10116_v33 = vrot.slane %v10114_v26, 6  ;;  %v9868_v20 = vld [vmem:[#allocation2 + $0x90] sm:$0xe]  ;;  %v15932_v7 = vpop.f32.mrb[94].mxu1 }
 0x521   : > { %v10100_v14 = vrot.slane %v10098_v59, 4  ;;  %v10122_v39 = vrot.slane %v10120_v18, 5  ;;  %v10125_v52 = vrot.slane %v10123_v11, 6  ;;  %v10130_v44 = vshrl.u32 %v9864_v47, 16  ;;  %16480 = vst [vmem:[#allocation12_spill] sm:$0xff] %v15932_v7 }
 0x522   : > { %v10443_v23 = vld [vmem:[#allocation3 + $0xe8] sm:$0xff]  ;;  %10404 = vst.msk [vmem:[#allocation3 + $0x110] sm:$0xff] %vm1416_vm8, %v11972_v51  ;;  %v10099_v25 = vsel %vm13509_vm6, %v10090_v16, %v10098_v59  ;;  %v10117_v35 = vor.u32 %v10116_v33, %v10113_v38  ;;  %v10133_v19 = vshll.u32 %v9864_v47, 16  ;;  %v10139_v28 = vshrl.u32 %v9865_v63, 16  ;;  %v15934_v59 = vpop.f32.mrb[95].mxu1 }
 0x523   : > { %12648 = vmatmul.mubr.msk.bf16.gmra.mrb[136].mxu1 %vm1416_vm8, %v10443_v23  ;;  %v10109_v43 = vsel %vm13509_vm6, %v10100_v14, %v10108_v24  ;;  %v10126_v40 = vor.u32 %v10125_v52, %v10122_v39  ;;  %v10132_v0 = vrot.slane %v10130_v44, 5  ;;  %v10142_v57 = vshll.u32 %v9865_v63, 16  ;;  %16481 = vst [vmem:[#allocation13_spill] sm:$0xff] %v15934_v59  ;;  %v9869_v14 = vld [vmem:[#allocation2 + $0x94] sm:$0xf] }
 0x524   : > { %v11973_v30 = vcombine.low %v10099_v25, %v10109_v43  ;;  %v10118_v17 = vrot.slane %v10117_v35, 4  ;;  %v10135_v54 = vrot.slane %v10133_v19, 6  ;;  %v10141_v58 = vrot.slane %v10139_v28, 5  ;;  %v9870_v25 = vld [vmem:[#allocation2 + $0x98] sm:$0x3] }
 0x525   : > { %v10128_v47 = vrot.slane %v10126_v40, 4  ;;  %v10144_v38 = vrot.slane %v10142_v57, 6  ;;  %v10148_v26 = vshrl.u32 %v9866_v31, 16  ;;  %v10151_v21 = vshll.u32 %v9866_v31, 16  ;;  %v15941_v57 = vpop.f32.mrb[96].mxu0 }
 0x526   : > { %10405 = vst.msk [vmem:[#allocation3 + $0x138] sm:$0xff] %vm1416_vm8, %v11973_v30  ;;  %v10127_v18 = vsel %vm13509_vm6, %v10118_v17, %v10126_v40  ;;  %v10136_v11 = vor.u32 %v10135_v54, %v10132_v0  ;;  %v10158_v63 = vshrl.u32 %v9867_v41, 16  ;;  %v10161_v51 = vshll.u32 %v9867_v41, 16  ;;  %v9871_v0 = vld [vmem:[#allocation2 + $0x9c] sm:$0xe] }
 0x527   : > { %v10145_v16 = vor.u32 %v10144_v38, %v10141_v58  ;;  %v10150_v24 = vrot.slane %v10148_v26, 5  ;;  %v10153_v33 = vrot.slane %v10151_v21, 6  ;;  %v10167_v39 = vshrl.u32 %v9868_v20, 16  ;;  %v15944_v58 = vpop.f32.mrb[97].mxu0 }
 0x528   : > { %v10137_v52 = vsel %vm13509_vm6, %v10128_v47, %v10136_v11  ;;  %v10160_v44 = vrot.slane %v10158_v63, 5  ;;  %v10163_v23 = vrot.slane %v10161_v51, 6  ;;  %v10170_v35 = vshll.u32 %v9868_v20, 16  ;;  %v15949_v21 = vpop.f32.mrb[98].mxu0  ;;  %v9872_v51 = vld [vmem:[#allocation2 + $0xa0] sm:$0xf] }
 0x529   : > { %v10448_v19 = vld [vmem:[#allocation3 + $0x110] sm:$0xff]  ;;  %v11974_v31 = vcombine.low %v10127_v18, %v10137_v52  ;;  %v10146_v28 = vrot.slane %v10145_v16, 4  ;;  %v10154_v43 = vor.u32 %v10153_v33, %v10150_v24  ;;  %v10169_v40 = vrot.slane %v10167_v39, 5  ;;  %v15951_v24 = vpop.f32.mrb[99].mxu0 }
 0x52a   : > { %12651 = vmatprep.mubr.msk.bf16.mxu1 %vm1416_vm8, %v10448_v19  ;;  %v10164_v41 = vor.u32 %v10163_v23, %v10160_v44  ;;  %v10172_v30 = vrot.slane %v10170_v35, 6  ;;  %v10176_v17 = vshrl.u32 %v9869_v14, 16  ;;  %v10179_v54 = vshll.u32 %v9869_v14, 16  ;;  %v9873_v44 = vld [vmem:[#allocation2 + $0xa4] sm:$0x3] }
 0x52b   : > { %10406 = vst.msk [vmem:[#allocation3 + $0x160] sm:$0xff] %vm1416_vm8, %v11974_v31  ;;  %v10155_v20 = vsel %vm13509_vm6, %v10146_v28, %v10154_v43  ;;  %v10156_v47 = vrot.slane %v10154_v43, 4  ;;  %v10186_v38 = vshrl.u32 %v9870_v25, 16  ;;  %v10189_v26 = vshll.u32 %v9870_v25, 16  ;;  %v9874_v28 = vld [vmem:[#allocation2 + $0xa8] sm:$0xe] }
 0x52c   : > { %v10173_v18 = vor.u32 %v10172_v30, %v10169_v40  ;;  %v10178_v11 = vrot.slane %v10176_v17, 5  ;;  %v10181_v63 = vrot.slane %v10179_v54, 6  ;;  %v10195_v16 = vshrl.u32 %v9871_v0, 16 }
 0x52d   : > { %v10453_v33 = vld [vmem:[#allocation3 + $0x138] sm:$0xff]  ;;  %v10165_v14 = vsel %vm13509_vm6, %v10156_v47, %v10164_v41  ;;  %v10188_v39 = vrot.slane %v10186_v38, 5  ;;  %v10191_v52 = vrot.slane %v10189_v26, 6  ;;  %v10198_v23 = vshll.u32 %v9871_v0, 16  ;;  %v9875_v0 = vld [vmem:[#allocation2 + $0xac] sm:$0xf] }
 0x52e   : > { %12652 = vmatmul.mubr.msk.bf16.gmra.mrb[140].mxu1 %vm1416_vm8, %v10453_v33  ;;  %v11975_v25 = vcombine.low %v10155_v20, %v10165_v14  ;;  %v10174_v35 = vrot.slane %v10173_v18, 4  ;;  %v10182_v19 = vor.u32 %v10181_v63, %v10178_v11  ;;  %v10197_v31 = vrot.slane %v10195_v16, 5  ;;  %v9876_v18 = vld [vmem:[#allocation2 + $0xb0] sm:$0x3]  ;;  %v15959_v63 = vpop.f32.mrb[96].mxu1 }
 0x52f   : > { %v10192_v43 = vor.u32 %v10191_v52, %v10188_v39  ;;  %v10200_v40 = vrot.slane %v10198_v23, 6  ;;  %v10204_v30 = vshrl.u32 %v9872_v51, 16  ;;  %v10207_v17 = vshll.u32 %v9872_v51, 16  ;;  %16482 = vst [vmem:[#allocation14_spill] sm:$0xff] %v15959_v63  ;;  %v15963_v23 = vpop.f32.mrb[97].mxu1 }
 0x530   : > { %10407 = vst.msk [vmem:[#allocation3 + $0x188] sm:$0xff] %vm1416_vm8, %v11975_v25  ;;  %v10183_v41 = vsel %vm13509_vm6, %v10174_v35, %v10182_v19  ;;  %v10184_v54 = vrot.slane %v10182_v19, 4  ;;  %v10214_v47 = vshrl.u32 %v9873_v44, 16  ;;  %v10217_v38 = vshll.u32 %v9873_v44, 16  ;;  %16483 = vst [vmem:[#allocation15_spill] sm:$0xff] %v15963_v23 }
 0x531   : > { %v10201_v26 = vor.u32 %v10200_v40, %v10197_v31  ;;  %v10206_v33 = vrot.slane %v10204_v30, 5  ;;  %v10209_v20 = vrot.slane %v10207_v17, 6  ;;  %v10223_v11 = vshrl.u32 %v9874_v28, 16  ;;  %v9877_v31 = vld [vmem:[#allocation2 + $0xb4] sm:$0xe]  ;;  %v15966_v40 = vpop.f32.mrb[98].mxu1 }
 0x532   : > { %v10458_v16 = vld [vmem:[#allocation3 + $0x160] sm:$0xff]  ;;  %v10193_v51 = vsel %vm13509_vm6, %v10184_v54, %v10192_v43  ;;  %v10216_v14 = vrot.slane %v10214_v47, 5  ;;  %v10219_v39 = vrot.slane %v10217_v38, 6  ;;  %v10226_v52 = vshll.u32 %v9874_v28, 16  ;;  %16484 = vst [vmem:[#allocation16_spill] sm:$0xff] %v15966_v40  ;;  %v15968_v7 = vpop.f32.mrb[99].mxu1 }
 0x533   : > { %12655 = vmatprep.mubr.msk.bf16.mxu1 %vm1416_vm8, %v10458_v16  ;;  %v11976_v44 = vcombine.low %v10183_v41, %v10193_v51  ;;  %v10202_v25 = vrot.slane %v10201_v26, 4  ;;  %v10210_v35 = vor.u32 %v10209_v20, %v10206_v33  ;;  %v10225_v19 = vrot.slane %v10223_v11, 5  ;;  %16485 = vst [vmem:[#allocation17_spill] sm:$0xff] %v15968_v7  ;;  %v9878_v33 = vld [vmem:[#allocation2 + $0xb8] sm:$0xf] }
 0x534   : > { %v10220_v30 = vor.u32 %v10219_v39, %v10216_v14  ;;  %v10228_v17 = vrot.slane %v10226_v52, 6  ;;  %v10232_v63 = vshrl.u32 %v9875_v0, 16  ;;  %v10235_v59 = vshll.u32 %v9875_v0, 16  ;;  %v9879_v14 = vld [vmem:[#allocation2 + $0xbc] sm:$0x3] }
 0x535   : > { %10408 = vst.msk [vmem:[#allocation3 + $0x1b0] sm:$0xff] %vm1416_vm8, %v11976_v44  ;;  %v10211_v28 = vsel %vm13509_vm6, %v10202_v25, %v10210_v35  ;;  %v10212_v43 = vrot.slane %v10210_v35, 4  ;;  %v10242_v54 = vshrl.u32 %v9876_v18, 16  ;;  %v10245_v41 = vshll.u32 %v9876_v18, 16  ;;  %v9880_v18 = vld [vmem:[#allocation2 + $0xc0] sm:$0xe] }
 0x536   : > { %v10229_v47 = vor.u32 %v10228_v17, %v10225_v19  ;;  %v10234_v38 = vrot.slane %v10232_v63, 5  ;;  %v10237_v26 = vrot.slane %v10235_v59, 6  ;;  %v10251_v20 = vshrl.u32 %v9877_v31, 16 }
 0x537   : > { %v10463_v11 = vld [vmem:[#allocation3 + $0x188] sm:$0xff]  ;;  %v10221_v16 = vsel %vm13509_vm6, %v10212_v43, %v10220_v30  ;;  %v10244_v0 = vrot.slane %v10242_v54, 5  ;;  %v10247_v51 = vrot.slane %v10245_v41, 6  ;;  %v10254_v39 = vshll.u32 %v9877_v31, 16 }
 0x538   : > { %12656 = vmatmul.mubr.msk.bf16.gmra.mrb[144].mxu1 %vm1416_vm8, %v10463_v11  ;;  %v11977_v52 = vcombine.low %v10211_v28, %v10221_v16  ;;  %v10230_v44 = vrot.slane %v10229_v47, 4  ;;  %v10238_v25 = vor.u32 %v10237_v26, %v10234_v38  ;;  %v10253_v35 = vrot.slane %v10251_v20, 5  ;;  %v9881_v31 = vld [vmem:[#allocation2 + $0xc4] sm:$0xf]  ;;  %v9882_v26 = vld [vmem:[#allocation2 + $0xc8] sm:$0x3] }
 0x539   : > { %v10248_v19 = vor.u32 %v10247_v51, %v10244_v0  ;;  %v10256_v63 = vrot.slane %v10254_v39, 6  ;;  %v10260_v59 = vshrl.u32 %v9878_v33, 16  ;;  %v10263_v17 = vshll.u32 %v9878_v33, 16  ;;  %v15979_v7 = vpop.f32.mrb[100].mxu0 }
 0x53a   : > { %10409 = vst.msk [vmem:[#allocation3 + $0x1d8] sm:$0xff] %vm1416_vm8, %v11977_v52  ;;  %v10239_v30 = vsel %vm13509_vm6, %v10230_v44, %v10238_v25  ;;  %v10240_v43 = vrot.slane %v10238_v25, 4  ;;  %v10270_v54 = vshrl.u32 %v9879_v14, 16  ;;  %v10273_v41 = vshll.u32 %v9879_v14, 16  ;;  %v12482_v11 = vpop.f32.mrb[101].mxu0 }
 0x53b   : > { %v10257_v28 = vor.u32 %v10256_v63, %v10253_v35  ;;  %v10262_v47 = vrot.slane %v10260_v59, 5  ;;  %v10265_v38 = vrot.slane %v10263_v17, 6  ;;  %v10279_v20 = vshrl.u32 %v9880_v18, 16  ;;  %v12484_v52 = vpop.f32.mrb[102].mxu0 }
 0x53c   : > { %v10468_v16 = vld [vmem:[#allocation3 + $0x1b0] sm:$0xff]  ;;  %v10249_v33 = vsel %vm13509_vm6, %v10240_v43, %v10248_v19  ;;  %v10272_v0 = vrot.slane %v10270_v54, 5  ;;  %v10275_v51 = vrot.slane %v10273_v41, 6  ;;  %v10282_v39 = vshll.u32 %v9880_v18, 16  ;;  %v12485_v35 = vpop.f32.mrb[103].mxu0 }
 0x53d   : > { %12659 = vmatprep.mubr.msk.bf16.mxu1 %vm1416_vm8, %v10468_v16  ;;  %v11978_v14 = vcombine.low %v10239_v30, %v10249_v33  ;;  %v10258_v44 = vrot.slane %v10257_v28, 4  ;;  %v10266_v25 = vor.u32 %v10265_v38, %v10262_v47  ;;  %v10281_v40 = vrot.slane %v10279_v20, 5 }
 0x53e   : > { %v10276_v63 = vor.u32 %v10275_v51, %v10272_v0  ;;  %v10284_v59 = vrot.slane %v10282_v39, 6  ;;  %v10288_v17 = vshrl.u32 %v9881_v31, 16  ;;  %v10291_v23 = vshll.u32 %v9881_v31, 16 }
 0x53f   : > { %10410 = vst.msk [vmem:[#allocation3 + $0x200] sm:$0xff] %vm1416_vm8, %v11978_v14  ;;  %v10267_v19 = vsel %vm13509_vm6, %v10258_v44, %v10266_v25  ;;  %v10268_v43 = vrot.slane %v10266_v25, 4  ;;  %v10298_v54 = vshrl.u32 %v9882_v26, 16  ;;  %v10301_v18 = vshll.u32 %v9882_v26, 16  ;;  %v16492_v44 = vld [vmem:[#allocation17_spill] sm:$0xff] }
 0x540   : > { %v10285_v41 = vor.u32 %v10284_v59, %v10281_v40  ;;  %v10290_v48 = vrot.slane %v10288_v17, 5  ;;  %v10293_v16 = vrot.slane %v10291_v23, 6  ;;  %v15989_v30 = vadd.f32 %v15768_v49, %v15766_v12  ;;  %v12417_v23 = vpop.f32.mrb[100].mxu1 }
 0x541   : > { %v10473_v28 = vld [vmem:[#allocation3 + $0x1d8] sm:$0xff]  ;;  %v10277_v47 = vsel %vm13509_vm6, %v10268_v43, %v10276_v63  ;;  %v10300_v31 = vrot.slane %v10298_v54, 5  ;;  %v10303_v38 = vrot.slane %v10301_v18, 6  ;;  %v15995_v20 = vadd.f32 %v15777_v27, %v15772_v2  ;;  %v12418_v51 = vpop.f32.mrb[101].mxu1 }
 0x542   : > { %12660 = vmatmul.mubr.msk.bf16.gmra.mrb[148].mxu1 %vm1416_vm8, %v10473_v28  ;;  %v11979_v26 = vcombine.low %v10267_v19, %v10277_v47  ;;  %v10286_v40 = vrot.slane %v10285_v41, 4  ;;  %v10294_v33 = vor.u32 %v10293_v16, %v10290_v48  ;;  %v12371_v12 = vadd.f32 %v15806_v55, %v15804_v1  ;;  %v12420_v48 = vpop.f32.mrb[102].mxu1  ;;  %v10493_v43 = vld [vmem:[#allocation3 + $0x278] sm:$0xff] }
 0x543   : > { %v10304_v0 = vor.u32 %v10303_v38, %v10300_v31  ;;  %v16002_v49 = vadd.f32 %v15817_v15, %v15811_v60  ;;  %v16007_v2 = vadd.f32 %v15836_v5, %v15834_v36  ;;  %v16011_v27 = vadd.f32 %v15843_v22, %v15838_v61  ;;  %v12421_v60 = vpop.f32.mrb[103].mxu1 }
 0x544   : > { %10411 = vst.msk [vmem:[#allocation3 + $0x228] sm:$0xff] %vm1416_vm8, %v11979_v26  ;;  %v10296_v39 = vrot.slane %v10294_v33, 4  ;;  %v12383_v1 = vadd.f32 %v15853_v4, %v15851_v42  ;;  %v16017_v55 = vadd.f32 %v15859_v13, %v15857_v34  ;;  %v10295_v14 = vsel %vm13509_vm6, %v10286_v40, %v10294_v33 }
 0x545   : > { %v16025_v5 = vadd.f32 %v15871_v32, %v15868_v45  ;;  %v12477_v22 = vadd.f32 %v15944_v58, %v15941_v57  ;;  %v16032_v42 = vadd.f32 %v15877_v37, %v15875_v9  ;;  %v12480_v4 = vadd.f32 %v15951_v24, %v15949_v21  ;;  %v16487_v21 = vld [vmem:[#allocation12_spill] sm:$0xff]  ;;  %v16489_v24 = vld [vmem:[#allocation14_spill] sm:$0xff] }
 0x546   : > { %v10478_v15 = vld [vmem:[#allocation3 + $0x200] sm:$0xff]  ;;  %v10305_v36 = vsel %vm13509_vm6, %v10296_v39, %v10304_v0  ;;  %v16038_v56 = vadd.f32 %v15890_v8, %v15888_v62  ;;  %v12483_v34 = vadd.f32 %v12482_v11, %v15979_v7  ;;  %v16044_v13 = vadd.f32 %v15897_v6, %v15892_v53  ;;  %v16486_v62 = vld [vmem:[#allocation11_spill] sm:$0xff]  ;;  %v16061_v53 = vld [vmem:[%s16375_s5] ss:$0 sm:$0xff] }
 0x547   : > { %12663 = vmatprep.mubr.msk.bf16.mxu1 %vm1416_vm8, %v10478_v15  ;;  %v11980_v61 = vcombine.low %v10295_v14, %v10305_v36  ;;  %v12486_v45 = vadd.f32 %v12485_v35, %v12484_v52  ;;  %v16048_v9 = vadd.f32 %v15912_v3, %v15908_v46  ;;  %v16052_v57 = vadd.f32 %v15918_v50, %v15914_v10  ;;  %v16488_v46 = vld [vmem:[#allocation13_spill] sm:$0xff]  ;;  %v16491_v52 = vld [vmem:[#allocation16_spill] sm:$0xff] }
 0x548   : > { %v12487_v32 = vpop.f32.mrb[104].mxu0  ;;  %v16056_v8 = vadd.f32 %v16486_v62, %v15925_v29  ;;  %v16065_v3 = vadd.f32 %v16488_v46, %v16487_v21  ;;  %v10880_v10 = vadd.f32 %v12371_v12, %v16061_v53  ;;  %v16490_v29 = vld [vmem:[#allocation15_spill] sm:$0xff]  ;;  %v16075_v25 = vadd.f32 %v16492_v44, %v16491_v52 }
 0x549   : > { %10412 = vst.msk [vmem:[#allocation3 + $0x250] sm:$0xff] %vm1416_vm8, %v11980_v61  ;;  %v12488_v37 = vpop.f32.mrb[105].mxu0  ;;  %v16071_v11 = vadd.f32 %v16490_v29, %v16489_v24  ;;  %v16077_v63 = vadd.f32 %v12418_v51, %v12417_v23  ;;  %v16079_v59 = vadd.f32 %v12421_v60, %v12420_v48  ;;  %v10872_v51 = vadd.f32 %v15989_v30, %v16061_v53 }
 0x54a   : > { %v12489_v6 = vadd.f32 %v12488_v37, %v12487_v32  ;;  %v12490_v58 = vpop.f32.mrb[106].mxu0  ;;  %v16081_v17 = vadd.f32 %v12483_v34, %v10880_v10  ;;  %v10883_v60 = vadd.f32 %v16002_v49, %v16061_v53  ;;  %v10875_v14 = vadd.f32 %v15995_v20, %v16061_v53 }
 0x54b   : > { %v10483_v7 = vld [vmem:[#allocation3 + $0x228] sm:$0xff]  ;;  %v12491_v50 = vpop.f32.mrb[107].mxu0  ;;  %v16099_v61 = vadd.f32 %v12477_v22, %v10872_v51  ;;  %v10896_v34 = vadd.f32 %v12383_v1, %v16061_v53  ;;  %v10888_v20 = vadd.f32 %v16007_v2, %v16061_v53  ;;  %v10899_v22 = vadd.f32 %v16017_v55, %v16061_v53 }
 0x54c   : > { %12664 = vmatmul.mubr.msk.bf16.gmra.mrb[152].mxu1 %vm1416_vm8, %v10483_v7  ;;  %v12492_v35 = vadd.f32 %v12491_v50, %v12490_v58  ;;  %v16102_v32 = vadd.f32 %v12486_v45, %v10883_v60  ;;  %v16104_v37 = vadd.f32 %v12480_v4, %v10875_v14  ;;  %v10891_v1 = vadd.f32 %v16011_v27, %v16061_v53 }
 0x54d   : > { %v16114_v45 = vadd.f32 %v12489_v6, %v10888_v20  ;;  %v10904_v55 = vadd.f32 %v16025_v5, %v16061_v53  ;;  %v10907_v27 = vadd.f32 %v16032_v42, %v16061_v53  ;;  %v10912_v6 = vadd.f32 %v16038_v56, %v16061_v53 }
 0x54e   : > { %v16118_v50 = vadd.f32 %v12492_v35, %v10891_v1  ;;  %v10923_v14 = vadd.f32 %v16052_v57, %v16061_v53 }
 0x550   : > { %v10488_v19 = vld [vmem:[#allocation3 + $0x250] sm:$0xff]  ;;  %v12423_v54 = vpop.f32.mrb[104].mxu1 }
 0x551   : > { %12667 = vmatprep.mubr.msk.bf16.mxu1 %vm1416_vm8, %v10488_v19  ;;  %v12424_v18 = vpop.f32.mrb[105].mxu1 }
 0x552   : > { %v16084_v41 = vadd.f32 %v12424_v18, %v12423_v54  ;;  %v12426_v16 = vpop.f32.mrb[106].mxu1 }
 0x553   : > { %v12427_v28 = vpop.f32.mrb[107].mxu1 }
 0x554   : > { %12668 = vmatmul.mubr.msk.bf16.gmra.mrb[156].mxu1 %vm1416_vm8, %v10493_v43  ;;  %v16087_v47 = vadd.f32 %v12427_v28, %v12426_v16  ;;  %v10915_v28 = vadd.f32 %v16044_v13, %v16061_v53  ;;  %v10920_v13 = vadd.f32 %v16048_v9, %v16061_v53 }
 0x558   : > { %v12493_v31 = vpop.f32.mrb[108].mxu0 }
 0x559   : > { %v12494_v38 = vpop.f32.mrb[109].mxu0 }
 0x55a   : > { %v12495_v26 = vadd.f32 %v12494_v38, %v12493_v31  ;;  %v12496_v40 = vpop.f32.mrb[110].mxu0 }
 0x55b   : > { %v12497_v33 = vpop.f32.mrb[111].mxu0 }
 0x55c   : > { %v12498_v23 = vadd.f32 %v12497_v33, %v12496_v40  ;;  %v16106_v30 = vadd.f32 %v12495_v26, %v10896_v34 }
 0x55e   : > { %v16116_v4 = vadd.f32 %v12498_v23, %v10899_v22 }
 0x560   : > { %v12429_v0 = vpop.f32.mrb[108].mxu1 }
 0x561   : > { %v12430_v12 = vpop.f32.mrb[109].mxu1 }
 0x562   : > { %v16091_v39 = vadd.f32 %v12430_v12, %v12429_v0  ;;  %v12432_v48 = vpop.f32.mrb[110].mxu1 }
 0x563   : > { %v12433_v15 = vpop.f32.mrb[111].mxu1 }
 0x564   : > { %v16097_v36 = vadd.f32 %v12433_v15, %v12432_v48 }
 0x568   : > { %v12499_v62 = vpop.f32.mrb[112].mxu0 }
 0x569   : > { %v12500_v7 = vpop.f32.mrb[113].mxu0 }
 0x56a   : > { %v12501_v58 = vadd.f32 %v12500_v7, %v12499_v62  ;;  %v12502_v49 = vpop.f32.mrb[114].mxu0 }
 0x56b   : > { %v12503_v21 = vpop.f32.mrb[115].mxu0 }
 0x56c   : > { %v12504_v46 = vadd.f32 %v12503_v21, %v12502_v49  ;;  %v16130_v18 = vadd.f32 %v12501_v58, %v10904_v55 }
 0x56e   : > { %v16136_v5 = vadd.f32 %v12504_v46, %v10907_v27 }
 0x570   : > { %v12435_v10 = vpop.f32.mrb[112].mxu1 }
 0x571   : > { %v12436_v24 = vpop.f32.mrb[113].mxu1 }
 0x572   : > { %v16120_v29 = vadd.f32 %v12436_v24, %v12435_v10  ;;  %v12438_v52 = vpop.f32.mrb[114].mxu1  ;;  %v10928_v10 = vadd.f32 %v16056_v8, %v16061_v53 }
 0x573   : > { %v12439_v44 = vpop.f32.mrb[115].mxu1 }
 0x574   : > { %v16122_v2 = vadd.f32 %v12439_v44, %v12438_v52  ;;  %v10931_v44 = vadd.f32 %v16065_v3, %v16061_v53 }
 0x579   : > { %v12505_v19 = vpop.f32.mrb[116].mxu0 }
 0x57a   : > { %v12506_v43 = vpop.f32.mrb[117].mxu0 }
 0x57b   : > { %v12507_v35 = vadd.f32 %v12506_v43, %v12505_v19  ;;  %v12508_v54 = vpop.f32.mrb[118].mxu0 }
 0x57c   : > { %v12509_v16 = vpop.f32.mrb[119].mxu0 }
 0x57d   : > { %v12510_v31 = vadd.f32 %v12509_v16, %v12508_v54  ;;  %v16134_v38 = vadd.f32 %v12507_v35, %v10912_v6 }
 0x57f   : > { %v16138_v26 = vadd.f32 %v12510_v31, %v10915_v28 }
 0x580   : > { %v12441_v40 = vpop.f32.mrb[116].mxu1 }
 0x581   : > { %v12442_v42 = vpop.f32.mrb[117].mxu1 }
 0x582   : > { %v16140_v33 = vadd.f32 %v12442_v42, %v12441_v40  ;;  %v12444_v56 = vpop.f32.mrb[118].mxu1  ;;  %v10936_v40 = vadd.f32 %v16071_v11, %v16061_v53  ;;  %v10947_v11 = vadd.f32 %v16079_v59, %v16061_v53 }
 0x583   : > { %v12445_v23 = vpop.f32.mrb[119].mxu1 }
 0x584   : > { %v16142_v0 = vadd.f32 %v12445_v23, %v12444_v56  ;;  %v10939_v23 = vadd.f32 %v16075_v25, %v16061_v53 }
 0x58a   : > { %v12511_v12 = vpop.f32.mrb[120].mxu0 }
 0x58b   : > { %v12512_v51 = vpop.f32.mrb[121].mxu0 }
 0x58c   : > { %v12513_v48 = vadd.f32 %v12512_v51, %v12511_v12  ;;  %v12514_v60 = vpop.f32.mrb[122].mxu0 }
 0x58d   : > { %v12515_v15 = vpop.f32.mrb[123].mxu0 }
 0x58e   : > { %v12516_v34 = vadd.f32 %v12515_v15, %v12514_v60  ;;  %v16148_v62 = vadd.f32 %v12513_v48, %v10920_v13  ;;  %v10944_v15 = vadd.f32 %v16077_v63, %v16061_v53  ;;  %v10955_v63 = vadd.f32 %v16087_v47, %v16061_v53 }
 0x590   : > { %v12447_v7 = vpop.f32.mrb[120].mxu1  ;;  %v16150_v58 = vadd.f32 %v12516_v34, %v10923_v14 }
 0x591   : > { %v12448_v49 = vpop.f32.mrb[121].mxu1 }
 0x592   : > { %v16152_v21 = vadd.f32 %v12448_v49, %v12447_v7  ;;  %v12450_v20 = vpop.f32.mrb[122].mxu1 }
 0x593   : > { %v12451_v46 = vpop.f32.mrb[123].mxu1 }
 0x594   : > { %v16154_v22 = vadd.f32 %v12451_v46, %v12450_v20 }
 0x59a   : > { %v12517_v9 = vpop.f32.mrb[124].mxu0 }
 0x59b   : > { %v12518_v1 = vpop.f32.mrb[125].mxu0 }
 0x59c   : > { %v12519_v24 = vadd.f32 %v12518_v1, %v12517_v9  ;;  %v12520_v57 = vpop.f32.mrb[126].mxu0  ;;  %v10952_v1 = vadd.f32 %v16084_v41, %v16061_v53  ;;  %v10963_v41 = vadd.f32 %v16097_v36, %v16061_v53 }
 0x59d   : > { %v12521_v52 = vpop.f32.mrb[127].mxu0 }
 0x59e   : > { %v12522_v55 = vadd.f32 %v12521_v52, %v12520_v57  ;;  %v16160_v19 = vadd.f32 %v12519_v24, %v10928_v10 }
 0x5a0   : > { %v12453_v43 = vpop.f32.mrb[124].mxu1  ;;  %v16162_v27 = vadd.f32 %v12522_v55, %v10931_v44 }
 0x5a1   : > { %v12454_v6 = vpop.f32.mrb[125].mxu1 }
 0x5a2   : > { %v16164_v35 = vadd.f32 %v12454_v6, %v12453_v43  ;;  %v12456_v54 = vpop.f32.mrb[126].mxu1  ;;  %v10960_v6 = vadd.f32 %v16091_v39, %v16061_v53  ;;  %v10971_v39 = vadd.f32 %v16122_v2, %v16061_v53 }
 0x5a3   : > { %v12457_v16 = vpop.f32.mrb[127].mxu1 }
 0x5a4   : > { %v16166_v28 = vadd.f32 %v12457_v16, %v12456_v54 }
 0x5a8   : > { %v12523_v8 = vpop.f32.mrb[128].mxu0 }
 0x5a9   : > { %v12524_v31 = vpop.f32.mrb[129].mxu0 }
 0x5aa   : > { %v12525_v42 = vadd.f32 %v12524_v31, %v12523_v8  ;;  %v12526_v3 = vpop.f32.mrb[130].mxu0 }
 0x5ab   : > { %v12527_v56 = vpop.f32.mrb[131].mxu0 }
 0x5ac   : > { %v12528_v12 = vadd.f32 %v12527_v56, %v12526_v3  ;;  %v16172_v51 = vadd.f32 %v12525_v42, %v10936_v40  ;;  %v10968_v56 = vadd.f32 %v16120_v29, %v16061_v53  ;;  %v10979_v29 = vadd.f32 %v16142_v0, %v16061_v53 }
 0x5ae   : > { %v16174_v13 = vadd.f32 %v12528_v12, %v10939_v23 }
 0x5b0   : > { %v12529_v48 = vpop.f32.mrb[132].mxu0 }
 0x5b1   : > { %v12530_v60 = vpop.f32.mrb[133].mxu0 }
 0x5b2   : > { %v12531_v14 = vadd.f32 %v12530_v60, %v12529_v48  ;;  %v12532_v34 = vpop.f32.mrb[134].mxu0 }
 0x5b3   : > { %v12533_v7 = vpop.f32.mrb[135].mxu0 }
 0x5b4   : > { %v12534_v49 = vadd.f32 %v12533_v7, %v12532_v34  ;;  %v16180_v20 = vadd.f32 %v12531_v14, %v10944_v15  ;;  %v10976_v7 = vadd.f32 %v16140_v33, %v16061_v53 }
 0x5b6   : > { %v16182_v25 = vadd.f32 %v12534_v49, %v10947_v11 }
 0x5b8   : > { %v12535_v46 = vpop.f32.mrb[136].mxu0 }
 0x5b9   : > { %v12536_v9 = vpop.f32.mrb[137].mxu0 }
 0x5ba   : > { %v12537_v10 = vadd.f32 %v12536_v9, %v12535_v46  ;;  %v12538_v24 = vpop.f32.mrb[138].mxu0 }
 0x5bb   : > { %v12539_v57 = vpop.f32.mrb[139].mxu0 }
 0x5bc   : > { %v12540_v52 = vadd.f32 %v12539_v57, %v12538_v24  ;;  %v16188_v44 = vadd.f32 %v12537_v10, %v10952_v1  ;;  %v10984_v57 = vadd.f32 %v16152_v21, %v16061_v53 }
 0x5be   : > { %v16190_v59 = vadd.f32 %v12540_v52, %v10955_v63 }
 0x5c0   : > { %v12541_v55 = vpop.f32.mrb[140].mxu0 }
 0x5c1   : > { %v12542_v43 = vpop.f32.mrb[141].mxu0 }
 0x5c2   : > { %v12543_v54 = vadd.f32 %v12542_v43, %v12541_v55  ;;  %v12544_v16 = vpop.f32.mrb[142].mxu0  ;;  %v10987_v55 = vadd.f32 %v16154_v22, %v16061_v53 }
 0x5c3   : > { %v12545_v8 = vpop.f32.mrb[143].mxu0 }
 0x5c4   : > { %v12546_v31 = vadd.f32 %v12545_v8, %v12544_v16  ;;  %v16196_v40 = vadd.f32 %v12543_v54, %v10960_v6  ;;  %v11322_v16 = vld [vmem:[%s13004_s26 + $0x10] sm:$0xff] }
 0x5c6   : > { %v16198_v47 = vadd.f32 %v12546_v31, %v10963_v41  ;;  %v11320_v31 = vld [vmem:[%s13004_s26] sm:$0xff] }
 0x5c8   : > { %v12547_v42 = vpop.f32.mrb[144].mxu0 }
 0x5c9   : > { %v12548_v3 = vpop.f32.mrb[145].mxu0 }
 0x5ca   : > { %v12549_v23 = vadd.f32 %v12548_v3, %v12547_v42  ;;  %v12550_v12 = vpop.f32.mrb[146].mxu0  ;;  %v11323_v42 = vld [vmem:[%s13004_s26 + $0x18] sm:$0xff] }
 0x5cb   : > { %v12551_v48 = vpop.f32.mrb[147].mxu0 }
 0x5cc   : > { %v12552_v60 = vadd.f32 %v12551_v48, %v12550_v12  ;;  %v16204_v15 = vadd.f32 %v12549_v23, %v10968_v56  ;;  %v11321_v23 = vld [vmem:[%s13004_s26 + $0x8] sm:$0xff] }
 0x5ce   : > { %v16206_v36 = vadd.f32 %v12552_v60, %v10971_v39 }
 0x5d0   : > { %v12553_v14 = vpop.f32.mrb[148].mxu0 }
 0x5d1   : > { %v12554_v34 = vpop.f32.mrb[149].mxu0 }
 0x5d2   : > { %v12555_v11 = vadd.f32 %v12554_v34, %v12553_v14  ;;  %v12556_v49 = vpop.f32.mrb[150].mxu0 }
 0x5d3   : > { %v12557_v46 = vpop.f32.mrb[151].mxu0 }
 0x5d4   : > { %v12558_v9 = vadd.f32 %v12557_v46, %v12556_v49  ;;  %v16212_v1 = vadd.f32 %v12555_v11, %v10976_v7  ;;  %v11324_v7 = vld [vmem:[%s13004_s26 + $0x20] sm:$0xff]  ;;  %v11327_v49 = vld [vmem:[%s13004_s26 + $0x38] sm:$0xff] }
 0x5d6   : > { %v16214_v2 = vadd.f32 %v12558_v9, %v10979_v29 }
 0x5d8   : > { %v12559_v10 = vpop.f32.mrb[152].mxu0 }
 0x5d9   : > { %v12560_v24 = vpop.f32.mrb[153].mxu0 }
 0x5da   : > { %v12561_v33 = vadd.f32 %v12560_v24, %v12559_v10  ;;  %v12562_v63 = vpop.f32.mrb[154].mxu0  ;;  %v11325_v10 = vld [vmem:[%s13004_s26 + $0x28] sm:$0xff] }
 0x5db   : > { %v12563_v52 = vpop.f32.mrb[155].mxu0 }
 0x5dc   : > { %v12564_v0 = vadd.f32 %v12563_v52, %v12562_v63  ;;  %v16220_v43 = vadd.f32 %v12561_v33, %v10984_v57 }
 0x5de   : > { %v16222_v6 = vadd.f32 %v12564_v0, %v10987_v55 }
 0x5df   : > { %v12641_v54 = vpop.f32.mrb[128].mxu1 }
 0x5e0   : > { %v11202_v8 = vadd.f32 %v12641_v54, %v16081_v17  ;;  %v11193_v41 = vpop.f32.mrb[129].mxu1 }
 0x5e1   : > { %v11194_v21 = vadd.f32 %v11193_v41, %v16099_v61  ;;  %v12642_v22 = vpop.f32.mrb[130].mxu1  ;;  %v11330_v41 = vld [vmem:[%s13004_s26 + $0x50] sm:$0xff] }
 0x5e2   : > { %v11354_v3 = vadd.f32 %v11322_v16, %v11202_v8  ;;  %v11205_v17 = vadd.f32 %v12642_v22, %v16102_v32  ;;  %v11196_v56 = vpop.f32.mrb[131].mxu1  ;;  %v11326_v32 = vld [vmem:[%s13004_s26 + $0x30] sm:$0xff]  ;;  %v11328_v22 = vld [vmem:[%s13004_s26 + $0x40] sm:$0xff] }
 0x5e3   : > { %v11352_v12 = vadd.f32 %v11320_v31, %v11194_v21  ;;  %v11197_v48 = vadd.f32 %v11196_v56, %v16104_v37 }
 0x5e4   : > { %11386 = vst.msk [vmem:[%s16232_s9 + $0x10] sm:$0xff] %vm1416_vm8, %v11354_v3  ;;  %v11355_v39 = vadd.f32 %v11323_v42, %v11205_v17  ;;  %v11331_v42 = vld [vmem:[%s13004_s26 + $0x58] sm:$0xff] }
 0x5e5   : > { %11384 = vst.msk [vmem:[%s16232_s9] sm:$0xff] %vm1416_vm8, %v11352_v12  ;;  %v11353_v61 = vadd.f32 %v11321_v23, %v11197_v48  ;;  %v11329_v23 = vld [vmem:[%s13004_s26 + $0x48] sm:$0xff] }
 0x5e6   : > { %11387 = vst.msk [vmem:[%s16232_s9 + $0x18] sm:$0xff] %vm1416_vm8, %v11355_v39 }
 0x5e7   : > { %11385 = vst.msk [vmem:[%s16232_s9 + $0x8] sm:$0xff] %vm1416_vm8, %v11353_v61 }
 0x5e9   : > { %v12645_v60 = vpop.f32.mrb[132].mxu1 }
 0x5ea   : > { %v11218_v14 = vadd.f32 %v12645_v60, %v16106_v30  ;;  %v11209_v34 = vpop.f32.mrb[133].mxu1 }
 0x5eb   : > { %v11210_v37 = vadd.f32 %v11209_v34, %v16114_v45  ;;  %v12646_v11 = vpop.f32.mrb[134].mxu1  ;;  %v10992_v45 = vadd.f32 %v16164_v35, %v16061_v53  ;;  %v11335_v34 = vld [vmem:[%s13004_s26 + $0x78] sm:$0xff] }
 0x5ec   : > { %v11358_v46 = vadd.f32 %v11326_v32, %v11218_v14  ;;  %v11221_v29 = vadd.f32 %v12646_v11, %v16116_v4  ;;  %v11212_v9 = vpop.f32.mrb[135].mxu1 }
 0x5ed   : > { %v11356_v24 = vadd.f32 %v11324_v7, %v11210_v37  ;;  %v11213_v57 = vadd.f32 %v11212_v9, %v16118_v50  ;;  %v12565_v33 = vpop.f32.mrb[156].mxu0  ;;  %v10995_v50 = vadd.f32 %v16166_v28, %v16061_v53 }
 0x5ee   : > { %11390 = vst.msk [vmem:[%s16232_s9 + $0x30] sm:$0xff] %vm1416_vm8, %v11358_v46  ;;  %v11359_v30 = vadd.f32 %v11327_v49, %v11221_v29  ;;  %v12566_v63 = vpop.f32.mrb[157].mxu0  ;;  %v11333_v49 = vld [vmem:[%s13004_s26 + $0x68] sm:$0xff] }
 0x5ef   : > { %11388 = vst.msk [vmem:[%s16232_s9 + $0x20] sm:$0xff] %vm1416_vm8, %v11356_v24  ;;  %v11357_v52 = vadd.f32 %v11325_v10, %v11213_v57  ;;  %v12567_v4 = vadd.f32 %v12566_v63, %v12565_v33  ;;  %v12568_v55 = vpop.f32.mrb[158].mxu0 }
 0x5f0   : > { %11391 = vst.msk [vmem:[%s16232_s9 + $0x38] sm:$0xff] %vm1416_vm8, %v11359_v30  ;;  %v12569_v0 = vpop.f32.mrb[159].mxu0  ;;  %v11339_v30 = vld [vmem:[%s13004_s26 + $0x98] sm:$0xff] }
 0x5f1   : > { %11389 = vst.msk [vmem:[%s16232_s9 + $0x28] sm:$0xff] %vm1416_vm8, %v11357_v52  ;;  %v12570_v54 = vadd.f32 %v12569_v0, %v12568_v55  ;;  %v16267_v16 = vadd.f32 %v12567_v4, %v10992_v45  ;;  %v11337_v4 = vld [vmem:[%s13004_s26 + $0x88] sm:$0xff] }
 0x5f3   : > { %v16269_v35 = vadd.f32 %v12570_v54, %v10995_v50 }
 0x5f6   : > { %v12649_v8 = vpop.f32.mrb[136].mxu1 }
 0x5f7   : > { %v11234_v31 = vadd.f32 %v12649_v8, %v16134_v38  ;;  %v11225_v21 = vpop.f32.mrb[137].mxu1 }
 0x5f8   : > { %v11226_v53 = vadd.f32 %v11225_v21, %v16130_v18  ;;  %v12650_v28 = vpop.f32.mrb[138].mxu1  ;;  %v11343_v21 = vld [vmem:[%s13004_s26 + $0xb8] sm:$0xff] }
 0x5f9   : > { %v11362_v3 = vadd.f32 %v11330_v41, %v11234_v31  ;;  %v11237_v17 = vadd.f32 %v12650_v28, %v16138_v26  ;;  %v11228_v56 = vpop.f32.mrb[139].mxu1  ;;  %v11334_v26 = vld [vmem:[%s13004_s26 + $0x70] sm:$0xff] }
 0x5fa   : > { %v11360_v12 = vadd.f32 %v11328_v22, %v11226_v53  ;;  %v11229_v48 = vadd.f32 %v11228_v56, %v16136_v5  ;;  %v11332_v5 = vld [vmem:[%s13004_s26 + $0x60] sm:$0xff] }
 0x5fb   : > { %11394 = vst.msk [vmem:[%s16232_s9 + $0x50] sm:$0xff] %vm1416_vm8, %v11362_v3  ;;  %v11363_v38 = vadd.f32 %v11331_v42, %v11237_v17  ;;  %v11341_v42 = vld [vmem:[%s13004_s26 + $0xa8] sm:$0xff] }
 0x5fc   : > { %11392 = vst.msk [vmem:[%s16232_s9 + $0x40] sm:$0xff] %vm1416_vm8, %v11360_v12  ;;  %v11361_v18 = vadd.f32 %v11329_v23, %v11229_v48 }
 0x5fd   : > { %11395 = vst.msk [vmem:[%s16232_s9 + $0x58] sm:$0xff] %vm1416_vm8, %v11363_v38 }
 0x5fe   : > { %11393 = vst.msk [vmem:[%s16232_s9 + $0x48] sm:$0xff] %vm1416_vm8, %v11361_v18  ;;  %v11347_v18 = vld [vmem:[%s13004_s26 + $0xd8] sm:$0xff] }
 0x601   : > { %v12653_v39 = vpop.f32.mrb[140].mxu1 }
 0x602   : > { %v11250_v61 = vadd.f32 %v12653_v39, %v16160_v19  ;;  %v11241_v60 = vpop.f32.mrb[141].mxu1 }
 0x603   : > { %v11242_v32 = vadd.f32 %v11241_v60, %v16148_v62  ;;  %v12654_v14 = vpop.f32.mrb[142].mxu1  ;;  %v11345_v60 = vld [vmem:[%s13004_s26 + $0xc8] sm:$0xff] }
 0x604   : > { %v11366_v7 = vadd.f32 %v11334_v26, %v11250_v61  ;;  %v11253_v37 = vadd.f32 %v12654_v14, %v16162_v27  ;;  %v11244_v11 = vpop.f32.mrb[143].mxu1  ;;  %v11338_v27 = vld [vmem:[%s13004_s26 + $0x90] sm:$0xff] }
 0x605   : > { %v11364_v46 = vadd.f32 %v11332_v5, %v11242_v32  ;;  %v11245_v29 = vadd.f32 %v11244_v11, %v16150_v58  ;;  %v11336_v58 = vld [vmem:[%s13004_s26 + $0x80] sm:$0xff] }
 0x606   : > { %11398 = vst.msk [vmem:[%s16232_s9 + $0x70] sm:$0xff] %vm1416_vm8, %v11366_v7  ;;  %v11367_v19 = vadd.f32 %v11335_v34, %v11253_v37 }
 0x607   : > { %11396 = vst.msk [vmem:[%s16232_s9 + $0x60] sm:$0xff] %vm1416_vm8, %v11364_v46  ;;  %v11365_v62 = vadd.f32 %v11333_v49, %v11245_v29  ;;  %v11351_v49 = vld [vmem:[%s13004_s26 + $0xf8] sm:$0xff] }
 0x608   : > { %11399 = vst.msk [vmem:[%s16232_s9 + $0x78] sm:$0xff] %vm1416_vm8, %v11367_v19 }
 0x609   : > { %11397 = vst.msk [vmem:[%s16232_s9 + $0x68] sm:$0xff] %vm1416_vm8, %v11365_v62  ;;  %v11349_v62 = vld [vmem:[%s13004_s26 + $0xe8] sm:$0xff] }
 0x60b   : > { %v12657_v9 = vpop.f32.mrb[144].mxu1 }
 0x60c   : > { %v11266_v10 = vadd.f32 %v12657_v9, %v16180_v20  ;;  %v11257_v24 = vpop.f32.mrb[145].mxu1 }
 0x60d   : > { %v11258_v57 = vadd.f32 %v11257_v24, %v16172_v51  ;;  %v12658_v33 = vpop.f32.mrb[146].mxu1 }
 0x60e   : > { %v11370_v63 = vadd.f32 %v11338_v27, %v11266_v10  ;;  %v11269_v45 = vadd.f32 %v12658_v33, %v16182_v25  ;;  %v11260_v52 = vpop.f32.mrb[147].mxu1  ;;  %v11342_v25 = vld [vmem:[%s13004_s26 + $0xb0] sm:$0xff] }
 0x60f   : > { %v11368_v55 = vadd.f32 %v11336_v58, %v11258_v57  ;;  %v11261_v0 = vadd.f32 %v11260_v52, %v16174_v13  ;;  %v11340_v13 = vld [vmem:[%s13004_s26 + $0xa0] sm:$0xff] }
 0x610   : > { %11402 = vst.msk [vmem:[%s16232_s9 + $0x90] sm:$0xff] %vm1416_vm8, %v11370_v63  ;;  %v11371_v20 = vadd.f32 %v11339_v30, %v11269_v45 }
 0x611   : > { %11400 = vst.msk [vmem:[%s16232_s9 + $0x80] sm:$0xff] %vm1416_vm8, %v11368_v55  ;;  %v11369_v51 = vadd.f32 %v11337_v4, %v11261_v0 }
 0x612   : > { %11403 = vst.msk [vmem:[%s16232_s9 + $0x98] sm:$0xff] %vm1416_vm8, %v11371_v20 }
 0x613   : > { %11401 = vst.msk [vmem:[%s16232_s9 + $0x88] sm:$0xff] %vm1416_vm8, %v11369_v51 }
 0x615   : > { %v12661_v50 = vpop.f32.mrb[148].mxu1 }
 0x616   : > { %v11282_v54 = vadd.f32 %v12661_v50, %v16196_v40  ;;  %v11273_v8 = vpop.f32.mrb[149].mxu1 }
 0x617   : > { %v11274_v41 = vadd.f32 %v11273_v8, %v16188_v44  ;;  %v12662_v31 = vpop.f32.mrb[150].mxu1 }
 0x618   : > { %v11374_v22 = vadd.f32 %v11342_v25, %v11282_v54  ;;  %v11285_v53 = vadd.f32 %v12662_v31, %v16198_v47  ;;  %v11276_v28 = vpop.f32.mrb[151].mxu1  ;;  %v11346_v47 = vld [vmem:[%s13004_s26 + $0xd0] sm:$0xff] }
 0x619   : > { %v11372_v3 = vadd.f32 %v11340_v13, %v11274_v41  ;;  %v11277_v17 = vadd.f32 %v11276_v28, %v16190_v59  ;;  %v11344_v59 = vld [vmem:[%s13004_s26 + $0xc0] sm:$0xff] }
 0x61a   : > { %11406 = vst.msk [vmem:[%s16232_s9 + $0xb0] sm:$0xff] %vm1416_vm8, %v11374_v22  ;;  %v11375_v40 = vadd.f32 %v11343_v21, %v11285_v53 }
 0x61b   : > { %11404 = vst.msk [vmem:[%s16232_s9 + $0xa0] sm:$0xff] %vm1416_vm8, %v11372_v3  ;;  %v11373_v44 = vadd.f32 %v11341_v42, %v11277_v17 }
 0x61c   : > { %11407 = vst.msk [vmem:[%s16232_s9 + $0xb8] sm:$0xff] %vm1416_vm8, %v11375_v40 }
 0x61d   : > { %11405 = vst.msk [vmem:[%s16232_s9 + $0xa8] sm:$0xff] %vm1416_vm8, %v11373_v44 }
 0x61f   : > { %v12665_v56 = vpop.f32.mrb[152].mxu1 }
 0x620   : > { %v11298_v23 = vadd.f32 %v12665_v56, %v16212_v1  ;;  %v11289_v12 = vpop.f32.mrb[153].mxu1 }
 0x621   : > { %v11290_v48 = vadd.f32 %v11289_v12, %v16204_v15  ;;  %v12666_v38 = vpop.f32.mrb[154].mxu1 }
 0x622   : > { %v11378_v39 = vadd.f32 %v11346_v47, %v11298_v23  ;;  %v11301_v26 = vadd.f32 %v12666_v38, %v16214_v2  ;;  %v11292_v61 = vpop.f32.mrb[155].mxu1  ;;  %v11350_v2 = vld [vmem:[%s13004_s26 + $0xf0] sm:$0xff] }
 0x623   : > { %v11376_v5 = vadd.f32 %v11344_v59, %v11290_v48  ;;  %v11293_v32 = vadd.f32 %v11292_v61, %v16206_v36  ;;  %v11348_v36 = vld [vmem:[%s13004_s26 + $0xe0] sm:$0xff] }
 0x624   : > { %11410 = vst.msk [vmem:[%s16232_s9 + $0xd0] sm:$0xff] %vm1416_vm8, %v11378_v39  ;;  %v11379_v1 = vadd.f32 %v11347_v18, %v11301_v26 }
 0x625   : > { %11408 = vst.msk [vmem:[%s16232_s9 + $0xc0] sm:$0xff] %vm1416_vm8, %v11376_v5  ;;  %v11377_v15 = vadd.f32 %v11345_v60, %v11293_v32 }
 0x626   : > { %11411 = vst.msk [vmem:[%s16232_s9 + $0xd8] sm:$0xff] %vm1416_vm8, %v11379_v1 }
 0x627   : > { %11409 = vst.msk [vmem:[%s16232_s9 + $0xc8] sm:$0xff] %vm1416_vm8, %v11377_v15  ;;  %v12669_v14 = vpop.f32.mrb[156].mxu1 }
 0x628   : > { %v11314_v34 = vadd.f32 %v12669_v14, %v16267_v16  ;;  %v11305_v7 = vpop.f32.mrb[157].mxu1 }
 0x629   : > { %v11306_v37 = vadd.f32 %v11305_v7, %v16220_v43  ;;  %v12670_v11 = vpop.f32.mrb[158].mxu1 }
 0x62a   : > { %v11382_v46 = vadd.f32 %v11350_v2, %v11314_v34  ;;  %v11317_v29 = vadd.f32 %v12670_v11, %v16269_v35  ;;  %v11308_v19 = vpop.f32.mrb[159].mxu1 }
 0x62b   : > { %v11380_v9 = vadd.f32 %v11348_v36, %v11306_v37  ;;  %v11309_v27 = vadd.f32 %v11308_v19, %v16222_v6 }
 0x62c   : > { %11414 = vst.msk [vmem:[%s16232_s9 + $0xf0] sm:$0xff] %vm1416_vm8, %v11382_v46  ;;  %v11383_v10 = vadd.f32 %v11351_v49, %v11317_v29 }
 0x62d   : > { %11412 = vst.msk [vmem:[%s16232_s9 + $0xe0] sm:$0xff] %vm1416_vm8, %v11380_v9  ;;  %v11381_v16 = vadd.f32 %v11349_v62, %v11309_v27 }
 0x62e   : > { %11415 = vst.msk [vmem:[%s16232_s9 + $0xf8] sm:$0xff] %vm1416_vm8, %v11383_v10 }
 0x62f   : > { %11413 = vst.msk [vmem:[%s16232_s9 + $0xe8] sm:$0xff] %vm1416_vm8, %v11381_v16 }
 0x630 PF: > { %s16_s21 = sadd.s32 1, %s12936_s21  }
 0x631   : > { %p13_p4 = scmp.ge.s32.totalorder %s16_s21, 4  }
 0x633   :  { %15 = sbr.rel (!%p13_p4) target bundleno = 1 (0x1), region = 77 }

</bundles_post_ra>
